<compile_context>
chip_gen: v7x
topology: tpu7x:2x2x1
jax: 0.10.0
libtpu: 0.0.40
codegen_flags: <defaults>
</compile_context>

<pallas_src>
import functools
import math

import jax
import jax.numpy as jnp
from jax import lax
from jax.experimental import pallas as pl
from jax.experimental.pallas import tpu as pltpu


# ----------------------------------------------------------------------------
# 1. Relative position bias kernel (batch invariant, (H, Sq, Sk) layout)
# ----------------------------------------------------------------------------
def _rel_pos_bias_kernel(emb_ref, out_ref, *, seq_len, q_tile, num_heads,
                         num_buckets, max_distance, bidirectional):
    """One grid step == `q_tile` query rows for ALL heads.

    emb_ref : (num_buckets, num_heads) f32 in SMEM (natural embedding layout)
    out_ref : (num_heads, q_tile, seq_len) f32 in VMEM
    """
    q0 = pl.program_id(0) * q_tile

    # Bucket math computed ONCE per (q, k) pair on a (q_tile, seq_len) block.
    q = q0 + lax.broadcasted_iota(jnp.int32, (q_tile, seq_len), 0)
    k = lax.broadcasted_iota(jnp.int32, (q_tile, seq_len), 1)
    rel = k - q                                    # memory - context

    if bidirectional:
        nb = num_buckets // 2
        rel_buckets = jnp.where(rel > 0, nb, 0)
        rel_pos = jnp.abs(rel)
    else:
        nb = num_buckets
        rel_buckets = jnp.zeros_like(rel)
        rel_pos = -jnp.minimum(rel, 0)

    max_exact = nb // 2
    is_small = rel_pos < max_exact
    rel_f = jnp.maximum(rel_pos, 1).astype(jnp.float32)   # avoid log(0); unused there
    val_if_large = max_exact + (
        jnp.log(rel_f / max_exact)
        / math.log(max_distance / max_exact)
        * (nb - max_exact)
    ).astype(jnp.int32)                            # trunc == torch .to(torch.long)
    val_if_large = jnp.minimum(val_if_large, nb - 1)
    bucket = rel_buckets + jnp.where(is_small, rel_pos, val_if_large)  # (q_tile, S)

    # Embedding "gather" as a bucket-unrolled select-accumulate: emb values are
    # scalars in SMEM, the select runs on the VPU, and every store below is a
    # fully dense (q_tile, seq_len) block -> no masked sublane stores and no
    # per-row tiny MXU matmuls.
    for h in range(num_heads):
        acc = jnp.zeros((q_tile, seq_len), jnp.float32)
        for b in range(num_buckets):
            acc = acc + jnp.where(bucket == b, emb_ref[b, h], 0.0)
        out_ref[h] = acc


def _choose_q_tile(seq_len, num_heads, budget_bytes=4 * 1024 * 1024):
    """Largest multiple-of-8 divisor of seq_len whose output block fits budget."""
    for tq in (256, 128, 64, 32, 16, 8):
        if seq_len % tq == 0 and num_heads * tq * seq_len * 4 <= budget_bytes:
            return tq
    return seq_len


def compute_position_bias(rel_attention_bias_weight, seq_len, *, num_heads,
                          num_buckets=32, max_distance=128, bidirectional=True):
    """UDOP/T5 relative position bias, shape (num_heads, seq_len, seq_len)."""
    q_tile = _choose_q_tile(seq_len, num_heads)
    n_tiles = seq_len // q_tile if seq_len % q_tile == 0 else 1
    emb = rel_attention_bias_weight.astype(jnp.float32)     # (nb, H)

    kernel = functools.partial(
        _rel_pos_bias_kernel, seq_len=seq_len, q_tile=q_tile,
        num_heads=num_heads, num_buckets=num_buckets,
        max_distance=max_distance, bidirectional=bidirectional)

    return pl.pallas_call(
        kernel,
        out_shape=jax.ShapeDtypeStruct((num_heads, seq_len, seq_len), jnp.float32),
        grid=(n_tiles,),
        in_specs=[pl.BlockSpec(memory_space=pltpu.MemorySpace.SMEM)],
        out_specs=pl.BlockSpec((num_heads, q_tile, seq_len), lambda i: (0, i, 0)),
        compiler_params=pltpu.CompilerParams(dimension_semantics=("parallel",)),
    )(emb)


# ----------------------------------------------------------------------------
# 2. Fused layer-norm + self-attention + residual kernel (grid over batch)
# ----------------------------------------------------------------------------
def _udop_self_attn_kernel(*refs, num_heads, d_kv, eps, has_mask):
    """One grid step == one batch element.

    refs layout:
      x_ref    : (S, D)        raw hidden states (residual input)
      lnw_ref  : (1, D) f32    UdopLayerNorm weight
      wqkv_ref : (D, 3*inner)  bf16 fused [Wq | Wk | Wv] (in, out layout)
      wo_ref   : (inner, D)    bf16 output projection (in, out layout)
      bias_ref : (H, S, S) f32 batch-invariant position bias
      mask_ref : (S, S) f32    (only if has_mask) additive attention mask
      o_ref    : (S, D)        layer output
      ctx      : (S, inner) f32 VMEM scratch for per-head contexts
    """
    if has_mask:
        x_ref, lnw_ref, wqkv_ref, wo_ref, bias_ref, mask_ref, o_ref, ctx = refs
    else:
        x_ref, lnw_ref, wqkv_ref, wo_ref, bias_ref, o_ref, ctx = refs
        mask_ref = None

    x = x_ref[...].astype(jnp.float32)                          # (S, D)

    # --- UdopLayerNorm: RMS norm (no mean subtraction, no bias) ---
    variance = jnp.mean(x * x, axis=-1, keepdims=True)
    normed = x * lax.rsqrt(variance + eps) * lnw_ref[...]
    normed_bf = normed.astype(jnp.bfloat16)

    # --- fused QKV projection (T5/UDOP: no bias, no 1/sqrt(d) scaling) ---
    # bf16 operands on the MXU, f32 accumulation.
    qkv = jnp.dot(normed_bf, wqkv_ref[...],
                  preferred_element_type=jnp.float32)           # (S, 3*inner) f32
    inner = num_heads * d_kv

    mask_add = mask_ref[...] if has_mask else None

    # TODO(synk): static head unroll is fine at these sizes; for large H/S lift
    # heads onto a grid axis and tile keys (flash-style online softmax).
    for h in range(num_heads):
        q_h = qkv[:, h * d_kv:(h + 1) * d_kv].astype(jnp.bfloat16)
        k_h = qkv[:, inner + h * d_kv: inner + (h + 1) * d_kv].astype(jnp.bfloat16)
        v_h = qkv[:, 2 * inner + h * d_kv: 2 * inner + (h + 1) * d_kv].astype(jnp.bfloat16)

        scores = lax.dot_general(q_h, k_h, (((1,), (1,)), ((), ())),
                                 preferred_element_type=jnp.float32)   # (S, S) f32
        scores = scores + bias_ref[h]
        if mask_add is not None:
            scores = scores + mask_add

        m = jnp.max(scores, axis=-1, keepdims=True)
        e = jnp.exp(scores - m)                                 # unnormalized probs
        l = jnp.sum(e, axis=-1, keepdims=True)
        ctx_un = jnp.dot(e.astype(jnp.bfloat16), v_h,
                         preferred_element_type=jnp.float32)    # (S, d_kv)
        # normalize AFTER P@V: S*d_kv multiplies instead of S^2 divides; the
        # reciprocal goes to the (otherwise idle) EUP slot.
        ctx[:, h * d_kv:(h + 1) * d_kv] = ctx_un * pl.reciprocal(l, approx=True)

    attn_out = jnp.dot(ctx[...].astype(jnp.bfloat16), wo_ref[...],
                       preferred_element_type=jnp.float32)      # (S, D)
    # dropout == identity in eval mode; residual add.
    o_ref[...] = (x + attn_out).astype(o_ref.dtype)


def udop_layer_self_attention(hidden_states, params, *, num_heads, d_kv,
                              relative_attention_num_buckets=32,
                              relative_attention_max_distance=128,
                              layer_norm_eps=1e-6, is_decoder=False,
                              extended_attention_mask=None):
    """Pallas equivalent of UdopLayerSelfAttention.forward (eval mode).

    Returns (hidden_states, present_key_value_state, position_bias) like torch.
    """
    batch, seq_len, d_model = hidden_states.shape
    inner = num_heads * d_kv

    # 1) relative position bias: batch-invariant, computed once, (H, S, S) f32.
    bias = compute_position_bias(
        params["relative_attention_bias"], seq_len,
        num_heads=num_heads,
        num_buckets=relative_attention_num_buckets,
        max_distance=relative_attention_max_distance,
        bidirectional=not is_decoder)

    # Returned position_bias follows torch semantics (mask folded in if given);
    # the kernel however consumes bias and mask SEPARATELY so the (H,S,S) bias
    # block keeps a batch-invariant index map and is DMA'd only once.
    has_mask = extended_attention_mask is not None
    if has_mask:
        position_bias = bias[None] + extended_attention_mask      # (B, H, S, S)
        mask_batch = extended_attention_mask.shape[0]
        mask4 = jnp.broadcast_to(extended_attention_mask.astype(jnp.float32),
                                 (mask_batch, 1, seq_len, seq_len))
    else:
        position_bias = bias[None]                                # (1, H, S, S)
        mask_batch = 1
        mask4 = None

    # Pre-fuse + pre-cast projection weights once (bf16 MXU operands).
    # TODO(synk): in a real model these would be fused/cast once at load time.
    wqkv = jnp.concatenate([params["wq"], params["wk"], params["wv"]],
                           axis=1).astype(jnp.bfloat16)           # (D, 3*inner)
    wo = params["wo"].astype(jnp.bfloat16)                        # (inner, D)
    lnw = params["layer_norm_weight"].reshape(1, d_model).astype(jnp.float32)

    # Explicit scoped-VMEM limit derived from the block sizes (with headroom).
    need = (4 * seq_len * d_model * 4                    # x + out (double buffered)
            + d_model * 4                                # lnw
            + d_model * 3 * inner * 2                    # wqkv bf16
            + inner * d_model * 2                        # wo bf16
            + num_heads * seq_len * seq_len * 4          # bias
            + (seq_len * seq_len * 4 if has_mask else 0)  # mask
            + seq_len * inner * 4)                       # ctx scratch
    vmem_limit = int(min(100 * 2**20, max(32 * 2**20, 2 * need)))

    kernel = functools.partial(_udop_self_attn_kernel, num_heads=num_heads,
                               d_kv=d_kv, eps=layer_norm_eps, has_mask=has_mask)

    def _const_spec(block_shape, index_map, single):
        if single:
            # constant block index across the batch grid -> single buffering.
            return pl.BlockSpec(block_shape, index_map,
                                pipeline_mode=pl.Buffered(1))
        return pl.BlockSpec(block_shape, index_map)

    def _run(single_buffer_consts):
        in_specs = [
            pl.BlockSpec((None, seq_len, d_model), lambda b: (b, 0, 0)),
            _const_spec((1, d_model), lambda b: (0, 0), single_buffer_consts),
            _const_spec((d_model, 3 * inner), lambda b: (0, 0),
                        single_buffer_consts),
            _const_spec((inner, d_model), lambda b: (0, 0), single_buffer_consts),
            _const_spec((num_heads, seq_len, seq_len), lambda b: (0, 0, 0),
                        single_buffer_consts),
        ]
        args = [hidden_states, lnw, wqkv, wo, bias]
        if has_mask:
            if mask_batch > 1:
                in_specs.append(pl.BlockSpec((None, None, seq_len, seq_len),
                                             lambda b: (b, 0, 0, 0)))
            else:
                in_specs.append(_const_spec((None, None, seq_len, seq_len),
                                            lambda b: (0, 0, 0, 0),
                                            single_buffer_consts))
            args.append(mask4)
        return pl.pallas_call(
            kernel,
            out_shape=jax.ShapeDtypeStruct((batch, seq_len, d_model),
                                           hidden_states.dtype),
            grid=(batch,),
            in_specs=in_specs,
            out_specs=pl.BlockSpec((None, seq_len, d_model), lambda b: (b, 0, 0)),
            scratch_shapes=[pltpu.VMEM((seq_len, inner), jnp.float32)],
            compiler_params=pltpu.CompilerParams(
                dimension_semantics=("parallel",),
                vmem_limit_bytes=vmem_limit),
        )(*args)

    try:
        out = _run(True)
    except Exception:
        # TODO(synk): pl.Buffered(1) not accepted by this jax/Mosaic version --
        # fall back to default double buffering (identical semantics).
        out = _run(False)

    present_key_value_state = None   # decoder KV caching not implemented
    return out, present_key_value_state, position_bias


# ----------------------------------------------------------------------------
# Plain-JAX references for correctness checks.
# ----------------------------------------------------------------------------
def _reference_position_bias(rel_bias_weight, seq_len, *, num_heads, num_buckets,
                             max_distance, is_decoder):
    pos = jnp.arange(seq_len, dtype=jnp.int32)
    rel = pos[None, :] - pos[:, None]
    if not is_decoder:
        nb = num_buckets // 2
        buckets = jnp.where(rel > 0, nb, 0)
        rel_pos = jnp.abs(rel)
    else:
        nb = num_buckets
        buckets = jnp.zeros_like(rel)
        rel_pos = -jnp.minimum(rel, 0)
    max_exact = nb // 2
    is_small = rel_pos < max_exact
    large = max_exact + (jnp.log(jnp.maximum(rel_pos, 1).astype(jnp.float32)
                                 / max_exact)
                         / math.log(max_distance / max_exact)
                         * (nb - max_exact)).astype(jnp.int32)
    large = jnp.minimum(large, nb - 1)
    bucket = buckets + jnp.where(is_small, rel_pos, large)
    pb = jnp.transpose(rel_bias_weight.astype(jnp.float32)[bucket], (2, 0, 1))
    return pb[None]                                   # (1, H, S, S)


def _reference_forward(hidden_states, params, *, num_heads, d_kv, num_buckets,
                       max_distance, eps, is_decoder=False,
                       extended_attention_mask=None):
    """Torch-faithful f32 reference."""
    B, S, D = hidden_states.shape
    x = hidden_states.astype(jnp.float32)
    variance = jnp.mean(x * x, axis=-1, keepdims=True)
    normed = params["layer_norm_weight"] * (x * lax.rsqrt(variance + eps))

    def proj(w):
        y = jnp.matmul(normed, w, precision=jax.lax.Precision.HIGHEST)
        return y.reshape(B, S, num_heads, d_kv).transpose(0, 2, 1, 3)

    q, k, v = proj(params["wq"]), proj(params["wk"]), proj(params["wv"])
    scores = jnp.einsum("bhqd,bhkd->bhqk", q, k,
                        precision=jax.lax.Precision.HIGHEST)
    pb = _reference_position_bias(params["relative_attention_bias"], S,
                                  num_heads=num_heads, num_buckets=num_buckets,
                                  max_distance=max_distance, is_decoder=is_decoder)
    if extended_attention_mask is not None:
        pb = pb + extended_attention_mask
    scores = scores + pb
    attn = jax.nn.softmax(scores, axis=-1)
    ctx = jnp.einsum("bhqk,bhkd->bhqd", attn, v,
                     precision=jax.lax.Precision.HIGHEST)
    ctx = ctx.transpose(0, 2, 1, 3).reshape(B, S, num_heads * d_kv)
    out = hidden_states + jnp.matmul(ctx, params["wo"],
                                     precision=jax.lax.Precision.HIGHEST)
    return out, pb


def _matched_reference(hidden_states, params, *, num_heads, d_kv, num_buckets,
                       max_distance, eps, is_decoder=False,
                       extended_attention_mask=None):
    """Reference with the SAME bf16 cast points as the kernel (tight check)."""
    B, S, D = hidden_states.shape
    inner = num_heads * d_kv
    x = hidden_states.astype(jnp.float32)
    variance = jnp.mean(x * x, axis=-1, keepdims=True)
    normed = x * lax.rsqrt(variance + eps) * params["layer_norm_weight"]
    normed_bf = normed.astype(jnp.bfloat16)

    wqkv = jnp.concatenate([params["wq"], params["wk"], params["wv"]],
                           axis=1).astype(jnp.bfloat16)
    qkv = jnp.dot(normed_bf, wqkv, preferred_element_type=jnp.float32)

    def split(t):
        return t.reshape(B, S, num_heads, d_kv).transpose(0, 2, 1, 3).astype(
            jnp.bfloat16)

    qh = split(qkv[..., :inner])
    kh = split(qkv[..., inner:2 * inner])
    vh = split(qkv[..., 2 * inner:])
    scores = jnp.einsum("bhqd,bhkd->bhqk", qh, kh,
                        preferred_element_type=jnp.float32)
    pb = _reference_position_bias(params["relative_attention_bias"], S,
                                  num_heads=num_heads, num_buckets=num_buckets,
                                  max_distance=max_distance, is_decoder=is_decoder)
    scores = scores + pb
    if extended_attention_mask is not None:
        scores = scores + extended_attention_mask
    m = jnp.max(scores, axis=-1, keepdims=True)
    e = jnp.exp(scores - m)
    l = jnp.sum(e, axis=-1, keepdims=True)
    ctx = jnp.einsum("bhqk,bhkd->bhqd", e.astype(jnp.bfloat16), vh,
                     preferred_element_type=jnp.float32) / l
    ctx = ctx.transpose(0, 2, 1, 3).reshape(B, S, inner)
    out = x + jnp.dot(ctx.astype(jnp.bfloat16), params["wo"].astype(jnp.bfloat16),
                      preferred_element_type=jnp.float32)
    return out.astype(hidden_states.dtype)


if __name__ == "__main__":
    batch, seq_len, d_model = 2, 16, 64
    num_heads, d_kv = 8, 8
    num_buckets, max_distance = 32, 128
    eps = 1e-6
    inner = num_heads * d_kv

    key = jax.random.PRNGKey(0)
    ks = jax.random.split(key, 7)
    scale = 1.0 / math.sqrt(d_model)
    params = {
        "layer_norm_weight": 1.0 + 0.1 * jax.random.normal(ks[0], (d_model,), jnp.float32),
        "wq": jax.random.normal(ks[1], (d_model, inner), jnp.float32) * scale,
        "wk": jax.random.normal(ks[2], (d_model, inner), jnp.float32) * scale,
        "wv": jax.random.normal(ks[3], (d_model, inner), jnp.float32) * scale,
        "wo": jax.random.normal(ks[4], (inner, d_model), jnp.float32) * scale,
        "relative_attention_bias": jax.random.normal(ks[5], (num_buckets, num_heads),
                                                     jnp.float32),
    }
    hidden = jax.random.normal(ks[6], (batch, seq_len, d_model), jnp.float32)
    cfg = dict(num_heads=num_heads, d_kv=d_kv, num_buckets=num_buckets,
               max_distance=max_distance, eps=eps, is_decoder=False)

    # ---------------- unmasked run ----------------
    out, present_kv, position_bias = udop_layer_self_attention(
        hidden, params, num_heads=num_heads, d_kv=d_kv,
        relative_attention_num_buckets=num_buckets,
        relative_attention_max_distance=max_distance,
        layer_norm_eps=eps, is_decoder=False, extended_attention_mask=None)
    out = jax.block_until_ready(out)
    position_bias = jax.block_until_ready(position_bias)

    assert out.shape == (batch, seq_len, d_model), out.shape
    assert position_bias.shape == (1, num_heads, seq_len, seq_len), position_bias.shape

    ref_out, ref_pb = _reference_forward(hidden, params, **cfg)
    matched_out = _matched_reference(hidden, params, **cfg)

    assert jnp.allclose(position_bias, ref_pb, atol=1e-4, rtol=1e-4), \
        "position bias mismatch vs reference"
    # tight check vs a reference using the same bf16 cast points
    assert jnp.allclose(out, matched_out, atol=1e-2, rtol=1e-2), \
        "output mismatch vs bf16-matched reference"
    # sanity check vs the full-f32 torch-faithful reference (bf16 rounding noise)
    assert jnp.allclose(out, ref_out, atol=1e-1, rtol=1e-1), \
        "output mismatch vs f32 reference"

    # ---------------- masked run (batch elem 1 cannot see last 4 keys) -------
    key_valid = jnp.arange(seq_len) < (seq_len - 4)
    mask_row = jnp.where(key_valid, 0.0, -1e9).astype(jnp.float32)       # (S,)
    ext_mask = jnp.zeros((batch, 1, 1, seq_len), jnp.float32).at[1].set(mask_row)

    out_m, _, pb_m = udop_layer_self_attention(
        hidden, params, num_heads=num_heads, d_kv=d_kv,
        relative_attention_num_buckets=num_buckets,
        relative_attention_max_distance=max_distance,
        layer_norm_eps=eps, is_decoder=False, extended_attention_mask=ext_mask)
    out_m = jax.block_until_ready(out_m)

    matched_m = _matched_reference(hidden, params, extended_attention_mask=ext_mask,
                                   **cfg)
    assert pb_m.shape == (batch, num_heads, seq_len, seq_len), pb_m.shape
    assert jnp.allclose(out_m, matched_m, atol=1e-2, rtol=1e-2), \
        "masked output mismatch vs bf16-matched reference"

    print("KERNEL_OK")
</pallas_src>

<mosaic_0001>
module attributes {stable_mosaic.version = 11 : i64} {
  func.func @_rel_pos_bias_kernel(%arg0: i32, %arg1: memref<32x8xf32, #tpu.memory_space<smem>>, %arg2: memref<8x16x16xf32, #tpu.memory_space<vmem>>) attributes {dimension_semantics = [#tpu.dimension_semantics<parallel>], iteration_bounds = array<i64: 1>, scalar_prefetch = 0 : i64, scratch_operands = 0 : i64, tpu.core_type = #tpu.core_type<tc>, window_params = [{transform_indices = @transform_0, window_bounds = array<i64: 32, 8>}, {transform_indices = @transform_1, window_bounds = array<i64: 8, 16, 16>}]} {
    %c16_i32 = arith.constant 16 : i32
    %0 = arith.muli %arg0, %c16_i32 : i32
    %1 = tpu.iota {dimensions = array<i32: 0>} : vector<16x16xi32>
    %2 = vector.broadcast %0 : i32 to vector<16x16xi32>
    %3 = arith.addi %2, %1 : vector<16x16xi32>
    %4 = tpu.iota {dimensions = array<i32: 1>} : vector<16x16xi32>
    %5 = arith.subi %4, %3 : vector<16x16xi32>
    %c0_i32 = arith.constant 0 : i32
    %6 = vector.broadcast %c0_i32 : i32 to vector<16x16xi32>
    %7 = arith.cmpi sgt, %5, %6 : vector<16x16xi32>
    %c16_i32_0 = arith.constant 16 : i32
    %c0_i32_1 = arith.constant 0 : i32
    %8 = vector.broadcast %c16_i32_0 : i32 to vector<16x16xi32>
    %9 = vector.broadcast %c0_i32_1 : i32 to vector<16x16xi32>
    %10 = arith.select %7, %8, %9 : vector<16x16xi1>, vector<16x16xi32>
    %11 = math.absi %5 : vector<16x16xi32>
    %c8_i32 = arith.constant 8 : i32
    %12 = vector.broadcast %c8_i32 : i32 to vector<16x16xi32>
    %13 = arith.cmpi slt, %11, %12 : vector<16x16xi32>
    %c1_i32 = arith.constant 1 : i32
    %14 = vector.broadcast %c1_i32 : i32 to vector<16x16xi32>
    %15 = arith.maxsi %11, %14 : vector<16x16xi32>
    %16 = arith.sitofp %15 : vector<16x16xi32> to vector<16x16xf32>
    %cst = arith.constant 8.000000e+00 : f32
    %17 = vector.broadcast %cst : f32 to vector<16x16xf32>
    %18 = arith.divf %16, %17 : vector<16x16xf32>
    %19 = math.log %18 : vector<16x16xf32>
    %cst_2 = arith.constant 2.77258873 : f32
    %20 = vector.broadcast %cst_2 : f32 to vector<16x16xf32>
    %21 = arith.divf %19, %20 : vector<16x16xf32>
    %cst_3 = arith.constant 8.000000e+00 : f32
    %22 = vector.broadcast %cst_3 : f32 to vector<16x16xf32>
    %23 = arith.mulf %21, %22 : vector<16x16xf32>
    %24 = arith.fptosi %23 : vector<16x16xf32> to vector<16x16xi32>
    %c8_i32_4 = arith.constant 8 : i32
    %25 = vector.broadcast %c8_i32_4 : i32 to vector<16x16xi32>
    %26 = arith.addi %25, %24 : vector<16x16xi32>
    %c15_i32 = arith.constant 15 : i32
    %27 = vector.broadcast %c15_i32 : i32 to vector<16x16xi32>
    %28 = arith.minsi %26, %27 : vector<16x16xi32>
    %29 = arith.select %13, %11, %28 : vector<16x16xi1>, vector<16x16xi32>
    %30 = arith.addi %10, %29 : vector<16x16xi32>
    %cst_5 = arith.constant 0.000000e+00 : f32
    %31 = vector.broadcast %cst_5 : f32 to vector<16x16xf32>
    %c0_i32_6 = arith.constant 0 : i32
    %32 = vector.broadcast %c0_i32_6 : i32 to vector<16x16xi32>
    %33 = arith.cmpi eq, %30, %32 : vector<16x16xi32>
    %c0 = arith.constant 0 : index
    %c0_7 = arith.constant 0 : index
    %34 = memref.load %arg1[%c0, %c0_7] : memref<32x8xf32, #tpu.memory_space<smem>>
    %cst_8 = arith.constant 0.000000e+00 : f32
    %35 = vector.broadcast %34 : f32 to vector<16x16xf32>
    %36 = vector.broadcast %cst_8 : f32 to vector<16x16xf32>
    %37 = arith.select %33, %35, %36 : vector<16x16xi1>, vector<16x16xf32>
    %38 = arith.addf %31, %37 : vector<16x16xf32>
    %c1_i32_9 = arith.constant 1 : i32
    %39 = vector.broadcast %c1_i32_9 : i32 to vector<16x16xi32>
    %40 = arith.cmpi eq, %30, %39 : vector<16x16xi32>
    %c1 = arith.constant 1 : index
    %c0_10 = arith.constant 0 : index
    %41 = memref.load %arg1[%c1, %c0_10] : memref<32x8xf32, #tpu.memory_space<smem>>
    %cst_11 = arith.constant 0.000000e+00 : f32
    %42 = vector.broadcast %41 : f32 to vector<16x16xf32>
    %43 = vector.broadcast %cst_11 : f32 to vector<16x16xf32>
    %44 = arith.select %40, %42, %43 : vector<16x16xi1>, vector<16x16xf32>
    %45 = arith.addf %38, %44 : vector<16x16xf32>
    %c2_i32 = arith.constant 2 : i32
    %46 = vector.broadcast %c2_i32 : i32 to vector<16x16xi32>
    %47 = arith.cmpi eq, %30, %46 : vector<16x16xi32>
    %c2 = arith.constant 2 : index
    %c0_12 = arith.constant 0 : index
    %48 = memref.load %arg1[%c2, %c0_12] : memref<32x8xf32, #tpu.memory_space<smem>>
    %cst_13 = arith.constant 0.000000e+00 : f32
    %49 = vector.broadcast %48 : f32 to vector<16x16xf32>
    %50 = vector.broadcast %cst_13 : f32 to vector<16x16xf32>
    %51 = arith.select %47, %49, %50 : vector<16x16xi1>, vector<16x16xf32>
    %52 = arith.addf %45, %51 : vector<16x16xf32>
    %c3_i32 = arith.constant 3 : i32
    %53 = vector.broadcast %c3_i32 : i32 to vector<16x16xi32>
    %54 = arith.cmpi eq, %30, %53 : vector<16x16xi32>
    %c3 = arith.constant 3 : index
    %c0_14 = arith.constant 0 : index
    %55 = memref.load %arg1[%c3, %c0_14] : memref<32x8xf32, #tpu.memory_space<smem>>
    %cst_15 = arith.constant 0.000000e+00 : f32
    %56 = vector.broadcast %55 : f32 to vector<16x16xf32>
    %57 = vector.broadcast %cst_15 : f32 to vector<16x16xf32>
    %58 = arith.select %54, %56, %57 : vector<16x16xi1>, vector<16x16xf32>
    %59 = arith.addf %52, %58 : vector<16x16xf32>
    %c4_i32 = arith.constant 4 : i32
    %60 = vector.broadcast %c4_i32 : i32 to vector<16x16xi32>
    %61 = arith.cmpi eq, %30, %60 : vector<16x16xi32>
    %c4 = arith.constant 4 : index
    %c0_16 = arith.constant 0 : index
    %62 = memref.load %arg1[%c4, %c0_16] : memref<32x8xf32, #tpu.memory_space<smem>>
    %cst_17 = arith.constant 0.000000e+00 : f32
    %63 = vector.broadcast %62 : f32 to vector<16x16xf32>
    %64 = vector.broadcast %cst_17 : f32 to vector<16x16xf32>
    %65 = arith.select %61, %63, %64 : vector<16x16xi1>, vector<16x16xf32>
    %66 = arith.addf %59, %65 : vector<16x16xf32>
    %c5_i32 = arith.constant 5 : i32
    %67 = vector.broadcast %c5_i32 : i32 to vector<16x16xi32>
    %68 = arith.cmpi eq, %30, %67 : vector<16x16xi32>
    %c5 = arith.constant 5 : index
    %c0_18 = arith.constant 0 : index
    %69 = memref.load %arg1[%c5, %c0_18] : memref<32x8xf32, #tpu.memory_space<smem>>
    %cst_19 = arith.constant 0.000000e+00 : f32
    %70 = vector.broadcast %69 : f32 to vector<16x16xf32>
    %71 = vector.broadcast %cst_19 : f32 to vector<16x16xf32>
    %72 = arith.select %68, %70, %71 : vector<16x16xi1>, vector<16x16xf32>
    %73 = arith.addf %66, %72 : vector<16x16xf32>
    %c6_i32 = arith.constant 6 : i32
    %74 = vector.broadcast %c6_i32 : i32 to vector<16x16xi32>
    %75 = arith.cmpi eq, %30, %74 : vector<16x16xi32>
    %c6 = arith.constant 6 : index
    %c0_20 = arith.constant 0 : index
    %76 = memref.load %arg1[%c6, %c0_20] : memref<32x8xf32, #tpu.memory_space<smem>>
    %cst_21 = arith.constant 0.000000e+00 : f32
    %77 = vector.broadcast %76 : f32 to vector<16x16xf32>
    %78 = vector.broadcast %cst_21 : f32 to vector<16x16xf32>
    %79 = arith.select %75, %77, %78 : vector<16x16xi1>, vector<16x16xf32>
    %80 = arith.addf %73, %79 : vector<16x16xf32>
    %c7_i32 = arith.constant 7 : i32
    %81 = vector.broadcast %c7_i32 : i32 to vector<16x16xi32>
    %82 = arith.cmpi eq, %30, %81 : vector<16x16xi32>
    %c7 = arith.constant 7 : index
    %c0_22 = arith.constant 0 : index
    %83 = memref.load %arg1[%c7, %c0_22] : memref<32x8xf32, #tpu.memory_space<smem>>
    %cst_23 = arith.constant 0.000000e+00 : f32
    %84 = vector.broadcast %83 : f32 to vector<16x16xf32>
    %85 = vector.broadcast %cst_23 : f32 to vector<16x16xf32>
    %86 = arith.select %82, %84, %85 : vector<16x16xi1>, vector<16x16xf32>
    %87 = arith.addf %80, %86 : vector<16x16xf32>
    %c8_i32_24 = arith.constant 8 : i32
    %88 = vector.broadcast %c8_i32_24 : i32 to vector<16x16xi32>
    %89 = arith.cmpi eq, %30, %88 : vector<16x16xi32>
    %c8 = arith.constant 8 : index
    %c0_25 = arith.constant 0 : index
    %90 = memref.load %arg1[%c8, %c0_25] : memref<32x8xf32, #tpu.memory_space<smem>>
    %cst_26 = arith.constant 0.000000e+00 : f32
    %91 = vector.broadcast %90 : f32 to vector<16x16xf32>
    %92 = vector.broadcast %cst_26 : f32 to vector<16x16xf32>
    %93 = arith.select %89, %91, %92 : vector<16x16xi1>, vector<16x16xf32>
    %94 = arith.addf %87, %93 : vector<16x16xf32>
    %c9_i32 = arith.constant 9 : i32
    %95 = vector.broadcast %c9_i32 : i32 to vector<16x16xi32>
    %96 = arith.cmpi eq, %30, %95 : vector<16x16xi32>
    %c9 = arith.constant 9 : index
    %c0_27 = arith.constant 0 : index
    %97 = memref.load %arg1[%c9, %c0_27] : memref<32x8xf32, #tpu.memory_space<smem>>
    %cst_28 = arith.constant 0.000000e+00 : f32
    %98 = vector.broadcast %97 : f32 to vector<16x16xf32>
    %99 = vector.broadcast %cst_28 : f32 to vector<16x16xf32>
    %100 = arith.select %96, %98, %99 : vector<16x16xi1>, vector<16x16xf32>
    %101 = arith.addf %94, %100 : vector<16x16xf32>
    %c10_i32 = arith.constant 10 : i32
    %102 = vector.broadcast %c10_i32 : i32 to vector<16x16xi32>
    %103 = arith.cmpi eq, %30, %102 : vector<16x16xi32>
    %c10 = arith.constant 10 : index
    %c0_29 = arith.constant 0 : index
    %104 = memref.load %arg1[%c10, %c0_29] : memref<32x8xf32, #tpu.memory_space<smem>>
    %cst_30 = arith.constant 0.000000e+00 : f32
    %105 = vector.broadcast %104 : f32 to vector<16x16xf32>
    %106 = vector.broadcast %cst_30 : f32 to vector<16x16xf32>
    %107 = arith.select %103, %105, %106 : vector<16x16xi1>, vector<16x16xf32>
    %108 = arith.addf %101, %107 : vector<16x16xf32>
    %c11_i32 = arith.constant 11 : i32
    %109 = vector.broadcast %c11_i32 : i32 to vector<16x16xi32>
    %110 = arith.cmpi eq, %30, %109 : vector<16x16xi32>
    %c11 = arith.constant 11 : index
    %c0_31 = arith.constant 0 : index
    %111 = memref.load %arg1[%c11, %c0_31] : memref<32x8xf32, #tpu.memory_space<smem>>
    %cst_32 = arith.constant 0.000000e+00 : f32
    %112 = vector.broadcast %111 : f32 to vector<16x16xf32>
    %113 = vector.broadcast %cst_32 : f32 to vector<16x16xf32>
    %114 = arith.select %110, %112, %113 : vector<16x16xi1>, vector<16x16xf32>
    %115 = arith.addf %108, %114 : vector<16x16xf32>
    %c12_i32 = arith.constant 12 : i32
    %116 = vector.broadcast %c12_i32 : i32 to vector<16x16xi32>
    %117 = arith.cmpi eq, %30, %116 : vector<16x16xi32>
    %c12 = arith.constant 12 : index
    %c0_33 = arith.constant 0 : index
    %118 = memref.load %arg1[%c12, %c0_33] : memref<32x8xf32, #tpu.memory_space<smem>>
    %cst_34 = arith.constant 0.000000e+00 : f32
    %119 = vector.broadcast %118 : f32 to vector<16x16xf32>
    %120 = vector.broadcast %cst_34 : f32 to vector<16x16xf32>
    %121 = arith.select %117, %119, %120 : vector<16x16xi1>, vector<16x16xf32>
    %122 = arith.addf %115, %121 : vector<16x16xf32>
    %c13_i32 = arith.constant 13 : i32
    %123 = vector.broadcast %c13_i32 : i32 to vector<16x16xi32>
    %124 = arith.cmpi eq, %30, %123 : vector<16x16xi32>
    %c13 = arith.constant 13 : index
    %c0_35 = arith.constant 0 : index
    %125 = memref.load %arg1[%c13, %c0_35] : memref<32x8xf32, #tpu.memory_space<smem>>
    %cst_36 = arith.constant 0.000000e+00 : f32
    %126 = vector.broadcast %125 : f32 to vector<16x16xf32>
    %127 = vector.broadcast %cst_36 : f32 to vector<16x16xf32>
    %128 = arith.select %124, %126, %127 : vector<16x16xi1>, vector<16x16xf32>
    %129 = arith.addf %122, %128 : vector<16x16xf32>
    %c14_i32 = arith.constant 14 : i32
    %130 = vector.broadcast %c14_i32 : i32 to vector<16x16xi32>
    %131 = arith.cmpi eq, %30, %130 : vector<16x16xi32>
    %c14 = arith.constant 14 : index
    %c0_37 = arith.constant 0 : index
    %132 = memref.load %arg1[%c14, %c0_37] : memref<32x8xf32, #tpu.memory_space<smem>>
    %cst_38 = arith.constant 0.000000e+00 : f32
    %133 = vector.broadcast %132 : f32 to vector<16x16xf32>
    %134 = vector.broadcast %cst_38 : f32 to vector<16x16xf32>
    %135 = arith.select %131, %133, %134 : vector<16x16xi1>, vector<16x16xf32>
    %136 = arith.addf %129, %135 : vector<16x16xf32>
    %c15_i32_39 = arith.constant 15 : i32
    %137 = vector.broadcast %c15_i32_39 : i32 to vector<16x16xi32>
    %138 = arith.cmpi eq, %30, %137 : vector<16x16xi32>
    %c15 = arith.constant 15 : index
    %c0_40 = arith.constant 0 : index
    %139 = memref.load %arg1[%c15, %c0_40] : memref<32x8xf32, #tpu.memory_space<smem>>
    %cst_41 = arith.constant 0.000000e+00 : f32
    %140 = vector.broadcast %139 : f32 to vector<16x16xf32>
    %141 = vector.broadcast %cst_41 : f32 to vector<16x16xf32>
    %142 = arith.select %138, %140, %141 : vector<16x16xi1>, vector<16x16xf32>
    %143 = arith.addf %136, %142 : vector<16x16xf32>
    %c16_i32_42 = arith.constant 16 : i32
    %144 = vector.broadcast %c16_i32_42 : i32 to vector<16x16xi32>
    %145 = arith.cmpi eq, %30, %144 : vector<16x16xi32>
    %c16 = arith.constant 16 : index
    %c0_43 = arith.constant 0 : index
    %146 = memref.load %arg1[%c16, %c0_43] : memref<32x8xf32, #tpu.memory_space<smem>>
    %cst_44 = arith.constant 0.000000e+00 : f32
    %147 = vector.broadcast %146 : f32 to vector<16x16xf32>
    %148 = vector.broadcast %cst_44 : f32 to vector<16x16xf32>
    %149 = arith.select %145, %147, %148 : vector<16x16xi1>, vector<16x16xf32>
    %150 = arith.addf %143, %149 : vector<16x16xf32>
    %c17_i32 = arith.constant 17 : i32
    %151 = vector.broadcast %c17_i32 : i32 to vector<16x16xi32>
    %152 = arith.cmpi eq, %30, %151 : vector<16x16xi32>
    %c17 = arith.constant 17 : index
    %c0_45 = arith.constant 0 : index
    %153 = memref.load %arg1[%c17, %c0_45] : memref<32x8xf32, #tpu.memory_space<smem>>
    %cst_46 = arith.constant 0.000000e+00 : f32
    %154 = vector.broadcast %153 : f32 to vector<16x16xf32>
    %155 = vector.broadcast %cst_46 : f32 to vector<16x16xf32>
    %156 = arith.select %152, %154, %155 : vector<16x16xi1>, vector<16x16xf32>
    %157 = arith.addf %150, %156 : vector<16x16xf32>
    %c18_i32 = arith.constant 18 : i32
    %158 = vector.broadcast %c18_i32 : i32 to vector<16x16xi32>
    %159 = arith.cmpi eq, %30, %158 : vector<16x16xi32>
    %c18 = arith.constant 18 : index
    %c0_47 = arith.constant 0 : index
    %160 = memref.load %arg1[%c18, %c0_47] : memref<32x8xf32, #tpu.memory_space<smem>>
    %cst_48 = arith.constant 0.000000e+00 : f32
    %161 = vector.broadcast %160 : f32 to vector<16x16xf32>
    %162 = vector.broadcast %cst_48 : f32 to vector<16x16xf32>
    %163 = arith.select %159, %161, %162 : vector<16x16xi1>, vector<16x16xf32>
    %164 = arith.addf %157, %163 : vector<16x16xf32>
    %c19_i32 = arith.constant 19 : i32
    %165 = vector.broadcast %c19_i32 : i32 to vector<16x16xi32>
    %166 = arith.cmpi eq, %30, %165 : vector<16x16xi32>
    %c19 = arith.constant 19 : index
    %c0_49 = arith.constant 0 : index
    %167 = memref.load %arg1[%c19, %c0_49] : memref<32x8xf32, #tpu.memory_space<smem>>
    %cst_50 = arith.constant 0.000000e+00 : f32
    %168 = vector.broadcast %167 : f32 to vector<16x16xf32>
    %169 = vector.broadcast %cst_50 : f32 to vector<16x16xf32>
    %170 = arith.select %166, %168, %169 : vector<16x16xi1>, vector<16x16xf32>
    %171 = arith.addf %164, %170 : vector<16x16xf32>
    %c20_i32 = arith.constant 20 : i32
    %172 = vector.broadcast %c20_i32 : i32 to vector<16x16xi32>
    %173 = arith.cmpi eq, %30, %172 : vector<16x16xi32>
    %c20 = arith.constant 20 : index
    %c0_51 = arith.constant 0 : index
    %174 = memref.load %arg1[%c20, %c0_51] : memref<32x8xf32, #tpu.memory_space<smem>>
    %cst_52 = arith.constant 0.000000e+00 : f32
    %175 = vector.broadcast %174 : f32 to vector<16x16xf32>
    %176 = vector.broadcast %cst_52 : f32 to vector<16x16xf32>
    %177 = arith.select %173, %175, %176 : vector<16x16xi1>, vector<16x16xf32>
    %178 = arith.addf %171, %177 : vector<16x16xf32>
    %c21_i32 = arith.constant 21 : i32
    %179 = vector.broadcast %c21_i32 : i32 to vector<16x16xi32>
    %180 = arith.cmpi eq, %30, %179 : vector<16x16xi32>
    %c21 = arith.constant 21 : index
    %c0_53 = arith.constant 0 : index
    %181 = memref.load %arg1[%c21, %c0_53] : memref<32x8xf32, #tpu.memory_space<smem>>
    %cst_54 = arith.constant 0.000000e+00 : f32
    %182 = vector.broadcast %181 : f32 to vector<16x16xf32>
    %183 = vector.broadcast %cst_54 : f32 to vector<16x16xf32>
    %184 = arith.select %180, %182, %183 : vector<16x16xi1>, vector<16x16xf32>
    %185 = arith.addf %178, %184 : vector<16x16xf32>
    %c22_i32 = arith.constant 22 : i32
    %186 = vector.broadcast %c22_i32 : i32 to vector<16x16xi32>
    %187 = arith.cmpi eq, %30, %186 : vector<16x16xi32>
    %c22 = arith.constant 22 : index
    %c0_55 = arith.constant 0 : index
    %188 = memref.load %arg1[%c22, %c0_55] : memref<32x8xf32, #tpu.memory_space<smem>>
    %cst_56 = arith.constant 0.000000e+00 : f32
    %189 = vector.broadcast %188 : f32 to vector<16x16xf32>
    %190 = vector.broadcast %cst_56 : f32 to vector<16x16xf32>
    %191 = arith.select %187, %189, %190 : vector<16x16xi1>, vector<16x16xf32>
    %192 = arith.addf %185, %191 : vector<16x16xf32>
    %c23_i32 = arith.constant 23 : i32
    %193 = vector.broadcast %c23_i32 : i32 to vector<16x16xi32>
    %194 = arith.cmpi eq, %30, %193 : vector<16x16xi32>
    %c23 = arith.constant 23 : index
    %c0_57 = arith.constant 0 : index
    %195 = memref.load %arg1[%c23, %c0_57] : memref<32x8xf32, #tpu.memory_space<smem>>
    %cst_58 = arith.constant 0.000000e+00 : f32
    %196 = vector.broadcast %195 : f32 to vector<16x16xf32>
    %197 = vector.broadcast %cst_58 : f32 to vector<16x16xf32>
    %198 = arith.select %194, %196, %197 : vector<16x16xi1>, vector<16x16xf32>
    %199 = arith.addf %192, %198 : vector<16x16xf32>
    %c24_i32 = arith.constant 24 : i32
    %200 = vector.broadcast %c24_i32 : i32 to vector<16x16xi32>
    %201 = arith.cmpi eq, %30, %200 : vector<16x16xi32>
    %c24 = arith.constant 24 : index
    %c0_59 = arith.constant 0 : index
    %202 = memref.load %arg1[%c24, %c0_59] : memref<32x8xf32, #tpu.memory_space<smem>>
    %cst_60 = arith.constant 0.000000e+00 : f32
    %203 = vector.broadcast %202 : f32 to vector<16x16xf32>
    %204 = vector.broadcast %cst_60 : f32 to vector<16x16xf32>
    %205 = arith.select %201, %203, %204 : vector<16x16xi1>, vector<16x16xf32>
    %206 = arith.addf %199, %205 : vector<16x16xf32>
    %c25_i32 = arith.constant 25 : i32
    %207 = vector.broadcast %c25_i32 : i32 to vector<16x16xi32>
    %208 = arith.cmpi eq, %30, %207 : vector<16x16xi32>
    %c25 = arith.constant 25 : index
    %c0_61 = arith.constant 0 : index
    %209 = memref.load %arg1[%c25, %c0_61] : memref<32x8xf32, #tpu.memory_space<smem>>
    %cst_62 = arith.constant 0.000000e+00 : f32
    %210 = vector.broadcast %209 : f32 to vector<16x16xf32>
    %211 = vector.broadcast %cst_62 : f32 to vector<16x16xf32>
    %212 = arith.select %208, %210, %211 : vector<16x16xi1>, vector<16x16xf32>
    %213 = arith.addf %206, %212 : vector<16x16xf32>
    %c26_i32 = arith.constant 26 : i32
    %214 = vector.broadcast %c26_i32 : i32 to vector<16x16xi32>
    %215 = arith.cmpi eq, %30, %214 : vector<16x16xi32>
    %c26 = arith.constant 26 : index
    %c0_63 = arith.constant 0 : index
    %216 = memref.load %arg1[%c26, %c0_63] : memref<32x8xf32, #tpu.memory_space<smem>>
    %cst_64 = arith.constant 0.000000e+00 : f32
    %217 = vector.broadcast %216 : f32 to vector<16x16xf32>
    %218 = vector.broadcast %cst_64 : f32 to vector<16x16xf32>
    %219 = arith.select %215, %217, %218 : vector<16x16xi1>, vector<16x16xf32>
    %220 = arith.addf %213, %219 : vector<16x16xf32>
    %c27_i32 = arith.constant 27 : i32
    %221 = vector.broadcast %c27_i32 : i32 to vector<16x16xi32>
    %222 = arith.cmpi eq, %30, %221 : vector<16x16xi32>
    %c27 = arith.constant 27 : index
    %c0_65 = arith.constant 0 : index
    %223 = memref.load %arg1[%c27, %c0_65] : memref<32x8xf32, #tpu.memory_space<smem>>
    %cst_66 = arith.constant 0.000000e+00 : f32
    %224 = vector.broadcast %223 : f32 to vector<16x16xf32>
    %225 = vector.broadcast %cst_66 : f32 to vector<16x16xf32>
    %226 = arith.select %222, %224, %225 : vector<16x16xi1>, vector<16x16xf32>
    %227 = arith.addf %220, %226 : vector<16x16xf32>
    %c28_i32 = arith.constant 28 : i32
    %228 = vector.broadcast %c28_i32 : i32 to vector<16x16xi32>
    %229 = arith.cmpi eq, %30, %228 : vector<16x16xi32>
    %c28 = arith.constant 28 : index
    %c0_67 = arith.constant 0 : index
    %230 = memref.load %arg1[%c28, %c0_67] : memref<32x8xf32, #tpu.memory_space<smem>>
    %cst_68 = arith.constant 0.000000e+00 : f32
    %231 = vector.broadcast %230 : f32 to vector<16x16xf32>
    %232 = vector.broadcast %cst_68 : f32 to vector<16x16xf32>
    %233 = arith.select %229, %231, %232 : vector<16x16xi1>, vector<16x16xf32>
    %234 = arith.addf %227, %233 : vector<16x16xf32>
    %c29_i32 = arith.constant 29 : i32
    %235 = vector.broadcast %c29_i32 : i32 to vector<16x16xi32>
    %236 = arith.cmpi eq, %30, %235 : vector<16x16xi32>
    %c29 = arith.constant 29 : index
    %c0_69 = arith.constant 0 : index
    %237 = memref.load %arg1[%c29, %c0_69] : memref<32x8xf32, #tpu.memory_space<smem>>
    %cst_70 = arith.constant 0.000000e+00 : f32
    %238 = vector.broadcast %237 : f32 to vector<16x16xf32>
    %239 = vector.broadcast %cst_70 : f32 to vector<16x16xf32>
    %240 = arith.select %236, %238, %239 : vector<16x16xi1>, vector<16x16xf32>
    %241 = arith.addf %234, %240 : vector<16x16xf32>
    %c30_i32 = arith.constant 30 : i32
    %242 = vector.broadcast %c30_i32 : i32 to vector<16x16xi32>
    %243 = arith.cmpi eq, %30, %242 : vector<16x16xi32>
    %c30 = arith.constant 30 : index
    %c0_71 = arith.constant 0 : index
    %244 = memref.load %arg1[%c30, %c0_71] : memref<32x8xf32, #tpu.memory_space<smem>>
    %cst_72 = arith.constant 0.000000e+00 : f32
    %245 = vector.broadcast %244 : f32 to vector<16x16xf32>
    %246 = vector.broadcast %cst_72 : f32 to vector<16x16xf32>
    %247 = arith.select %243, %245, %246 : vector<16x16xi1>, vector<16x16xf32>
    %248 = arith.addf %241, %247 : vector<16x16xf32>
    %c31_i32 = arith.constant 31 : i32
    %249 = vector.broadcast %c31_i32 : i32 to vector<16x16xi32>
    %250 = arith.cmpi eq, %30, %249 : vector<16x16xi32>
    %c31 = arith.constant 31 : index
    %c0_73 = arith.constant 0 : index
    %251 = memref.load %arg1[%c31, %c0_73] : memref<32x8xf32, #tpu.memory_space<smem>>
    %cst_74 = arith.constant 0.000000e+00 : f32
    %252 = vector.broadcast %251 : f32 to vector<16x16xf32>
    %253 = vector.broadcast %cst_74 : f32 to vector<16x16xf32>
    %254 = arith.select %250, %252, %253 : vector<16x16xi1>, vector<16x16xf32>
    %255 = arith.addf %248, %254 : vector<16x16xf32>
    %c0_75 = arith.constant 0 : index
    %c0_76 = arith.constant 0 : index
    %c0_77 = arith.constant 0 : index
    %256 = vector.load %arg2[%c0_75, %c0_76, %c0_77] : memref<8x16x16xf32, #tpu.memory_space<vmem>>, vector<1x16x16xf32>
    %257 = vector.shape_cast %256 : vector<1x16x16xf32> to vector<16x16xf32>
    %258 = vector.shape_cast %255 : vector<16x16xf32> to vector<1x16x16xf32>
    tpu.vector_store %arg2[%c0_75, %c0_76, %c0_77], %258 {strides = array<i32>} : memref<8x16x16xf32, #tpu.memory_space<vmem>>, vector<1x16x16xf32>,
    %cst_78 = arith.constant 0.000000e+00 : f32
    %259 = vector.broadcast %cst_78 : f32 to vector<16x16xf32>
    %c0_i32_79 = arith.constant 0 : i32
    %260 = vector.broadcast %c0_i32_79 : i32 to vector<16x16xi32>
    %261 = arith.cmpi eq, %30, %260 : vector<16x16xi32>
    %c0_80 = arith.constant 0 : index
    %c1_81 = arith.constant 1 : index
    %262 = memref.load %arg1[%c0_80, %c1_81] : memref<32x8xf32, #tpu.memory_space<smem>>
    %cst_82 = arith.constant 0.000000e+00 : f32
    %263 = vector.broadcast %262 : f32 to vector<16x16xf32>
    %264 = vector.broadcast %cst_82 : f32 to vector<16x16xf32>
    %265 = arith.select %261, %263, %264 : vector<16x16xi1>, vector<16x16xf32>
    %266 = arith.addf %259, %265 : vector<16x16xf32>
    %c1_i32_83 = arith.constant 1 : i32
    %267 = vector.broadcast %c1_i32_83 : i32 to vector<16x16xi32>
    %268 = arith.cmpi eq, %30, %267 : vector<16x16xi32>
    %c1_84 = arith.constant 1 : index
    %c1_85 = arith.constant 1 : index
    %269 = memref.load %arg1[%c1_84, %c1_85] : memref<32x8xf32, #tpu.memory_space<smem>>
    %cst_86 = arith.constant 0.000000e+00 : f32
    %270 = vector.broadcast %269 : f32 to vector<16x16xf32>
    %271 = vector.broadcast %cst_86 : f32 to vector<16x16xf32>
    %272 = arith.select %268, %270, %271 : vector<16x16xi1>, vector<16x16xf32>
    %273 = arith.addf %266, %272 : vector<16x16xf32>
    %c2_i32_87 = arith.constant 2 : i32
    %274 = vector.broadcast %c2_i32_87 : i32 to vector<16x16xi32>
    %275 = arith.cmpi eq, %30, %274 : vector<16x16xi32>
    %c2_88 = arith.constant 2 : index
    %c1_89 = arith.constant 1 : index
    %276 = memref.load %arg1[%c2_88, %c1_89] : memref<32x8xf32, #tpu.memory_space<smem>>
    %cst_90 = arith.constant 0.000000e+00 : f32
    %277 = vector.broadcast %276 : f32 to vector<16x16xf32>
    %278 = vector.broadcast %cst_90 : f32 to vector<16x16xf32>
    %279 = arith.select %275, %277, %278 : vector<16x16xi1>, vector<16x16xf32>
    %280 = arith.addf %273, %279 : vector<16x16xf32>
    %c3_i32_91 = arith.constant 3 : i32
    %281 = vector.broadcast %c3_i32_91 : i32 to vector<16x16xi32>
    %282 = arith.cmpi eq, %30, %281 : vector<16x16xi32>
    %c3_92 = arith.constant 3 : index
    %c1_93 = arith.constant 1 : index
    %283 = memref.load %arg1[%c3_92, %c1_93] : memref<32x8xf32, #tpu.memory_space<smem>>
    %cst_94 = arith.constant 0.000000e+00 : f32
    %284 = vector.broadcast %283 : f32 to vector<16x16xf32>
    %285 = vector.broadcast %cst_94 : f32 to vector<16x16xf32>
    %286 = arith.select %282, %284, %285 : vector<16x16xi1>, vector<16x16xf32>
    %287 = arith.addf %280, %286 : vector<16x16xf32>
    %c4_i32_95 = arith.constant 4 : i32
    %288 = vector.broadcast %c4_i32_95 : i32 to vector<16x16xi32>
    %289 = arith.cmpi eq, %30, %288 : vector<16x16xi32>
    %c4_96 = arith.constant 4 : index
    %c1_97 = arith.constant 1 : index
    %290 = memref.load %arg1[%c4_96, %c1_97] : memref<32x8xf32, #tpu.memory_space<smem>>
    %cst_98 = arith.constant 0.000000e+00 : f32
    %291 = vector.broadcast %290 : f32 to vector<16x16xf32>
    %292 = vector.broadcast %cst_98 : f32 to vector<16x16xf32>
    %293 = arith.select %289, %291, %292 : vector<16x16xi1>, vector<16x16xf32>
    %294 = arith.addf %287, %293 : vector<16x16xf32>
    %c5_i32_99 = arith.constant 5 : i32
    %295 = vector.broadcast %c5_i32_99 : i32 to vector<16x16xi32>
    %296 = arith.cmpi eq, %30, %295 : vector<16x16xi32>
    %c5_100 = arith.constant 5 : index
    %c1_101 = arith.constant 1 : index
    %297 = memref.load %arg1[%c5_100, %c1_101] : memref<32x8xf32, #tpu.memory_space<smem>>
    %cst_102 = arith.constant 0.000000e+00 : f32
    %298 = vector.broadcast %297 : f32 to vector<16x16xf32>
    %299 = vector.broadcast %cst_102 : f32 to vector<16x16xf32>
    %300 = arith.select %296, %298, %299 : vector<16x16xi1>, vector<16x16xf32>
    %301 = arith.addf %294, %300 : vector<16x16xf32>
    %c6_i32_103 = arith.constant 6 : i32
    %302 = vector.broadcast %c6_i32_103 : i32 to vector<16x16xi32>
    %303 = arith.cmpi eq, %30, %302 : vector<16x16xi32>
    %c6_104 = arith.constant 6 : index
    %c1_105 = arith.constant 1 : index
    %304 = memref.load %arg1[%c6_104, %c1_105] : memref<32x8xf32, #tpu.memory_space<smem>>
    %cst_106 = arith.constant 0.000000e+00 : f32
    %305 = vector.broadcast %304 : f32 to vector<16x16xf32>
    %306 = vector.broadcast %cst_106 : f32 to vector<16x16xf32>
    %307 = arith.select %303, %305, %306 : vector<16x16xi1>, vector<16x16xf32>
    %308 = arith.addf %301, %307 : vector<16x16xf32>
    %c7_i32_107 = arith.constant 7 : i32
    %309 = vector.broadcast %c7_i32_107 : i32 to vector<16x16xi32>
    %310 = arith.cmpi eq, %30, %309 : vector<16x16xi32>
    %c7_108 = arith.constant 7 : index
    %c1_109 = arith.constant 1 : index
    %311 = memref.load %arg1[%c7_108, %c1_109] : memref<32x8xf32, #tpu.memory_space<smem>>
    %cst_110 = arith.constant 0.000000e+00 : f32
    %312 = vector.broadcast %311 : f32 to vector<16x16xf32>
    %313 = vector.broadcast %cst_110 : f32 to vector<16x16xf32>
    %314 = arith.select %310, %312, %313 : vector<16x16xi1>, vector<16x16xf32>
    %315 = arith.addf %308, %314 : vector<16x16xf32>
    %c8_i32_111 = arith.constant 8 : i32
    %316 = vector.broadcast %c8_i32_111 : i32 to vector<16x16xi32>
    %317 = arith.cmpi eq, %30, %316 : vector<16x16xi32>
    %c8_112 = arith.constant 8 : index
    %c1_113 = arith.constant 1 : index
    %318 = memref.load %arg1[%c8_112, %c1_113] : memref<32x8xf32, #tpu.memory_space<smem>>
    %cst_114 = arith.constant 0.000000e+00 : f32
    %319 = vector.broadcast %318 : f32 to vector<16x16xf32>
    %320 = vector.broadcast %cst_114 : f32 to vector<16x16xf32>
    %321 = arith.select %317, %319, %320 : vector<16x16xi1>, vector<16x16xf32>
    %322 = arith.addf %315, %321 : vector<16x16xf32>
    %c9_i32_115 = arith.constant 9 : i32
    %323 = vector.broadcast %c9_i32_115 : i32 to vector<16x16xi32>
    %324 = arith.cmpi eq, %30, %323 : vector<16x16xi32>
    %c9_116 = arith.constant 9 : index
    %c1_117 = arith.constant 1 : index
    %325 = memref.load %arg1[%c9_116, %c1_117] : memref<32x8xf32, #tpu.memory_space<smem>>
    %cst_118 = arith.constant 0.000000e+00 : f32
    %326 = vector.broadcast %325 : f32 to vector<16x16xf32>
    %327 = vector.broadcast %cst_118 : f32 to vector<16x16xf32>
    %328 = arith.select %324, %326, %327 : vector<16x16xi1>, vector<16x16xf32>
    %329 = arith.addf %322, %328 : vector<16x16xf32>
    %c10_i32_119 = arith.constant 10 : i32
    %330 = vector.broadcast %c10_i32_119 : i32 to vector<16x16xi32>
    %331 = arith.cmpi eq, %30, %330 : vector<16x16xi32>
    %c10_120 = arith.constant 10 : index
    %c1_121 = arith.constant 1 : index
    %332 = memref.load %arg1[%c10_120, %c1_121] : memref<32x8xf32, #tpu.memory_space<smem>>
    %cst_122 = arith.constant 0.000000e+00 : f32
    %333 = vector.broadcast %332 : f32 to vector<16x16xf32>
    %334 = vector.broadcast %cst_122 : f32 to vector<16x16xf32>
    %335 = arith.select %331, %333, %334 : vector<16x16xi1>, vector<16x16xf32>
    %336 = arith.addf %329, %335 : vector<16x16xf32>
    %c11_i32_123 = arith.constant 11 : i32
    %337 = vector.broadcast %c11_i32_123 : i32 to vector<16x16xi32>
    %338 = arith.cmpi eq, %30, %337 : vector<16x16xi32>
    %c11_124 = arith.constant 11 : index
    %c1_125 = arith.constant 1 : index
    %339 = memref.load %arg1[%c11_124, %c1_125] : memref<32x8xf32, #tpu.memory_space<smem>>
    %cst_126 = arith.constant 0.000000e+00 : f32
    %340 = vector.broadcast %339 : f32 to vector<16x16xf32>
    %341 = vector.broadcast %cst_126 : f32 to vector<16x16xf32>
    %342 = arith.select %338, %340, %341 : vector<16x16xi1>, vector<16x16xf32>
    %343 = arith.addf %336, %342 : vector<16x16xf32>
    %c12_i32_127 = arith.constant 12 : i32
    %344 = vector.broadcast %c12_i32_127 : i32 to vector<16x16xi32>
    %345 = arith.cmpi eq, %30, %344 : vector<16x16xi32>
    %c12_128 = arith.constant 12 : index
    %c1_129 = arith.constant 1 : index
    %346 = memref.load %arg1[%c12_128, %c1_129] : memref<32x8xf32, #tpu.memory_space<smem>>
    %cst_130 = arith.constant 0.000000e+00 : f32
    %347 = vector.broadcast %346 : f32 to vector<16x16xf32>
    %348 = vector.broadcast %cst_130 : f32 to vector<16x16xf32>
    %349 = arith.select %345, %347, %348 : vector<16x16xi1>, vector<16x16xf32>
    %350 = arith.addf %343, %349 : vector<16x16xf32>
    %c13_i32_131 = arith.constant 13 : i32
    %351 = vector.broadcast %c13_i32_131 : i32 to vector<16x16xi32>
    %352 = arith.cmpi eq, %30, %351 : vector<16x16xi32>
    %c13_132 = arith.constant 13 : index
    %c1_133 = arith.constant 1 : index
    %353 = memref.load %arg1[%c13_132, %c1_133] : memref<32x8xf32, #tpu.memory_space<smem>>
    %cst_134 = arith.constant 0.000000e+00 : f32
    %354 = vector.broadcast %353 : f32 to vector<16x16xf32>
    %355 = vector.broadcast %cst_134 : f32 to vector<16x16xf32>
    %356 = arith.select %352, %354, %355 : vector<16x16xi1>, vector<16x16xf32>
    %357 = arith.addf %350, %356 : vector<16x16xf32>
    %c14_i32_135 = arith.constant 14 : i32
    %358 = vector.broadcast %c14_i32_135 : i32 to vector<16x16xi32>
    %359 = arith.cmpi eq, %30, %358 : vector<16x16xi32>
    %c14_136 = arith.constant 14 : index
    %c1_137 = arith.constant 1 : index
    %360 = memref.load %arg1[%c14_136, %c1_137] : memref<32x8xf32, #tpu.memory_space<smem>>
    %cst_138 = arith.constant 0.000000e+00 : f32
    %361 = vector.broadcast %360 : f32 to vector<16x16xf32>
    %362 = vector.broadcast %cst_138 : f32 to vector<16x16xf32>
    %363 = arith.select %359, %361, %362 : vector<16x16xi1>, vector<16x16xf32>
    %364 = arith.addf %357, %363 : vector<16x16xf32>
    %c15_i32_139 = arith.constant 15 : i32
    %365 = vector.broadcast %c15_i32_139 : i32 to vector<16x16xi32>
    %366 = arith.cmpi eq, %30, %365 : vector<16x16xi32>
    %c15_140 = arith.constant 15 : index
    %c1_141 = arith.constant 1 : index
    %367 = memref.load %arg1[%c15_140, %c1_141] : memref<32x8xf32, #tpu.memory_space<smem>>
    %cst_142 = arith.constant 0.000000e+00 : f32
    %368 = vector.broadcast %367 : f32 to vector<16x16xf32>
    %369 = vector.broadcast %cst_142 : f32 to vector<16x16xf32>
    %370 = arith.select %366, %368, %369 : vector<16x16xi1>, vector<16x16xf32>
    %371 = arith.addf %364, %370 : vector<16x16xf32>
    %c16_i32_143 = arith.constant 16 : i32
    %372 = vector.broadcast %c16_i32_143 : i32 to vector<16x16xi32>
    %373 = arith.cmpi eq, %30, %372 : vector<16x16xi32>
    %c16_144 = arith.constant 16 : index
    %c1_145 = arith.constant 1 : index
    %374 = memref.load %arg1[%c16_144, %c1_145] : memref<32x8xf32, #tpu.memory_space<smem>>
    %cst_146 = arith.constant 0.000000e+00 : f32
    %375 = vector.broadcast %374 : f32 to vector<16x16xf32>
    %376 = vector.broadcast %cst_146 : f32 to vector<16x16xf32>
    %377 = arith.select %373, %375, %376 : vector<16x16xi1>, vector<16x16xf32>
    %378 = arith.addf %371, %377 : vector<16x16xf32>
    %c17_i32_147 = arith.constant 17 : i32
    %379 = vector.broadcast %c17_i32_147 : i32 to vector<16x16xi32>
    %380 = arith.cmpi eq, %30, %379 : vector<16x16xi32>
    %c17_148 = arith.constant 17 : index
    %c1_149 = arith.constant 1 : index
    %381 = memref.load %arg1[%c17_148, %c1_149] : memref<32x8xf32, #tpu.memory_space<smem>>
    %cst_150 = arith.constant 0.000000e+00 : f32
    %382 = vector.broadcast %381 : f32 to vector<16x16xf32>
    %383 = vector.broadcast %cst_150 : f32 to vector<16x16xf32>
    %384 = arith.select %380, %382, %383 : vector<16x16xi1>, vector<16x16xf32>
    %385 = arith.addf %378, %384 : vector<16x16xf32>
    %c18_i32_151 = arith.constant 18 : i32
    %386 = vector.broadcast %c18_i32_151 : i32 to vector<16x16xi32>
    %387 = arith.cmpi eq, %30, %386 : vector<16x16xi32>
    %c18_152 = arith.constant 18 : index
    %c1_153 = arith.constant 1 : index
    %388 = memref.load %arg1[%c18_152, %c1_153] : memref<32x8xf32, #tpu.memory_space<smem>>
    %cst_154 = arith.constant 0.000000e+00 : f32
    %389 = vector.broadcast %388 : f32 to vector<16x16xf32>
    %390 = vector.broadcast %cst_154 : f32 to vector<16x16xf32>
    %391 = arith.select %387, %389, %390 : vector<16x16xi1>, vector<16x16xf32>
    %392 = arith.addf %385, %391 : vector<16x16xf32>
    %c19_i32_155 = arith.constant 19 : i32
    %393 = vector.broadcast %c19_i32_155 : i32 to vector<16x16xi32>
    %394 = arith.cmpi eq, %30, %393 : vector<16x16xi32>
    %c19_156 = arith.constant 19 : index
    %c1_157 = arith.constant 1 : index
    %395 = memref.load %arg1[%c19_156, %c1_157] : memref<32x8xf32, #tpu.memory_space<smem>>
    %cst_158 = arith.constant 0.000000e+00 : f32
    %396 = vector.broadcast %395 : f32 to vector<16x16xf32>
    %397 = vector.broadcast %cst_158 : f32 to vector<16x16xf32>
    %398 = arith.select %394, %396, %397 : vector<16x16xi1>, vector<16x16xf32>
    %399 = arith.addf %392, %398 : vector<16x16xf32>
    %c20_i32_159 = arith.constant 20 : i32
    %400 = vector.broadcast %c20_i32_159 : i32 to vector<16x16xi32>
    %401 = arith.cmpi eq, %30, %400 : vector<16x16xi32>
    %c20_160 = arith.constant 20 : index
    %c1_161 = arith.constant 1 : index
    %402 = memref.load %arg1[%c20_160, %c1_161] : memref<32x8xf32, #tpu.memory_space<smem>>
    %cst_162 = arith.constant 0.000000e+00 : f32
    %403 = vector.broadcast %402 : f32 to vector<16x16xf32>
    %404 = vector.broadcast %cst_162 : f32 to vector<16x16xf32>
    %405 = arith.select %401, %403, %404 : vector<16x16xi1>, vector<16x16xf32>
    %406 = arith.addf %399, %405 : vector<16x16xf32>
    %c21_i32_163 = arith.constant 21 : i32
    %407 = vector.broadcast %c21_i32_163 : i32 to vector<16x16xi32>
    %408 = arith.cmpi eq, %30, %407 : vector<16x16xi32>
    %c21_164 = arith.constant 21 : index
    %c1_165 = arith.constant 1 : index
    %409 = memref.load %arg1[%c21_164, %c1_165] : memref<32x8xf32, #tpu.memory_space<smem>>
    %cst_166 = arith.constant 0.000000e+00 : f32
    %410 = vector.broadcast %409 : f32 to vector<16x16xf32>
    %411 = vector.broadcast %cst_166 : f32 to vector<16x16xf32>
    %412 = arith.select %408, %410, %411 : vector<16x16xi1>, vector<16x16xf32>
    %413 = arith.addf %406, %412 : vector<16x16xf32>
    %c22_i32_167 = arith.constant 22 : i32
    %414 = vector.broadcast %c22_i32_167 : i32 to vector<16x16xi32>
    %415 = arith.cmpi eq, %30, %414 : vector<16x16xi32>
    %c22_168 = arith.constant 22 : index
    %c1_169 = arith.constant 1 : index
    %416 = memref.load %arg1[%c22_168, %c1_169] : memref<32x8xf32, #tpu.memory_space<smem>>
    %cst_170 = arith.constant 0.000000e+00 : f32
    %417 = vector.broadcast %416 : f32 to vector<16x16xf32>
    %418 = vector.broadcast %cst_170 : f32 to vector<16x16xf32>
    %419 = arith.select %415, %417, %418 : vector<16x16xi1>, vector<16x16xf32>
    %420 = arith.addf %413, %419 : vector<16x16xf32>
    %c23_i32_171 = arith.constant 23 : i32
    %421 = vector.broadcast %c23_i32_171 : i32 to vector<16x16xi32>
    %422 = arith.cmpi eq, %30, %421 : vector<16x16xi32>
    %c23_172 = arith.constant 23 : index
    %c1_173 = arith.constant 1 : index
    %423 = memref.load %arg1[%c23_172, %c1_173] : memref<32x8xf32, #tpu.memory_space<smem>>
    %cst_174 = arith.constant 0.000000e+00 : f32
    %424 = vector.broadcast %423 : f32 to vector<16x16xf32>
    %425 = vector.broadcast %cst_174 : f32 to vector<16x16xf32>
    %426 = arith.select %422, %424, %425 : vector<16x16xi1>, vector<16x16xf32>
    %427 = arith.addf %420, %426 : vector<16x16xf32>
    %c24_i32_175 = arith.constant 24 : i32
    %428 = vector.broadcast %c24_i32_175 : i32 to vector<16x16xi32>
    %429 = arith.cmpi eq, %30, %428 : vector<16x16xi32>
    %c24_176 = arith.constant 24 : index
    %c1_177 = arith.constant 1 : index
    %430 = memref.load %arg1[%c24_176, %c1_177] : memref<32x8xf32, #tpu.memory_space<smem>>
    %cst_178 = arith.constant 0.000000e+00 : f32
    %431 = vector.broadcast %430 : f32 to vector<16x16xf32>
    %432 = vector.broadcast %cst_178 : f32 to vector<16x16xf32>
    %433 = arith.select %429, %431, %432 : vector<16x16xi1>, vector<16x16xf32>
    %434 = arith.addf %427, %433 : vector<16x16xf32>
    %c25_i32_179 = arith.constant 25 : i32
    %435 = vector.broadcast %c25_i32_179 : i32 to vector<16x16xi32>
    %436 = arith.cmpi eq, %30, %435 : vector<16x16xi32>
    %c25_180 = arith.constant 25 : index
    %c1_181 = arith.constant 1 : index
    %437 = memref.load %arg1[%c25_180, %c1_181] : memref<32x8xf32, #tpu.memory_space<smem>>
    %cst_182 = arith.constant 0.000000e+00 : f32
    %438 = vector.broadcast %437 : f32 to vector<16x16xf32>
    %439 = vector.broadcast %cst_182 : f32 to vector<16x16xf32>
    %440 = arith.select %436, %438, %439 : vector<16x16xi1>, vector<16x16xf32>
    %441 = arith.addf %434, %440 : vector<16x16xf32>
    %c26_i32_183 = arith.constant 26 : i32
    %442 = vector.broadcast %c26_i32_183 : i32 to vector<16x16xi32>
    %443 = arith.cmpi eq, %30, %442 : vector<16x16xi32>
    %c26_184 = arith.constant 26 : index
    %c1_185 = arith.constant 1 : index
    %444 = memref.load %arg1[%c26_184, %c1_185] : memref<32x8xf32, #tpu.memory_space<smem>>
    %cst_186 = arith.constant 0.000000e+00 : f32
    %445 = vector.broadcast %444 : f32 to vector<16x16xf32>
    %446 = vector.broadcast %cst_186 : f32 to vector<16x16xf32>
    %447 = arith.select %443, %445, %446 : vector<16x16xi1>, vector<16x16xf32>
    %448 = arith.addf %441, %447 : vector<16x16xf32>
    %c27_i32_187 = arith.constant 27 : i32
    %449 = vector.broadcast %c27_i32_187 : i32 to vector<16x16xi32>
    %450 = arith.cmpi eq, %30, %449 : vector<16x16xi32>
    %c27_188 = arith.constant 27 : index
    %c1_189 = arith.constant 1 : index
    %451 = memref.load %arg1[%c27_188, %c1_189] : memref<32x8xf32, #tpu.memory_space<smem>>
    %cst_190 = arith.constant 0.000000e+00 : f32
    %452 = vector.broadcast %451 : f32 to vector<16x16xf32>
    %453 = vector.broadcast %cst_190 : f32 to vector<16x16xf32>
    %454 = arith.select %450, %452, %453 : vector<16x16xi1>, vector<16x16xf32>
    %455 = arith.addf %448, %454 : vector<16x16xf32>
    %c28_i32_191 = arith.constant 28 : i32
    %456 = vector.broadcast %c28_i32_191 : i32 to vector<16x16xi32>
    %457 = arith.cmpi eq, %30, %456 : vector<16x16xi32>
    %c28_192 = arith.constant 28 : index
    %c1_193 = arith.constant 1 : index
    %458 = memref.load %arg1[%c28_192, %c1_193] : memref<32x8xf32, #tpu.memory_space<smem>>
    %cst_194 = arith.constant 0.000000e+00 : f32
    %459 = vector.broadcast %458 : f32 to vector<16x16xf32>
    %460 = vector.broadcast %cst_194 : f32 to vector<16x16xf32>
    %461 = arith.select %457, %459, %460 : vector<16x16xi1>, vector<16x16xf32>
    %462 = arith.addf %455, %461 : vector<16x16xf32>
    %c29_i32_195 = arith.constant 29 : i32
    %463 = vector.broadcast %c29_i32_195 : i32 to vector<16x16xi32>
    %464 = arith.cmpi eq, %30, %463 : vector<16x16xi32>
    %c29_196 = arith.constant 29 : index
    %c1_197 = arith.constant 1 : index
    %465 = memref.load %arg1[%c29_196, %c1_197] : memref<32x8xf32, #tpu.memory_space<smem>>
    %cst_198 = arith.constant 0.000000e+00 : f32
    %466 = vector.broadcast %465 : f32 to vector<16x16xf32>
    %467 = vector.broadcast %cst_198 : f32 to vector<16x16xf32>
    %468 = arith.select %464, %466, %467 : vector<16x16xi1>, vector<16x16xf32>
    %469 = arith.addf %462, %468 : vector<16x16xf32>
    %c30_i32_199 = arith.constant 30 : i32
    %470 = vector.broadcast %c30_i32_199 : i32 to vector<16x16xi32>
    %471 = arith.cmpi eq, %30, %470 : vector<16x16xi32>
    %c30_200 = arith.constant 30 : index
    %c1_201 = arith.constant 1 : index
    %472 = memref.load %arg1[%c30_200, %c1_201] : memref<32x8xf32, #tpu.memory_space<smem>>
    %cst_202 = arith.constant 0.000000e+00 : f32
    %473 = vector.broadcast %472 : f32 to vector<16x16xf32>
    %474 = vector.broadcast %cst_202 : f32 to vector<16x16xf32>
    %475 = arith.select %471, %473, %474 : vector<16x16xi1>, vector<16x16xf32>
    %476 = arith.addf %469, %475 : vector<16x16xf32>
    %c31_i32_203 = arith.constant 31 : i32
    %477 = vector.broadcast %c31_i32_203 : i32 to vector<16x16xi32>
    %478 = arith.cmpi eq, %30, %477 : vector<16x16xi32>
    %c31_204 = arith.constant 31 : index
    %c1_205 = arith.constant 1 : index
    %479 = memref.load %arg1[%c31_204, %c1_205] : memref<32x8xf32, #tpu.memory_space<smem>>
    %cst_206 = arith.constant 0.000000e+00 : f32
    %480 = vector.broadcast %479 : f32 to vector<16x16xf32>
    %481 = vector.broadcast %cst_206 : f32 to vector<16x16xf32>
    %482 = arith.select %478, %480, %481 : vector<16x16xi1>, vector<16x16xf32>
    %483 = arith.addf %476, %482 : vector<16x16xf32>
    %c1_207 = arith.constant 1 : index
    %c0_208 = arith.constant 0 : index
    %c0_209 = arith.constant 0 : index
    %484 = vector.load %arg2[%c1_207, %c0_208, %c0_209] : memref<8x16x16xf32, #tpu.memory_space<vmem>>, vector<1x16x16xf32>
    %485 = vector.shape_cast %484 : vector<1x16x16xf32> to vector<16x16xf32>
    %486 = vector.shape_cast %483 : vector<16x16xf32> to vector<1x16x16xf32>
    tpu.vector_store %arg2[%c1_207, %c0_208, %c0_209], %486 {strides = array<i32>} : memref<8x16x16xf32, #tpu.memory_space<vmem>>, vector<1x16x16xf32>,
    %cst_210 = arith.constant 0.000000e+00 : f32
    %487 = vector.broadcast %cst_210 : f32 to vector<16x16xf32>
    %c0_i32_211 = arith.constant 0 : i32
    %488 = vector.broadcast %c0_i32_211 : i32 to vector<16x16xi32>
    %489 = arith.cmpi eq, %30, %488 : vector<16x16xi32>
    %c0_212 = arith.constant 0 : index
    %c2_213 = arith.constant 2 : index
    %490 = memref.load %arg1[%c0_212, %c2_213] : memref<32x8xf32, #tpu.memory_space<smem>>
    %cst_214 = arith.constant 0.000000e+00 : f32
    %491 = vector.broadcast %490 : f32 to vector<16x16xf32>
    %492 = vector.broadcast %cst_214 : f32 to vector<16x16xf32>
    %493 = arith.select %489, %491, %492 : vector<16x16xi1>, vector<16x16xf32>
    %494 = arith.addf %487, %493 : vector<16x16xf32>
    %c1_i32_215 = arith.constant 1 : i32
    %495 = vector.broadcast %c1_i32_215 : i32 to vector<16x16xi32>
    %496 = arith.cmpi eq, %30, %495 : vector<16x16xi32>
    %c1_216 = arith.constant 1 : index
    %c2_217 = arith.constant 2 : index
    %497 = memref.load %arg1[%c1_216, %c2_217] : memref<32x8xf32, #tpu.memory_space<smem>>
    %cst_218 = arith.constant 0.000000e+00 : f32
    %498 = vector.broadcast %497 : f32 to vector<16x16xf32>
    %499 = vector.broadcast %cst_218 : f32 to vector<16x16xf32>
    %500 = arith.select %496, %498, %499 : vector<16x16xi1>, vector<16x16xf32>
    %501 = arith.addf %494, %500 : vector<16x16xf32>
    %c2_i32_219 = arith.constant 2 : i32
    %502 = vector.broadcast %c2_i32_219 : i32 to vector<16x16xi32>
    %503 = arith.cmpi eq, %30, %502 : vector<16x16xi32>
    %c2_220 = arith.constant 2 : index
    %c2_221 = arith.constant 2 : index
    %504 = memref.load %arg1[%c2_220, %c2_221] : memref<32x8xf32, #tpu.memory_space<smem>>
    %cst_222 = arith.constant 0.000000e+00 : f32
    %505 = vector.broadcast %504 : f32 to vector<16x16xf32>
    %506 = vector.broadcast %cst_222 : f32 to vector<16x16xf32>
    %507 = arith.select %503, %505, %506 : vector<16x16xi1>, vector<16x16xf32>
    %508 = arith.addf %501, %507 : vector<16x16xf32>
    %c3_i32_223 = arith.constant 3 : i32
    %509 = vector.broadcast %c3_i32_223 : i32 to vector<16x16xi32>
    %510 = arith.cmpi eq, %30, %509 : vector<16x16xi32>
    %c3_224 = arith.constant 3 : index
    %c2_225 = arith.constant 2 : index
    %511 = memref.load %arg1[%c3_224, %c2_225] : memref<32x8xf32, #tpu.memory_space<smem>>
    %cst_226 = arith.constant 0.000000e+00 : f32
    %512 = vector.broadcast %511 : f32 to vector<16x16xf32>
    %513 = vector.broadcast %cst_226 : f32 to vector<16x16xf32>
    %514 = arith.select %510, %512, %513 : vector<16x16xi1>, vector<16x16xf32>
    %515 = arith.addf %508, %514 : vector<16x16xf32>
    %c4_i32_227 = arith.constant 4 : i32
    %516 = vector.broadcast %c4_i32_227 : i32 to vector<16x16xi32>
    %517 = arith.cmpi eq, %30, %516 : vector<16x16xi32>
    %c4_228 = arith.constant 4 : index
    %c2_229 = arith.constant 2 : index
    %518 = memref.load %arg1[%c4_228, %c2_229] : memref<32x8xf32, #tpu.memory_space<smem>>
    %cst_230 = arith.constant 0.000000e+00 : f32
    %519 = vector.broadcast %518 : f32 to vector<16x16xf32>
    %520 = vector.broadcast %cst_230 : f32 to vector<16x16xf32>
    %521 = arith.select %517, %519, %520 : vector<16x16xi1>, vector<16x16xf32>
    %522 = arith.addf %515, %521 : vector<16x16xf32>
    %c5_i32_231 = arith.constant 5 : i32
    %523 = vector.broadcast %c5_i32_231 : i32 to vector<16x16xi32>
    %524 = arith.cmpi eq, %30, %523 : vector<16x16xi32>
    %c5_232 = arith.constant 5 : index
    %c2_233 = arith.constant 2 : index
    %525 = memref.load %arg1[%c5_232, %c2_233] : memref<32x8xf32, #tpu.memory_space<smem>>
    %cst_234 = arith.constant 0.000000e+00 : f32
    %526 = vector.broadcast %525 : f32 to vector<16x16xf32>
    %527 = vector.broadcast %cst_234 : f32 to vector<16x16xf32>
    %528 = arith.select %524, %526, %527 : vector<16x16xi1>, vector<16x16xf32>
    %529 = arith.addf %522, %528 : vector<16x16xf32>
    %c6_i32_235 = arith.constant 6 : i32
    %530 = vector.broadcast %c6_i32_235 : i32 to vector<16x16xi32>
    %531 = arith.cmpi eq, %30, %530 : vector<16x16xi32>
    %c6_236 = arith.constant 6 : index
    %c2_237 = arith.constant 2 : index
    %532 = memref.load %arg1[%c6_236, %c2_237] : memref<32x8xf32, #tpu.memory_space<smem>>
    %cst_238 = arith.constant 0.000000e+00 : f32
    %533 = vector.broadcast %532 : f32 to vector<16x16xf32>
    %534 = vector.broadcast %cst_238 : f32 to vector<16x16xf32>
    %535 = arith.select %531, %533, %534 : vector<16x16xi1>, vector<16x16xf32>
    %536 = arith.addf %529, %535 : vector<16x16xf32>
    %c7_i32_239 = arith.constant 7 : i32
    %537 = vector.broadcast %c7_i32_239 : i32 to vector<16x16xi32>
    %538 = arith.cmpi eq, %30, %537 : vector<16x16xi32>
    %c7_240 = arith.constant 7 : index
    %c2_241 = arith.constant 2 : index
    %539 = memref.load %arg1[%c7_240, %c2_241] : memref<32x8xf32, #tpu.memory_space<smem>>
    %cst_242 = arith.constant 0.000000e+00 : f32
    %540 = vector.broadcast %539 : f32 to vector<16x16xf32>
    %541 = vector.broadcast %cst_242 : f32 to vector<16x16xf32>
    %542 = arith.select %538, %540, %541 : vector<16x16xi1>, vector<16x16xf32>
    %543 = arith.addf %536, %542 : vector<16x16xf32>
    %c8_i32_243 = arith.constant 8 : i32
    %544 = vector.broadcast %c8_i32_243 : i32 to vector<16x16xi32>
    %545 = arith.cmpi eq, %30, %544 : vector<16x16xi32>
    %c8_244 = arith.constant 8 : index
    %c2_245 = arith.constant 2 : index
    %546 = memref.load %arg1[%c8_244, %c2_245] : memref<32x8xf32, #tpu.memory_space<smem>>
    %cst_246 = arith.constant 0.000000e+00 : f32
    %547 = vector.broadcast %546 : f32 to vector<16x16xf32>
    %548 = vector.broadcast %cst_246 : f32 to vector<16x16xf32>
    %549 = arith.select %545, %547, %548 : vector<16x16xi1>, vector<16x16xf32>
    %550 = arith.addf %543, %549 : vector<16x16xf32>
    %c9_i32_247 = arith.constant 9 : i32
    %551 = vector.broadcast %c9_i32_247 : i32 to vector<16x16xi32>
    %552 = arith.cmpi eq, %30, %551 : vector<16x16xi32>
    %c9_248 = arith.constant 9 : index
    %c2_249 = arith.constant 2 : index
    %553 = memref.load %arg1[%c9_248, %c2_249] : memref<32x8xf32, #tpu.memory_space<smem>>
    %cst_250 = arith.constant 0.000000e+00 : f32
    %554 = vector.broadcast %553 : f32 to vector<16x16xf32>
    %555 = vector.broadcast %cst_250 : f32 to vector<16x16xf32>
    %556 = arith.select %552, %554, %555 : vector<16x16xi1>, vector<16x16xf32>
    %557 = arith.addf %550, %556 : vector<16x16xf32>
    %c10_i32_251 = arith.constant 10 : i32
    %558 = vector.broadcast %c10_i32_251 : i32 to vector<16x16xi32>
    %559 = arith.cmpi eq, %30, %558 : vector<16x16xi32>
    %c10_252 = arith.constant 10 : index
    %c2_253 = arith.constant 2 : index
    %560 = memref.load %arg1[%c10_252, %c2_253] : memref<32x8xf32, #tpu.memory_space<smem>>
    %cst_254 = arith.constant 0.000000e+00 : f32
    %561 = vector.broadcast %560 : f32 to vector<16x16xf32>
    %562 = vector.broadcast %cst_254 : f32 to vector<16x16xf32>
    %563 = arith.select %559, %561, %562 : vector<16x16xi1>, vector<16x16xf32>
    %564 = arith.addf %557, %563 : vector<16x16xf32>
    %c11_i32_255 = arith.constant 11 : i32
    %565 = vector.broadcast %c11_i32_255 : i32 to vector<16x16xi32>
    %566 = arith.cmpi eq, %30, %565 : vector<16x16xi32>
    %c11_256 = arith.constant 11 : index
    %c2_257 = arith.constant 2 : index
    %567 = memref.load %arg1[%c11_256, %c2_257] : memref<32x8xf32, #tpu.memory_space<smem>>
    %cst_258 = arith.constant 0.000000e+00 : f32
    %568 = vector.broadcast %567 : f32 to vector<16x16xf32>
    %569 = vector.broadcast %cst_258 : f32 to vector<16x16xf32>
    %570 = arith.select %566, %568, %569 : vector<16x16xi1>, vector<16x16xf32>
    %571 = arith.addf %564, %570 : vector<16x16xf32>
    %c12_i32_259 = arith.constant 12 : i32
    %572 = vector.broadcast %c12_i32_259 : i32 to vector<16x16xi32>
    %573 = arith.cmpi eq, %30, %572 : vector<16x16xi32>
    %c12_260 = arith.constant 12 : index
    %c2_261 = arith.constant 2 : index
    %574 = memref.load %arg1[%c12_260, %c2_261] : memref<32x8xf32, #tpu.memory_space<smem>>
    %cst_262 = arith.constant 0.000000e+00 : f32
    %575 = vector.broadcast %574 : f32 to vector<16x16xf32>
    %576 = vector.broadcast %cst_262 : f32 to vector<16x16xf32>
    %577 = arith.select %573, %575, %576 : vector<16x16xi1>, vector<16x16xf32>
    %578 = arith.addf %571, %577 : vector<16x16xf32>
    %c13_i32_263 = arith.constant 13 : i32
    %579 = vector.broadcast %c13_i32_263 : i32 to vector<16x16xi32>
    %580 = arith.cmpi eq, %30, %579 : vector<16x16xi32>
    %c13_264 = arith.constant 13 : index
    %c2_265 = arith.constant 2 : index
    %581 = memref.load %arg1[%c13_264, %c2_265] : memref<32x8xf32, #tpu.memory_space<smem>>
    %cst_266 = arith.constant 0.000000e+00 : f32
    %582 = vector.broadcast %581 : f32 to vector<16x16xf32>
    %583 = vector.broadcast %cst_266 : f32 to vector<16x16xf32>
    %584 = arith.select %580, %582, %583 : vector<16x16xi1>, vector<16x16xf32>
    %585 = arith.addf %578, %584 : vector<16x16xf32>
    %c14_i32_267 = arith.constant 14 : i32
    %586 = vector.broadcast %c14_i32_267 : i32 to vector<16x16xi32>
    %587 = arith.cmpi eq, %30, %586 : vector<16x16xi32>
    %c14_268 = arith.constant 14 : index
    %c2_269 = arith.constant 2 : index
    %588 = memref.load %arg1[%c14_268, %c2_269] : memref<32x8xf32, #tpu.memory_space<smem>>
    %cst_270 = arith.constant 0.000000e+00 : f32
    %589 = vector.broadcast %588 : f32 to vector<16x16xf32>
    %590 = vector.broadcast %cst_270 : f32 to vector<16x16xf32>
    %591 = arith.select %587, %589, %590 : vector<16x16xi1>, vector<16x16xf32>
    %592 = arith.addf %585, %591 : vector<16x16xf32>
    %c15_i32_271 = arith.constant 15 : i32
    %593 = vector.broadcast %c15_i32_271 : i32 to vector<16x16xi32>
    %594 = arith.cmpi eq, %30, %593 : vector<16x16xi32>
    %c15_272 = arith.constant 15 : index
    %c2_273 = arith.constant 2 : index
    %595 = memref.load %arg1[%c15_272, %c2_273] : memref<32x8xf32, #tpu.memory_space<smem>>
    %cst_274 = arith.constant 0.000000e+00 : f32
    %596 = vector.broadcast %595 : f32 to vector<16x16xf32>
    %597 = vector.broadcast %cst_274 : f32 to vector<16x16xf32>
    %598 = arith.select %594, %596, %597 : vector<16x16xi1>, vector<16x16xf32>
    %599 = arith.addf %592, %598 : vector<16x16xf32>
    %c16_i32_275 = arith.constant 16 : i32
    %600 = vector.broadcast %c16_i32_275 : i32 to vector<16x16xi32>
    %601 = arith.cmpi eq, %30, %600 : vector<16x16xi32>
    %c16_276 = arith.constant 16 : index
    %c2_277 = arith.constant 2 : index
    %602 = memref.load %arg1[%c16_276, %c2_277] : memref<32x8xf32, #tpu.memory_space<smem>>
    %cst_278 = arith.constant 0.000000e+00 : f32
    %603 = vector.broadcast %602 : f32 to vector<16x16xf32>
    %604 = vector.broadcast %cst_278 : f32 to vector<16x16xf32>
    %605 = arith.select %601, %603, %604 : vector<16x16xi1>, vector<16x16xf32>
    %606 = arith.addf %599, %605 : vector<16x16xf32>
    %c17_i32_279 = arith.constant 17 : i32
    %607 = vector.broadcast %c17_i32_279 : i32 to vector<16x16xi32>
    %608 = arith.cmpi eq, %30, %607 : vector<16x16xi32>
    %c17_280 = arith.constant 17 : index
    %c2_281 = arith.constant 2 : index
    %609 = memref.load %arg1[%c17_280, %c2_281] : memref<32x8xf32, #tpu.memory_space<smem>>
    %cst_282 = arith.constant 0.000000e+00 : f32
    %610 = vector.broadcast %609 : f32 to vector<16x16xf32>
    %611 = vector.broadcast %cst_282 : f32 to vector<16x16xf32>
    %612 = arith.select %608, %610, %611 : vector<16x16xi1>, vector<16x16xf32>
    %613 = arith.addf %606, %612 : vector<16x16xf32>
    %c18_i32_283 = arith.constant 18 : i32
    %614 = vector.broadcast %c18_i32_283 : i32 to vector<16x16xi32>
    %615 = arith.cmpi eq, %30, %614 : vector<16x16xi32>
    %c18_284 = arith.constant 18 : index
    %c2_285 = arith.constant 2 : index
    %616 = memref.load %arg1[%c18_284, %c2_285] : memref<32x8xf32, #tpu.memory_space<smem>>
    %cst_286 = arith.constant 0.000000e+00 : f32
    %617 = vector.broadcast %616 : f32 to vector<16x16xf32>
    %618 = vector.broadcast %cst_286 : f32 to vector<16x16xf32>
    %619 = arith.select %615, %617, %618 : vector<16x16xi1>, vector<16x16xf32>
    %620 = arith.addf %613, %619 : vector<16x16xf32>
    %c19_i32_287 = arith.constant 19 : i32
    %621 = vector.broadcast %c19_i32_287 : i32 to vector<16x16xi32>
    %622 = arith.cmpi eq, %30, %621 : vector<16x16xi32>
    %c19_288 = arith.constant 19 : index
    %c2_289 = arith.constant 2 : index
    %623 = memref.load %arg1[%c19_288, %c2_289] : memref<32x8xf32, #tpu.memory_space<smem>>
    %cst_290 = arith.constant 0.000000e+00 : f32
    %624 = vector.broadcast %623 : f32 to vector<16x16xf32>
    %625 = vector.broadcast %cst_290 : f32 to vector<16x16xf32>
    %626 = arith.select %622, %624, %625 : vector<16x16xi1>, vector<16x16xf32>
    %627 = arith.addf %620, %626 : vector<16x16xf32>
    %c20_i32_291 = arith.constant 20 : i32
    %628 = vector.broadcast %c20_i32_291 : i32 to vector<16x16xi32>
    %629 = arith.cmpi eq, %30, %628 : vector<16x16xi32>
    %c20_292 = arith.constant 20 : index
    %c2_293 = arith.constant 2 : index
    %630 = memref.load %arg1[%c20_292, %c2_293] : memref<32x8xf32, #tpu.memory_space<smem>>
    %cst_294 = arith.constant 0.000000e+00 : f32
    %631 = vector.broadcast %630 : f32 to vector<16x16xf32>
    %632 = vector.broadcast %cst_294 : f32 to vector<16x16xf32>
    %633 = arith.select %629, %631, %632 : vector<16x16xi1>, vector<16x16xf32>
    %634 = arith.addf %627, %633 : vector<16x16xf32>
    %c21_i32_295 = arith.constant 21 : i32
    %635 = vector.broadcast %c21_i32_295 : i32 to vector<16x16xi32>
    %636 = arith.cmpi eq, %30, %635 : vector<16x16xi32>
    %c21_296 = arith.constant 21 : index
    %c2_297 = arith.constant 2 : index
    %637 = memref.load %arg1[%c21_296, %c2_297] : memref<32x8xf32, #tpu.memory_space<smem>>
    %cst_298 = arith.constant 0.000000e+00 : f32
    %638 = vector.broadcast %637 : f32 to vector<16x16xf32>
    %639 = vector.broadcast %cst_298 : f32 to vector<16x16xf32>
    %640 = arith.select %636, %638, %639 : vector<16x16xi1>, vector<16x16xf32>
    %641 = arith.addf %634, %640 : vector<16x16xf32>
    %c22_i32_299 = arith.constant 22 : i32
    %642 = vector.broadcast %c22_i32_299 : i32 to vector<16x16xi32>
    %643 = arith.cmpi eq, %30, %642 : vector<16x16xi32>
    %c22_300 = arith.constant 22 : index
    %c2_301 = arith.constant 2 : index
    %644 = memref.load %arg1[%c22_300, %c2_301] : memref<32x8xf32, #tpu.memory_space<smem>>
    %cst_302 = arith.constant 0.000000e+00 : f32
    %645 = vector.broadcast %644 : f32 to vector<16x16xf32>
    %646 = vector.broadcast %cst_302 : f32 to vector<16x16xf32>
    %647 = arith.select %643, %645, %646 : vector<16x16xi1>, vector<16x16xf32>
    %648 = arith.addf %641, %647 : vector<16x16xf32>
    %c23_i32_303 = arith.constant 23 : i32
    %649 = vector.broadcast %c23_i32_303 : i32 to vector<16x16xi32>
    %650 = arith.cmpi eq, %30, %649 : vector<16x16xi32>
    %c23_304 = arith.constant 23 : index
    %c2_305 = arith.constant 2 : index
    %651 = memref.load %arg1[%c23_304, %c2_305] : memref<32x8xf32, #tpu.memory_space<smem>>
    %cst_306 = arith.constant 0.000000e+00 : f32
    %652 = vector.broadcast %651 : f32 to vector<16x16xf32>
    %653 = vector.broadcast %cst_306 : f32 to vector<16x16xf32>
    %654 = arith.select %650, %652, %653 : vector<16x16xi1>, vector<16x16xf32>
    %655 = arith.addf %648, %654 : vector<16x16xf32>
    %c24_i32_307 = arith.constant 24 : i32
    %656 = vector.broadcast %c24_i32_307 : i32 to vector<16x16xi32>
    %657 = arith.cmpi eq, %30, %656 : vector<16x16xi32>
    %c24_308 = arith.constant 24 : index
    %c2_309 = arith.constant 2 : index
    %658 = memref.load %arg1[%c24_308, %c2_309] : memref<32x8xf32, #tpu.memory_space<smem>>
    %cst_310 = arith.constant 0.000000e+00 : f32
    %659 = vector.broadcast %658 : f32 to vector<16x16xf32>
    %660 = vector.broadcast %cst_310 : f32 to vector<16x16xf32>
    %661 = arith.select %657, %659, %660 : vector<16x16xi1>, vector<16x16xf32>
    %662 = arith.addf %655, %661 : vector<16x16xf32>
    %c25_i32_311 = arith.constant 25 : i32
    %663 = vector.broadcast %c25_i32_311 : i32 to vector<16x16xi32>
    %664 = arith.cmpi eq, %30, %663 : vector<16x16xi32>
    %c25_312 = arith.constant 25 : index
    %c2_313 = arith.constant 2 : index
    %665 = memref.load %arg1[%c25_312, %c2_313] : memref<32x8xf32, #tpu.memory_space<smem>>
    %cst_314 = arith.constant 0.000000e+00 : f32
    %666 = vector.broadcast %665 : f32 to vector<16x16xf32>
    %667 = vector.broadcast %cst_314 : f32 to vector<16x16xf32>
    %668 = arith.select %664, %666, %667 : vector<16x16xi1>, vector<16x16xf32>
    %669 = arith.addf %662, %668 : vector<16x16xf32>
    %c26_i32_315 = arith.constant 26 : i32
    %670 = vector.broadcast %c26_i32_315 : i32 to vector<16x16xi32>
    %671 = arith.cmpi eq, %30, %670 : vector<16x16xi32>
    %c26_316 = arith.constant 26 : index
    %c2_317 = arith.constant 2 : index
    %672 = memref.load %arg1[%c26_316, %c2_317] : memref<32x8xf32, #tpu.memory_space<smem>>
    %cst_318 = arith.constant 0.000000e+00 : f32
    %673 = vector.broadcast %672 : f32 to vector<16x16xf32>
    %674 = vector.broadcast %cst_318 : f32 to vector<16x16xf32>
    %675 = arith.select %671, %673, %674 : vector<16x16xi1>, vector<16x16xf32>
    %676 = arith.addf %669, %675 : vector<16x16xf32>
    %c27_i32_319 = arith.constant 27 : i32
    %677 = vector.broadcast %c27_i32_319 : i32 to vector<16x16xi32>
    %678 = arith.cmpi eq, %30, %677 : vector<16x16xi32>
    %c27_320 = arith.constant 27 : index
    %c2_321 = arith.constant 2 : index
    %679 = memref.load %arg1[%c27_320, %c2_321] : memref<32x8xf32, #tpu.memory_space<smem>>
    %cst_322 = arith.constant 0.000000e+00 : f32
    %680 = vector.broadcast %679 : f32 to vector<16x16xf32>
    %681 = vector.broadcast %cst_322 : f32 to vector<16x16xf32>
    %682 = arith.select %678, %680, %681 : vector<16x16xi1>, vector<16x16xf32>
    %683 = arith.addf %676, %682 : vector<16x16xf32>
    %c28_i32_323 = arith.constant 28 : i32
    %684 = vector.broadcast %c28_i32_323 : i32 to vector<16x16xi32>
    %685 = arith.cmpi eq, %30, %684 : vector<16x16xi32>
    %c28_324 = arith.constant 28 : index
    %c2_325 = arith.constant 2 : index
    %686 = memref.load %arg1[%c28_324, %c2_325] : memref<32x8xf32, #tpu.memory_space<smem>>
    %cst_326 = arith.constant 0.000000e+00 : f32
    %687 = vector.broadcast %686 : f32 to vector<16x16xf32>
    %688 = vector.broadcast %cst_326 : f32 to vector<16x16xf32>
    %689 = arith.select %685, %687, %688 : vector<16x16xi1>, vector<16x16xf32>
    %690 = arith.addf %683, %689 : vector<16x16xf32>
    %c29_i32_327 = arith.constant 29 : i32
    %691 = vector.broadcast %c29_i32_327 : i32 to vector<16x16xi32>
    %692 = arith.cmpi eq, %30, %691 : vector<16x16xi32>
    %c29_328 = arith.constant 29 : index
    %c2_329 = arith.constant 2 : index
    %693 = memref.load %arg1[%c29_328, %c2_329] : memref<32x8xf32, #tpu.memory_space<smem>>
    %cst_330 = arith.constant 0.000000e+00 : f32
    %694 = vector.broadcast %693 : f32 to vector<16x16xf32>
    %695 = vector.broadcast %cst_330 : f32 to vector<16x16xf32>
    %696 = arith.select %692, %694, %695 : vector<16x16xi1>, vector<16x16xf32>
    %697 = arith.addf %690, %696 : vector<16x16xf32>
    %c30_i32_331 = arith.constant 30 : i32
    %698 = vector.broadcast %c30_i32_331 : i32 to vector<16x16xi32>
    %699 = arith.cmpi eq, %30, %698 : vector<16x16xi32>
    %c30_332 = arith.constant 30 : index
    %c2_333 = arith.constant 2 : index
    %700 = memref.load %arg1[%c30_332, %c2_333] : memref<32x8xf32, #tpu.memory_space<smem>>
    %cst_334 = arith.constant 0.000000e+00 : f32
    %701 = vector.broadcast %700 : f32 to vector<16x16xf32>
    %702 = vector.broadcast %cst_334 : f32 to vector<16x16xf32>
    %703 = arith.select %699, %701, %702 : vector<16x16xi1>, vector<16x16xf32>
    %704 = arith.addf %697, %703 : vector<16x16xf32>
    %c31_i32_335 = arith.constant 31 : i32
    %705 = vector.broadcast %c31_i32_335 : i32 to vector<16x16xi32>
    %706 = arith.cmpi eq, %30, %705 : vector<16x16xi32>
    %c31_336 = arith.constant 31 : index
    %c2_337 = arith.constant 2 : index
    %707 = memref.load %arg1[%c31_336, %c2_337] : memref<32x8xf32, #tpu.memory_space<smem>>
    %cst_338 = arith.constant 0.000000e+00 : f32
    %708 = vector.broadcast %707 : f32 to vector<16x16xf32>
    %709 = vector.broadcast %cst_338 : f32 to vector<16x16xf32>
    %710 = arith.select %706, %708, %709 : vector<16x16xi1>, vector<16x16xf32>
    %711 = arith.addf %704, %710 : vector<16x16xf32>
    %c2_339 = arith.constant 2 : index
    %c0_340 = arith.constant 0 : index
    %c0_341 = arith.constant 0 : index
    %712 = vector.load %arg2[%c2_339, %c0_340, %c0_341] : memref<8x16x16xf32, #tpu.memory_space<vmem>>, vector<1x16x16xf32>
    %713 = vector.shape_cast %712 : vector<1x16x16xf32> to vector<16x16xf32>
    %714 = vector.shape_cast %711 : vector<16x16xf32> to vector<1x16x16xf32>
    tpu.vector_store %arg2[%c2_339, %c0_340, %c0_341], %714 {strides = array<i32>} : memref<8x16x16xf32, #tpu.memory_space<vmem>>, vector<1x16x16xf32>,
    %cst_342 = arith.constant 0.000000e+00 : f32
    %715 = vector.broadcast %cst_342 : f32 to vector<16x16xf32>
    %c0_i32_343 = arith.constant 0 : i32
    %716 = vector.broadcast %c0_i32_343 : i32 to vector<16x16xi32>
    %717 = arith.cmpi eq, %30, %716 : vector<16x16xi32>
    %c0_344 = arith.constant 0 : index
    %c3_345 = arith.constant 3 : index
    %718 = memref.load %arg1[%c0_344, %c3_345] : memref<32x8xf32, #tpu.memory_space<smem>>
    %cst_346 = arith.constant 0.000000e+00 : f32
    %719 = vector.broadcast %718 : f32 to vector<16x16xf32>
    %720 = vector.broadcast %cst_346 : f32 to vector<16x16xf32>
    %721 = arith.select %717, %719, %720 : vector<16x16xi1>, vector<16x16xf32>
    %722 = arith.addf %715, %721 : vector<16x16xf32>
    %c1_i32_347 = arith.constant 1 : i32
    %723 = vector.broadcast %c1_i32_347 : i32 to vector<16x16xi32>
    %724 = arith.cmpi eq, %30, %723 : vector<16x16xi32>
    %c1_348 = arith.constant 1 : index
    %c3_349 = arith.constant 3 : index
    %725 = memref.load %arg1[%c1_348, %c3_349] : memref<32x8xf32, #tpu.memory_space<smem>>
    %cst_350 = arith.constant 0.000000e+00 : f32
    %726 = vector.broadcast %725 : f32 to vector<16x16xf32>
    %727 = vector.broadcast %cst_350 : f32 to vector<16x16xf32>
    %728 = arith.select %724, %726, %727 : vector<16x16xi1>, vector<16x16xf32>
    %729 = arith.addf %722, %728 : vector<16x16xf32>
    %c2_i32_351 = arith.constant 2 : i32
    %730 = vector.broadcast %c2_i32_351 : i32 to vector<16x16xi32>
    %731 = arith.cmpi eq, %30, %730 : vector<16x16xi32>
    %c2_352 = arith.constant 2 : index
    %c3_353 = arith.constant 3 : index
    %732 = memref.load %arg1[%c2_352, %c3_353] : memref<32x8xf32, #tpu.memory_space<smem>>
    %cst_354 = arith.constant 0.000000e+00 : f32
    %733 = vector.broadcast %732 : f32 to vector<16x16xf32>
    %734 = vector.broadcast %cst_354 : f32 to vector<16x16xf32>
    %735 = arith.select %731, %733, %734 : vector<16x16xi1>, vector<16x16xf32>
    %736 = arith.addf %729, %735 : vector<16x16xf32>
    %c3_i32_355 = arith.constant 3 : i32
    %737 = vector.broadcast %c3_i32_355 : i32 to vector<16x16xi32>
    %738 = arith.cmpi eq, %30, %737 : vector<16x16xi32>
    %c3_356 = arith.constant 3 : index
    %c3_357 = arith.constant 3 : index
    %739 = memref.load %arg1[%c3_356, %c3_357] : memref<32x8xf32, #tpu.memory_space<smem>>
    %cst_358 = arith.constant 0.000000e+00 : f32
    %740 = vector.broadcast %739 : f32 to vector<16x16xf32>
    %741 = vector.broadcast %cst_358 : f32 to vector<16x16xf32>
    %742 = arith.select %738, %740, %741 : vector<16x16xi1>, vector<16x16xf32>
    %743 = arith.addf %736, %742 : vector<16x16xf32>
    %c4_i32_359 = arith.constant 4 : i32
    %744 = vector.broadcast %c4_i32_359 : i32 to vector<16x16xi32>
    %745 = arith.cmpi eq, %30, %744 : vector<16x16xi32>
    %c4_360 = arith.constant 4 : index
    %c3_361 = arith.constant 3 : index
    %746 = memref.load %arg1[%c4_360, %c3_361] : memref<32x8xf32, #tpu.memory_space<smem>>
    %cst_362 = arith.constant 0.000000e+00 : f32
    %747 = vector.broadcast %746 : f32 to vector<16x16xf32>
    %748 = vector.broadcast %cst_362 : f32 to vector<16x16xf32>
    %749 = arith.select %745, %747, %748 : vector<16x16xi1>, vector<16x16xf32>
    %750 = arith.addf %743, %749 : vector<16x16xf32>
    %c5_i32_363 = arith.constant 5 : i32
    %751 = vector.broadcast %c5_i32_363 : i32 to vector<16x16xi32>
    %752 = arith.cmpi eq, %30, %751 : vector<16x16xi32>
    %c5_364 = arith.constant 5 : index
    %c3_365 = arith.constant 3 : index
    %753 = memref.load %arg1[%c5_364, %c3_365] : memref<32x8xf32, #tpu.memory_space<smem>>
    %cst_366 = arith.constant 0.000000e+00 : f32
    %754 = vector.broadcast %753 : f32 to vector<16x16xf32>
    %755 = vector.broadcast %cst_366 : f32 to vector<16x16xf32>
    %756 = arith.select %752, %754, %755 : vector<16x16xi1>, vector<16x16xf32>
    %757 = arith.addf %750, %756 : vector<16x16xf32>
    %c6_i32_367 = arith.constant 6 : i32
    %758 = vector.broadcast %c6_i32_367 : i32 to vector<16x16xi32>
    %759 = arith.cmpi eq, %30, %758 : vector<16x16xi32>
    %c6_368 = arith.constant 6 : index
    %c3_369 = arith.constant 3 : index
    %760 = memref.load %arg1[%c6_368, %c3_369] : memref<32x8xf32, #tpu.memory_space<smem>>
    %cst_370 = arith.constant 0.000000e+00 : f32
    %761 = vector.broadcast %760 : f32 to vector<16x16xf32>
    %762 = vector.broadcast %cst_370 : f32 to vector<16x16xf32>
    %763 = arith.select %759, %761, %762 : vector<16x16xi1>, vector<16x16xf32>
    %764 = arith.addf %757, %763 : vector<16x16xf32>
    %c7_i32_371 = arith.constant 7 : i32
    %765 = vector.broadcast %c7_i32_371 : i32 to vector<16x16xi32>
    %766 = arith.cmpi eq, %30, %765 : vector<16x16xi32>
    %c7_372 = arith.constant 7 : index
    %c3_373 = arith.constant 3 : index
    %767 = memref.load %arg1[%c7_372, %c3_373] : memref<32x8xf32, #tpu.memory_space<smem>>
    %cst_374 = arith.constant 0.000000e+00 : f32
    %768 = vector.broadcast %767 : f32 to vector<16x16xf32>
    %769 = vector.broadcast %cst_374 : f32 to vector<16x16xf32>
    %770 = arith.select %766, %768, %769 : vector<16x16xi1>, vector<16x16xf32>
    %771 = arith.addf %764, %770 : vector<16x16xf32>
    %c8_i32_375 = arith.constant 8 : i32
    %772 = vector.broadcast %c8_i32_375 : i32 to vector<16x16xi32>
    %773 = arith.cmpi eq, %30, %772 : vector<16x16xi32>
    %c8_376 = arith.constant 8 : index
    %c3_377 = arith.constant 3 : index
    %774 = memref.load %arg1[%c8_376, %c3_377] : memref<32x8xf32, #tpu.memory_space<smem>>
    %cst_378 = arith.constant 0.000000e+00 : f32
    %775 = vector.broadcast %774 : f32 to vector<16x16xf32>
    %776 = vector.broadcast %cst_378 : f32 to vector<16x16xf32>
    %777 = arith.select %773, %775, %776 : vector<16x16xi1>, vector<16x16xf32>
    %778 = arith.addf %771, %777 : vector<16x16xf32>
    %c9_i32_379 = arith.constant 9 : i32
    %779 = vector.broadcast %c9_i32_379 : i32 to vector<16x16xi32>
    %780 = arith.cmpi eq, %30, %779 : vector<16x16xi32>
    %c9_380 = arith.constant 9 : index
    %c3_381 = arith.constant 3 : index
    %781 = memref.load %arg1[%c9_380, %c3_381] : memref<32x8xf32, #tpu.memory_space<smem>>
    %cst_382 = arith.constant 0.000000e+00 : f32
    %782 = vector.broadcast %781 : f32 to vector<16x16xf32>
    %783 = vector.broadcast %cst_382 : f32 to vector<16x16xf32>
    %784 = arith.select %780, %782, %783 : vector<16x16xi1>, vector<16x16xf32>
    %785 = arith.addf %778, %784 : vector<16x16xf32>
    %c10_i32_383 = arith.constant 10 : i32
    %786 = vector.broadcast %c10_i32_383 : i32 to vector<16x16xi32>
    %787 = arith.cmpi eq, %30, %786 : vector<16x16xi32>
    %c10_384 = arith.constant 10 : index
    %c3_385 = arith.constant 3 : index
    %788 = memref.load %arg1[%c10_384, %c3_385] : memref<32x8xf32, #tpu.memory_space<smem>>
    %cst_386 = arith.constant 0.000000e+00 : f32
    %789 = vector.broadcast %788 : f32 to vector<16x16xf32>
    %790 = vector.broadcast %cst_386 : f32 to vector<16x16xf32>
    %791 = arith.select %787, %789, %790 : vector<16x16xi1>, vector<16x16xf32>
    %792 = arith.addf %785, %791 : vector<16x16xf32>
    %c11_i32_387 = arith.constant 11 : i32
    %793 = vector.broadcast %c11_i32_387 : i32 to vector<16x16xi32>
    %794 = arith.cmpi eq, %30, %793 : vector<16x16xi32>
    %c11_388 = arith.constant 11 : index
    %c3_389 = arith.constant 3 : index
    %795 = memref.load %arg1[%c11_388, %c3_389] : memref<32x8xf32, #tpu.memory_space<smem>>
    %cst_390 = arith.constant 0.000000e+00 : f32
    %796 = vector.broadcast %795 : f32 to vector<16x16xf32>
    %797 = vector.broadcast %cst_390 : f32 to vector<16x16xf32>
    %798 = arith.select %794, %796, %797 : vector<16x16xi1>, vector<16x16xf32>
    %799 = arith.addf %792, %798 : vector<16x16xf32>
    %c12_i32_391 = arith.constant 12 : i32
    %800 = vector.broadcast %c12_i32_391 : i32 to vector<16x16xi32>
    %801 = arith.cmpi eq, %30, %800 : vector<16x16xi32>
    %c12_392 = arith.constant 12 : index
    %c3_393 = arith.constant 3 : index
    %802 = memref.load %arg1[%c12_392, %c3_393] : memref<32x8xf32, #tpu.memory_space<smem>>
    %cst_394 = arith.constant 0.000000e+00 : f32
    %803 = vector.broadcast %802 : f32 to vector<16x16xf32>
    %804 = vector.broadcast %cst_394 : f32 to vector<16x16xf32>
    %805 = arith.select %801, %803, %804 : vector<16x16xi1>, vector<16x16xf32>
    %806 = arith.addf %799, %805 : vector<16x16xf32>
    %c13_i32_395 = arith.constant 13 : i32
    %807 = vector.broadcast %c13_i32_395 : i32 to vector<16x16xi32>
    %808 = arith.cmpi eq, %30, %807 : vector<16x16xi32>
    %c13_396 = arith.constant 13 : index
    %c3_397 = arith.constant 3 : index
    %809 = memref.load %arg1[%c13_396, %c3_397] : memref<32x8xf32, #tpu.memory_space<smem>>
    %cst_398 = arith.constant 0.000000e+00 : f32
    %810 = vector.broadcast %809 : f32 to vector<16x16xf32>
    %811 = vector.broadcast %cst_398 : f32 to vector<16x16xf32>
    %812 = arith.select %808, %810, %811 : vector<16x16xi1>, vector<16x16xf32>
    %813 = arith.addf %806, %812 : vector<16x16xf32>
    %c14_i32_399 = arith.constant 14 : i32
    %814 = vector.broadcast %c14_i32_399 : i32 to vector<16x16xi32>
    %815 = arith.cmpi eq, %30, %814 : vector<16x16xi32>
    %c14_400 = arith.constant 14 : index
    %c3_401 = arith.constant 3 : index
    %816 = memref.load %arg1[%c14_400, %c3_401] : memref<32x8xf32, #tpu.memory_space<smem>>
    %cst_402 = arith.constant 0.000000e+00 : f32
    %817 = vector.broadcast %816 : f32 to vector<16x16xf32>
    %818 = vector.broadcast %cst_402 : f32 to vector<16x16xf32>
    %819 = arith.select %815, %817, %818 : vector<16x16xi1>, vector<16x16xf32>
    %820 = arith.addf %813, %819 : vector<16x16xf32>
    %c15_i32_403 = arith.constant 15 : i32
    %821 = vector.broadcast %c15_i32_403 : i32 to vector<16x16xi32>
    %822 = arith.cmpi eq, %30, %821 : vector<16x16xi32>
    %c15_404 = arith.constant 15 : index
    %c3_405 = arith.constant 3 : index
    %823 = memref.load %arg1[%c15_404, %c3_405] : memref<32x8xf32, #tpu.memory_space<smem>>
    %cst_406 = arith.constant 0.000000e+00 : f32
    %824 = vector.broadcast %823 : f32 to vector<16x16xf32>
    %825 = vector.broadcast %cst_406 : f32 to vector<16x16xf32>
    %826 = arith.select %822, %824, %825 : vector<16x16xi1>, vector<16x16xf32>
    %827 = arith.addf %820, %826 : vector<16x16xf32>
    %c16_i32_407 = arith.constant 16 : i32
    %828 = vector.broadcast %c16_i32_407 : i32 to vector<16x16xi32>
    %829 = arith.cmpi eq, %30, %828 : vector<16x16xi32>
    %c16_408 = arith.constant 16 : index
    %c3_409 = arith.constant 3 : index
    %830 = memref.load %arg1[%c16_408, %c3_409] : memref<32x8xf32, #tpu.memory_space<smem>>
    %cst_410 = arith.constant 0.000000e+00 : f32
    %831 = vector.broadcast %830 : f32 to vector<16x16xf32>
    %832 = vector.broadcast %cst_410 : f32 to vector<16x16xf32>
    %833 = arith.select %829, %831, %832 : vector<16x16xi1>, vector<16x16xf32>
    %834 = arith.addf %827, %833 : vector<16x16xf32>
    %c17_i32_411 = arith.constant 17 : i32
    %835 = vector.broadcast %c17_i32_411 : i32 to vector<16x16xi32>
    %836 = arith.cmpi eq, %30, %835 : vector<16x16xi32>
    %c17_412 = arith.constant 17 : index
    %c3_413 = arith.constant 3 : index
    %837 = memref.load %arg1[%c17_412, %c3_413] : memref<32x8xf32, #tpu.memory_space<smem>>
    %cst_414 = arith.constant 0.000000e+00 : f32
    %838 = vector.broadcast %837 : f32 to vector<16x16xf32>
    %839 = vector.broadcast %cst_414 : f32 to vector<16x16xf32>
    %840 = arith.select %836, %838, %839 : vector<16x16xi1>, vector<16x16xf32>
    %841 = arith.addf %834, %840 : vector<16x16xf32>
    %c18_i32_415 = arith.constant 18 : i32
    %842 = vector.broadcast %c18_i32_415 : i32 to vector<16x16xi32>
    %843 = arith.cmpi eq, %30, %842 : vector<16x16xi32>
    %c18_416 = arith.constant 18 : index
    %c3_417 = arith.constant 3 : index
    %844 = memref.load %arg1[%c18_416, %c3_417] : memref<32x8xf32, #tpu.memory_space<smem>>
    %cst_418 = arith.constant 0.000000e+00 : f32
    %845 = vector.broadcast %844 : f32 to vector<16x16xf32>
    %846 = vector.broadcast %cst_418 : f32 to vector<16x16xf32>
    %847 = arith.select %843, %845, %846 : vector<16x16xi1>, vector<16x16xf32>
    %848 = arith.addf %841, %847 : vector<16x16xf32>
    %c19_i32_419 = arith.constant 19 : i32
    %849 = vector.broadcast %c19_i32_419 : i32 to vector<16x16xi32>
    %850 = arith.cmpi eq, %30, %849 : vector<16x16xi32>
    %c19_420 = arith.constant 19 : index
    %c3_421 = arith.constant 3 : index
    %851 = memref.load %arg1[%c19_420, %c3_421] : memref<32x8xf32, #tpu.memory_space<smem>>
    %cst_422 = arith.constant 0.000000e+00 : f32
    %852 = vector.broadcast %851 : f32 to vector<16x16xf32>
    %853 = vector.broadcast %cst_422 : f32 to vector<16x16xf32>
    %854 = arith.select %850, %852, %853 : vector<16x16xi1>, vector<16x16xf32>
    %855 = arith.addf %848, %854 : vector<16x16xf32>
    %c20_i32_423 = arith.constant 20 : i32
    %856 = vector.broadcast %c20_i32_423 : i32 to vector<16x16xi32>
    %857 = arith.cmpi eq, %30, %856 : vector<16x16xi32>
    %c20_424 = arith.constant 20 : index
    %c3_425 = arith.constant 3 : index
    %858 = memref.load %arg1[%c20_424, %c3_425] : memref<32x8xf32, #tpu.memory_space<smem>>
    %cst_426 = arith.constant 0.000000e+00 : f32
    %859 = vector.broadcast %858 : f32 to vector<16x16xf32>
    %860 = vector.broadcast %cst_426 : f32 to vector<16x16xf32>
    %861 = arith.select %857, %859, %860 : vector<16x16xi1>, vector<16x16xf32>
    %862 = arith.addf %855, %861 : vector<16x16xf32>
    %c21_i32_427 = arith.constant 21 : i32
    %863 = vector.broadcast %c21_i32_427 : i32 to vector<16x16xi32>
    %864 = arith.cmpi eq, %30, %863 : vector<16x16xi32>
    %c21_428 = arith.constant 21 : index
    %c3_429 = arith.constant 3 : index
    %865 = memref.load %arg1[%c21_428, %c3_429] : memref<32x8xf32, #tpu.memory_space<smem>>
    %cst_430 = arith.constant 0.000000e+00 : f32
    %866 = vector.broadcast %865 : f32 to vector<16x16xf32>
    %867 = vector.broadcast %cst_430 : f32 to vector<16x16xf32>
    %868 = arith.select %864, %866, %867 : vector<16x16xi1>, vector<16x16xf32>
    %869 = arith.addf %862, %868 : vector<16x16xf32>
    %c22_i32_431 = arith.constant 22 : i32
    %870 = vector.broadcast %c22_i32_431 : i32 to vector<16x16xi32>
    %871 = arith.cmpi eq, %30, %870 : vector<16x16xi32>
    %c22_432 = arith.constant 22 : index
    %c3_433 = arith.constant 3 : index
    %872 = memref.load %arg1[%c22_432, %c3_433] : memref<32x8xf32, #tpu.memory_space<smem>>
    %cst_434 = arith.constant 0.000000e+00 : f32
    %873 = vector.broadcast %872 : f32 to vector<16x16xf32>
    %874 = vector.broadcast %cst_434 : f32 to vector<16x16xf32>
    %875 = arith.select %871, %873, %874 : vector<16x16xi1>, vector<16x16xf32>
    %876 = arith.addf %869, %875 : vector<16x16xf32>
    %c23_i32_435 = arith.constant 23 : i32
    %877 = vector.broadcast %c23_i32_435 : i32 to vector<16x16xi32>
    %878 = arith.cmpi eq, %30, %877 : vector<16x16xi32>
    %c23_436 = arith.constant 23 : index
    %c3_437 = arith.constant 3 : index
    %879 = memref.load %arg1[%c23_436, %c3_437] : memref<32x8xf32, #tpu.memory_space<smem>>
    %cst_438 = arith.constant 0.000000e+00 : f32
    %880 = vector.broadcast %879 : f32 to vector<16x16xf32>
    %881 = vector.broadcast %cst_438 : f32 to vector<16x16xf32>
    %882 = arith.select %878, %880, %881 : vector<16x16xi1>, vector<16x16xf32>
    %883 = arith.addf %876, %882 : vector<16x16xf32>
    %c24_i32_439 = arith.constant 24 : i32
    %884 = vector.broadcast %c24_i32_439 : i32 to vector<16x16xi32>
    %885 = arith.cmpi eq, %30, %884 : vector<16x16xi32>
    %c24_440 = arith.constant 24 : index
    %c3_441 = arith.constant 3 : index
    %886 = memref.load %arg1[%c24_440, %c3_441] : memref<32x8xf32, #tpu.memory_space<smem>>
    %cst_442 = arith.constant 0.000000e+00 : f32
    %887 = vector.broadcast %886 : f32 to vector<16x16xf32>
    %888 = vector.broadcast %cst_442 : f32 to vector<16x16xf32>
    %889 = arith.select %885, %887, %888 : vector<16x16xi1>, vector<16x16xf32>
    %890 = arith.addf %883, %889 : vector<16x16xf32>
    %c25_i32_443 = arith.constant 25 : i32
    %891 = vector.broadcast %c25_i32_443 : i32 to vector<16x16xi32>
    %892 = arith.cmpi eq, %30, %891 : vector<16x16xi32>
    %c25_444 = arith.constant 25 : index
    %c3_445 = arith.constant 3 : index
    %893 = memref.load %arg1[%c25_444, %c3_445] : memref<32x8xf32, #tpu.memory_space<smem>>
    %cst_446 = arith.constant 0.000000e+00 : f32
    %894 = vector.broadcast %893 : f32 to vector<16x16xf32>
    %895 = vector.broadcast %cst_446 : f32 to vector<16x16xf32>
    %896 = arith.select %892, %894, %895 : vector<16x16xi1>, vector<16x16xf32>
    %897 = arith.addf %890, %896 : vector<16x16xf32>
    %c26_i32_447 = arith.constant 26 : i32
    %898 = vector.broadcast %c26_i32_447 : i32 to vector<16x16xi32>
    %899 = arith.cmpi eq, %30, %898 : vector<16x16xi32>
    %c26_448 = arith.constant 26 : index
    %c3_449 = arith.constant 3 : index
    %900 = memref.load %arg1[%c26_448, %c3_449] : memref<32x8xf32, #tpu.memory_space<smem>>
    %cst_450 = arith.constant 0.000000e+00 : f32
    %901 = vector.broadcast %900 : f32 to vector<16x16xf32>
    %902 = vector.broadcast %cst_450 : f32 to vector<16x16xf32>
    %903 = arith.select %899, %901, %902 : vector<16x16xi1>, vector<16x16xf32>
    %904 = arith.addf %897, %903 : vector<16x16xf32>
    %c27_i32_451 = arith.constant 27 : i32
    %905 = vector.broadcast %c27_i32_451 : i32 to vector<16x16xi32>
    %906 = arith.cmpi eq, %30, %905 : vector<16x16xi32>
    %c27_452 = arith.constant 27 : index
    %c3_453 = arith.constant 3 : index
    %907 = memref.load %arg1[%c27_452, %c3_453] : memref<32x8xf32, #tpu.memory_space<smem>>
    %cst_454 = arith.constant 0.000000e+00 : f32
    %908 = vector.broadcast %907 : f32 to vector<16x16xf32>
    %909 = vector.broadcast %cst_454 : f32 to vector<16x16xf32>
    %910 = arith.select %906, %908, %909 : vector<16x16xi1>, vector<16x16xf32>
    %911 = arith.addf %904, %910 : vector<16x16xf32>
    %c28_i32_455 = arith.constant 28 : i32
    %912 = vector.broadcast %c28_i32_455 : i32 to vector<16x16xi32>
    %913 = arith.cmpi eq, %30, %912 : vector<16x16xi32>
    %c28_456 = arith.constant 28 : index
    %c3_457 = arith.constant 3 : index
    %914 = memref.load %arg1[%c28_456, %c3_457] : memref<32x8xf32, #tpu.memory_space<smem>>
    %cst_458 = arith.constant 0.000000e+00 : f32
    %915 = vector.broadcast %914 : f32 to vector<16x16xf32>
    %916 = vector.broadcast %cst_458 : f32 to vector<16x16xf32>
    %917 = arith.select %913, %915, %916 : vector<16x16xi1>, vector<16x16xf32>
    %918 = arith.addf %911, %917 : vector<16x16xf32>
    %c29_i32_459 = arith.constant 29 : i32
    %919 = vector.broadcast %c29_i32_459 : i32 to vector<16x16xi32>
    %920 = arith.cmpi eq, %30, %919 : vector<16x16xi32>
    %c29_460 = arith.constant 29 : index
    %c3_461 = arith.constant 3 : index
    %921 = memref.load %arg1[%c29_460, %c3_461] : memref<32x8xf32, #tpu.memory_space<smem>>
    %cst_462 = arith.constant 0.000000e+00 : f32
    %922 = vector.broadcast %921 : f32 to vector<16x16xf32>
    %923 = vector.broadcast %cst_462 : f32 to vector<16x16xf32>
    %924 = arith.select %920, %922, %923 : vector<16x16xi1>, vector<16x16xf32>
    %925 = arith.addf %918, %924 : vector<16x16xf32>
    %c30_i32_463 = arith.constant 30 : i32
    %926 = vector.broadcast %c30_i32_463 : i32 to vector<16x16xi32>
    %927 = arith.cmpi eq, %30, %926 : vector<16x16xi32>
    %c30_464 = arith.constant 30 : index
    %c3_465 = arith.constant 3 : index
    %928 = memref.load %arg1[%c30_464, %c3_465] : memref<32x8xf32, #tpu.memory_space<smem>>
    %cst_466 = arith.constant 0.000000e+00 : f32
    %929 = vector.broadcast %928 : f32 to vector<16x16xf32>
    %930 = vector.broadcast %cst_466 : f32 to vector<16x16xf32>
    %931 = arith.select %927, %929, %930 : vector<16x16xi1>, vector<16x16xf32>
    %932 = arith.addf %925, %931 : vector<16x16xf32>
    %c31_i32_467 = arith.constant 31 : i32
    %933 = vector.broadcast %c31_i32_467 : i32 to vector<16x16xi32>
    %934 = arith.cmpi eq, %30, %933 : vector<16x16xi32>
    %c31_468 = arith.constant 31 : index
    %c3_469 = arith.constant 3 : index
    %935 = memref.load %arg1[%c31_468, %c3_469] : memref<32x8xf32, #tpu.memory_space<smem>>
    %cst_470 = arith.constant 0.000000e+00 : f32
    %936 = vector.broadcast %935 : f32 to vector<16x16xf32>
    %937 = vector.broadcast %cst_470 : f32 to vector<16x16xf32>
    %938 = arith.select %934, %936, %937 : vector<16x16xi1>, vector<16x16xf32>
    %939 = arith.addf %932, %938 : vector<16x16xf32>
    %c3_471 = arith.constant 3 : index
    %c0_472 = arith.constant 0 : index
    %c0_473 = arith.constant 0 : index
    %940 = vector.load %arg2[%c3_471, %c0_472, %c0_473] : memref<8x16x16xf32, #tpu.memory_space<vmem>>, vector<1x16x16xf32>
    %941 = vector.shape_cast %940 : vector<1x16x16xf32> to vector<16x16xf32>
    %942 = vector.shape_cast %939 : vector<16x16xf32> to vector<1x16x16xf32>
    tpu.vector_store %arg2[%c3_471, %c0_472, %c0_473], %942 {strides = array<i32>} : memref<8x16x16xf32, #tpu.memory_space<vmem>>, vector<1x16x16xf32>,
    %cst_474 = arith.constant 0.000000e+00 : f32
    %943 = vector.broadcast %cst_474 : f32 to vector<16x16xf32>
    %c0_i32_475 = arith.constant 0 : i32
    %944 = vector.broadcast %c0_i32_475 : i32 to vector<16x16xi32>
    %945 = arith.cmpi eq, %30, %944 : vector<16x16xi32>
    %c0_476 = arith.constant 0 : index
    %c4_477 = arith.constant 4 : index
    %946 = memref.load %arg1[%c0_476, %c4_477] : memref<32x8xf32, #tpu.memory_space<smem>>
    %cst_478 = arith.constant 0.000000e+00 : f32
    %947 = vector.broadcast %946 : f32 to vector<16x16xf32>
    %948 = vector.broadcast %cst_478 : f32 to vector<16x16xf32>
    %949 = arith.select %945, %947, %948 : vector<16x16xi1>, vector<16x16xf32>
    %950 = arith.addf %943, %949 : vector<16x16xf32>
    %c1_i32_479 = arith.constant 1 : i32
    %951 = vector.broadcast %c1_i32_479 : i32 to vector<16x16xi32>
    %952 = arith.cmpi eq, %30, %951 : vector<16x16xi32>
    %c1_480 = arith.constant 1 : index
    %c4_481 = arith.constant 4 : index
    %953 = memref.load %arg1[%c1_480, %c4_481] : memref<32x8xf32, #tpu.memory_space<smem>>
    %cst_482 = arith.constant 0.000000e+00 : f32
    %954 = vector.broadcast %953 : f32 to vector<16x16xf32>
    %955 = vector.broadcast %cst_482 : f32 to vector<16x16xf32>
    %956 = arith.select %952, %954, %955 : vector<16x16xi1>, vector<16x16xf32>
    %957 = arith.addf %950, %956 : vector<16x16xf32>
    %c2_i32_483 = arith.constant 2 : i32
    %958 = vector.broadcast %c2_i32_483 : i32 to vector<16x16xi32>
    %959 = arith.cmpi eq, %30, %958 : vector<16x16xi32>
    %c2_484 = arith.constant 2 : index
    %c4_485 = arith.constant 4 : index
    %960 = memref.load %arg1[%c2_484, %c4_485] : memref<32x8xf32, #tpu.memory_space<smem>>
    %cst_486 = arith.constant 0.000000e+00 : f32
    %961 = vector.broadcast %960 : f32 to vector<16x16xf32>
    %962 = vector.broadcast %cst_486 : f32 to vector<16x16xf32>
    %963 = arith.select %959, %961, %962 : vector<16x16xi1>, vector<16x16xf32>
    %964 = arith.addf %957, %963 : vector<16x16xf32>
    %c3_i32_487 = arith.constant 3 : i32
    %965 = vector.broadcast %c3_i32_487 : i32 to vector<16x16xi32>
    %966 = arith.cmpi eq, %30, %965 : vector<16x16xi32>
    %c3_488 = arith.constant 3 : index
    %c4_489 = arith.constant 4 : index
    %967 = memref.load %arg1[%c3_488, %c4_489] : memref<32x8xf32, #tpu.memory_space<smem>>
    %cst_490 = arith.constant 0.000000e+00 : f32
    %968 = vector.broadcast %967 : f32 to vector<16x16xf32>
    %969 = vector.broadcast %cst_490 : f32 to vector<16x16xf32>
    %970 = arith.select %966, %968, %969 : vector<16x16xi1>, vector<16x16xf32>
    %971 = arith.addf %964, %970 : vector<16x16xf32>
    %c4_i32_491 = arith.constant 4 : i32
    %972 = vector.broadcast %c4_i32_491 : i32 to vector<16x16xi32>
    %973 = arith.cmpi eq, %30, %972 : vector<16x16xi32>
    %c4_492 = arith.constant 4 : index
    %c4_493 = arith.constant 4 : index
    %974 = memref.load %arg1[%c4_492, %c4_493] : memref<32x8xf32, #tpu.memory_space<smem>>
    %cst_494 = arith.constant 0.000000e+00 : f32
    %975 = vector.broadcast %974 : f32 to vector<16x16xf32>
    %976 = vector.broadcast %cst_494 : f32 to vector<16x16xf32>
    %977 = arith.select %973, %975, %976 : vector<16x16xi1>, vector<16x16xf32>
    %978 = arith.addf %971, %977 : vector<16x16xf32>
    %c5_i32_495 = arith.constant 5 : i32
    %979 = vector.broadcast %c5_i32_495 : i32 to vector<16x16xi32>
    %980 = arith.cmpi eq, %30, %979 : vector<16x16xi32>
    %c5_496 = arith.constant 5 : index
    %c4_497 = arith.constant 4 : index
    %981 = memref.load %arg1[%c5_496, %c4_497] : memref<32x8xf32, #tpu.memory_space<smem>>
    %cst_498 = arith.constant 0.000000e+00 : f32
    %982 = vector.broadcast %981 : f32 to vector<16x16xf32>
    %983 = vector.broadcast %cst_498 : f32 to vector<16x16xf32>
    %984 = arith.select %980, %982, %983 : vector<16x16xi1>, vector<16x16xf32>
    %985 = arith.addf %978, %984 : vector<16x16xf32>
    %c6_i32_499 = arith.constant 6 : i32
    %986 = vector.broadcast %c6_i32_499 : i32 to vector<16x16xi32>
    %987 = arith.cmpi eq, %30, %986 : vector<16x16xi32>
    %c6_500 = arith.constant 6 : index
    %c4_501 = arith.constant 4 : index
    %988 = memref.load %arg1[%c6_500, %c4_501] : memref<32x8xf32, #tpu.memory_space<smem>>
    %cst_502 = arith.constant 0.000000e+00 : f32
    %989 = vector.broadcast %988 : f32 to vector<16x16xf32>
    %990 = vector.broadcast %cst_502 : f32 to vector<16x16xf32>
    %991 = arith.select %987, %989, %990 : vector<16x16xi1>, vector<16x16xf32>
    %992 = arith.addf %985, %991 : vector<16x16xf32>
    %c7_i32_503 = arith.constant 7 : i32
    %993 = vector.broadcast %c7_i32_503 : i32 to vector<16x16xi32>
    %994 = arith.cmpi eq, %30, %993 : vector<16x16xi32>
    %c7_504 = arith.constant 7 : index
    %c4_505 = arith.constant 4 : index
    %995 = memref.load %arg1[%c7_504, %c4_505] : memref<32x8xf32, #tpu.memory_space<smem>>
    %cst_506 = arith.constant 0.000000e+00 : f32
    %996 = vector.broadcast %995 : f32 to vector<16x16xf32>
    %997 = vector.broadcast %cst_506 : f32 to vector<16x16xf32>
    %998 = arith.select %994, %996, %997 : vector<16x16xi1>, vector<16x16xf32>
    %999 = arith.addf %992, %998 : vector<16x16xf32>
    %c8_i32_507 = arith.constant 8 : i32
    %1000 = vector.broadcast %c8_i32_507 : i32 to vector<16x16xi32>
    %1001 = arith.cmpi eq, %30, %1000 : vector<16x16xi32>
    %c8_508 = arith.constant 8 : index
    %c4_509 = arith.constant 4 : index
    %1002 = memref.load %arg1[%c8_508, %c4_509] : memref<32x8xf32, #tpu.memory_space<smem>>
    %cst_510 = arith.constant 0.000000e+00 : f32
    %1003 = vector.broadcast %1002 : f32 to vector<16x16xf32>
    %1004 = vector.broadcast %cst_510 : f32 to vector<16x16xf32>
    %1005 = arith.select %1001, %1003, %1004 : vector<16x16xi1>, vector<16x16xf32>
    %1006 = arith.addf %999, %1005 : vector<16x16xf32>
    %c9_i32_511 = arith.constant 9 : i32
    %1007 = vector.broadcast %c9_i32_511 : i32 to vector<16x16xi32>
    %1008 = arith.cmpi eq, %30, %1007 : vector<16x16xi32>
    %c9_512 = arith.constant 9 : index
    %c4_513 = arith.constant 4 : index
    %1009 = memref.load %arg1[%c9_512, %c4_513] : memref<32x8xf32, #tpu.memory_space<smem>>
    %cst_514 = arith.constant 0.000000e+00 : f32
    %1010 = vector.broadcast %1009 : f32 to vector<16x16xf32>
    %1011 = vector.broadcast %cst_514 : f32 to vector<16x16xf32>
    %1012 = arith.select %1008, %1010, %1011 : vector<16x16xi1>, vector<16x16xf32>
    %1013 = arith.addf %1006, %1012 : vector<16x16xf32>
    %c10_i32_515 = arith.constant 10 : i32
    %1014 = vector.broadcast %c10_i32_515 : i32 to vector<16x16xi32>
    %1015 = arith.cmpi eq, %30, %1014 : vector<16x16xi32>
    %c10_516 = arith.constant 10 : index
    %c4_517 = arith.constant 4 : index
    %1016 = memref.load %arg1[%c10_516, %c4_517] : memref<32x8xf32, #tpu.memory_space<smem>>
    %cst_518 = arith.constant 0.000000e+00 : f32
    %1017 = vector.broadcast %1016 : f32 to vector<16x16xf32>
    %1018 = vector.broadcast %cst_518 : f32 to vector<16x16xf32>
    %1019 = arith.select %1015, %1017, %1018 : vector<16x16xi1>, vector<16x16xf32>
    %1020 = arith.addf %1013, %1019 : vector<16x16xf32>
    %c11_i32_519 = arith.constant 11 : i32
    %1021 = vector.broadcast %c11_i32_519 : i32 to vector<16x16xi32>
    %1022 = arith.cmpi eq, %30, %1021 : vector<16x16xi32>
    %c11_520 = arith.constant 11 : index
    %c4_521 = arith.constant 4 : index
    %1023 = memref.load %arg1[%c11_520, %c4_521] : memref<32x8xf32, #tpu.memory_space<smem>>
    %cst_522 = arith.constant 0.000000e+00 : f32
    %1024 = vector.broadcast %1023 : f32 to vector<16x16xf32>
    %1025 = vector.broadcast %cst_522 : f32 to vector<16x16xf32>
    %1026 = arith.select %1022, %1024, %1025 : vector<16x16xi1>, vector<16x16xf32>
    %1027 = arith.addf %1020, %1026 : vector<16x16xf32>
    %c12_i32_523 = arith.constant 12 : i32
    %1028 = vector.broadcast %c12_i32_523 : i32 to vector<16x16xi32>
    %1029 = arith.cmpi eq, %30, %1028 : vector<16x16xi32>
    %c12_524 = arith.constant 12 : index
    %c4_525 = arith.constant 4 : index
    %1030 = memref.load %arg1[%c12_524, %c4_525] : memref<32x8xf32, #tpu.memory_space<smem>>
    %cst_526 = arith.constant 0.000000e+00 : f32
    %1031 = vector.broadcast %1030 : f32 to vector<16x16xf32>
    %1032 = vector.broadcast %cst_526 : f32 to vector<16x16xf32>
    %1033 = arith.select %1029, %1031, %1032 : vector<16x16xi1>, vector<16x16xf32>
    %1034 = arith.addf %1027, %1033 : vector<16x16xf32>
    %c13_i32_527 = arith.constant 13 : i32
    %1035 = vector.broadcast %c13_i32_527 : i32 to vector<16x16xi32>
    %1036 = arith.cmpi eq, %30, %1035 : vector<16x16xi32>
    %c13_528 = arith.constant 13 : index
    %c4_529 = arith.constant 4 : index
    %1037 = memref.load %arg1[%c13_528, %c4_529] : memref<32x8xf32, #tpu.memory_space<smem>>
    %cst_530 = arith.constant 0.000000e+00 : f32
    %1038 = vector.broadcast %1037 : f32 to vector<16x16xf32>
    %1039 = vector.broadcast %cst_530 : f32 to vector<16x16xf32>
    %1040 = arith.select %1036, %1038, %1039 : vector<16x16xi1>, vector<16x16xf32>
    %1041 = arith.addf %1034, %1040 : vector<16x16xf32>
    %c14_i32_531 = arith.constant 14 : i32
    %1042 = vector.broadcast %c14_i32_531 : i32 to vector<16x16xi32>
    %1043 = arith.cmpi eq, %30, %1042 : vector<16x16xi32>
    %c14_532 = arith.constant 14 : index
    %c4_533 = arith.constant 4 : index
    %1044 = memref.load %arg1[%c14_532, %c4_533] : memref<32x8xf32, #tpu.memory_space<smem>>
    %cst_534 = arith.constant 0.000000e+00 : f32
    %1045 = vector.broadcast %1044 : f32 to vector<16x16xf32>
    %1046 = vector.broadcast %cst_534 : f32 to vector<16x16xf32>
    %1047 = arith.select %1043, %1045, %1046 : vector<16x16xi1>, vector<16x16xf32>
    %1048 = arith.addf %1041, %1047 : vector<16x16xf32>
    %c15_i32_535 = arith.constant 15 : i32
    %1049 = vector.broadcast %c15_i32_535 : i32 to vector<16x16xi32>
    %1050 = arith.cmpi eq, %30, %1049 : vector<16x16xi32>
    %c15_536 = arith.constant 15 : index
    %c4_537 = arith.constant 4 : index
    %1051 = memref.load %arg1[%c15_536, %c4_537] : memref<32x8xf32, #tpu.memory_space<smem>>
    %cst_538 = arith.constant 0.000000e+00 : f32
    %1052 = vector.broadcast %1051 : f32 to vector<16x16xf32>
    %1053 = vector.broadcast %cst_538 : f32 to vector<16x16xf32>
    %1054 = arith.select %1050, %1052, %1053 : vector<16x16xi1>, vector<16x16xf32>
    %1055 = arith.addf %1048, %1054 : vector<16x16xf32>
    %c16_i32_539 = arith.constant 16 : i32
    %1056 = vector.broadcast %c16_i32_539 : i32 to vector<16x16xi32>
    %1057 = arith.cmpi eq, %30, %1056 : vector<16x16xi32>
    %c16_540 = arith.constant 16 : index
    %c4_541 = arith.constant 4 : index
    %1058 = memref.load %arg1[%c16_540, %c4_541] : memref<32x8xf32, #tpu.memory_space<smem>>
    %cst_542 = arith.constant 0.000000e+00 : f32
    %1059 = vector.broadcast %1058 : f32 to vector<16x16xf32>
    %1060 = vector.broadcast %cst_542 : f32 to vector<16x16xf32>
    %1061 = arith.select %1057, %1059, %1060 : vector<16x16xi1>, vector<16x16xf32>
    %1062 = arith.addf %1055, %1061 : vector<16x16xf32>
    %c17_i32_543 = arith.constant 17 : i32
    %1063 = vector.broadcast %c17_i32_543 : i32 to vector<16x16xi32>
    %1064 = arith.cmpi eq, %30, %1063 : vector<16x16xi32>
    %c17_544 = arith.constant 17 : index
    %c4_545 = arith.constant 4 : index
    %1065 = memref.load %arg1[%c17_544, %c4_545] : memref<32x8xf32, #tpu.memory_space<smem>>
    %cst_546 = arith.constant 0.000000e+00 : f32
    %1066 = vector.broadcast %1065 : f32 to vector<16x16xf32>
    %1067 = vector.broadcast %cst_546 : f32 to vector<16x16xf32>
    %1068 = arith.select %1064, %1066, %1067 : vector<16x16xi1>, vector<16x16xf32>
    %1069 = arith.addf %1062, %1068 : vector<16x16xf32>
    %c18_i32_547 = arith.constant 18 : i32
    %1070 = vector.broadcast %c18_i32_547 : i32 to vector<16x16xi32>
    %1071 = arith.cmpi eq, %30, %1070 : vector<16x16xi32>
    %c18_548 = arith.constant 18 : index
    %c4_549 = arith.constant 4 : index
    %1072 = memref.load %arg1[%c18_548, %c4_549] : memref<32x8xf32, #tpu.memory_space<smem>>
    %cst_550 = arith.constant 0.000000e+00 : f32
    %1073 = vector.broadcast %1072 : f32 to vector<16x16xf32>
    %1074 = vector.broadcast %cst_550 : f32 to vector<16x16xf32>
    %1075 = arith.select %1071, %1073, %1074 : vector<16x16xi1>, vector<16x16xf32>
    %1076 = arith.addf %1069, %1075 : vector<16x16xf32>
    %c19_i32_551 = arith.constant 19 : i32
    %1077 = vector.broadcast %c19_i32_551 : i32 to vector<16x16xi32>
    %1078 = arith.cmpi eq, %30, %1077 : vector<16x16xi32>
    %c19_552 = arith.constant 19 : index
    %c4_553 = arith.constant 4 : index
    %1079 = memref.load %arg1[%c19_552, %c4_553] : memref<32x8xf32, #tpu.memory_space<smem>>
    %cst_554 = arith.constant 0.000000e+00 : f32
    %1080 = vector.broadcast %1079 : f32 to vector<16x16xf32>
    %1081 = vector.broadcast %cst_554 : f32 to vector<16x16xf32>
    %1082 = arith.select %1078, %1080, %1081 : vector<16x16xi1>, vector<16x16xf32>
    %1083 = arith.addf %1076, %1082 : vector<16x16xf32>
    %c20_i32_555 = arith.constant 20 : i32
    %1084 = vector.broadcast %c20_i32_555 : i32 to vector<16x16xi32>
    %1085 = arith.cmpi eq, %30, %1084 : vector<16x16xi32>
    %c20_556 = arith.constant 20 : index
    %c4_557 = arith.constant 4 : index
    %1086 = memref.load %arg1[%c20_556, %c4_557] : memref<32x8xf32, #tpu.memory_space<smem>>
    %cst_558 = arith.constant 0.000000e+00 : f32
    %1087 = vector.broadcast %1086 : f32 to vector<16x16xf32>
    %1088 = vector.broadcast %cst_558 : f32 to vector<16x16xf32>
    %1089 = arith.select %1085, %1087, %1088 : vector<16x16xi1>, vector<16x16xf32>
    %1090 = arith.addf %1083, %1089 : vector<16x16xf32>
    %c21_i32_559 = arith.constant 21 : i32
    %1091 = vector.broadcast %c21_i32_559 : i32 to vector<16x16xi32>
    %1092 = arith.cmpi eq, %30, %1091 : vector<16x16xi32>
    %c21_560 = arith.constant 21 : index
    %c4_561 = arith.constant 4 : index
    %1093 = memref.load %arg1[%c21_560, %c4_561] : memref<32x8xf32, #tpu.memory_space<smem>>
    %cst_562 = arith.constant 0.000000e+00 : f32
    %1094 = vector.broadcast %1093 : f32 to vector<16x16xf32>
    %1095 = vector.broadcast %cst_562 : f32 to vector<16x16xf32>
    %1096 = arith.select %1092, %1094, %1095 : vector<16x16xi1>, vector<16x16xf32>
    %1097 = arith.addf %1090, %1096 : vector<16x16xf32>
    %c22_i32_563 = arith.constant 22 : i32
    %1098 = vector.broadcast %c22_i32_563 : i32 to vector<16x16xi32>
    %1099 = arith.cmpi eq, %30, %1098 : vector<16x16xi32>
    %c22_564 = arith.constant 22 : index
    %c4_565 = arith.constant 4 : index
    %1100 = memref.load %arg1[%c22_564, %c4_565] : memref<32x8xf32, #tpu.memory_space<smem>>
    %cst_566 = arith.constant 0.000000e+00 : f32
    %1101 = vector.broadcast %1100 : f32 to vector<16x16xf32>
    %1102 = vector.broadcast %cst_566 : f32 to vector<16x16xf32>
    %1103 = arith.select %1099, %1101, %1102 : vector<16x16xi1>, vector<16x16xf32>
    %1104 = arith.addf %1097, %1103 : vector<16x16xf32>
    %c23_i32_567 = arith.constant 23 : i32
    %1105 = vector.broadcast %c23_i32_567 : i32 to vector<16x16xi32>
    %1106 = arith.cmpi eq, %30, %1105 : vector<16x16xi32>
    %c23_568 = arith.constant 23 : index
    %c4_569 = arith.constant 4 : index
    %1107 = memref.load %arg1[%c23_568, %c4_569] : memref<32x8xf32, #tpu.memory_space<smem>>
    %cst_570 = arith.constant 0.000000e+00 : f32
    %1108 = vector.broadcast %1107 : f32 to vector<16x16xf32>
    %1109 = vector.broadcast %cst_570 : f32 to vector<16x16xf32>
    %1110 = arith.select %1106, %1108, %1109 : vector<16x16xi1>, vector<16x16xf32>
    %1111 = arith.addf %1104, %1110 : vector<16x16xf32>
    %c24_i32_571 = arith.constant 24 : i32
    %1112 = vector.broadcast %c24_i32_571 : i32 to vector<16x16xi32>
    %1113 = arith.cmpi eq, %30, %1112 : vector<16x16xi32>
    %c24_572 = arith.constant 24 : index
    %c4_573 = arith.constant 4 : index
    %1114 = memref.load %arg1[%c24_572, %c4_573] : memref<32x8xf32, #tpu.memory_space<smem>>
    %cst_574 = arith.constant 0.000000e+00 : f32
    %1115 = vector.broadcast %1114 : f32 to vector<16x16xf32>
    %1116 = vector.broadcast %cst_574 : f32 to vector<16x16xf32>
    %1117 = arith.select %1113, %1115, %1116 : vector<16x16xi1>, vector<16x16xf32>
    %1118 = arith.addf %1111, %1117 : vector<16x16xf32>
    %c25_i32_575 = arith.constant 25 : i32
    %1119 = vector.broadcast %c25_i32_575 : i32 to vector<16x16xi32>
    %1120 = arith.cmpi eq, %30, %1119 : vector<16x16xi32>
    %c25_576 = arith.constant 25 : index
    %c4_577 = arith.constant 4 : index
    %1121 = memref.load %arg1[%c25_576, %c4_577] : memref<32x8xf32, #tpu.memory_space<smem>>
    %cst_578 = arith.constant 0.000000e+00 : f32
    %1122 = vector.broadcast %1121 : f32 to vector<16x16xf32>
    %1123 = vector.broadcast %cst_578 : f32 to vector<16x16xf32>
    %1124 = arith.select %1120, %1122, %1123 : vector<16x16xi1>, vector<16x16xf32>
    %1125 = arith.addf %1118, %1124 : vector<16x16xf32>
    %c26_i32_579 = arith.constant 26 : i32
    %1126 = vector.broadcast %c26_i32_579 : i32 to vector<16x16xi32>
    %1127 = arith.cmpi eq, %30, %1126 : vector<16x16xi32>
    %c26_580 = arith.constant 26 : index
    %c4_581 = arith.constant 4 : index
    %1128 = memref.load %arg1[%c26_580, %c4_581] : memref<32x8xf32, #tpu.memory_space<smem>>
    %cst_582 = arith.constant 0.000000e+00 : f32
    %1129 = vector.broadcast %1128 : f32 to vector<16x16xf32>
    %1130 = vector.broadcast %cst_582 : f32 to vector<16x16xf32>
    %1131 = arith.select %1127, %1129, %1130 : vector<16x16xi1>, vector<16x16xf32>
    %1132 = arith.addf %1125, %1131 : vector<16x16xf32>
    %c27_i32_583 = arith.constant 27 : i32
    %1133 = vector.broadcast %c27_i32_583 : i32 to vector<16x16xi32>
    %1134 = arith.cmpi eq, %30, %1133 : vector<16x16xi32>
    %c27_584 = arith.constant 27 : index
    %c4_585 = arith.constant 4 : index
    %1135 = memref.load %arg1[%c27_584, %c4_585] : memref<32x8xf32, #tpu.memory_space<smem>>
    %cst_586 = arith.constant 0.000000e+00 : f32
    %1136 = vector.broadcast %1135 : f32 to vector<16x16xf32>
    %1137 = vector.broadcast %cst_586 : f32 to vector<16x16xf32>
    %1138 = arith.select %1134, %1136, %1137 : vector<16x16xi1>, vector<16x16xf32>
    %1139 = arith.addf %1132, %1138 : vector<16x16xf32>
    %c28_i32_587 = arith.constant 28 : i32
    %1140 = vector.broadcast %c28_i32_587 : i32 to vector<16x16xi32>
    %1141 = arith.cmpi eq, %30, %1140 : vector<16x16xi32>
    %c28_588 = arith.constant 28 : index
    %c4_589 = arith.constant 4 : index
    %1142 = memref.load %arg1[%c28_588, %c4_589] : memref<32x8xf32, #tpu.memory_space<smem>>
    %cst_590 = arith.constant 0.000000e+00 : f32
    %1143 = vector.broadcast %1142 : f32 to vector<16x16xf32>
    %1144 = vector.broadcast %cst_590 : f32 to vector<16x16xf32>
    %1145 = arith.select %1141, %1143, %1144 : vector<16x16xi1>, vector<16x16xf32>
    %1146 = arith.addf %1139, %1145 : vector<16x16xf32>
    %c29_i32_591 = arith.constant 29 : i32
    %1147 = vector.broadcast %c29_i32_591 : i32 to vector<16x16xi32>
    %1148 = arith.cmpi eq, %30, %1147 : vector<16x16xi32>
    %c29_592 = arith.constant 29 : index
    %c4_593 = arith.constant 4 : index
    %1149 = memref.load %arg1[%c29_592, %c4_593] : memref<32x8xf32, #tpu.memory_space<smem>>
    %cst_594 = arith.constant 0.000000e+00 : f32
    %1150 = vector.broadcast %1149 : f32 to vector<16x16xf32>
    %1151 = vector.broadcast %cst_594 : f32 to vector<16x16xf32>
    %1152 = arith.select %1148, %1150, %1151 : vector<16x16xi1>, vector<16x16xf32>
    %1153 = arith.addf %1146, %1152 : vector<16x16xf32>
    %c30_i32_595 = arith.constant 30 : i32
    %1154 = vector.broadcast %c30_i32_595 : i32 to vector<16x16xi32>
    %1155 = arith.cmpi eq, %30, %1154 : vector<16x16xi32>
    %c30_596 = arith.constant 30 : index
    %c4_597 = arith.constant 4 : index
    %1156 = memref.load %arg1[%c30_596, %c4_597] : memref<32x8xf32, #tpu.memory_space<smem>>
    %cst_598 = arith.constant 0.000000e+00 : f32
    %1157 = vector.broadcast %1156 : f32 to vector<16x16xf32>
    %1158 = vector.broadcast %cst_598 : f32 to vector<16x16xf32>
    %1159 = arith.select %1155, %1157, %1158 : vector<16x16xi1>, vector<16x16xf32>
    %1160 = arith.addf %1153, %1159 : vector<16x16xf32>
    %c31_i32_599 = arith.constant 31 : i32
    %1161 = vector.broadcast %c31_i32_599 : i32 to vector<16x16xi32>
    %1162 = arith.cmpi eq, %30, %1161 : vector<16x16xi32>
    %c31_600 = arith.constant 31 : index
    %c4_601 = arith.constant 4 : index
    %1163 = memref.load %arg1[%c31_600, %c4_601] : memref<32x8xf32, #tpu.memory_space<smem>>
    %cst_602 = arith.constant 0.000000e+00 : f32
    %1164 = vector.broadcast %1163 : f32 to vector<16x16xf32>
    %1165 = vector.broadcast %cst_602 : f32 to vector<16x16xf32>
    %1166 = arith.select %1162, %1164, %1165 : vector<16x16xi1>, vector<16x16xf32>
    %1167 = arith.addf %1160, %1166 : vector<16x16xf32>
    %c4_603 = arith.constant 4 : index
    %c0_604 = arith.constant 0 : index
    %c0_605 = arith.constant 0 : index
    %1168 = vector.load %arg2[%c4_603, %c0_604, %c0_605] : memref<8x16x16xf32, #tpu.memory_space<vmem>>, vector<1x16x16xf32>
    %1169 = vector.shape_cast %1168 : vector<1x16x16xf32> to vector<16x16xf32>
    %1170 = vector.shape_cast %1167 : vector<16x16xf32> to vector<1x16x16xf32>
    tpu.vector_store %arg2[%c4_603, %c0_604, %c0_605], %1170 {strides = array<i32>} : memref<8x16x16xf32, #tpu.memory_space<vmem>>, vector<1x16x16xf32>,
    %cst_606 = arith.constant 0.000000e+00 : f32
    %1171 = vector.broadcast %cst_606 : f32 to vector<16x16xf32>
    %c0_i32_607 = arith.constant 0 : i32
    %1172 = vector.broadcast %c0_i32_607 : i32 to vector<16x16xi32>
    %1173 = arith.cmpi eq, %30, %1172 : vector<16x16xi32>
    %c0_608 = arith.constant 0 : index
    %c5_609 = arith.constant 5 : index
    %1174 = memref.load %arg1[%c0_608, %c5_609] : memref<32x8xf32, #tpu.memory_space<smem>>
    %cst_610 = arith.constant 0.000000e+00 : f32
    %1175 = vector.broadcast %1174 : f32 to vector<16x16xf32>
    %1176 = vector.broadcast %cst_610 : f32 to vector<16x16xf32>
    %1177 = arith.select %1173, %1175, %1176 : vector<16x16xi1>, vector<16x16xf32>
    %1178 = arith.addf %1171, %1177 : vector<16x16xf32>
    %c1_i32_611 = arith.constant 1 : i32
    %1179 = vector.broadcast %c1_i32_611 : i32 to vector<16x16xi32>
    %1180 = arith.cmpi eq, %30, %1179 : vector<16x16xi32>
    %c1_612 = arith.constant 1 : index
    %c5_613 = arith.constant 5 : index
    %1181 = memref.load %arg1[%c1_612, %c5_613] : memref<32x8xf32, #tpu.memory_space<smem>>
    %cst_614 = arith.constant 0.000000e+00 : f32
    %1182 = vector.broadcast %1181 : f32 to vector<16x16xf32>
    %1183 = vector.broadcast %cst_614 : f32 to vector<16x16xf32>
    %1184 = arith.select %1180, %1182, %1183 : vector<16x16xi1>, vector<16x16xf32>
    %1185 = arith.addf %1178, %1184 : vector<16x16xf32>
    %c2_i32_615 = arith.constant 2 : i32
    %1186 = vector.broadcast %c2_i32_615 : i32 to vector<16x16xi32>
    %1187 = arith.cmpi eq, %30, %1186 : vector<16x16xi32>
    %c2_616 = arith.constant 2 : index
    %c5_617 = arith.constant 5 : index
    %1188 = memref.load %arg1[%c2_616, %c5_617] : memref<32x8xf32, #tpu.memory_space<smem>>
    %cst_618 = arith.constant 0.000000e+00 : f32
    %1189 = vector.broadcast %1188 : f32 to vector<16x16xf32>
    %1190 = vector.broadcast %cst_618 : f32 to vector<16x16xf32>
    %1191 = arith.select %1187, %1189, %1190 : vector<16x16xi1>, vector<16x16xf32>
    %1192 = arith.addf %1185, %1191 : vector<16x16xf32>
    %c3_i32_619 = arith.constant 3 : i32
    %1193 = vector.broadcast %c3_i32_619 : i32 to vector<16x16xi32>
    %1194 = arith.cmpi eq, %30, %1193 : vector<16x16xi32>
    %c3_620 = arith.constant 3 : index
    %c5_621 = arith.constant 5 : index
    %1195 = memref.load %arg1[%c3_620, %c5_621] : memref<32x8xf32, #tpu.memory_space<smem>>
    %cst_622 = arith.constant 0.000000e+00 : f32
    %1196 = vector.broadcast %1195 : f32 to vector<16x16xf32>
    %1197 = vector.broadcast %cst_622 : f32 to vector<16x16xf32>
    %1198 = arith.select %1194, %1196, %1197 : vector<16x16xi1>, vector<16x16xf32>
    %1199 = arith.addf %1192, %1198 : vector<16x16xf32>
    %c4_i32_623 = arith.constant 4 : i32
    %1200 = vector.broadcast %c4_i32_623 : i32 to vector<16x16xi32>
    %1201 = arith.cmpi eq, %30, %1200 : vector<16x16xi32>
    %c4_624 = arith.constant 4 : index
    %c5_625 = arith.constant 5 : index
    %1202 = memref.load %arg1[%c4_624, %c5_625] : memref<32x8xf32, #tpu.memory_space<smem>>
    %cst_626 = arith.constant 0.000000e+00 : f32
    %1203 = vector.broadcast %1202 : f32 to vector<16x16xf32>
    %1204 = vector.broadcast %cst_626 : f32 to vector<16x16xf32>
    %1205 = arith.select %1201, %1203, %1204 : vector<16x16xi1>, vector<16x16xf32>
    %1206 = arith.addf %1199, %1205 : vector<16x16xf32>
    %c5_i32_627 = arith.constant 5 : i32
    %1207 = vector.broadcast %c5_i32_627 : i32 to vector<16x16xi32>
    %1208 = arith.cmpi eq, %30, %1207 : vector<16x16xi32>
    %c5_628 = arith.constant 5 : index
    %c5_629 = arith.constant 5 : index
    %1209 = memref.load %arg1[%c5_628, %c5_629] : memref<32x8xf32, #tpu.memory_space<smem>>
    %cst_630 = arith.constant 0.000000e+00 : f32
    %1210 = vector.broadcast %1209 : f32 to vector<16x16xf32>
    %1211 = vector.broadcast %cst_630 : f32 to vector<16x16xf32>
    %1212 = arith.select %1208, %1210, %1211 : vector<16x16xi1>, vector<16x16xf32>
    %1213 = arith.addf %1206, %1212 : vector<16x16xf32>
    %c6_i32_631 = arith.constant 6 : i32
    %1214 = vector.broadcast %c6_i32_631 : i32 to vector<16x16xi32>
    %1215 = arith.cmpi eq, %30, %1214 : vector<16x16xi32>
    %c6_632 = arith.constant 6 : index
    %c5_633 = arith.constant 5 : index
    %1216 = memref.load %arg1[%c6_632, %c5_633] : memref<32x8xf32, #tpu.memory_space<smem>>
    %cst_634 = arith.constant 0.000000e+00 : f32
    %1217 = vector.broadcast %1216 : f32 to vector<16x16xf32>
    %1218 = vector.broadcast %cst_634 : f32 to vector<16x16xf32>
    %1219 = arith.select %1215, %1217, %1218 : vector<16x16xi1>, vector<16x16xf32>
    %1220 = arith.addf %1213, %1219 : vector<16x16xf32>
    %c7_i32_635 = arith.constant 7 : i32
    %1221 = vector.broadcast %c7_i32_635 : i32 to vector<16x16xi32>
    %1222 = arith.cmpi eq, %30, %1221 : vector<16x16xi32>
    %c7_636 = arith.constant 7 : index
    %c5_637 = arith.constant 5 : index
    %1223 = memref.load %arg1[%c7_636, %c5_637] : memref<32x8xf32, #tpu.memory_space<smem>>
    %cst_638 = arith.constant 0.000000e+00 : f32
    %1224 = vector.broadcast %1223 : f32 to vector<16x16xf32>
    %1225 = vector.broadcast %cst_638 : f32 to vector<16x16xf32>
    %1226 = arith.select %1222, %1224, %1225 : vector<16x16xi1>, vector<16x16xf32>
    %1227 = arith.addf %1220, %1226 : vector<16x16xf32>
    %c8_i32_639 = arith.constant 8 : i32
    %1228 = vector.broadcast %c8_i32_639 : i32 to vector<16x16xi32>
    %1229 = arith.cmpi eq, %30, %1228 : vector<16x16xi32>
    %c8_640 = arith.constant 8 : index
    %c5_641 = arith.constant 5 : index
    %1230 = memref.load %arg1[%c8_640, %c5_641] : memref<32x8xf32, #tpu.memory_space<smem>>
    %cst_642 = arith.constant 0.000000e+00 : f32
    %1231 = vector.broadcast %1230 : f32 to vector<16x16xf32>
    %1232 = vector.broadcast %cst_642 : f32 to vector<16x16xf32>
    %1233 = arith.select %1229, %1231, %1232 : vector<16x16xi1>, vector<16x16xf32>
    %1234 = arith.addf %1227, %1233 : vector<16x16xf32>
    %c9_i32_643 = arith.constant 9 : i32
    %1235 = vector.broadcast %c9_i32_643 : i32 to vector<16x16xi32>
    %1236 = arith.cmpi eq, %30, %1235 : vector<16x16xi32>
    %c9_644 = arith.constant 9 : index
    %c5_645 = arith.constant 5 : index
    %1237 = memref.load %arg1[%c9_644, %c5_645] : memref<32x8xf32, #tpu.memory_space<smem>>
    %cst_646 = arith.constant 0.000000e+00 : f32
    %1238 = vector.broadcast %1237 : f32 to vector<16x16xf32>
    %1239 = vector.broadcast %cst_646 : f32 to vector<16x16xf32>
    %1240 = arith.select %1236, %1238, %1239 : vector<16x16xi1>, vector<16x16xf32>
    %1241 = arith.addf %1234, %1240 : vector<16x16xf32>
    %c10_i32_647 = arith.constant 10 : i32
    %1242 = vector.broadcast %c10_i32_647 : i32 to vector<16x16xi32>
    %1243 = arith.cmpi eq, %30, %1242 : vector<16x16xi32>
    %c10_648 = arith.constant 10 : index
    %c5_649 = arith.constant 5 : index
    %1244 = memref.load %arg1[%c10_648, %c5_649] : memref<32x8xf32, #tpu.memory_space<smem>>
    %cst_650 = arith.constant 0.000000e+00 : f32
    %1245 = vector.broadcast %1244 : f32 to vector<16x16xf32>
    %1246 = vector.broadcast %cst_650 : f32 to vector<16x16xf32>
    %1247 = arith.select %1243, %1245, %1246 : vector<16x16xi1>, vector<16x16xf32>
    %1248 = arith.addf %1241, %1247 : vector<16x16xf32>
    %c11_i32_651 = arith.constant 11 : i32
    %1249 = vector.broadcast %c11_i32_651 : i32 to vector<16x16xi32>
    %1250 = arith.cmpi eq, %30, %1249 : vector<16x16xi32>
    %c11_652 = arith.constant 11 : index
    %c5_653 = arith.constant 5 : index
    %1251 = memref.load %arg1[%c11_652, %c5_653] : memref<32x8xf32, #tpu.memory_space<smem>>
    %cst_654 = arith.constant 0.000000e+00 : f32
    %1252 = vector.broadcast %1251 : f32 to vector<16x16xf32>
    %1253 = vector.broadcast %cst_654 : f32 to vector<16x16xf32>
    %1254 = arith.select %1250, %1252, %1253 : vector<16x16xi1>, vector<16x16xf32>
    %1255 = arith.addf %1248, %1254 : vector<16x16xf32>
    %c12_i32_655 = arith.constant 12 : i32
    %1256 = vector.broadcast %c12_i32_655 : i32 to vector<16x16xi32>
    %1257 = arith.cmpi eq, %30, %1256 : vector<16x16xi32>
    %c12_656 = arith.constant 12 : index
    %c5_657 = arith.constant 5 : index
    %1258 = memref.load %arg1[%c12_656, %c5_657] : memref<32x8xf32, #tpu.memory_space<smem>>
    %cst_658 = arith.constant 0.000000e+00 : f32
    %1259 = vector.broadcast %1258 : f32 to vector<16x16xf32>
    %1260 = vector.broadcast %cst_658 : f32 to vector<16x16xf32>
    %1261 = arith.select %1257, %1259, %1260 : vector<16x16xi1>, vector<16x16xf32>
    %1262 = arith.addf %1255, %1261 : vector<16x16xf32>
    %c13_i32_659 = arith.constant 13 : i32
    %1263 = vector.broadcast %c13_i32_659 : i32 to vector<16x16xi32>
    %1264 = arith.cmpi eq, %30, %1263 : vector<16x16xi32>
    %c13_660 = arith.constant 13 : index
    %c5_661 = arith.constant 5 : index
    %1265 = memref.load %arg1[%c13_660, %c5_661] : memref<32x8xf32, #tpu.memory_space<smem>>
    %cst_662 = arith.constant 0.000000e+00 : f32
    %1266 = vector.broadcast %1265 : f32 to vector<16x16xf32>
    %1267 = vector.broadcast %cst_662 : f32 to vector<16x16xf32>
    %1268 = arith.select %1264, %1266, %1267 : vector<16x16xi1>, vector<16x16xf32>
    %1269 = arith.addf %1262, %1268 : vector<16x16xf32>
    %c14_i32_663 = arith.constant 14 : i32
    %1270 = vector.broadcast %c14_i32_663 : i32 to vector<16x16xi32>
    %1271 = arith.cmpi eq, %30, %1270 : vector<16x16xi32>
    %c14_664 = arith.constant 14 : index
    %c5_665 = arith.constant 5 : index
    %1272 = memref.load %arg1[%c14_664, %c5_665] : memref<32x8xf32, #tpu.memory_space<smem>>
    %cst_666 = arith.constant 0.000000e+00 : f32
    %1273 = vector.broadcast %1272 : f32 to vector<16x16xf32>
    %1274 = vector.broadcast %cst_666 : f32 to vector<16x16xf32>
    %1275 = arith.select %1271, %1273, %1274 : vector<16x16xi1>, vector<16x16xf32>
    %1276 = arith.addf %1269, %1275 : vector<16x16xf32>
    %c15_i32_667 = arith.constant 15 : i32
    %1277 = vector.broadcast %c15_i32_667 : i32 to vector<16x16xi32>
    %1278 = arith.cmpi eq, %30, %1277 : vector<16x16xi32>
    %c15_668 = arith.constant 15 : index
    %c5_669 = arith.constant 5 : index
    %1279 = memref.load %arg1[%c15_668, %c5_669] : memref<32x8xf32, #tpu.memory_space<smem>>
    %cst_670 = arith.constant 0.000000e+00 : f32
    %1280 = vector.broadcast %1279 : f32 to vector<16x16xf32>
    %1281 = vector.broadcast %cst_670 : f32 to vector<16x16xf32>
    %1282 = arith.select %1278, %1280, %1281 : vector<16x16xi1>, vector<16x16xf32>
    %1283 = arith.addf %1276, %1282 : vector<16x16xf32>
    %c16_i32_671 = arith.constant 16 : i32
    %1284 = vector.broadcast %c16_i32_671 : i32 to vector<16x16xi32>
    %1285 = arith.cmpi eq, %30, %1284 : vector<16x16xi32>
    %c16_672 = arith.constant 16 : index
    %c5_673 = arith.constant 5 : index
    %1286 = memref.load %arg1[%c16_672, %c5_673] : memref<32x8xf32, #tpu.memory_space<smem>>
    %cst_674 = arith.constant 0.000000e+00 : f32
    %1287 = vector.broadcast %1286 : f32 to vector<16x16xf32>
    %1288 = vector.broadcast %cst_674 : f32 to vector<16x16xf32>
    %1289 = arith.select %1285, %1287, %1288 : vector<16x16xi1>, vector<16x16xf32>
    %1290 = arith.addf %1283, %1289 : vector<16x16xf32>
    %c17_i32_675 = arith.constant 17 : i32
    %1291 = vector.broadcast %c17_i32_675 : i32 to vector<16x16xi32>
    %1292 = arith.cmpi eq, %30, %1291 : vector<16x16xi32>
    %c17_676 = arith.constant 17 : index
    %c5_677 = arith.constant 5 : index
    %1293 = memref.load %arg1[%c17_676, %c5_677] : memref<32x8xf32, #tpu.memory_space<smem>>
    %cst_678 = arith.constant 0.000000e+00 : f32
    %1294 = vector.broadcast %1293 : f32 to vector<16x16xf32>
    %1295 = vector.broadcast %cst_678 : f32 to vector<16x16xf32>
    %1296 = arith.select %1292, %1294, %1295 : vector<16x16xi1>, vector<16x16xf32>
    %1297 = arith.addf %1290, %1296 : vector<16x16xf32>
    %c18_i32_679 = arith.constant 18 : i32
    %1298 = vector.broadcast %c18_i32_679 : i32 to vector<16x16xi32>
    %1299 = arith.cmpi eq, %30, %1298 : vector<16x16xi32>
    %c18_680 = arith.constant 18 : index
    %c5_681 = arith.constant 5 : index
    %1300 = memref.load %arg1[%c18_680, %c5_681] : memref<32x8xf32, #tpu.memory_space<smem>>
    %cst_682 = arith.constant 0.000000e+00 : f32
    %1301 = vector.broadcast %1300 : f32 to vector<16x16xf32>
    %1302 = vector.broadcast %cst_682 : f32 to vector<16x16xf32>
    %1303 = arith.select %1299, %1301, %1302 : vector<16x16xi1>, vector<16x16xf32>
    %1304 = arith.addf %1297, %1303 : vector<16x16xf32>
    %c19_i32_683 = arith.constant 19 : i32
    %1305 = vector.broadcast %c19_i32_683 : i32 to vector<16x16xi32>
    %1306 = arith.cmpi eq, %30, %1305 : vector<16x16xi32>
    %c19_684 = arith.constant 19 : index
    %c5_685 = arith.constant 5 : index
    %1307 = memref.load %arg1[%c19_684, %c5_685] : memref<32x8xf32, #tpu.memory_space<smem>>
    %cst_686 = arith.constant 0.000000e+00 : f32
    %1308 = vector.broadcast %1307 : f32 to vector<16x16xf32>
    %1309 = vector.broadcast %cst_686 : f32 to vector<16x16xf32>
    %1310 = arith.select %1306, %1308, %1309 : vector<16x16xi1>, vector<16x16xf32>
    %1311 = arith.addf %1304, %1310 : vector<16x16xf32>
    %c20_i32_687 = arith.constant 20 : i32
    %1312 = vector.broadcast %c20_i32_687 : i32 to vector<16x16xi32>
    %1313 = arith.cmpi eq, %30, %1312 : vector<16x16xi32>
    %c20_688 = arith.constant 20 : index
    %c5_689 = arith.constant 5 : index
    %1314 = memref.load %arg1[%c20_688, %c5_689] : memref<32x8xf32, #tpu.memory_space<smem>>
    %cst_690 = arith.constant 0.000000e+00 : f32
    %1315 = vector.broadcast %1314 : f32 to vector<16x16xf32>
    %1316 = vector.broadcast %cst_690 : f32 to vector<16x16xf32>
    %1317 = arith.select %1313, %1315, %1316 : vector<16x16xi1>, vector<16x16xf32>
    %1318 = arith.addf %1311, %1317 : vector<16x16xf32>
    %c21_i32_691 = arith.constant 21 : i32
    %1319 = vector.broadcast %c21_i32_691 : i32 to vector<16x16xi32>
    %1320 = arith.cmpi eq, %30, %1319 : vector<16x16xi32>
    %c21_692 = arith.constant 21 : index
    %c5_693 = arith.constant 5 : index
    %1321 = memref.load %arg1[%c21_692, %c5_693] : memref<32x8xf32, #tpu.memory_space<smem>>
    %cst_694 = arith.constant 0.000000e+00 : f32
    %1322 = vector.broadcast %1321 : f32 to vector<16x16xf32>
    %1323 = vector.broadcast %cst_694 : f32 to vector<16x16xf32>
    %1324 = arith.select %1320, %1322, %1323 : vector<16x16xi1>, vector<16x16xf32>
    %1325 = arith.addf %1318, %1324 : vector<16x16xf32>
    %c22_i32_695 = arith.constant 22 : i32
    %1326 = vector.broadcast %c22_i32_695 : i32 to vector<16x16xi32>
    %1327 = arith.cmpi eq, %30, %1326 : vector<16x16xi32>
    %c22_696 = arith.constant 22 : index
    %c5_697 = arith.constant 5 : index
    %1328 = memref.load %arg1[%c22_696, %c5_697] : memref<32x8xf32, #tpu.memory_space<smem>>
    %cst_698 = arith.constant 0.000000e+00 : f32
    %1329 = vector.broadcast %1328 : f32 to vector<16x16xf32>
    %1330 = vector.broadcast %cst_698 : f32 to vector<16x16xf32>
    %1331 = arith.select %1327, %1329, %1330 : vector<16x16xi1>, vector<16x16xf32>
    %1332 = arith.addf %1325, %1331 : vector<16x16xf32>
    %c23_i32_699 = arith.constant 23 : i32
    %1333 = vector.broadcast %c23_i32_699 : i32 to vector<16x16xi32>
    %1334 = arith.cmpi eq, %30, %1333 : vector<16x16xi32>
    %c23_700 = arith.constant 23 : index
    %c5_701 = arith.constant 5 : index
    %1335 = memref.load %arg1[%c23_700, %c5_701] : memref<32x8xf32, #tpu.memory_space<smem>>
    %cst_702 = arith.constant 0.000000e+00 : f32
    %1336 = vector.broadcast %1335 : f32 to vector<16x16xf32>
    %1337 = vector.broadcast %cst_702 : f32 to vector<16x16xf32>
    %1338 = arith.select %1334, %1336, %1337 : vector<16x16xi1>, vector<16x16xf32>
    %1339 = arith.addf %1332, %1338 : vector<16x16xf32>
    %c24_i32_703 = arith.constant 24 : i32
    %1340 = vector.broadcast %c24_i32_703 : i32 to vector<16x16xi32>
    %1341 = arith.cmpi eq, %30, %1340 : vector<16x16xi32>
    %c24_704 = arith.constant 24 : index
    %c5_705 = arith.constant 5 : index
    %1342 = memref.load %arg1[%c24_704, %c5_705] : memref<32x8xf32, #tpu.memory_space<smem>>
    %cst_706 = arith.constant 0.000000e+00 : f32
    %1343 = vector.broadcast %1342 : f32 to vector<16x16xf32>
    %1344 = vector.broadcast %cst_706 : f32 to vector<16x16xf32>
    %1345 = arith.select %1341, %1343, %1344 : vector<16x16xi1>, vector<16x16xf32>
    %1346 = arith.addf %1339, %1345 : vector<16x16xf32>
    %c25_i32_707 = arith.constant 25 : i32
    %1347 = vector.broadcast %c25_i32_707 : i32 to vector<16x16xi32>
    %1348 = arith.cmpi eq, %30, %1347 : vector<16x16xi32>
    %c25_708 = arith.constant 25 : index
    %c5_709 = arith.constant 5 : index
    %1349 = memref.load %arg1[%c25_708, %c5_709] : memref<32x8xf32, #tpu.memory_space<smem>>
    %cst_710 = arith.constant 0.000000e+00 : f32
    %1350 = vector.broadcast %1349 : f32 to vector<16x16xf32>
    %1351 = vector.broadcast %cst_710 : f32 to vector<16x16xf32>
    %1352 = arith.select %1348, %1350, %1351 : vector<16x16xi1>, vector<16x16xf32>
    %1353 = arith.addf %1346, %1352 : vector<16x16xf32>
    %c26_i32_711 = arith.constant 26 : i32
    %1354 = vector.broadcast %c26_i32_711 : i32 to vector<16x16xi32>
    %1355 = arith.cmpi eq, %30, %1354 : vector<16x16xi32>
    %c26_712 = arith.constant 26 : index
    %c5_713 = arith.constant 5 : index
    %1356 = memref.load %arg1[%c26_712, %c5_713] : memref<32x8xf32, #tpu.memory_space<smem>>
    %cst_714 = arith.constant 0.000000e+00 : f32
    %1357 = vector.broadcast %1356 : f32 to vector<16x16xf32>
    %1358 = vector.broadcast %cst_714 : f32 to vector<16x16xf32>
    %1359 = arith.select %1355, %1357, %1358 : vector<16x16xi1>, vector<16x16xf32>
    %1360 = arith.addf %1353, %1359 : vector<16x16xf32>
    %c27_i32_715 = arith.constant 27 : i32
    %1361 = vector.broadcast %c27_i32_715 : i32 to vector<16x16xi32>
    %1362 = arith.cmpi eq, %30, %1361 : vector<16x16xi32>
    %c27_716 = arith.constant 27 : index
    %c5_717 = arith.constant 5 : index
    %1363 = memref.load %arg1[%c27_716, %c5_717] : memref<32x8xf32, #tpu.memory_space<smem>>
    %cst_718 = arith.constant 0.000000e+00 : f32
    %1364 = vector.broadcast %1363 : f32 to vector<16x16xf32>
    %1365 = vector.broadcast %cst_718 : f32 to vector<16x16xf32>
    %1366 = arith.select %1362, %1364, %1365 : vector<16x16xi1>, vector<16x16xf32>
    %1367 = arith.addf %1360, %1366 : vector<16x16xf32>
    %c28_i32_719 = arith.constant 28 : i32
    %1368 = vector.broadcast %c28_i32_719 : i32 to vector<16x16xi32>
    %1369 = arith.cmpi eq, %30, %1368 : vector<16x16xi32>
    %c28_720 = arith.constant 28 : index
    %c5_721 = arith.constant 5 : index
    %1370 = memref.load %arg1[%c28_720, %c5_721] : memref<32x8xf32, #tpu.memory_space<smem>>
    %cst_722 = arith.constant 0.000000e+00 : f32
    %1371 = vector.broadcast %1370 : f32 to vector<16x16xf32>
    %1372 = vector.broadcast %cst_722 : f32 to vector<16x16xf32>
    %1373 = arith.select %1369, %1371, %1372 : vector<16x16xi1>, vector<16x16xf32>
    %1374 = arith.addf %1367, %1373 : vector<16x16xf32>
    %c29_i32_723 = arith.constant 29 : i32
    %1375 = vector.broadcast %c29_i32_723 : i32 to vector<16x16xi32>
    %1376 = arith.cmpi eq, %30, %1375 : vector<16x16xi32>
    %c29_724 = arith.constant 29 : index
    %c5_725 = arith.constant 5 : index
    %1377 = memref.load %arg1[%c29_724, %c5_725] : memref<32x8xf32, #tpu.memory_space<smem>>
    %cst_726 = arith.constant 0.000000e+00 : f32
    %1378 = vector.broadcast %1377 : f32 to vector<16x16xf32>
    %1379 = vector.broadcast %cst_726 : f32 to vector<16x16xf32>
    %1380 = arith.select %1376, %1378, %1379 : vector<16x16xi1>, vector<16x16xf32>
    %1381 = arith.addf %1374, %1380 : vector<16x16xf32>
    %c30_i32_727 = arith.constant 30 : i32
    %1382 = vector.broadcast %c30_i32_727 : i32 to vector<16x16xi32>
    %1383 = arith.cmpi eq, %30, %1382 : vector<16x16xi32>
    %c30_728 = arith.constant 30 : index
    %c5_729 = arith.constant 5 : index
    %1384 = memref.load %arg1[%c30_728, %c5_729] : memref<32x8xf32, #tpu.memory_space<smem>>
    %cst_730 = arith.constant 0.000000e+00 : f32
    %1385 = vector.broadcast %1384 : f32 to vector<16x16xf32>
    %1386 = vector.broadcast %cst_730 : f32 to vector<16x16xf32>
    %1387 = arith.select %1383, %1385, %1386 : vector<16x16xi1>, vector<16x16xf32>
    %1388 = arith.addf %1381, %1387 : vector<16x16xf32>
    %c31_i32_731 = arith.constant 31 : i32
    %1389 = vector.broadcast %c31_i32_731 : i32 to vector<16x16xi32>
    %1390 = arith.cmpi eq, %30, %1389 : vector<16x16xi32>
    %c31_732 = arith.constant 31 : index
    %c5_733 = arith.constant 5 : index
    %1391 = memref.load %arg1[%c31_732, %c5_733] : memref<32x8xf32, #tpu.memory_space<smem>>
    %cst_734 = arith.constant 0.000000e+00 : f32
    %1392 = vector.broadcast %1391 : f32 to vector<16x16xf32>
    %1393 = vector.broadcast %cst_734 : f32 to vector<16x16xf32>
    %1394 = arith.select %1390, %1392, %1393 : vector<16x16xi1>, vector<16x16xf32>
    %1395 = arith.addf %1388, %1394 : vector<16x16xf32>
    %c5_735 = arith.constant 5 : index
    %c0_736 = arith.constant 0 : index
    %c0_737 = arith.constant 0 : index
    %1396 = vector.load %arg2[%c5_735, %c0_736, %c0_737] : memref<8x16x16xf32, #tpu.memory_space<vmem>>, vector<1x16x16xf32>
    %1397 = vector.shape_cast %1396 : vector<1x16x16xf32> to vector<16x16xf32>
    %1398 = vector.shape_cast %1395 : vector<16x16xf32> to vector<1x16x16xf32>
    tpu.vector_store %arg2[%c5_735, %c0_736, %c0_737], %1398 {strides = array<i32>} : memref<8x16x16xf32, #tpu.memory_space<vmem>>, vector<1x16x16xf32>,
    %cst_738 = arith.constant 0.000000e+00 : f32
    %1399 = vector.broadcast %cst_738 : f32 to vector<16x16xf32>
    %c0_i32_739 = arith.constant 0 : i32
    %1400 = vector.broadcast %c0_i32_739 : i32 to vector<16x16xi32>
    %1401 = arith.cmpi eq, %30, %1400 : vector<16x16xi32>
    %c0_740 = arith.constant 0 : index
    %c6_741 = arith.constant 6 : index
    %1402 = memref.load %arg1[%c0_740, %c6_741] : memref<32x8xf32, #tpu.memory_space<smem>>
    %cst_742 = arith.constant 0.000000e+00 : f32
    %1403 = vector.broadcast %1402 : f32 to vector<16x16xf32>
    %1404 = vector.broadcast %cst_742 : f32 to vector<16x16xf32>
    %1405 = arith.select %1401, %1403, %1404 : vector<16x16xi1>, vector<16x16xf32>
    %1406 = arith.addf %1399, %1405 : vector<16x16xf32>
    %c1_i32_743 = arith.constant 1 : i32
    %1407 = vector.broadcast %c1_i32_743 : i32 to vector<16x16xi32>
    %1408 = arith.cmpi eq, %30, %1407 : vector<16x16xi32>
    %c1_744 = arith.constant 1 : index
    %c6_745 = arith.constant 6 : index
    %1409 = memref.load %arg1[%c1_744, %c6_745] : memref<32x8xf32, #tpu.memory_space<smem>>
    %cst_746 = arith.constant 0.000000e+00 : f32
    %1410 = vector.broadcast %1409 : f32 to vector<16x16xf32>
    %1411 = vector.broadcast %cst_746 : f32 to vector<16x16xf32>
    %1412 = arith.select %1408, %1410, %1411 : vector<16x16xi1>, vector<16x16xf32>
    %1413 = arith.addf %1406, %1412 : vector<16x16xf32>
    %c2_i32_747 = arith.constant 2 : i32
    %1414 = vector.broadcast %c2_i32_747 : i32 to vector<16x16xi32>
    %1415 = arith.cmpi eq, %30, %1414 : vector<16x16xi32>
    %c2_748 = arith.constant 2 : index
    %c6_749 = arith.constant 6 : index
    %1416 = memref.load %arg1[%c2_748, %c6_749] : memref<32x8xf32, #tpu.memory_space<smem>>
    %cst_750 = arith.constant 0.000000e+00 : f32
    %1417 = vector.broadcast %1416 : f32 to vector<16x16xf32>
    %1418 = vector.broadcast %cst_750 : f32 to vector<16x16xf32>
    %1419 = arith.select %1415, %1417, %1418 : vector<16x16xi1>, vector<16x16xf32>
    %1420 = arith.addf %1413, %1419 : vector<16x16xf32>
    %c3_i32_751 = arith.constant 3 : i32
    %1421 = vector.broadcast %c3_i32_751 : i32 to vector<16x16xi32>
    %1422 = arith.cmpi eq, %30, %1421 : vector<16x16xi32>
    %c3_752 = arith.constant 3 : index
    %c6_753 = arith.constant 6 : index
    %1423 = memref.load %arg1[%c3_752, %c6_753] : memref<32x8xf32, #tpu.memory_space<smem>>
    %cst_754 = arith.constant 0.000000e+00 : f32
    %1424 = vector.broadcast %1423 : f32 to vector<16x16xf32>
    %1425 = vector.broadcast %cst_754 : f32 to vector<16x16xf32>
    %1426 = arith.select %1422, %1424, %1425 : vector<16x16xi1>, vector<16x16xf32>
    %1427 = arith.addf %1420, %1426 : vector<16x16xf32>
    %c4_i32_755 = arith.constant 4 : i32
    %1428 = vector.broadcast %c4_i32_755 : i32 to vector<16x16xi32>
    %1429 = arith.cmpi eq, %30, %1428 : vector<16x16xi32>
    %c4_756 = arith.constant 4 : index
    %c6_757 = arith.constant 6 : index
    %1430 = memref.load %arg1[%c4_756, %c6_757] : memref<32x8xf32, #tpu.memory_space<smem>>
    %cst_758 = arith.constant 0.000000e+00 : f32
    %1431 = vector.broadcast %1430 : f32 to vector<16x16xf32>
    %1432 = vector.broadcast %cst_758 : f32 to vector<16x16xf32>
    %1433 = arith.select %1429, %1431, %1432 : vector<16x16xi1>, vector<16x16xf32>
    %1434 = arith.addf %1427, %1433 : vector<16x16xf32>
    %c5_i32_759 = arith.constant 5 : i32
    %1435 = vector.broadcast %c5_i32_759 : i32 to vector<16x16xi32>
    %1436 = arith.cmpi eq, %30, %1435 : vector<16x16xi32>
    %c5_760 = arith.constant 5 : index
    %c6_761 = arith.constant 6 : index
    %1437 = memref.load %arg1[%c5_760, %c6_761] : memref<32x8xf32, #tpu.memory_space<smem>>
    %cst_762 = arith.constant 0.000000e+00 : f32
    %1438 = vector.broadcast %1437 : f32 to vector<16x16xf32>
    %1439 = vector.broadcast %cst_762 : f32 to vector<16x16xf32>
    %1440 = arith.select %1436, %1438, %1439 : vector<16x16xi1>, vector<16x16xf32>
    %1441 = arith.addf %1434, %1440 : vector<16x16xf32>
    %c6_i32_763 = arith.constant 6 : i32
    %1442 = vector.broadcast %c6_i32_763 : i32 to vector<16x16xi32>
    %1443 = arith.cmpi eq, %30, %1442 : vector<16x16xi32>
    %c6_764 = arith.constant 6 : index
    %c6_765 = arith.constant 6 : index
    %1444 = memref.load %arg1[%c6_764, %c6_765] : memref<32x8xf32, #tpu.memory_space<smem>>
    %cst_766 = arith.constant 0.000000e+00 : f32
    %1445 = vector.broadcast %1444 : f32 to vector<16x16xf32>
    %1446 = vector.broadcast %cst_766 : f32 to vector<16x16xf32>
    %1447 = arith.select %1443, %1445, %1446 : vector<16x16xi1>, vector<16x16xf32>
    %1448 = arith.addf %1441, %1447 : vector<16x16xf32>
    %c7_i32_767 = arith.constant 7 : i32
    %1449 = vector.broadcast %c7_i32_767 : i32 to vector<16x16xi32>
    %1450 = arith.cmpi eq, %30, %1449 : vector<16x16xi32>
    %c7_768 = arith.constant 7 : index
    %c6_769 = arith.constant 6 : index
    %1451 = memref.load %arg1[%c7_768, %c6_769] : memref<32x8xf32, #tpu.memory_space<smem>>
    %cst_770 = arith.constant 0.000000e+00 : f32
    %1452 = vector.broadcast %1451 : f32 to vector<16x16xf32>
    %1453 = vector.broadcast %cst_770 : f32 to vector<16x16xf32>
    %1454 = arith.select %1450, %1452, %1453 : vector<16x16xi1>, vector<16x16xf32>
    %1455 = arith.addf %1448, %1454 : vector<16x16xf32>
    %c8_i32_771 = arith.constant 8 : i32
    %1456 = vector.broadcast %c8_i32_771 : i32 to vector<16x16xi32>
    %1457 = arith.cmpi eq, %30, %1456 : vector<16x16xi32>
    %c8_772 = arith.constant 8 : index
    %c6_773 = arith.constant 6 : index
    %1458 = memref.load %arg1[%c8_772, %c6_773] : memref<32x8xf32, #tpu.memory_space<smem>>
    %cst_774 = arith.constant 0.000000e+00 : f32
    %1459 = vector.broadcast %1458 : f32 to vector<16x16xf32>
    %1460 = vector.broadcast %cst_774 : f32 to vector<16x16xf32>
    %1461 = arith.select %1457, %1459, %1460 : vector<16x16xi1>, vector<16x16xf32>
    %1462 = arith.addf %1455, %1461 : vector<16x16xf32>
    %c9_i32_775 = arith.constant 9 : i32
    %1463 = vector.broadcast %c9_i32_775 : i32 to vector<16x16xi32>
    %1464 = arith.cmpi eq, %30, %1463 : vector<16x16xi32>
    %c9_776 = arith.constant 9 : index
    %c6_777 = arith.constant 6 : index
    %1465 = memref.load %arg1[%c9_776, %c6_777] : memref<32x8xf32, #tpu.memory_space<smem>>
    %cst_778 = arith.constant 0.000000e+00 : f32
    %1466 = vector.broadcast %1465 : f32 to vector<16x16xf32>
    %1467 = vector.broadcast %cst_778 : f32 to vector<16x16xf32>
    %1468 = arith.select %1464, %1466, %1467 : vector<16x16xi1>, vector<16x16xf32>
    %1469 = arith.addf %1462, %1468 : vector<16x16xf32>
    %c10_i32_779 = arith.constant 10 : i32
    %1470 = vector.broadcast %c10_i32_779 : i32 to vector<16x16xi32>
    %1471 = arith.cmpi eq, %30, %1470 : vector<16x16xi32>
    %c10_780 = arith.constant 10 : index
    %c6_781 = arith.constant 6 : index
    %1472 = memref.load %arg1[%c10_780, %c6_781] : memref<32x8xf32, #tpu.memory_space<smem>>
    %cst_782 = arith.constant 0.000000e+00 : f32
    %1473 = vector.broadcast %1472 : f32 to vector<16x16xf32>
    %1474 = vector.broadcast %cst_782 : f32 to vector<16x16xf32>
    %1475 = arith.select %1471, %1473, %1474 : vector<16x16xi1>, vector<16x16xf32>
    %1476 = arith.addf %1469, %1475 : vector<16x16xf32>
    %c11_i32_783 = arith.constant 11 : i32
    %1477 = vector.broadcast %c11_i32_783 : i32 to vector<16x16xi32>
    %1478 = arith.cmpi eq, %30, %1477 : vector<16x16xi32>
    %c11_784 = arith.constant 11 : index
    %c6_785 = arith.constant 6 : index
    %1479 = memref.load %arg1[%c11_784, %c6_785] : memref<32x8xf32, #tpu.memory_space<smem>>
    %cst_786 = arith.constant 0.000000e+00 : f32
    %1480 = vector.broadcast %1479 : f32 to vector<16x16xf32>
    %1481 = vector.broadcast %cst_786 : f32 to vector<16x16xf32>
    %1482 = arith.select %1478, %1480, %1481 : vector<16x16xi1>, vector<16x16xf32>
    %1483 = arith.addf %1476, %1482 : vector<16x16xf32>
    %c12_i32_787 = arith.constant 12 : i32
    %1484 = vector.broadcast %c12_i32_787 : i32 to vector<16x16xi32>
    %1485 = arith.cmpi eq, %30, %1484 : vector<16x16xi32>
    %c12_788 = arith.constant 12 : index
    %c6_789 = arith.constant 6 : index
    %1486 = memref.load %arg1[%c12_788, %c6_789] : memref<32x8xf32, #tpu.memory_space<smem>>
    %cst_790 = arith.constant 0.000000e+00 : f32
    %1487 = vector.broadcast %1486 : f32 to vector<16x16xf32>
    %1488 = vector.broadcast %cst_790 : f32 to vector<16x16xf32>
    %1489 = arith.select %1485, %1487, %1488 : vector<16x16xi1>, vector<16x16xf32>
    %1490 = arith.addf %1483, %1489 : vector<16x16xf32>
    %c13_i32_791 = arith.constant 13 : i32
    %1491 = vector.broadcast %c13_i32_791 : i32 to vector<16x16xi32>
    %1492 = arith.cmpi eq, %30, %1491 : vector<16x16xi32>
    %c13_792 = arith.constant 13 : index
    %c6_793 = arith.constant 6 : index
    %1493 = memref.load %arg1[%c13_792, %c6_793] : memref<32x8xf32, #tpu.memory_space<smem>>
    %cst_794 = arith.constant 0.000000e+00 : f32
    %1494 = vector.broadcast %1493 : f32 to vector<16x16xf32>
    %1495 = vector.broadcast %cst_794 : f32 to vector<16x16xf32>
    %1496 = arith.select %1492, %1494, %1495 : vector<16x16xi1>, vector<16x16xf32>
    %1497 = arith.addf %1490, %1496 : vector<16x16xf32>
    %c14_i32_795 = arith.constant 14 : i32
    %1498 = vector.broadcast %c14_i32_795 : i32 to vector<16x16xi32>
    %1499 = arith.cmpi eq, %30, %1498 : vector<16x16xi32>
    %c14_796 = arith.constant 14 : index
    %c6_797 = arith.constant 6 : index
    %1500 = memref.load %arg1[%c14_796, %c6_797] : memref<32x8xf32, #tpu.memory_space<smem>>
    %cst_798 = arith.constant 0.000000e+00 : f32
    %1501 = vector.broadcast %1500 : f32 to vector<16x16xf32>
    %1502 = vector.broadcast %cst_798 : f32 to vector<16x16xf32>
    %1503 = arith.select %1499, %1501, %1502 : vector<16x16xi1>, vector<16x16xf32>
    %1504 = arith.addf %1497, %1503 : vector<16x16xf32>
    %c15_i32_799 = arith.constant 15 : i32
    %1505 = vector.broadcast %c15_i32_799 : i32 to vector<16x16xi32>
    %1506 = arith.cmpi eq, %30, %1505 : vector<16x16xi32>
    %c15_800 = arith.constant 15 : index
    %c6_801 = arith.constant 6 : index
    %1507 = memref.load %arg1[%c15_800, %c6_801] : memref<32x8xf32, #tpu.memory_space<smem>>
    %cst_802 = arith.constant 0.000000e+00 : f32
    %1508 = vector.broadcast %1507 : f32 to vector<16x16xf32>
    %1509 = vector.broadcast %cst_802 : f32 to vector<16x16xf32>
    %1510 = arith.select %1506, %1508, %1509 : vector<16x16xi1>, vector<16x16xf32>
    %1511 = arith.addf %1504, %1510 : vector<16x16xf32>
    %c16_i32_803 = arith.constant 16 : i32
    %1512 = vector.broadcast %c16_i32_803 : i32 to vector<16x16xi32>
    %1513 = arith.cmpi eq, %30, %1512 : vector<16x16xi32>
    %c16_804 = arith.constant 16 : index
    %c6_805 = arith.constant 6 : index
    %1514 = memref.load %arg1[%c16_804, %c6_805] : memref<32x8xf32, #tpu.memory_space<smem>>
    %cst_806 = arith.constant 0.000000e+00 : f32
    %1515 = vector.broadcast %1514 : f32 to vector<16x16xf32>
    %1516 = vector.broadcast %cst_806 : f32 to vector<16x16xf32>
    %1517 = arith.select %1513, %1515, %1516 : vector<16x16xi1>, vector<16x16xf32>
    %1518 = arith.addf %1511, %1517 : vector<16x16xf32>
    %c17_i32_807 = arith.constant 17 : i32
    %1519 = vector.broadcast %c17_i32_807 : i32 to vector<16x16xi32>
    %1520 = arith.cmpi eq, %30, %1519 : vector<16x16xi32>
    %c17_808 = arith.constant 17 : index
    %c6_809 = arith.constant 6 : index
    %1521 = memref.load %arg1[%c17_808, %c6_809] : memref<32x8xf32, #tpu.memory_space<smem>>
    %cst_810 = arith.constant 0.000000e+00 : f32
    %1522 = vector.broadcast %1521 : f32 to vector<16x16xf32>
    %1523 = vector.broadcast %cst_810 : f32 to vector<16x16xf32>
    %1524 = arith.select %1520, %1522, %1523 : vector<16x16xi1>, vector<16x16xf32>
    %1525 = arith.addf %1518, %1524 : vector<16x16xf32>
    %c18_i32_811 = arith.constant 18 : i32
    %1526 = vector.broadcast %c18_i32_811 : i32 to vector<16x16xi32>
    %1527 = arith.cmpi eq, %30, %1526 : vector<16x16xi32>
    %c18_812 = arith.constant 18 : index
    %c6_813 = arith.constant 6 : index
    %1528 = memref.load %arg1[%c18_812, %c6_813] : memref<32x8xf32, #tpu.memory_space<smem>>
    %cst_814 = arith.constant 0.000000e+00 : f32
    %1529 = vector.broadcast %1528 : f32 to vector<16x16xf32>
    %1530 = vector.broadcast %cst_814 : f32 to vector<16x16xf32>
    %1531 = arith.select %1527, %1529, %1530 : vector<16x16xi1>, vector<16x16xf32>
    %1532 = arith.addf %1525, %1531 : vector<16x16xf32>
    %c19_i32_815 = arith.constant 19 : i32
    %1533 = vector.broadcast %c19_i32_815 : i32 to vector<16x16xi32>
    %1534 = arith.cmpi eq, %30, %1533 : vector<16x16xi32>
    %c19_816 = arith.constant 19 : index
    %c6_817 = arith.constant 6 : index
    %1535 = memref.load %arg1[%c19_816, %c6_817] : memref<32x8xf32, #tpu.memory_space<smem>>
    %cst_818 = arith.constant 0.000000e+00 : f32
    %1536 = vector.broadcast %1535 : f32 to vector<16x16xf32>
    %1537 = vector.broadcast %cst_818 : f32 to vector<16x16xf32>
    %1538 = arith.select %1534, %1536, %1537 : vector<16x16xi1>, vector<16x16xf32>
    %1539 = arith.addf %1532, %1538 : vector<16x16xf32>
    %c20_i32_819 = arith.constant 20 : i32
    %1540 = vector.broadcast %c20_i32_819 : i32 to vector<16x16xi32>
    %1541 = arith.cmpi eq, %30, %1540 : vector<16x16xi32>
    %c20_820 = arith.constant 20 : index
    %c6_821 = arith.constant 6 : index
    %1542 = memref.load %arg1[%c20_820, %c6_821] : memref<32x8xf32, #tpu.memory_space<smem>>
    %cst_822 = arith.constant 0.000000e+00 : f32
    %1543 = vector.broadcast %1542 : f32 to vector<16x16xf32>
    %1544 = vector.broadcast %cst_822 : f32 to vector<16x16xf32>
    %1545 = arith.select %1541, %1543, %1544 : vector<16x16xi1>, vector<16x16xf32>
    %1546 = arith.addf %1539, %1545 : vector<16x16xf32>
    %c21_i32_823 = arith.constant 21 : i32
    %1547 = vector.broadcast %c21_i32_823 : i32 to vector<16x16xi32>
    %1548 = arith.cmpi eq, %30, %1547 : vector<16x16xi32>
    %c21_824 = arith.constant 21 : index
    %c6_825 = arith.constant 6 : index
    %1549 = memref.load %arg1[%c21_824, %c6_825] : memref<32x8xf32, #tpu.memory_space<smem>>
    %cst_826 = arith.constant 0.000000e+00 : f32
    %1550 = vector.broadcast %1549 : f32 to vector<16x16xf32>
    %1551 = vector.broadcast %cst_826 : f32 to vector<16x16xf32>
    %1552 = arith.select %1548, %1550, %1551 : vector<16x16xi1>, vector<16x16xf32>
    %1553 = arith.addf %1546, %1552 : vector<16x16xf32>
    %c22_i32_827 = arith.constant 22 : i32
    %1554 = vector.broadcast %c22_i32_827 : i32 to vector<16x16xi32>
    %1555 = arith.cmpi eq, %30, %1554 : vector<16x16xi32>
    %c22_828 = arith.constant 22 : index
    %c6_829 = arith.constant 6 : index
    %1556 = memref.load %arg1[%c22_828, %c6_829] : memref<32x8xf32, #tpu.memory_space<smem>>
    %cst_830 = arith.constant 0.000000e+00 : f32
    %1557 = vector.broadcast %1556 : f32 to vector<16x16xf32>
    %1558 = vector.broadcast %cst_830 : f32 to vector<16x16xf32>
    %1559 = arith.select %1555, %1557, %1558 : vector<16x16xi1>, vector<16x16xf32>
    %1560 = arith.addf %1553, %1559 : vector<16x16xf32>
    %c23_i32_831 = arith.constant 23 : i32
    %1561 = vector.broadcast %c23_i32_831 : i32 to vector<16x16xi32>
    %1562 = arith.cmpi eq, %30, %1561 : vector<16x16xi32>
    %c23_832 = arith.constant 23 : index
    %c6_833 = arith.constant 6 : index
    %1563 = memref.load %arg1[%c23_832, %c6_833] : memref<32x8xf32, #tpu.memory_space<smem>>
    %cst_834 = arith.constant 0.000000e+00 : f32
    %1564 = vector.broadcast %1563 : f32 to vector<16x16xf32>
    %1565 = vector.broadcast %cst_834 : f32 to vector<16x16xf32>
    %1566 = arith.select %1562, %1564, %1565 : vector<16x16xi1>, vector<16x16xf32>
    %1567 = arith.addf %1560, %1566 : vector<16x16xf32>
    %c24_i32_835 = arith.constant 24 : i32
    %1568 = vector.broadcast %c24_i32_835 : i32 to vector<16x16xi32>
    %1569 = arith.cmpi eq, %30, %1568 : vector<16x16xi32>
    %c24_836 = arith.constant 24 : index
    %c6_837 = arith.constant 6 : index
    %1570 = memref.load %arg1[%c24_836, %c6_837] : memref<32x8xf32, #tpu.memory_space<smem>>
    %cst_838 = arith.constant 0.000000e+00 : f32
    %1571 = vector.broadcast %1570 : f32 to vector<16x16xf32>
    %1572 = vector.broadcast %cst_838 : f32 to vector<16x16xf32>
    %1573 = arith.select %1569, %1571, %1572 : vector<16x16xi1>, vector<16x16xf32>
    %1574 = arith.addf %1567, %1573 : vector<16x16xf32>
    %c25_i32_839 = arith.constant 25 : i32
    %1575 = vector.broadcast %c25_i32_839 : i32 to vector<16x16xi32>
    %1576 = arith.cmpi eq, %30, %1575 : vector<16x16xi32>
    %c25_840 = arith.constant 25 : index
    %c6_841 = arith.constant 6 : index
    %1577 = memref.load %arg1[%c25_840, %c6_841] : memref<32x8xf32, #tpu.memory_space<smem>>
    %cst_842 = arith.constant 0.000000e+00 : f32
    %1578 = vector.broadcast %1577 : f32 to vector<16x16xf32>
    %1579 = vector.broadcast %cst_842 : f32 to vector<16x16xf32>
    %1580 = arith.select %1576, %1578, %1579 : vector<16x16xi1>, vector<16x16xf32>
    %1581 = arith.addf %1574, %1580 : vector<16x16xf32>
    %c26_i32_843 = arith.constant 26 : i32
    %1582 = vector.broadcast %c26_i32_843 : i32 to vector<16x16xi32>
    %1583 = arith.cmpi eq, %30, %1582 : vector<16x16xi32>
    %c26_844 = arith.constant 26 : index
    %c6_845 = arith.constant 6 : index
    %1584 = memref.load %arg1[%c26_844, %c6_845] : memref<32x8xf32, #tpu.memory_space<smem>>
    %cst_846 = arith.constant 0.000000e+00 : f32
    %1585 = vector.broadcast %1584 : f32 to vector<16x16xf32>
    %1586 = vector.broadcast %cst_846 : f32 to vector<16x16xf32>
    %1587 = arith.select %1583, %1585, %1586 : vector<16x16xi1>, vector<16x16xf32>
    %1588 = arith.addf %1581, %1587 : vector<16x16xf32>
    %c27_i32_847 = arith.constant 27 : i32
    %1589 = vector.broadcast %c27_i32_847 : i32 to vector<16x16xi32>
    %1590 = arith.cmpi eq, %30, %1589 : vector<16x16xi32>
    %c27_848 = arith.constant 27 : index
    %c6_849 = arith.constant 6 : index
    %1591 = memref.load %arg1[%c27_848, %c6_849] : memref<32x8xf32, #tpu.memory_space<smem>>
    %cst_850 = arith.constant 0.000000e+00 : f32
    %1592 = vector.broadcast %1591 : f32 to vector<16x16xf32>
    %1593 = vector.broadcast %cst_850 : f32 to vector<16x16xf32>
    %1594 = arith.select %1590, %1592, %1593 : vector<16x16xi1>, vector<16x16xf32>
    %1595 = arith.addf %1588, %1594 : vector<16x16xf32>
    %c28_i32_851 = arith.constant 28 : i32
    %1596 = vector.broadcast %c28_i32_851 : i32 to vector<16x16xi32>
    %1597 = arith.cmpi eq, %30, %1596 : vector<16x16xi32>
    %c28_852 = arith.constant 28 : index
    %c6_853 = arith.constant 6 : index
    %1598 = memref.load %arg1[%c28_852, %c6_853] : memref<32x8xf32, #tpu.memory_space<smem>>
    %cst_854 = arith.constant 0.000000e+00 : f32
    %1599 = vector.broadcast %1598 : f32 to vector<16x16xf32>
    %1600 = vector.broadcast %cst_854 : f32 to vector<16x16xf32>
    %1601 = arith.select %1597, %1599, %1600 : vector<16x16xi1>, vector<16x16xf32>
    %1602 = arith.addf %1595, %1601 : vector<16x16xf32>
    %c29_i32_855 = arith.constant 29 : i32
    %1603 = vector.broadcast %c29_i32_855 : i32 to vector<16x16xi32>
    %1604 = arith.cmpi eq, %30, %1603 : vector<16x16xi32>
    %c29_856 = arith.constant 29 : index
    %c6_857 = arith.constant 6 : index
    %1605 = memref.load %arg1[%c29_856, %c6_857] : memref<32x8xf32, #tpu.memory_space<smem>>
    %cst_858 = arith.constant 0.000000e+00 : f32
    %1606 = vector.broadcast %1605 : f32 to vector<16x16xf32>
    %1607 = vector.broadcast %cst_858 : f32 to vector<16x16xf32>
    %1608 = arith.select %1604, %1606, %1607 : vector<16x16xi1>, vector<16x16xf32>
    %1609 = arith.addf %1602, %1608 : vector<16x16xf32>
    %c30_i32_859 = arith.constant 30 : i32
    %1610 = vector.broadcast %c30_i32_859 : i32 to vector<16x16xi32>
    %1611 = arith.cmpi eq, %30, %1610 : vector<16x16xi32>
    %c30_860 = arith.constant 30 : index
    %c6_861 = arith.constant 6 : index
    %1612 = memref.load %arg1[%c30_860, %c6_861] : memref<32x8xf32, #tpu.memory_space<smem>>
    %cst_862 = arith.constant 0.000000e+00 : f32
    %1613 = vector.broadcast %1612 : f32 to vector<16x16xf32>
    %1614 = vector.broadcast %cst_862 : f32 to vector<16x16xf32>
    %1615 = arith.select %1611, %1613, %1614 : vector<16x16xi1>, vector<16x16xf32>
    %1616 = arith.addf %1609, %1615 : vector<16x16xf32>
    %c31_i32_863 = arith.constant 31 : i32
    %1617 = vector.broadcast %c31_i32_863 : i32 to vector<16x16xi32>
    %1618 = arith.cmpi eq, %30, %1617 : vector<16x16xi32>
    %c31_864 = arith.constant 31 : index
    %c6_865 = arith.constant 6 : index
    %1619 = memref.load %arg1[%c31_864, %c6_865] : memref<32x8xf32, #tpu.memory_space<smem>>
    %cst_866 = arith.constant 0.000000e+00 : f32
    %1620 = vector.broadcast %1619 : f32 to vector<16x16xf32>
    %1621 = vector.broadcast %cst_866 : f32 to vector<16x16xf32>
    %1622 = arith.select %1618, %1620, %1621 : vector<16x16xi1>, vector<16x16xf32>
    %1623 = arith.addf %1616, %1622 : vector<16x16xf32>
    %c6_867 = arith.constant 6 : index
    %c0_868 = arith.constant 0 : index
    %c0_869 = arith.constant 0 : index
    %1624 = vector.load %arg2[%c6_867, %c0_868, %c0_869] : memref<8x16x16xf32, #tpu.memory_space<vmem>>, vector<1x16x16xf32>
    %1625 = vector.shape_cast %1624 : vector<1x16x16xf32> to vector<16x16xf32>
    %1626 = vector.shape_cast %1623 : vector<16x16xf32> to vector<1x16x16xf32>
    tpu.vector_store %arg2[%c6_867, %c0_868, %c0_869], %1626 {strides = array<i32>} : memref<8x16x16xf32, #tpu.memory_space<vmem>>, vector<1x16x16xf32>,
    %cst_870 = arith.constant 0.000000e+00 : f32
    %1627 = vector.broadcast %cst_870 : f32 to vector<16x16xf32>
    %c0_i32_871 = arith.constant 0 : i32
    %1628 = vector.broadcast %c0_i32_871 : i32 to vector<16x16xi32>
    %1629 = arith.cmpi eq, %30, %1628 : vector<16x16xi32>
    %c0_872 = arith.constant 0 : index
    %c7_873 = arith.constant 7 : index
    %1630 = memref.load %arg1[%c0_872, %c7_873] : memref<32x8xf32, #tpu.memory_space<smem>>
    %cst_874 = arith.constant 0.000000e+00 : f32
    %1631 = vector.broadcast %1630 : f32 to vector<16x16xf32>
    %1632 = vector.broadcast %cst_874 : f32 to vector<16x16xf32>
    %1633 = arith.select %1629, %1631, %1632 : vector<16x16xi1>, vector<16x16xf32>
    %1634 = arith.addf %1627, %1633 : vector<16x16xf32>
    %c1_i32_875 = arith.constant 1 : i32
    %1635 = vector.broadcast %c1_i32_875 : i32 to vector<16x16xi32>
    %1636 = arith.cmpi eq, %30, %1635 : vector<16x16xi32>
    %c1_876 = arith.constant 1 : index
    %c7_877 = arith.constant 7 : index
    %1637 = memref.load %arg1[%c1_876, %c7_877] : memref<32x8xf32, #tpu.memory_space<smem>>
    %cst_878 = arith.constant 0.000000e+00 : f32
    %1638 = vector.broadcast %1637 : f32 to vector<16x16xf32>
    %1639 = vector.broadcast %cst_878 : f32 to vector<16x16xf32>
    %1640 = arith.select %1636, %1638, %1639 : vector<16x16xi1>, vector<16x16xf32>
    %1641 = arith.addf %1634, %1640 : vector<16x16xf32>
    %c2_i32_879 = arith.constant 2 : i32
    %1642 = vector.broadcast %c2_i32_879 : i32 to vector<16x16xi32>
    %1643 = arith.cmpi eq, %30, %1642 : vector<16x16xi32>
    %c2_880 = arith.constant 2 : index
    %c7_881 = arith.constant 7 : index
    %1644 = memref.load %arg1[%c2_880, %c7_881] : memref<32x8xf32, #tpu.memory_space<smem>>
    %cst_882 = arith.constant 0.000000e+00 : f32
    %1645 = vector.broadcast %1644 : f32 to vector<16x16xf32>
    %1646 = vector.broadcast %cst_882 : f32 to vector<16x16xf32>
    %1647 = arith.select %1643, %1645, %1646 : vector<16x16xi1>, vector<16x16xf32>
    %1648 = arith.addf %1641, %1647 : vector<16x16xf32>
    %c3_i32_883 = arith.constant 3 : i32
    %1649 = vector.broadcast %c3_i32_883 : i32 to vector<16x16xi32>
    %1650 = arith.cmpi eq, %30, %1649 : vector<16x16xi32>
    %c3_884 = arith.constant 3 : index
    %c7_885 = arith.constant 7 : index
    %1651 = memref.load %arg1[%c3_884, %c7_885] : memref<32x8xf32, #tpu.memory_space<smem>>
    %cst_886 = arith.constant 0.000000e+00 : f32
    %1652 = vector.broadcast %1651 : f32 to vector<16x16xf32>
    %1653 = vector.broadcast %cst_886 : f32 to vector<16x16xf32>
    %1654 = arith.select %1650, %1652, %1653 : vector<16x16xi1>, vector<16x16xf32>
    %1655 = arith.addf %1648, %1654 : vector<16x16xf32>
    %c4_i32_887 = arith.constant 4 : i32
    %1656 = vector.broadcast %c4_i32_887 : i32 to vector<16x16xi32>
    %1657 = arith.cmpi eq, %30, %1656 : vector<16x16xi32>
    %c4_888 = arith.constant 4 : index
    %c7_889 = arith.constant 7 : index
    %1658 = memref.load %arg1[%c4_888, %c7_889] : memref<32x8xf32, #tpu.memory_space<smem>>
    %cst_890 = arith.constant 0.000000e+00 : f32
    %1659 = vector.broadcast %1658 : f32 to vector<16x16xf32>
    %1660 = vector.broadcast %cst_890 : f32 to vector<16x16xf32>
    %1661 = arith.select %1657, %1659, %1660 : vector<16x16xi1>, vector<16x16xf32>
    %1662 = arith.addf %1655, %1661 : vector<16x16xf32>
    %c5_i32_891 = arith.constant 5 : i32
    %1663 = vector.broadcast %c5_i32_891 : i32 to vector<16x16xi32>
    %1664 = arith.cmpi eq, %30, %1663 : vector<16x16xi32>
    %c5_892 = arith.constant 5 : index
    %c7_893 = arith.constant 7 : index
    %1665 = memref.load %arg1[%c5_892, %c7_893] : memref<32x8xf32, #tpu.memory_space<smem>>
    %cst_894 = arith.constant 0.000000e+00 : f32
    %1666 = vector.broadcast %1665 : f32 to vector<16x16xf32>
    %1667 = vector.broadcast %cst_894 : f32 to vector<16x16xf32>
    %1668 = arith.select %1664, %1666, %1667 : vector<16x16xi1>, vector<16x16xf32>
    %1669 = arith.addf %1662, %1668 : vector<16x16xf32>
    %c6_i32_895 = arith.constant 6 : i32
    %1670 = vector.broadcast %c6_i32_895 : i32 to vector<16x16xi32>
    %1671 = arith.cmpi eq, %30, %1670 : vector<16x16xi32>
    %c6_896 = arith.constant 6 : index
    %c7_897 = arith.constant 7 : index
    %1672 = memref.load %arg1[%c6_896, %c7_897] : memref<32x8xf32, #tpu.memory_space<smem>>
    %cst_898 = arith.constant 0.000000e+00 : f32
    %1673 = vector.broadcast %1672 : f32 to vector<16x16xf32>
    %1674 = vector.broadcast %cst_898 : f32 to vector<16x16xf32>
    %1675 = arith.select %1671, %1673, %1674 : vector<16x16xi1>, vector<16x16xf32>
    %1676 = arith.addf %1669, %1675 : vector<16x16xf32>
    %c7_i32_899 = arith.constant 7 : i32
    %1677 = vector.broadcast %c7_i32_899 : i32 to vector<16x16xi32>
    %1678 = arith.cmpi eq, %30, %1677 : vector<16x16xi32>
    %c7_900 = arith.constant 7 : index
    %c7_901 = arith.constant 7 : index
    %1679 = memref.load %arg1[%c7_900, %c7_901] : memref<32x8xf32, #tpu.memory_space<smem>>
    %cst_902 = arith.constant 0.000000e+00 : f32
    %1680 = vector.broadcast %1679 : f32 to vector<16x16xf32>
    %1681 = vector.broadcast %cst_902 : f32 to vector<16x16xf32>
    %1682 = arith.select %1678, %1680, %1681 : vector<16x16xi1>, vector<16x16xf32>
    %1683 = arith.addf %1676, %1682 : vector<16x16xf32>
    %c8_i32_903 = arith.constant 8 : i32
    %1684 = vector.broadcast %c8_i32_903 : i32 to vector<16x16xi32>
    %1685 = arith.cmpi eq, %30, %1684 : vector<16x16xi32>
    %c8_904 = arith.constant 8 : index
    %c7_905 = arith.constant 7 : index
    %1686 = memref.load %arg1[%c8_904, %c7_905] : memref<32x8xf32, #tpu.memory_space<smem>>
    %cst_906 = arith.constant 0.000000e+00 : f32
    %1687 = vector.broadcast %1686 : f32 to vector<16x16xf32>
    %1688 = vector.broadcast %cst_906 : f32 to vector<16x16xf32>
    %1689 = arith.select %1685, %1687, %1688 : vector<16x16xi1>, vector<16x16xf32>
    %1690 = arith.addf %1683, %1689 : vector<16x16xf32>
    %c9_i32_907 = arith.constant 9 : i32
    %1691 = vector.broadcast %c9_i32_907 : i32 to vector<16x16xi32>
    %1692 = arith.cmpi eq, %30, %1691 : vector<16x16xi32>
    %c9_908 = arith.constant 9 : index
    %c7_909 = arith.constant 7 : index
    %1693 = memref.load %arg1[%c9_908, %c7_909] : memref<32x8xf32, #tpu.memory_space<smem>>
    %cst_910 = arith.constant 0.000000e+00 : f32
    %1694 = vector.broadcast %1693 : f32 to vector<16x16xf32>
    %1695 = vector.broadcast %cst_910 : f32 to vector<16x16xf32>
    %1696 = arith.select %1692, %1694, %1695 : vector<16x16xi1>, vector<16x16xf32>
    %1697 = arith.addf %1690, %1696 : vector<16x16xf32>
    %c10_i32_911 = arith.constant 10 : i32
    %1698 = vector.broadcast %c10_i32_911 : i32 to vector<16x16xi32>
    %1699 = arith.cmpi eq, %30, %1698 : vector<16x16xi32>
    %c10_912 = arith.constant 10 : index
    %c7_913 = arith.constant 7 : index
    %1700 = memref.load %arg1[%c10_912, %c7_913] : memref<32x8xf32, #tpu.memory_space<smem>>
    %cst_914 = arith.constant 0.000000e+00 : f32
    %1701 = vector.broadcast %1700 : f32 to vector<16x16xf32>
    %1702 = vector.broadcast %cst_914 : f32 to vector<16x16xf32>
    %1703 = arith.select %1699, %1701, %1702 : vector<16x16xi1>, vector<16x16xf32>
    %1704 = arith.addf %1697, %1703 : vector<16x16xf32>
    %c11_i32_915 = arith.constant 11 : i32
    %1705 = vector.broadcast %c11_i32_915 : i32 to vector<16x16xi32>
    %1706 = arith.cmpi eq, %30, %1705 : vector<16x16xi32>
    %c11_916 = arith.constant 11 : index
    %c7_917 = arith.constant 7 : index
    %1707 = memref.load %arg1[%c11_916, %c7_917] : memref<32x8xf32, #tpu.memory_space<smem>>
    %cst_918 = arith.constant 0.000000e+00 : f32
    %1708 = vector.broadcast %1707 : f32 to vector<16x16xf32>
    %1709 = vector.broadcast %cst_918 : f32 to vector<16x16xf32>
    %1710 = arith.select %1706, %1708, %1709 : vector<16x16xi1>, vector<16x16xf32>
    %1711 = arith.addf %1704, %1710 : vector<16x16xf32>
    %c12_i32_919 = arith.constant 12 : i32
    %1712 = vector.broadcast %c12_i32_919 : i32 to vector<16x16xi32>
    %1713 = arith.cmpi eq, %30, %1712 : vector<16x16xi32>
    %c12_920 = arith.constant 12 : index
    %c7_921 = arith.constant 7 : index
    %1714 = memref.load %arg1[%c12_920, %c7_921] : memref<32x8xf32, #tpu.memory_space<smem>>
    %cst_922 = arith.constant 0.000000e+00 : f32
    %1715 = vector.broadcast %1714 : f32 to vector<16x16xf32>
    %1716 = vector.broadcast %cst_922 : f32 to vector<16x16xf32>
    %1717 = arith.select %1713, %1715, %1716 : vector<16x16xi1>, vector<16x16xf32>
    %1718 = arith.addf %1711, %1717 : vector<16x16xf32>
    %c13_i32_923 = arith.constant 13 : i32
    %1719 = vector.broadcast %c13_i32_923 : i32 to vector<16x16xi32>
    %1720 = arith.cmpi eq, %30, %1719 : vector<16x16xi32>
    %c13_924 = arith.constant 13 : index
    %c7_925 = arith.constant 7 : index
    %1721 = memref.load %arg1[%c13_924, %c7_925] : memref<32x8xf32, #tpu.memory_space<smem>>
    %cst_926 = arith.constant 0.000000e+00 : f32
    %1722 = vector.broadcast %1721 : f32 to vector<16x16xf32>
    %1723 = vector.broadcast %cst_926 : f32 to vector<16x16xf32>
    %1724 = arith.select %1720, %1722, %1723 : vector<16x16xi1>, vector<16x16xf32>
    %1725 = arith.addf %1718, %1724 : vector<16x16xf32>
    %c14_i32_927 = arith.constant 14 : i32
    %1726 = vector.broadcast %c14_i32_927 : i32 to vector<16x16xi32>
    %1727 = arith.cmpi eq, %30, %1726 : vector<16x16xi32>
    %c14_928 = arith.constant 14 : index
    %c7_929 = arith.constant 7 : index
    %1728 = memref.load %arg1[%c14_928, %c7_929] : memref<32x8xf32, #tpu.memory_space<smem>>
    %cst_930 = arith.constant 0.000000e+00 : f32
    %1729 = vector.broadcast %1728 : f32 to vector<16x16xf32>
    %1730 = vector.broadcast %cst_930 : f32 to vector<16x16xf32>
    %1731 = arith.select %1727, %1729, %1730 : vector<16x16xi1>, vector<16x16xf32>
    %1732 = arith.addf %1725, %1731 : vector<16x16xf32>
    %c15_i32_931 = arith.constant 15 : i32
    %1733 = vector.broadcast %c15_i32_931 : i32 to vector<16x16xi32>
    %1734 = arith.cmpi eq, %30, %1733 : vector<16x16xi32>
    %c15_932 = arith.constant 15 : index
    %c7_933 = arith.constant 7 : index
    %1735 = memref.load %arg1[%c15_932, %c7_933] : memref<32x8xf32, #tpu.memory_space<smem>>
    %cst_934 = arith.constant 0.000000e+00 : f32
    %1736 = vector.broadcast %1735 : f32 to vector<16x16xf32>
    %1737 = vector.broadcast %cst_934 : f32 to vector<16x16xf32>
    %1738 = arith.select %1734, %1736, %1737 : vector<16x16xi1>, vector<16x16xf32>
    %1739 = arith.addf %1732, %1738 : vector<16x16xf32>
    %c16_i32_935 = arith.constant 16 : i32
    %1740 = vector.broadcast %c16_i32_935 : i32 to vector<16x16xi32>
    %1741 = arith.cmpi eq, %30, %1740 : vector<16x16xi32>
    %c16_936 = arith.constant 16 : index
    %c7_937 = arith.constant 7 : index
    %1742 = memref.load %arg1[%c16_936, %c7_937] : memref<32x8xf32, #tpu.memory_space<smem>>
    %cst_938 = arith.constant 0.000000e+00 : f32
    %1743 = vector.broadcast %1742 : f32 to vector<16x16xf32>
    %1744 = vector.broadcast %cst_938 : f32 to vector<16x16xf32>
    %1745 = arith.select %1741, %1743, %1744 : vector<16x16xi1>, vector<16x16xf32>
    %1746 = arith.addf %1739, %1745 : vector<16x16xf32>
    %c17_i32_939 = arith.constant 17 : i32
    %1747 = vector.broadcast %c17_i32_939 : i32 to vector<16x16xi32>
    %1748 = arith.cmpi eq, %30, %1747 : vector<16x16xi32>
    %c17_940 = arith.constant 17 : index
    %c7_941 = arith.constant 7 : index
    %1749 = memref.load %arg1[%c17_940, %c7_941] : memref<32x8xf32, #tpu.memory_space<smem>>
    %cst_942 = arith.constant 0.000000e+00 : f32
    %1750 = vector.broadcast %1749 : f32 to vector<16x16xf32>
    %1751 = vector.broadcast %cst_942 : f32 to vector<16x16xf32>
    %1752 = arith.select %1748, %1750, %1751 : vector<16x16xi1>, vector<16x16xf32>
    %1753 = arith.addf %1746, %1752 : vector<16x16xf32>
    %c18_i32_943 = arith.constant 18 : i32
    %1754 = vector.broadcast %c18_i32_943 : i32 to vector<16x16xi32>
    %1755 = arith.cmpi eq, %30, %1754 : vector<16x16xi32>
    %c18_944 = arith.constant 18 : index
    %c7_945 = arith.constant 7 : index
    %1756 = memref.load %arg1[%c18_944, %c7_945] : memref<32x8xf32, #tpu.memory_space<smem>>
    %cst_946 = arith.constant 0.000000e+00 : f32
    %1757 = vector.broadcast %1756 : f32 to vector<16x16xf32>
    %1758 = vector.broadcast %cst_946 : f32 to vector<16x16xf32>
    %1759 = arith.select %1755, %1757, %1758 : vector<16x16xi1>, vector<16x16xf32>
    %1760 = arith.addf %1753, %1759 : vector<16x16xf32>
    %c19_i32_947 = arith.constant 19 : i32
    %1761 = vector.broadcast %c19_i32_947 : i32 to vector<16x16xi32>
    %1762 = arith.cmpi eq, %30, %1761 : vector<16x16xi32>
    %c19_948 = arith.constant 19 : index
    %c7_949 = arith.constant 7 : index
    %1763 = memref.load %arg1[%c19_948, %c7_949] : memref<32x8xf32, #tpu.memory_space<smem>>
    %cst_950 = arith.constant 0.000000e+00 : f32
    %1764 = vector.broadcast %1763 : f32 to vector<16x16xf32>
    %1765 = vector.broadcast %cst_950 : f32 to vector<16x16xf32>
    %1766 = arith.select %1762, %1764, %1765 : vector<16x16xi1>, vector<16x16xf32>
    %1767 = arith.addf %1760, %1766 : vector<16x16xf32>
    %c20_i32_951 = arith.constant 20 : i32
    %1768 = vector.broadcast %c20_i32_951 : i32 to vector<16x16xi32>
    %1769 = arith.cmpi eq, %30, %1768 : vector<16x16xi32>
    %c20_952 = arith.constant 20 : index
    %c7_953 = arith.constant 7 : index
    %1770 = memref.load %arg1[%c20_952, %c7_953] : memref<32x8xf32, #tpu.memory_space<smem>>
    %cst_954 = arith.constant 0.000000e+00 : f32
    %1771 = vector.broadcast %1770 : f32 to vector<16x16xf32>
    %1772 = vector.broadcast %cst_954 : f32 to vector<16x16xf32>
    %1773 = arith.select %1769, %1771, %1772 : vector<16x16xi1>, vector<16x16xf32>
    %1774 = arith.addf %1767, %1773 : vector<16x16xf32>
    %c21_i32_955 = arith.constant 21 : i32
    %1775 = vector.broadcast %c21_i32_955 : i32 to vector<16x16xi32>
    %1776 = arith.cmpi eq, %30, %1775 : vector<16x16xi32>
    %c21_956 = arith.constant 21 : index
    %c7_957 = arith.constant 7 : index
    %1777 = memref.load %arg1[%c21_956, %c7_957] : memref<32x8xf32, #tpu.memory_space<smem>>
    %cst_958 = arith.constant 0.000000e+00 : f32
    %1778 = vector.broadcast %1777 : f32 to vector<16x16xf32>
    %1779 = vector.broadcast %cst_958 : f32 to vector<16x16xf32>
    %1780 = arith.select %1776, %1778, %1779 : vector<16x16xi1>, vector<16x16xf32>
    %1781 = arith.addf %1774, %1780 : vector<16x16xf32>
    %c22_i32_959 = arith.constant 22 : i32
    %1782 = vector.broadcast %c22_i32_959 : i32 to vector<16x16xi32>
    %1783 = arith.cmpi eq, %30, %1782 : vector<16x16xi32>
    %c22_960 = arith.constant 22 : index
    %c7_961 = arith.constant 7 : index
    %1784 = memref.load %arg1[%c22_960, %c7_961] : memref<32x8xf32, #tpu.memory_space<smem>>
    %cst_962 = arith.constant 0.000000e+00 : f32
    %1785 = vector.broadcast %1784 : f32 to vector<16x16xf32>
    %1786 = vector.broadcast %cst_962 : f32 to vector<16x16xf32>
    %1787 = arith.select %1783, %1785, %1786 : vector<16x16xi1>, vector<16x16xf32>
    %1788 = arith.addf %1781, %1787 : vector<16x16xf32>
    %c23_i32_963 = arith.constant 23 : i32
    %1789 = vector.broadcast %c23_i32_963 : i32 to vector<16x16xi32>
    %1790 = arith.cmpi eq, %30, %1789 : vector<16x16xi32>
    %c23_964 = arith.constant 23 : index
    %c7_965 = arith.constant 7 : index
    %1791 = memref.load %arg1[%c23_964, %c7_965] : memref<32x8xf32, #tpu.memory_space<smem>>
    %cst_966 = arith.constant 0.000000e+00 : f32
    %1792 = vector.broadcast %1791 : f32 to vector<16x16xf32>
    %1793 = vector.broadcast %cst_966 : f32 to vector<16x16xf32>
    %1794 = arith.select %1790, %1792, %1793 : vector<16x16xi1>, vector<16x16xf32>
    %1795 = arith.addf %1788, %1794 : vector<16x16xf32>
    %c24_i32_967 = arith.constant 24 : i32
    %1796 = vector.broadcast %c24_i32_967 : i32 to vector<16x16xi32>
    %1797 = arith.cmpi eq, %30, %1796 : vector<16x16xi32>
    %c24_968 = arith.constant 24 : index
    %c7_969 = arith.constant 7 : index
    %1798 = memref.load %arg1[%c24_968, %c7_969] : memref<32x8xf32, #tpu.memory_space<smem>>
    %cst_970 = arith.constant 0.000000e+00 : f32
    %1799 = vector.broadcast %1798 : f32 to vector<16x16xf32>
    %1800 = vector.broadcast %cst_970 : f32 to vector<16x16xf32>
    %1801 = arith.select %1797, %1799, %1800 : vector<16x16xi1>, vector<16x16xf32>
    %1802 = arith.addf %1795, %1801 : vector<16x16xf32>
    %c25_i32_971 = arith.constant 25 : i32
    %1803 = vector.broadcast %c25_i32_971 : i32 to vector<16x16xi32>
    %1804 = arith.cmpi eq, %30, %1803 : vector<16x16xi32>
    %c25_972 = arith.constant 25 : index
    %c7_973 = arith.constant 7 : index
    %1805 = memref.load %arg1[%c25_972, %c7_973] : memref<32x8xf32, #tpu.memory_space<smem>>
    %cst_974 = arith.constant 0.000000e+00 : f32
    %1806 = vector.broadcast %1805 : f32 to vector<16x16xf32>
    %1807 = vector.broadcast %cst_974 : f32 to vector<16x16xf32>
    %1808 = arith.select %1804, %1806, %1807 : vector<16x16xi1>, vector<16x16xf32>
    %1809 = arith.addf %1802, %1808 : vector<16x16xf32>
    %c26_i32_975 = arith.constant 26 : i32
    %1810 = vector.broadcast %c26_i32_975 : i32 to vector<16x16xi32>
    %1811 = arith.cmpi eq, %30, %1810 : vector<16x16xi32>
    %c26_976 = arith.constant 26 : index
    %c7_977 = arith.constant 7 : index
    %1812 = memref.load %arg1[%c26_976, %c7_977] : memref<32x8xf32, #tpu.memory_space<smem>>
    %cst_978 = arith.constant 0.000000e+00 : f32
    %1813 = vector.broadcast %1812 : f32 to vector<16x16xf32>
    %1814 = vector.broadcast %cst_978 : f32 to vector<16x16xf32>
    %1815 = arith.select %1811, %1813, %1814 : vector<16x16xi1>, vector<16x16xf32>
    %1816 = arith.addf %1809, %1815 : vector<16x16xf32>
    %c27_i32_979 = arith.constant 27 : i32
    %1817 = vector.broadcast %c27_i32_979 : i32 to vector<16x16xi32>
    %1818 = arith.cmpi eq, %30, %1817 : vector<16x16xi32>
    %c27_980 = arith.constant 27 : index
    %c7_981 = arith.constant 7 : index
    %1819 = memref.load %arg1[%c27_980, %c7_981] : memref<32x8xf32, #tpu.memory_space<smem>>
    %cst_982 = arith.constant 0.000000e+00 : f32
    %1820 = vector.broadcast %1819 : f32 to vector<16x16xf32>
    %1821 = vector.broadcast %cst_982 : f32 to vector<16x16xf32>
    %1822 = arith.select %1818, %1820, %1821 : vector<16x16xi1>, vector<16x16xf32>
    %1823 = arith.addf %1816, %1822 : vector<16x16xf32>
    %c28_i32_983 = arith.constant 28 : i32
    %1824 = vector.broadcast %c28_i32_983 : i32 to vector<16x16xi32>
    %1825 = arith.cmpi eq, %30, %1824 : vector<16x16xi32>
    %c28_984 = arith.constant 28 : index
    %c7_985 = arith.constant 7 : index
    %1826 = memref.load %arg1[%c28_984, %c7_985] : memref<32x8xf32, #tpu.memory_space<smem>>
    %cst_986 = arith.constant 0.000000e+00 : f32
    %1827 = vector.broadcast %1826 : f32 to vector<16x16xf32>
    %1828 = vector.broadcast %cst_986 : f32 to vector<16x16xf32>
    %1829 = arith.select %1825, %1827, %1828 : vector<16x16xi1>, vector<16x16xf32>
    %1830 = arith.addf %1823, %1829 : vector<16x16xf32>
    %c29_i32_987 = arith.constant 29 : i32
    %1831 = vector.broadcast %c29_i32_987 : i32 to vector<16x16xi32>
    %1832 = arith.cmpi eq, %30, %1831 : vector<16x16xi32>
    %c29_988 = arith.constant 29 : index
    %c7_989 = arith.constant 7 : index
    %1833 = memref.load %arg1[%c29_988, %c7_989] : memref<32x8xf32, #tpu.memory_space<smem>>
    %cst_990 = arith.constant 0.000000e+00 : f32
    %1834 = vector.broadcast %1833 : f32 to vector<16x16xf32>
    %1835 = vector.broadcast %cst_990 : f32 to vector<16x16xf32>
    %1836 = arith.select %1832, %1834, %1835 : vector<16x16xi1>, vector<16x16xf32>
    %1837 = arith.addf %1830, %1836 : vector<16x16xf32>
    %c30_i32_991 = arith.constant 30 : i32
    %1838 = vector.broadcast %c30_i32_991 : i32 to vector<16x16xi32>
    %1839 = arith.cmpi eq, %30, %1838 : vector<16x16xi32>
    %c30_992 = arith.constant 30 : index
    %c7_993 = arith.constant 7 : index
    %1840 = memref.load %arg1[%c30_992, %c7_993] : memref<32x8xf32, #tpu.memory_space<smem>>
    %cst_994 = arith.constant 0.000000e+00 : f32
    %1841 = vector.broadcast %1840 : f32 to vector<16x16xf32>
    %1842 = vector.broadcast %cst_994 : f32 to vector<16x16xf32>
    %1843 = arith.select %1839, %1841, %1842 : vector<16x16xi1>, vector<16x16xf32>
    %1844 = arith.addf %1837, %1843 : vector<16x16xf32>
    %c31_i32_995 = arith.constant 31 : i32
    %1845 = vector.broadcast %c31_i32_995 : i32 to vector<16x16xi32>
    %1846 = arith.cmpi eq, %30, %1845 : vector<16x16xi32>
    %c31_996 = arith.constant 31 : index
    %c7_997 = arith.constant 7 : index
    %1847 = memref.load %arg1[%c31_996, %c7_997] : memref<32x8xf32, #tpu.memory_space<smem>>
    %cst_998 = arith.constant 0.000000e+00 : f32
    %1848 = vector.broadcast %1847 : f32 to vector<16x16xf32>
    %1849 = vector.broadcast %cst_998 : f32 to vector<16x16xf32>
    %1850 = arith.select %1846, %1848, %1849 : vector<16x16xi1>, vector<16x16xf32>
    %1851 = arith.addf %1844, %1850 : vector<16x16xf32>
    %c7_999 = arith.constant 7 : index
    %c0_1000 = arith.constant 0 : index
    %c0_1001 = arith.constant 0 : index
    %1852 = vector.load %arg2[%c7_999, %c0_1000, %c0_1001] : memref<8x16x16xf32, #tpu.memory_space<vmem>>, vector<1x16x16xf32>
    %1853 = vector.shape_cast %1852 : vector<1x16x16xf32> to vector<16x16xf32>
    %1854 = vector.shape_cast %1851 : vector<16x16xf32> to vector<1x16x16xf32>
    tpu.vector_store %arg2[%c7_999, %c0_1000, %c0_1001], %1854 {strides = array<i32>} : memref<8x16x16xf32, #tpu.memory_space<vmem>>, vector<1x16x16xf32>,
    return
  }
  func.func @transform_0(%arg0: i32) -> (i32, i32) {
    %c0_i32 = arith.constant 0 : i32
    %c0_i32_0 = arith.constant 0 : i32
    %c0_i32_1 = arith.constant 0 : i32
    return %c0_i32, %c0_i32_0 : i32, i32
  }
  func.func @transform_1(%arg0: i32) -> (i32, i32, i32) {
    %c0_i32 = arith.constant 0 : i32
    %c0_i32_0 = arith.constant 0 : i32
    %c0_i32_1 = arith.constant 0 : i32
    return %c0_i32, %arg0, %c0_i32_0 : i32, i32, i32
  }
}

</mosaic_0001>

<bundles_post_ra>
// kernel: tpu_custom_call.1
= control target key start
LH: loop header
LB: loop body
LE: loop exit
PB: predicated region body
PF: predicated region fallthrough
CT: control target
= control target key end

     0   :  { %s4498_s0 = inlined_call_operand.vmem [shape: f32[32,8], index: 0, kind: input, shape index: {}]   ;;  %s4499_s1 = inlined_call_operand.hbm [shape: f32[8,16,16], index: 1, kind: output, shape index: {}]  }
   0x1   :  { %4649 = sst [smem:[#allocation56_spill]] %s4499_s1 }
   0x2   :  { %6 = vsyncpa [#allocation4], 0 }
   0x3   :  { %7 = vsyncpa [#allocation3], 0  ;;  %s13_s8 = sshll.u32 %s4498_s0, 4  ;;  %s14_s8 = int_to_ptr.vmem [resolvable:$true] %s13_s8 }
   0x4   :  { %s1988_s9 = scalar_lea.vmem %s14_s8, 512  ;;  %p1993_p1 = scmp.lt.s32.totalorder %s14_s8, %s14_s8 }
   0x5   :  { %p1989_p0 = scmp.ne.s32.totalorder %s14_s8, %s1988_s9  ;;  %p1994_p2 = scmp.lt.s32.totalorder %s1988_s9, %s1988_s9 }
   0x7   :  { %p1995_p3 = por %p1994_p2, %p1993_p1 }
   0x9   :  { %p1996_p4 = pnand %p1995_p3, %p1989_p0 }
   0xb   :  { %1999 = shalt.err (!%p1996_p4)
}
   0xc   :  { %s2026_s10 = smov [#allocation2]   ;;  %s4500_s11 = smov 128  }
   0xd   :  { %s4501_s12 = smov 8  }
   0xe   :  { %19 = dma.vmem_to_smem %s14_s8, 512, %s2026_s10, [#allocation4], %s4500_s11, %s4500_s11, %s4501_s12  }
   0xf   :  { %2022 = dma.done.wait [#allocation4], 512  }
  0x10   :  { %2023 = vsyncadd [#allocation4], 4294966784 }
  0x11   :  { %23 = sfence }
  0x12   :  { %v25_v0 = vlaneseq  ;;  %s2047_s0 = sld [smem:[#allocation2]]  ;;  %v2029_v17 = vmov 0  }
  0x13   :  { %s2049_s13 = sld [smem:[#allocation2 + $0x80]] }
  0x14   :  { %v26_v1 = vshrl.u32 %v25_v0, 7  ;;  %v32_v2 = vand.u32 127, %v25_v0  ;;  %s2051_s14 = sld [smem:[#allocation2 + $0x100]] }
  0x15   :  { %s2053_s15 = sld [smem:[#allocation2 + $0x180]] }
  0x16   :  { %s2055_s16 = sld [smem:[#allocation2 + $0x200]]  ;;  %v27_v3 = vadd.s32 8, %v26_v1  ;;  %v33_v4 = vsub.s32 %v32_v2, %v26_v1 }
  0x17   :  { %s2057_s17 = sld [smem:[#allocation2 + $0x280]] }
  0x18   :  { %4650 = sst [smem:[#allocation8_spill]] %s2047_s0  ;;  %v34_v5 = vsub.s32 %v32_v2, %v27_v3  ;;  %v40_v6 = vsub.s32 0, %v33_v4  ;;  %vm35_vm2 = vcmp.gt.s32.totalorder %v33_v4, 0  ;;  %v80_v16 = vstv %s2047_s0  ;;  %s2147_s0 = sld [smem:[#allocation2 + $0x581]] }
  0x19   :  { %4651 = sst [smem:[#allocation9_spill]] %s2049_s13  ;;  %s2059_s18 = sld [smem:[#allocation2 + $0x300]]  ;;  %v2140_v18 = vsel %vm35_vm2, 16, %v2029_v17  ;;  %v88_v19 = vstv %s2049_s13 }
  0x1a   :  { %4652 = sst [smem:[#allocation10_spill]] %s2051_s14  ;;  %s2061_s19 = sld [smem:[#allocation2 + $0x380]]  ;;  %v2075_v7 = vmin.u32 %v40_v6, %v33_v4  ;;  %v43_v8 = vsub.s32 0, %v34_v5  ;;  %vm36_vm3 = vcmp.gt.s32.totalorder %v34_v5, 0  ;;  %v96_v20 = vstv %s2051_s14 }
  0x1b   :  { %4653 = sst [smem:[#allocation11_spill]] %s2053_s15  ;;  %s2063_s20 = sld [smem:[#allocation2 + $0x400]]  ;;  %v104_v21 = vstv %s2053_s15  ;;  %v2149_v22 = vsel %vm36_vm3, 16, %v2029_v17 }
  0x1c   :  { %4654 = sst [smem:[#allocation12_spill]] %s2055_s16  ;;  %s2065_s21 = sld [smem:[#allocation2 + $0x480]]  ;;  %v2085_v9 = vmin.u32 %v43_v8, %v34_v5  ;;  %vm47_vm0 = vcmp.gt.s32.totalorder %v2075_v7, 1  ;;  %v112_v23 = vstv %s2055_s16  ;;  %vm45_vm4 = vcmp.lt.s32.totalorder %v2075_v7, 8 }
  0x1d   :  { %4655 = sst [smem:[#allocation13_spill]] %s2057_s17  ;;  %s2067_s22 = sld [smem:[#allocation2 + $0x500]]  ;;  %v48_v10 = vsel %vm47_vm0, %v2075_v7, 1  ;;  %v120_v24 = vstv %s2057_s17 }
  0x1e   :  { %s2069_s23 = sld [smem:[#allocation2 + $0x580]]  ;;  %vm49_vm1 = vcmp.gt.s32.totalorder %v2085_v9, 1  ;;  %v51_v11 = vcvt.s32.f32 %v48_v10  ;;  %s2156_s13 = sld [smem:[#allocation2 + $0x681]]  ;;  %vm46_vm5 = vcmp.lt.s32.totalorder %v2085_v9, 8  ;;  %v403_v8 = vstv %s2147_s0 }
  0x1f   :  { %4656 = sst [smem:[#allocation14_spill]] %s2059_s18  ;;  %s2071_s24 = sld [smem:[#allocation2 + $0x600]]  ;;  %v50_v12 = vsel %vm49_vm1, %v2085_v9, 1  ;;  %v128_v25 = vstv %s2059_s18 }
  0x20   :  { %4657 = sst [smem:[#allocation15_spill]] %s2061_s19  ;;  %s2073_s25 = sld [smem:[#allocation2 + $0x680]]  ;;  %v52_v13 = vcvt.s32.f32 %v50_v12  ;;  %v54_v14 = vmul.f32 0.125, %v51_v11  ;;  %v136_v26 = vstv %s2061_s19 }
  0x21   :  { %4658 = sst [smem:[#allocation16_spill]] %s2063_s20  ;;  %v144_v27 = vstv %s2063_s20  ;;  %s2162_s15 = sld [smem:[#allocation2 + $0x701]] }
  0x22   :  { %4659 = sst [smem:[#allocation17_spill]] %s2065_s21  ;;  %s2077_s26 = sld [smem:[#allocation2 + $0x700]]  ;;  %v55_v15 = vmul.f32 0.125, %v52_v13  ;;  %1984 = vlog2.f32 %v54_v14  ;;  %v152_v28 = vstv %s2065_s21 }
  0x23   :  { %4660 = sst [smem:[#allocation18_spill]] %s2067_s22  ;;  %s2079_s27 = sld [smem:[#allocation2 + $0x780]]  ;;  %v160_v29 = vstv %s2067_s22 }
  0x24   :  { %4661 = sst [smem:[#allocation19_spill]] %s2069_s23  ;;  %s2081_s28 = sld [smem:[#allocation2 + $0x800]]  ;;  %1986 = vlog2.f32 %v55_v15  ;;  %v168_v30 = vstv %s2069_s23 }
  0x25   :  { %4662 = sst [smem:[#allocation20_spill]] %s2071_s24  ;;  %s2083_s29 = sld [smem:[#allocation2 + $0x880]]  ;;  %v176_v31 = vstv %s2071_s24 }
  0x26   :  { %4663 = sst [smem:[#allocation21_spill]] %s2073_s25  ;;  %s2088_s30 = sld [smem:[#allocation2 + $0x900]]  ;;  %v184_v32 = vstv %s2073_s25 }
  0x27   :  { %s2090_s2 = sld [smem:[#allocation2 + $0x980]]  ;;  %s2164_s14 = sld [smem:[#allocation2 + $0x781]]  ;;  %v421_v14 = vstv %s2162_s15 }
  0x28   :  { %4664 = sst [smem:[#allocation22_spill]] %s2077_s26  ;;  %s2093_s3 = sld [smem:[#allocation2 + $0xa00]]  ;;  %v192_v33 = vstv %s2077_s26 }
  0x29   :  { %4665 = sst [smem:[#allocation23_spill]] %s2079_s27  ;;  %s2095_s4 = sld [smem:[#allocation2 + $0xa80]]  ;;  %v200_v35 = vstv %s2079_s27 }
  0x2a   :  { %4666 = sst [smem:[#allocation24_spill]] %s2081_s28  ;;  %s2170_s18 = sld [smem:[#allocation2 + $0x801]]  ;;  %v208_v36 = vstv %s2081_s28 }
  0x2b   :  { %4667 = sst [smem:[#allocation25_spill]] %s2083_s29  ;;  %s2098_s5 = sld [smem:[#allocation2 + $0xb00]]  ;;  %v216_v37 = vstv %s2083_s29 }
  0x2c   :  { %4668 = sst [smem:[#allocation26_spill]] %s2088_s30  ;;  %s2100_s6 = sld [smem:[#allocation2 + $0xb80]]  ;;  %v1985_v34 = vpop.eup %1984  ;;  %v224_v38 = vstv %s2088_s30 }
  0x2d   :  { %4669 = sst [smem:[#allocation27_spill]] %s2090_s2  ;;  %s2103_s7 = sld [smem:[#allocation2 + $0xc00]]  ;;  %v57_v39 = vmul.f32 0.6931472, %v1985_v34  ;;  %v232_v40 = vstv %s2090_s2 }
  0x2e   :  { %4670 = sst [smem:[#allocation28_spill]] %s2093_s3  ;;  %s2105_s8 = sld [smem:[#allocation2 + $0xc80]]  ;;  %v240_v41 = vstv %s2093_s3  ;;  %v1987_v43 = vpop.eup %1986 }
  0x2f   :  { %4671 = sst [smem:[#allocation29_spill]] %s2095_s4  ;;  %s2107_s9 = sld [smem:[#allocation2 + $0xd00]]  ;;  %v248_v42 = vstv %s2095_s4  ;;  %v59_v48 = vmul.f32 0.6931472, %v1987_v43  ;;  %v61_v49 = vmul.f32 0.36067376, %v57_v39 }
  0x30   :  { %s2109_s10 = sld [smem:[#allocation2 + $0xd80]]  ;;  %s2172_s17 = sld [smem:[#allocation2 + $0x881]] }
  0x31   :  { %s2111_s11 = sld [smem:[#allocation2 + $0xe00]]  ;;  %s2178_s20 = sld [smem:[#allocation2 + $0x901]]  ;;  %v256_v44 = vstv %s2098_s5  ;;  %v62_v56 = vmul.f32 0.36067376, %v59_v48  ;;  %v63_v57 = vmul.f32 8.0, %v61_v49 }
  0x32   :  { %4672 = sst [smem:[#allocation30_spill]] %s2100_s6  ;;  %s2113_s12 = sld [smem:[#allocation2 + $0xe80]] }
  0x33   :  { %4673 = sst [smem:[#allocation31_spill]] %s2103_s7  ;;  %s2115_s1 = sld [smem:[#allocation2 + $0xf00]]  ;;  %v64_v0 = vmul.f32 8.0, %v62_v56  ;;  %v1975_v1 = vtrunc.f32 %v63_v57 }
  0x34   :  { %4674 = sst [smem:[#allocation32_spill]] %s2105_s8  ;;  %s2119_s7 = sld [smem:[#allocation2 + $0x1]] }
  0x35   :  { %4675 = sst [smem:[#allocation33_spill]] %s2107_s9  ;;  %s2117_s6 = sld [smem:[#allocation2 + $0xf80]]  ;;  %v1976_v10 = vcvt.f32.s32 %v1975_v1  ;;  %v1977_v11 = vtrunc.f32 %v64_v0 }
  0x36   :  { %4676 = sst [smem:[#allocation34_spill]] %s2109_s10  ;;  %s2121_s8 = sld [smem:[#allocation2 + $0x81]] }
  0x37   :  { %4677 = sst [smem:[#allocation35_spill]] %s2111_s11  ;;  %s2123_s10 = sld [smem:[#allocation2 + $0x101]]  ;;  %v1978_v39 = vcvt.f32.s32 %v1977_v11  ;;  %v67_v43 = vadd.s32 8, %v1976_v10 }
  0x38   :  { %4678 = sst [smem:[#allocation36_spill]] %s2113_s12  ;;  %s2125_s11 = sld [smem:[#allocation2 + $0x181]] }
  0x39   :  { %4679 = sst [smem:[#allocation37_spill]] %s2115_s1  ;;  %s2127_s12 = sld [smem:[#allocation2 + $0x201]]  ;;  %v320_v54 = vstv %s2115_s1  ;;  %v68_v13 = vadd.s32 8, %v1978_v39  ;;  %vm69_vm6 = vcmp.lt.s32.totalorder %v67_v43, 15 }
  0x3a   :  { %4681 = sst [smem:[#allocation39_spill]] %s2119_s7  ;;  %s2129_s9 = sld [smem:[#allocation2 + $0x281]]  ;;  %v70_v34 = vsel %vm69_vm6, %v67_v43, 15 }
  0x3b   :  { %4680 = sst [smem:[#allocation38_spill]] %s2117_s6  ;;  %s2131_s7 = sld [smem:[#allocation2 + $0x301]]  ;;  %vm71_vm7 = vcmp.lt.s32.totalorder %v68_v13, 15  ;;  %v73_v1 = vsel %vm45_vm4, %v2075_v7, %v70_v34 }
  0x3c   :  { %4682 = sst [smem:[#allocation40_spill]] %s2121_s8  ;;  %s2133_s6 = sld [smem:[#allocation2 + $0x381]]  ;;  %v72_v15 = vsel %vm71_vm7, %v68_v13, 15  ;;  %v2266_v17 = vadd.s32 %v73_v1, %v2140_v18 }
  0x3d   :  { %4683 = sst [smem:[#allocation41_spill]] %s2123_s10  ;;  %s4692_s19 = sld [smem:[#allocation30_spill]]  ;;  %v74_v48 = vsel %vm46_vm5, %v2085_v9, %v72_v15 }
  0x3e   :  { %4684 = sst [smem:[#allocation42_spill]] %s2125_s11  ;;  %s2136_s8 = sld [smem:[#allocation2 + $0x401]]  ;;  %v355_v61 = vstv %s2125_s11  ;;  %v2279_v7 = vadd.s32 %v74_v48, %v2149_v22  ;;  %vm77_vm8 = vcmp.eq.s32.totalorder %v2266_v17, 0  ;;  %vm4642_vm9 = vcmp.eq.s32.totalorder %v2266_v17, 1 }
  0x3f   :  { %4685 = sst [smem:[#allocation43_spill]] %s2127_s12  ;;  %s2138_s10 = sld [smem:[#allocation2 + $0x481]]  ;;  %v361_v62 = vstv %s2127_s12  ;;  %vm4643_vm10 = vcmp.eq.s32.totalorder %v2266_v17, 2  ;;  %v81_v9 = vsel %vm77_vm8, %v80_v16, 0.0  ;;  %v89_v18 = vsel %vm4642_vm9, %v88_v19, 0.0 }
  0x40   :  { %4686 = sst [smem:[#allocation44_spill]] %s2129_s9  ;;  %s4693_s21 = sld [smem:[#allocation31_spill]]  ;;  %v367_v63 = vstv %s2129_s9  ;;  %v97_v22 = vsel %vm4643_vm10, %v96_v20, 0.0  ;;  %vm4613_vm11 = vcmp.eq.s32.totalorder %v2266_v17, 3  ;;  %vm78_vm12 = vcmp.eq.s32.totalorder %v2279_v7, 0 }
  0x41   :  { %4687 = sst [smem:[#allocation45_spill]] %s2131_s7  ;;  %s2145_s7 = sld [smem:[#allocation2 + $0x501]]  ;;  %vm4641_vm13 = vcmp.eq.s32.totalorder %v2279_v7, 1  ;;  %v91_v13 = vadd.f32 %v89_v18, %v81_v9  ;;  %vm4647_vm14 = vcmp.eq.s32.totalorder %v2279_v7, 2  ;;  %v82_v15 = vsel %vm78_vm12, %v80_v16, 0.0 }
  0x42   :  { %4688 = sst [smem:[#allocation46_spill]] %s2133_s6  ;;  %s4694_s22 = sld [smem:[#allocation32_spill]]  ;;  %v379_v3 = vstv %s2133_s6  ;;  %v90_v34 = vsel %vm4641_vm13, %v88_v19, 0.0  ;;  %v98_v48 = vsel %vm4647_vm14, %v96_v20, 0.0  ;;  %vm4601_vm15 = vcmp.eq.s32.totalorder %v2279_v7, 3 }
  0x43   :  { %4690 = sst [smem:[#allocation48_spill]] %s2170_s18  ;;  %s2180_s23 = sld [smem:[#allocation2 + $0x981]]  ;;  %v264_v45 = vstv %s4692_s19  ;;  %v92_v1 = vadd.f32 %v90_v34, %v82_v15  ;;  %v99_v9 = vadd.f32 %v97_v22, %v91_v13  ;;  %v105_v16 = vsel %vm4613_vm11, %v104_v21, 0.0 }
  0x44   :  { %4691 = sst [smem:[#allocation49_spill]] %s2172_s17  ;;  %s4697_s26 = sld [smem:[#allocation34_spill]]  ;;  %v385_v4 = vstv %s2136_s8  ;;  %v106_v19 = vsel %vm4601_vm15, %v104_v21, 0.0  ;;  %vm4600_vm0 = vcmp.eq.s32.totalorder %v2266_v17, 4  ;;  %vm4597_vm1 = vcmp.eq.s32.totalorder %v2279_v7, 4 }
  0x45   :  { %4689 = sst [smem:[#allocation47_spill]] %s2138_s10  ;;  %s2154_s10 = sld [smem:[#allocation2 + $0x601]]  ;;  %vm4594_vm2 = vcmp.eq.s32.totalorder %v2266_v17, 5  ;;  %v100_v20 = vadd.f32 %v98_v48, %v92_v1  ;;  %v107_v22 = vadd.f32 %v105_v16, %v99_v9  ;;  %v113_v13 = vsel %vm4600_vm0, %v112_v23, 0.0 }
  0x46   :  { %s4696_s24 = sld [smem:[#allocation33_spill]]  ;;  %s4698_s25 = sld [smem:[#allocation35_spill]]  ;;  %v272_v46 = vstv %s4693_s21  ;;  %vm4596_vm3 = vcmp.eq.s32.totalorder %v2279_v7, 5  ;;  %v114_v21 = vsel %vm4597_vm1, %v112_v23, 0.0  ;;  %v121_v15 = vsel %vm4594_vm2, %v120_v24, 0.0 }
  0x47   :  { %s2185_s16 = sld [smem:[#allocation2 + $0xa01]]  ;;  %s4699_s17 = sld [smem:[#allocation36_spill]]  ;;  %v397_v6 = vstv %s2145_s7  ;;  %vm4595_vm4 = vcmp.eq.s32.totalorder %v2266_v17, 6  ;;  %v108_v48 = vadd.f32 %v106_v19, %v100_v20  ;;  %v115_v1 = vadd.f32 %v113_v13, %v107_v22 }
  0x48   :  { %s2187_s18 = sld [smem:[#allocation2 + $0xa81]]  ;;  %s4700_s29 = sld [smem:[#allocation38_spill]]  ;;  %v280_v47 = vstv %s4694_s22  ;;  %vm4599_vm5 = vcmp.eq.s32.totalorder %v2279_v7, 6  ;;  %v122_v23 = vsel %vm4596_vm3, %v120_v24, 0.0  ;;  %v129_v16 = vsel %vm4595_vm4, %v128_v25, 0.0 }
  0x49   :  { %4695 = sst [smem:[#allocation50_spill]] %s2180_s23  ;;  %s2193_s30 = sld [smem:[#allocation2 + $0xb01]]  ;;  %v451_v49 = vstv %s2180_s23  ;;  %vm4598_vm6 = vcmp.eq.s32.totalorder %v2266_v17, 7  ;;  %v116_v43 = vadd.f32 %v114_v21, %v108_v48  ;;  %v123_v18 = vadd.f32 %v121_v15, %v115_v1 }
  0x4a   :  { %s4702_s28 = sld [smem:[#allocation39_spill]]  ;;  %s2195_s27 = sld [smem:[#allocation2 + $0xb81]]  ;;  %v296_v51 = vstv %s4697_s26  ;;  %vm4603_vm7 = vcmp.eq.s32.totalorder %v2279_v7, 7  ;;  %vm4602_vm2 = vcmp.eq.s32.totalorder %v2266_v17, 8  ;;  %v130_v19 = vsel %vm4599_vm5, %v128_v25, 0.0 }
  0x4b   :  { %s4704_s3 = sld [smem:[#allocation40_spill]]  ;;  %s4705_s4 = sld [smem:[#allocation41_spill]]  ;;  %v409_v12 = vstv %s2154_s10  ;;  %v137_v24 = vsel %vm4598_vm6, %v136_v26, 0.0  ;;  %vm4612_vm4 = vcmp.eq.s32.totalorder %v2279_v7, 8  ;;  %v124_v22 = vadd.f32 %v122_v23, %v116_v43 }
  0x4c   :  { %v288_v50 = vstv %s4696_s24  ;;  %s2199_s2 = sld [smem:[#allocation2 + $0xc01]]  ;;  %v304_v52 = vstv %s4698_s25  ;;  %s4707_s21 = sld [smem:[#allocation45_spill]]  ;;  %v131_v13 = vadd.f32 %v129_v16, %v123_v18  ;;  %vm4609_vm3 = vcmp.eq.s32.totalorder %v2266_v17, 9 }
  0x4d   :  { %v312_v53 = vstv %s4699_s17  ;;  %s2206_s22 = sld [smem:[#allocation2 + $0xc81]]  ;;  %s4708_s26 = sld [smem:[#allocation47_spill]]  ;;  %vm4604_vm1 = vcmp.eq.s32.totalorder %v2279_v7, 9  ;;  %v138_v25 = vsel %vm4603_vm7, %v136_v26, 0.0  ;;  %v145_v21 = vsel %vm4602_vm2, %v144_v27, 0.0 }
  0x4e   :  { %v328_v55 = vstv %s4700_s29  ;;  %s2208_s19 = sld [smem:[#allocation2 + $0xd01]]  ;;  %s2233_s9 = sld [smem:[#allocation2 + $0x2]]  ;;  %vm4605_vm6 = vcmp.eq.s32.totalorder %v2266_v17, 10  ;;  %vm4608_vm5 = vcmp.eq.s32.totalorder %v2279_v7, 10  ;;  %v132_v43 = vadd.f32 %v130_v19, %v124_v22 }
  0x4f   :  { %4701 = sst [smem:[#allocation35_spill]] %s2193_s30  ;;  %s2212_s24 = sld [smem:[#allocation2 + $0xd81]]  ;;  %v139_v18 = vadd.f32 %v137_v24, %v131_v13  ;;  %vm4606_vm0 = vcmp.eq.s32.totalorder %v2266_v17, 11  ;;  %vm4607_vm15 = vcmp.eq.s32.totalorder %v2279_v7, 11  ;;  %v146_v26 = vsel %vm4612_vm4, %v144_v27, 0.0 }
  0x50   :  { %4703 = sst [smem:[#allocation51_spill]] %s2195_s27  ;;  %v337_v58 = vstv %s4702_s28  ;;  %s2219_s29 = sld [smem:[#allocation2 + $0xe01]]  ;;  %v153_v15 = vsel %vm4609_vm3, %v152_v28, 0.0  ;;  %v154_v48 = vsel %vm4604_vm1, %v152_v28, 0.0  ;;  %v140_v23 = vadd.f32 %v138_v25, %v132_v43 }
  0x51   :  { %v343_v59 = vstv %s4704_s3  ;;  %v349_v60 = vstv %s4705_s4  ;;  %s2221_s1 = sld [smem:[#allocation2 + $0xe81]]  ;;  %s4712_s28 = sld [smem:[#allocation48_spill]]  ;;  %v147_v16 = vadd.f32 %v145_v21, %v139_v18  ;;  %vm4611_vm2 = vcmp.eq.s32.totalorder %v2266_v17, 12 }
  0x52   :  { %v373_v2 = vstv %s4707_s21  ;;  %s2225_s3 = sld [smem:[#allocation2 + $0xf01]]  ;;  %s2235_s12 = sld [smem:[#allocation2 + $0x82]]  ;;  %vm4610_vm7 = vcmp.eq.s32.totalorder %v2279_v7, 12  ;;  %v161_v27 = vsel %vm4605_vm6, %v160_v29, 0.0  ;;  %v162_v19 = vsel %vm4608_vm5, %v160_v29, 0.0 }
  0x53   :  { %4706 = sst [smem:[#allocation41_spill]] %s2206_s22  ;;  %v391_v5 = vstv %s4708_s26  ;;  %s2239_s6 = sld [smem:[#allocation2 + $0x102]]  ;;  %v169_v28 = vsel %vm4606_vm0, %v168_v30, 0.0  ;;  %v170_v24 = vsel %vm4607_vm15, %v168_v30, 0.0  ;;  %v148_v22 = vadd.f32 %v146_v26, %v140_v23 }
  0x54   :  { %s2227_s17 = sld [smem:[#allocation2 + $0xf81]]  ;;  %s2241_s26 = sld [smem:[#allocation2 + $0x182]]  ;;  %v532_v11 = vstv %s2233_s9  ;;  %v155_v13 = vadd.f32 %v153_v15, %v147_v16  ;;  %vm4625_vm1 = vcmp.eq.s32.totalorder %v2266_v17, 13  ;;  %vm4614_vm6 = vcmp.eq.s32.totalorder %v2279_v7, 13 }
  0x55   :  { %s4714_s11 = sld [smem:[#allocation49_spill]]  ;;  %s2258_s23 = sld [smem:[#allocation2 + $0x202]]  ;;  %v177_v25 = vsel %vm4611_vm2, %v176_v31, 0.0  ;;  %v178_v29 = vsel %vm4610_vm7, %v176_v31, 0.0  ;;  %vm4615_vm0 = vcmp.eq.s32.totalorder %v2266_v17, 14  ;;  %vm4624_vm15 = vcmp.eq.s32.totalorder %v2279_v7, 14 }
  0x56   :  { %4709 = sst [smem:[#allocation45_spill]] %s2219_s29  ;;  %s2276_s29 = sld [smem:[#allocation2 + $0x282]]  ;;  %v156_v30 = vadd.f32 %v154_v48, %v148_v22  ;;  %v163_v21 = vadd.f32 %v161_v27, %v155_v13  ;;  %vm4621_vm5 = vcmp.eq.s32.totalorder %v2266_v17, 15  ;;  %vm4616_vm3 = vcmp.eq.s32.totalorder %v2279_v7, 15 }
  0x57   :  { %4710 = sst [smem:[#allocation52_spill]] %s2221_s1  ;;  %v511_v0 = vstv %s2221_s1  ;;  %s2346_s30 = sld [smem:[#allocation2 + $0x482]]  ;;  %v185_v43 = vsel %vm4625_vm1, %v184_v32, 0.0  ;;  %v186_v31 = vsel %vm4614_vm6, %v184_v32, 0.0  ;;  %vm4617_vm7 = vcmp.eq.s32.totalorder %v2266_v17, 16 }
  0x58   :  { %4711 = sst [smem:[#allocation53_spill]] %s2225_s3  ;;  %v517_v39 = vstv %s2225_s3  ;;  %v538_v10 = vstv %s2235_s12  ;;  %vm4620_vm2 = vcmp.eq.s32.totalorder %v2279_v7, 16  ;;  %v164_v18 = vadd.f32 %v162_v19, %v156_v30  ;;  %s2974_s7 = sld [smem:[#allocation2 + $0x602]] }
  0x59   :  { %4715 = sst [smem:[#allocation49_spill]] %s2235_s12  ;;  %v544_v57 = vstv %s2239_s6  ;;  %s2317_s12 = sld [smem:[#allocation2 + $0x402]]  ;;  %v171_v26 = vadd.f32 %v169_v28, %v163_v21  ;;  %vm4618_vm4 = vcmp.eq.s32.totalorder %v2266_v17, 17  ;;  %vm4619_vm11 = vcmp.eq.s32.totalorder %v2279_v7, 17 }
  0x5a   :  { %4713 = sst [smem:[#allocation48_spill]] %s2227_s17  ;;  %v550_v56 = vstv %s2241_s26  ;;  %s2284_s17 = sld [smem:[#allocation2 + $0x302]]  ;;  %v193_v15 = vsel %vm4615_vm0, %v192_v33, 0.0  ;;  %v194_v32 = vsel %vm4624_vm15, %v192_v33, 0.0  ;;  %v201_v48 = vsel %vm4621_vm5, %v200_v35, 0.0 }
  0x5b   :  { %4716 = sst [smem:[#allocation54_spill]] %s2239_s6  ;;  %v202_v23 = vsel %vm4616_vm3, %v200_v35, 0.0  ;;  %v172_v16 = vadd.f32 %v170_v24, %v164_v18  ;;  %v179_v27 = vadd.f32 %v177_v25, %v171_v26  ;;  %vm4623_vm6 = vcmp.eq.s32.totalorder %v2266_v17, 18  ;;  %s4813_s15 = sld [smem:[#allocation45_spill]] }
  0x5c   :  { %4717 = sst [smem:[#allocation55_spill]] %s2241_s26  ;;  %s2299_s26 = sld [smem:[#allocation2 + $0x382]]  ;;  %vm4622_vm0 = vcmp.eq.s32.totalorder %v2279_v7, 18  ;;  %v209_v19 = vsel %vm4617_vm7, %v208_v36, 0.0  ;;  %v210_v33 = vsel %vm4620_vm2, %v208_v36, 0.0  ;;  %v217_v35 = vsel %vm4618_vm4, %v216_v37, 0.0 }
  0x5d   :  { %v586_v1 = vstv %s2346_s30  ;;  %v218_v28 = vsel %vm4619_vm11, %v216_v37, 0.0  ;;  %v180_v24 = vadd.f32 %v178_v29, %v172_v16  ;;  %v187_v22 = vadd.f32 %v185_v43, %v179_v27  ;;  %s3002_s8 = sld [smem:[#allocation2 + $0x702]]  ;;  %s3157_s0 = sld [smem:[#allocation2 + $0x3]] }
  0x5e   :  { %vm4637_vm3 = vcmp.eq.s32.totalorder %v2266_v17, 19  ;;  %vm4626_vm7 = vcmp.eq.s32.totalorder %v2279_v7, 19  ;;  %v225_v13 = vsel %vm4623_vm6, %v224_v38, 0.0  ;;  %v226_v36 = vsel %vm4622_vm0, %v224_v38, 0.0  ;;  %s3066_s9 = sld [smem:[#allocation2 + $0x982]]  ;;  %s3246_s21 = sld [smem:[#allocation2 + $0x403]] }
  0x5f   :  { %v580_v20 = vstv %s2317_s12  ;;  %vm4627_vm4 = vcmp.eq.s32.totalorder %v2266_v17, 20  ;;  %vm4636_vm11 = vcmp.eq.s32.totalorder %v2279_v7, 20  ;;  %v188_v37 = vadd.f32 %v186_v31, %v180_v24  ;;  %s3057_s12 = sld [smem:[#allocation2 + $0x902]] }
  0x60   :  { %v568_v9 = vstv %s2284_s17  ;;  %v195_v25 = vadd.f32 %v193_v15, %v187_v22  ;;  %vm4633_vm2 = vcmp.eq.s32.totalorder %v2266_v17, 21  ;;  %vm4628_vm5 = vcmp.eq.s32.totalorder %v2279_v7, 21  ;;  %s3036_s17 = sld [smem:[#allocation2 + $0x802]] }
  0x61   :  { %v233_v29 = vsel %vm4637_vm3, %v232_v40, 0.0  ;;  %v234_v38 = vsel %vm4626_vm7, %v232_v40, 0.0  ;;  %vm4629_vm0 = vcmp.eq.s32.totalorder %v2266_v17, 22  ;;  %vm4632_vm6 = vcmp.eq.s32.totalorder %v2279_v7, 22  ;;  %s3076_s10 = sld [smem:[#allocation2 + $0xa02]] }
  0x62   :  { %v574_v34 = vstv %s2299_s26  ;;  %v196_v30 = vadd.f32 %v194_v32, %v188_v37  ;;  %v203_v21 = vadd.f32 %v201_v48, %v195_v25  ;;  %vm4630_vm15 = vcmp.eq.s32.totalorder %v2266_v17, 23  ;;  %s3053_s26 = sld [smem:[#allocation2 + $0x882]] }
  0x63   :  { %vm4631_vm1 = vcmp.eq.s32.totalorder %v2279_v7, 23  ;;  %v241_v43 = vsel %vm4627_vm4, %v240_v41, 0.0  ;;  %v242_v40 = vsel %vm4636_vm11, %v240_v41, 0.0  ;;  %v249_v31 = vsel %vm4633_vm2, %v248_v42, 0.0  ;;  %s3087_s30 = sld [smem:[#allocation2 + $0xa82]] }
  0x64   :  { %v250_v18 = vsel %vm4628_vm5, %v248_v42, 0.0  ;;  %v204_v26 = vadd.f32 %v202_v23, %v196_v30  ;;  %v211_v15 = vadd.f32 %v209_v19, %v203_v21  ;;  %vm4635_vm7 = vcmp.eq.s32.totalorder %v2266_v17, 24  ;;  %s3098_s1 = sld [smem:[#allocation2 + $0xb02]] }
  0x65   :  { %vm4634_vm4 = vcmp.eq.s32.totalorder %v2279_v7, 24  ;;  %v257_v32 = vsel %vm4629_vm0, %v256_v44, 0.0  ;;  %v258_v41 = vsel %vm4632_vm6, %v256_v44, 0.0  ;;  %v265_v42 = vsel %vm4630_vm15, %v264_v45, 0.0  ;;  %s3108_s25 = sld [smem:[#allocation2 + $0xb82]] }
  0x66   :  { %v266_v48 = vsel %vm4631_vm1, %v264_v45, 0.0  ;;  %v212_v23 = vadd.f32 %v210_v33, %v204_v26  ;;  %v219_v16 = vadd.f32 %v217_v35, %v211_v15  ;;  %vm277_vm5 = vcmp.eq.s32.totalorder %v2266_v17, 25  ;;  %s3110_s3 = sld [smem:[#allocation2 + $0xc02]] }
  0x67   :  { %vm278_vm0 = vcmp.eq.s32.totalorder %v2279_v7, 25  ;;  %v273_v27 = vsel %vm4635_vm7, %v272_v46, 0.0  ;;  %v274_v44 = vsel %vm4634_vm4, %v272_v46, 0.0  ;;  %vm285_vm15 = vcmp.eq.s32.totalorder %v2266_v17, 26  ;;  %s3114_s5 = sld [smem:[#allocation2 + $0xc82]] }
  0x68   :  { %vm286_vm1 = vcmp.eq.s32.totalorder %v2279_v7, 26  ;;  %v220_v45 = vadd.f32 %v218_v28, %v212_v23  ;;  %v227_v19 = vadd.f32 %v225_v13, %v219_v16  ;;  %vm293_vm6 = vcmp.eq.s32.totalorder %v2266_v17, 27  ;;  %s3123_s6 = sld [smem:[#allocation2 + $0xd02]] }
  0x69   :  { %vm294_vm2 = vcmp.eq.s32.totalorder %v2279_v7, 27  ;;  %v281_v33 = vsel %vm277_vm5, %v280_v47, 0.0  ;;  %v282_v46 = vsel %vm278_vm0, %v280_v47, 0.0  ;;  %vm301_vm4 = vcmp.eq.s32.totalorder %v2266_v17, 28  ;;  %s3134_s4 = sld [smem:[#allocation2 + $0xd82]] }
  0x6a   :  { %vm4639_vm7 = vcmp.eq.s32.totalorder %v2279_v7, 28  ;;  %v228_v35 = vadd.f32 %v226_v36, %v220_v45  ;;  %v235_v28 = vadd.f32 %v233_v29, %v227_v19  ;;  %vm4638_vm11 = vcmp.eq.s32.totalorder %v2266_v17, 29  ;;  %s3138_s22 = sld [smem:[#allocation2 + $0xe02]] }
  0x6b   :  { %vm4640_vm3 = vcmp.eq.s32.totalorder %v2279_v7, 29  ;;  %v289_v24 = vsel %vm285_vm15, %v288_v50, 0.0  ;;  %v290_v47 = vsel %vm286_vm1, %v288_v50, 0.0  ;;  %v297_v22 = vsel %vm293_vm6, %v296_v51, 0.0  ;;  %s3147_s27 = sld [smem:[#allocation2 + $0xe82]] }
  0x6c   :  { %v2579_v13 = vsel %vm294_vm2, %v296_v51, 0.0  ;;  %v236_v36 = vadd.f32 %v234_v38, %v228_v35  ;;  %v243_v37 = vadd.f32 %v241_v43, %v235_v28  ;;  %v2585_v25 = vsel %vm301_vm4, %v304_v52, 0.0 }
  0x6d   :  { %v2591_v50 = vsel %vm4639_vm7, %v304_v52, 0.0  ;;  %v2597_v29 = vsel %vm4638_vm11, %v312_v53, 0.0  ;;  %v2603_v51 = vsel %vm4640_vm3, %v312_v53, 0.0  ;;  %v338_v38 = vsel %vm77_vm8, %v337_v58, 0.0 }
  0x6e   :  { %v339_v52 = vsel %vm78_vm12, %v337_v58, 0.0  ;;  %v244_v30 = vadd.f32 %v242_v40, %v236_v36  ;;  %v251_v21 = vadd.f32 %v249_v31, %v243_v37  ;;  %vm317_vm11 = vcmp.eq.s32.totalorder %v2266_v17, 30 }
  0x6f   :  { %vm4646_vm7 = vcmp.eq.s32.totalorder %v2279_v7, 30  ;;  %v344_v53 = vsel %vm4642_vm9, %v343_v59, 0.0  ;;  %v345_v43 = vsel %vm4641_vm13, %v343_v59, 0.0  ;;  %v350_v58 = vsel %vm4643_vm10, %v349_v60, 0.0 }
  0x70   :  { %v351_v40 = vsel %vm4647_vm14, %v349_v60, 0.0  ;;  %v252_v31 = vadd.f32 %v250_v18, %v244_v30  ;;  %v259_v26 = vadd.f32 %v257_v32, %v251_v21  ;;  %v346_v15 = vadd.f32 %v344_v53, %v338_v38 }
  0x71   :  { %v347_v23 = vadd.f32 %v345_v43, %v339_v52  ;;  %vm4644_vm3 = vcmp.eq.s32.totalorder %v2266_v17, 31  ;;  %vm4645_vm13 = vcmp.eq.s32.totalorder %v2279_v7, 31  ;;  %vm4752_vm9 = vcmp.eq.s32.totalorder %v2266_v17, 3 }
  0x72   :  { %v356_v59 = vsel %vm4752_vm9, %v355_v61, 0.0  ;;  %vm4753_vm10 = vcmp.eq.s32.totalorder %v2279_v7, 3  ;;  %v260_v18 = vadd.f32 %v258_v41, %v252_v31  ;;  %v267_v32 = vadd.f32 %v265_v42, %v259_v26 }
  0x73   :  { %v357_v60 = vsel %vm4753_vm10, %v355_v61, 0.0  ;;  %v352_v16 = vadd.f32 %v350_v58, %v346_v15  ;;  %v353_v45 = vadd.f32 %v351_v40, %v347_v23  ;;  %v321_v19 = vsel %vm317_vm11, %v320_v54, 0.0 }
  0x74   :  { %v322_v35 = vsel %vm4646_vm7, %v320_v54, 0.0  ;;  %vm4755_vm9 = vcmp.eq.s32.totalorder %v2266_v17, 4  ;;  %vm4756_vm10 = vcmp.eq.s32.totalorder %v2279_v7, 4  ;;  %v268_v41 = vadd.f32 %v266_v48, %v260_v18 }
  0x75   :  { %v362_v28 = vsel %vm4755_vm9, %v361_v62, 0.0  ;;  %v363_v61 = vsel %vm4756_vm10, %v361_v62, 0.0  ;;  %v275_v42 = vadd.f32 %v273_v27, %v267_v32  ;;  %v358_v36 = vadd.f32 %v356_v59, %v352_v16 }
  0x76   :  { %v359_v37 = vadd.f32 %v357_v60, %v353_v45  ;;  %v329_v38 = vsel %vm4644_vm3, %v328_v55, 0.0  ;;  %v330_v54 = vsel %vm4645_vm13, %v328_v55, 0.0  ;;  %vm4758_vm9 = vcmp.eq.s32.totalorder %v2266_v17, 5 }
  0x77   :  { %v368_v52 = vsel %vm4758_vm9, %v367_v63, 0.0  ;;  %vm4759_vm10 = vcmp.eq.s32.totalorder %v2279_v7, 5  ;;  %v276_v48 = vadd.f32 %v274_v44, %v268_v41  ;;  %v283_v27 = vadd.f32 %v281_v33, %v275_v42 }
  0x78   :  { %v369_v62 = vsel %vm4759_vm10, %v367_v63, 0.0  ;;  %v364_v30 = vadd.f32 %v362_v28, %v358_v36  ;;  %v365_v21 = vadd.f32 %v363_v61, %v359_v37  ;;  %vm4761_vm3 = vcmp.eq.s32.totalorder %v2266_v17, 6 }
  0x79   :  { %v374_v55 = vsel %vm4761_vm3, %v373_v2, 0.0  ;;  %vm4762_vm13 = vcmp.eq.s32.totalorder %v2279_v7, 6  ;;  %vm4763_vm9 = vcmp.eq.s32.totalorder %v2266_v17, 7  ;;  %vm4764_vm10 = vcmp.eq.s32.totalorder %v2279_v7, 7 }
  0x7a   :  { %v375_v53 = vsel %vm4762_vm13, %v373_v2, 0.0  ;;  %v380_v43 = vsel %vm4763_vm9, %v379_v3, 0.0  ;;  %v381_v63 = vsel %vm4764_vm10, %v379_v3, 0.0  ;;  %v284_v44 = vadd.f32 %v282_v46, %v276_v48 }
  0x7b   :  { %v291_v33 = vadd.f32 %v289_v24, %v283_v27  ;;  %v370_v58 = vadd.f32 %v368_v52, %v364_v30  ;;  %v371_v40 = vadd.f32 %v369_v62, %v365_v21  ;;  %vm4648_vm3 = vcmask 130048  }
  0x7c   :  { %vm4765_vm13 = vcmp.eq.s32.totalorder %v2266_v17, 8  ;;  %vm4766_vm7 = vcmp.eq.s32.totalorder %v2279_v7, 8  ;;  %vm4767_vm9 = vcmp.eq.s32.totalorder %v2266_v17, 9  ;;  %vm4768_vm10 = vcmp.eq.s32.totalorder %v2279_v7, 9 }
  0x7d   :  { %v386_v2 = vsel %vm4765_vm13, %v385_v4, 0.0  ;;  %v387_v31 = vsel %vm4766_vm7, %v385_v4, 0.0  ;;  %v392_v3 = vsel %vm4767_vm9, %v391_v5, 0.0  ;;  %v393_v46 = vsel %vm4768_vm10, %v391_v5, 0.0 }
  0x7e   :  { %v292_v24 = vadd.f32 %v290_v47, %v284_v44  ;;  %v299_v26 = vadd.f32 %v297_v22, %v291_v33  ;;  %v376_v15 = vadd.f32 %v374_v55, %v370_v58  ;;  %v377_v23 = vadd.f32 %v375_v53, %v371_v40 }
  0x7f   :  { %vm4769_vm13 = vcmp.eq.s32.totalorder %v2266_v17, 10  ;;  %vm4770_vm7 = vcmp.eq.s32.totalorder %v2279_v7, 10  ;;  %vm4771_vm9 = vcmp.eq.s32.totalorder %v2266_v17, 11  ;;  %vm4772_vm10 = vcmp.eq.s32.totalorder %v2279_v7, 11 }
  0x80   :  { %v398_v59 = vsel %vm4769_vm13, %v397_v6, 0.0  ;;  %v399_v4 = vsel %vm4770_vm7, %v397_v6, 0.0  ;;  %v404_v60 = vsel %vm4771_vm9, %v403_v8, 0.0  ;;  %v405_v5 = vsel %vm4772_vm10, %v403_v8, 0.0 }
  0x81   :  { %v300_v47 = vadd.f32 %v2579_v13, %v292_v24  ;;  %v307_v22 = vadd.f32 %v2585_v25, %v299_v26  ;;  %v382_v18 = vadd.f32 %v380_v43, %v376_v15  ;;  %v383_v32 = vadd.f32 %v381_v63, %v377_v23 }
  0x82   :  { %vm4773_vm13 = vcmp.eq.s32.totalorder %v2266_v17, 12  ;;  %vm4774_vm7 = vcmp.eq.s32.totalorder %v2279_v7, 12  ;;  %v4775_v45 = vstv %s2156_s13  ;;  %vm4776_vm9 = vcmp.eq.s32.totalorder %v2266_v17, 13  ;;  %s4794_s13 = sld [smem:[#allocation35_spill]] }
  0x83   :  { %v410_v6 = vsel %vm4773_vm13, %v409_v12, 0.0  ;;  %v411_v16 = vsel %vm4774_vm7, %v409_v12, 0.0  ;;  %v416_v8 = vsel %vm4776_vm9, %v4775_v45, 0.0  ;;  %v4777_v28 = vmov %v4775_v45 }
  0x84   :  { %vm4778_vm10 = vcmp.eq.s32.totalorder %v2279_v7, 13  ;;  %v308_v25 = vadd.f32 %v2591_v50, %v300_v47  ;;  %v315_v61 = vadd.f32 %v2597_v29, %v307_v22  ;;  %v388_v41 = vadd.f32 %v386_v2, %v382_v18 }
  0x85   :  { %v417_v13 = vsel %vm4778_vm10, %v4777_v28, 0.0  ;;  %v389_v42 = vadd.f32 %v387_v31, %v383_v32  ;;  %vm4779_vm13 = vcmp.eq.s32.totalorder %v2266_v17, 14  ;;  %vm4780_vm7 = vcmp.eq.s32.totalorder %v2279_v7, 14 }
  0x86   :  { %v422_v12 = vsel %vm4779_vm13, %v421_v14, 0.0  ;;  %v423_v36 = vsel %vm4780_vm7, %v421_v14, 0.0  ;;  %v4781_v37 = vstv %s2164_s14  ;;  %vm4782_vm9 = vcmp.eq.s32.totalorder %v2266_v17, 15  ;;  %s4802_s14 = sld [smem:[#allocation41_spill]] }
  0x87   :  { %v428_v52 = vsel %vm4782_vm9, %v4781_v37, 0.0  ;;  %v4783_v62 = vmov %v4781_v37  ;;  %vm4784_vm10 = vcmp.eq.s32.totalorder %v2279_v7, 15  ;;  %v316_v29 = vadd.f32 %v2603_v51, %v308_v25 }
  0x88   :  { %v429_v50 = vsel %vm4784_vm10, %v4783_v62, 0.0  ;;  %v323_v48 = vadd.f32 %v321_v19, %v315_v61  ;;  %v394_v27 = vadd.f32 %v392_v3, %v388_v41  ;;  %v395_v30 = vadd.f32 %v393_v46, %v389_v42 }
  0x89   :  { %v4786_v21 = vstv %s4712_s28  ;;  %vm4787_vm13 = vcmp.eq.s32.totalorder %v2266_v17, 16  ;;  %vm4789_vm7 = vcmp.eq.s32.totalorder %v2279_v7, 16  ;;  %v4790_v43 = vstv %s4714_s11  ;;  %s4800_s11 = sld [smem:[#allocation51_spill]]  ;;  %s4844_s28 = sld [smem:[#allocation48_spill]] }
  0x8a   :  { %v434_v14 = vsel %vm4787_vm13, %v4786_v21, 0.0  ;;  %v4788_v55 = vmov %v4786_v21  ;;  %vm4791_vm9 = vcmp.eq.s32.totalorder %v2266_v17, 17  ;;  %v4792_v44 = vmov %v4790_v43 }
  0x8b   :  { %v435_v53 = vsel %vm4789_vm7, %v4788_v55, 0.0  ;;  %v2770_v63 = vsel %vm4791_vm9, %v4790_v43, 0.0  ;;  %vm4793_vm10 = vcmp.eq.s32.totalorder %v2279_v7, 17  ;;  %v324_v19 = vadd.f32 %v322_v35, %v316_v29 }
  0x8c   :  { %v2776_v51 = vsel %vm4793_vm10, %v4792_v44, 0.0  ;;  %v331_v33 = vadd.f32 %v329_v38, %v323_v48  ;;  %v400_v58 = vadd.f32 %v398_v59, %v394_v27  ;;  %v401_v40 = vadd.f32 %v399_v4, %v395_v30 }
  0x8d   :  { %v4795_v2 = vstv %s2178_s20  ;;  %vm4796_vm13 = vcmp.eq.s32.totalorder %v2266_v17, 18  ;;  %vm4798_vm7 = vcmp.eq.s32.totalorder %v2279_v7, 18  ;;  %vm4799_vm9 = vcmp.eq.s32.totalorder %v2266_v17, 19  ;;  %s3223_s20 = sld [smem:[#allocation2 + $0x303]] }
  0x8e   :  { %v2782_v31 = vsel %vm4796_vm13, %v4795_v2, 0.0  ;;  %v4797_v3 = vmov %v4795_v2  ;;  %v2794_v35 = vsel %vm4799_vm9, %v451_v49, 0.0  ;;  %vm4801_vm10 = vcmp.eq.s32.totalorder %v2279_v7, 19  ;;  %334 = vst.msk [vmem:[#allocation5] sm:$0xff] %vm4648_vm3, %v331_v33 }
  0x8f   :  { %v2788_v46 = vsel %vm4798_vm7, %v4797_v3, 0.0  ;;  %v2800_v38 = vsel %vm4801_vm10, %v451_v49, 0.0  ;;  %v332_v24 = vadd.f32 %v330_v54, %v324_v19  ;;  %v406_v26 = vadd.f32 %v404_v60, %v400_v58 }
  0x90   :  { %v407_v15 = vadd.f32 %v405_v5, %v401_v40  ;;  %v4803_v23 = vstv %s2185_s16  ;;  %vm4804_vm13 = vcmp.eq.s32.totalorder %v2266_v17, 20  ;;  %vm4806_vm7 = vcmp.eq.s32.totalorder %v2279_v7, 20  ;;  %s3189_s16 = sld [smem:[#allocation2 + $0x203]] }
  0x91   :  { %v2807_v59 = vsel %vm4804_vm13, %v4803_v23, 0.0  ;;  %v4805_v4 = vmov %v4803_v23  ;;  %v4807_v49 = vstv %s2187_s18  ;;  %vm4808_vm9 = vcmp.eq.s32.totalorder %v2266_v17, 21  ;;  %335 = vst.msk [vmem:[#allocation5 + $0x8] sm:$0xff] %vm4648_vm3, %v332_v24  ;;  %s3208_s18 = sld [smem:[#allocation2 + $0x283]] }
  0x92   :  { %v2813_v47 = vsel %vm4806_vm7, %v4805_v4, 0.0  ;;  %v2819_v54 = vsel %vm4808_vm9, %v4807_v49, 0.0  ;;  %v4809_v22 = vmov %v4807_v49  ;;  %vm4810_vm10 = vcmp.eq.s32.totalorder %v2279_v7, 21 }
  0x93   :  { %v2825_v60 = vsel %vm4810_vm10, %v4809_v22, 0.0  ;;  %v4811_v5 = vstv %s4794_s13  ;;  %vm4812_vm13 = vcmp.eq.s32.totalorder %v2266_v17, 22  ;;  %v412_v32 = vadd.f32 %v410_v6, %v406_v26  ;;  %s3161_s13 = sld [smem:[#allocation2 + $0xf02]] }
  0x94   :  { %v2831_v18 = vsel %vm4812_vm13, %v4811_v5, 0.0  ;;  %v413_v45 = vadd.f32 %v411_v16, %v407_v15  ;;  %v4814_v28 = vmov %v4811_v5  ;;  %vm4815_vm7 = vcmp.eq.s32.totalorder %v2279_v7, 22 }
  0x95   :  { %v2838_v25 = vsel %vm4815_vm7, %v4814_v28, 0.0  ;;  %v4816_v61 = vstv %s4800_s11  ;;  %vm4817_vm9 = vcmp.eq.s32.totalorder %v2266_v17, 23  ;;  %vm4819_vm10 = vcmp.eq.s32.totalorder %v2279_v7, 23  ;;  %s3169_s11 = sld [smem:[#allocation2 + $0x83]] }
  0x96   :  { %v2844_v41 = vsel %vm4817_vm9, %v4816_v61, 0.0  ;;  %v4818_v42 = vmov %v4816_v61  ;;  %v4820_v62 = vstv %s2199_s2  ;;  %vm4821_vm13 = vcmp.eq.s32.totalorder %v2266_v17, 24  ;;  %s2952_s2 = sld [smem:[#allocation2 + $0x582]] }
  0x97   :  { %v2850_v37 = vsel %vm4819_vm10, %v4818_v42, 0.0  ;;  %v2856_v6 = vsel %vm4821_vm13, %v4820_v62, 0.0  ;;  %v4822_v16 = vmov %v4820_v62  ;;  %vm4823_vm7 = vcmp.eq.s32.totalorder %v2279_v7, 24 }
  0x98   :  { %v2862_v29 = vsel %vm4823_vm7, %v4822_v16, 0.0  ;;  %v4825_v48 = vstv %s4802_s14  ;;  %v418_v30 = vadd.f32 %v416_v8, %v412_v32  ;;  %v419_v21 = vadd.f32 %v417_v13, %v413_v45  ;;  %s3171_s14 = sld [smem:[#allocation2 + $0x103]] }
  0x99   :  { %v2868_v27 = vsel %vm277_vm5, %v4825_v48, 0.0  ;;  %v4827_v55 = vmov %v4825_v48  ;;  %v4828_v44 = vstv %s2208_s19  ;;  %v4830_v40 = vstv %s2212_s24  ;;  %s2932_s24 = sld [smem:[#allocation2 + $0x502]]  ;;  %s3240_s19 = sld [smem:[#allocation2 + $0x383]] }
  0x9a   :  { %v2874_v43 = vsel %vm278_vm0, %v4827_v55, 0.0  ;;  %v2880_v19 = vsel %vm285_vm15, %v4828_v44, 0.0  ;;  %v4829_v33 = vmov %v4828_v44  ;;  %v2892_v8 = vsel %vm293_vm6, %v4830_v40, 0.0 }
  0x9b   :  { %v2886_v58 = vsel %vm286_vm1, %v4829_v33, 0.0  ;;  %v4831_v13 = vmov %v4830_v40  ;;  %v4833_v3 = vstv %s4813_s15  ;;  %v424_v26 = vadd.f32 %v422_v12, %v418_v30  ;;  %s3187_s15 = sld [smem:[#allocation2 + $0x183]] }
  0x9c   :  { %v2898_v2 = vsel %vm294_vm2, %v4831_v13, 0.0  ;;  %v2904_v24 = vsel %vm301_vm4, %v4833_v3, 0.0  ;;  %v425_v15 = vadd.f32 %v423_v36, %v419_v21  ;;  %v4835_v23 = vmov %v4833_v3 }
  0x9d   :  { %vm4836_vm9 = vcmp.eq.s32.totalorder %v2279_v7, 28  ;;  %v533_v49 = vsel %vm77_vm8, %v532_v11, 0.0  ;;  %v534_v22 = vsel %vm78_vm12, %v532_v11, 0.0  ;;  %vm4837_vm10 = vcmp.eq.s32.totalorder %v2266_v17, 1 }
  0x9e   :  { %v2910_v4 = vsel %vm4836_vm9, %v4835_v23, 0.0  ;;  %v539_v5 = vsel %vm4837_vm10, %v538_v10, 0.0  ;;  %vm4838_vm13 = vcmp.eq.s32.totalorder %v2279_v7, 1  ;;  %vm4839_vm7 = vcmp.eq.s32.totalorder %v2266_v17, 2 }
  0x9f   :  { %v540_v12 = vsel %vm4838_vm13, %v538_v10, 0.0  ;;  %v545_v36 = vsel %vm4839_vm7, %v544_v57, 0.0  ;;  %v430_v32 = vadd.f32 %v428_v52, %v424_v26  ;;  %v431_v45 = vadd.f32 %v429_v50, %v425_v15 }
  0xa0   :  { %v541_v28 = vadd.f32 %v539_v5, %v533_v49  ;;  %v542_v11 = vadd.f32 %v540_v12, %v534_v22  ;;  %vm4841_vm9 = vcmp.eq.s32.totalorder %v2266_v17, 29  ;;  %v546_v10 = vsel %vm4647_vm14, %v544_v57, 0.0 }
  0xa1   :  { %v2938_v61 = vsel %vm4841_vm9, %v511_v0, 0.0  ;;  %vm4842_vm10 = vcmp.eq.s32.totalorder %v2266_v17, 3  ;;  %vm4843_vm13 = vcmp.eq.s32.totalorder %v2279_v7, 3  ;;  %v436_v42 = vadd.f32 %v434_v14, %v430_v32 }
  0xa2   :  { %v551_v52 = vsel %vm4842_vm10, %v550_v56, 0.0  ;;  %v552_v50 = vsel %vm4843_vm13, %v550_v56, 0.0  ;;  %v437_v62 = vadd.f32 %v435_v53, %v431_v45  ;;  %v547_v16 = vadd.f32 %v545_v36, %v541_v28 }
  0xa3   :  { %v548_v48 = vadd.f32 %v546_v10, %v542_v11  ;;  %vm4845_vm7 = vcmp.eq.s32.totalorder %v2279_v7, 29  ;;  %v2964_v30 = vsel %vm317_vm11, %v517_v39, 0.0  ;;  %v4846_v56 = vstv %s2258_s23  ;;  %s2998_s23 = sld [smem:[#allocation2 + $0x682]] }
  0xa4   :  { %v2958_v57 = vsel %vm4845_vm7, %v511_v0, 0.0  ;;  %vm4847_vm9 = vcmp.eq.s32.totalorder %v2266_v17, 4  ;;  %v4848_v55 = vmov %v4846_v56  ;;  %vm4849_vm10 = vcmp.eq.s32.totalorder %v2279_v7, 4 }
  0xa5   :  { %v557_v21 = vsel %vm4847_vm9, %v4846_v56, 0.0  ;;  %v558_v14 = vsel %vm4849_vm10, %v4848_v55, 0.0  ;;  %v442_v0 = vadd.f32 %v2770_v63, %v436_v42  ;;  %v443_v53 = vadd.f32 %v2776_v51, %v437_v62 }
  0xa6   :  { %v553_v44 = vadd.f32 %v551_v52, %v547_v16  ;;  %v554_v33 = vadd.f32 %v552_v50, %v548_v48  ;;  %vm4850_vm13 = vcmp.eq.s32.totalorder %v2279_v7, 30  ;;  %v4851_v13 = vstv %s4844_s28  ;;  %s3256_s28 = sld [smem:[#allocation2 + $0x483]] }
  0xa7   :  { %v2982_v40 = vsel %vm4850_vm13, %v517_v39, 0.0  ;;  %vm4852_vm7 = vcmp.eq.s32.totalorder %v2266_v17, 31  ;;  %v4853_v26 = vstv %s2276_s29  ;;  %vm4854_vm9 = vcmp.eq.s32.totalorder %v2266_v17, 5  ;;  %s3022_s29 = sld [smem:[#allocation2 + $0x782]] }
  0xa8   :  { %v2988_v3 = vsel %vm4852_vm7, %v4851_v13, 0.0  ;;  %v563_v63 = vsel %vm4854_vm9, %v4853_v26, 0.0  ;;  %v4855_v15 = vmov %v4853_v26  ;;  %vm4856_vm10 = vcmp.eq.s32.totalorder %v2279_v7, 5 }
  0xa9   :  { %v564_v51 = vsel %vm4856_vm10, %v4855_v15, 0.0  ;;  %v448_v39 = vadd.f32 %v2782_v31, %v442_v0  ;;  %v449_v23 = vadd.f32 %v2788_v46, %v443_v53  ;;  %v559_v49 = vadd.f32 %v557_v21, %v553_v44 }
  0xaa   :  { %v560_v22 = vadd.f32 %v558_v14, %v554_v33  ;;  %v4857_v5 = vmov %v4851_v13  ;;  %vm4858_vm13 = vcmp.eq.s32.totalorder %v2279_v7, 31  ;;  %vm4859_vm7 = vcmp.eq.s32.totalorder %v2266_v17, 6 }
  0xab   :  { %v3008_v12 = vsel %vm4858_vm13, %v4857_v5, 0.0  ;;  %v569_v36 = vsel %vm4859_vm7, %v568_v9, 0.0  ;;  %vm4860_vm9 = vcmp.eq.s32.totalorder %v2279_v7, 6  ;;  %vm4861_vm10 = vcmp.eq.s32.totalorder %v2266_v17, 7 }
  0xac   :  { %v570_v31 = vsel %vm4860_vm9, %v568_v9, 0.0  ;;  %v575_v46 = vsel %vm4861_vm10, %v574_v34, 0.0  ;;  %v454_v32 = vadd.f32 %v2794_v35, %v448_v39  ;;  %v455_v45 = vadd.f32 %v2800_v38, %v449_v23 }
  0xad   :  { %v565_v28 = vadd.f32 %v563_v63, %v559_v49  ;;  %v566_v11 = vadd.f32 %v564_v51, %v560_v22  ;;  %vm4862_vm13 = vcmp.eq.s32.totalorder %v2279_v7, 7  ;;  %vm4863_vm7 = vcmp.eq.s32.totalorder %v2266_v17, 8 }
  0xae   :  { %v576_v9 = vsel %vm4862_vm13, %v574_v34, 0.0  ;;  %v581_v10 = vsel %vm4863_vm7, %v580_v20, 0.0  ;;  %v592_v52 = vstv %s2932_s24  ;;  %v598_v50 = vstv %s2952_s2  ;;  %s3250_s24 = sld [smem:[#allocation2 + $0xf82]]  ;;  %s3264_s2 = sld [smem:[#allocation2 + $0x503]] }
  0xaf   :  { %v460_v42 = vadd.f32 %v2807_v59, %v454_v32  ;;  %v461_v35 = vadd.f32 %v2813_v47, %v455_v45  ;;  %v571_v38 = vadd.f32 %v569_v36, %v565_v28  ;;  %v572_v62 = vadd.f32 %v570_v31, %v566_v11 }
  0xb0   :  { %vm4864_vm9 = vcmp.eq.s32.totalorder %v2279_v7, 8  ;;  %vm4865_vm10 = vcmp.eq.s32.totalorder %v2266_v17, 9  ;;  %vm4866_vm13 = vcmp.eq.s32.totalorder %v2279_v7, 9  ;;  %v604_v56 = vstv %s2974_s7  ;;  %s3274_s7 = sld [smem:[#allocation2 + $0x583]] }
  0xb1   :  { %v582_v16 = vsel %vm4864_vm9, %v580_v20, 0.0  ;;  %v587_v34 = vsel %vm4865_vm10, %v586_v1, 0.0  ;;  %v588_v48 = vsel %vm4866_vm13, %v586_v1, 0.0  ;;  %v466_v59 = vadd.f32 %v2819_v54, %v460_v42 }
  0xb2   :  { %v467_v47 = vadd.f32 %v2825_v60, %v461_v35  ;;  %v577_v21 = vadd.f32 %v575_v46, %v571_v38  ;;  %v578_v55 = vadd.f32 %v576_v9, %v572_v62  ;;  %vm4867_vm7 = vcmp.eq.s32.totalorder %v2266_v17, 10 }
  0xb3   :  { %v593_v20 = vsel %vm4867_vm7, %v592_v52, 0.0  ;;  %vm4868_vm9 = vcmp.eq.s32.totalorder %v2279_v7, 10  ;;  %vm4869_vm10 = vcmp.eq.s32.totalorder %v2266_v17, 11  ;;  %v610_v0 = vstv %s2998_s23  ;;  %s3284_s23 = sld [smem:[#allocation2 + $0x603]] }
  0xb4   :  { %v594_v14 = vsel %vm4868_vm9, %v592_v52, 0.0  ;;  %v599_v1 = vsel %vm4869_vm10, %v598_v50, 0.0  ;;  %v472_v54 = vadd.f32 %v2831_v18, %v466_v59  ;;  %v473_v60 = vadd.f32 %v2838_v25, %v467_v47 }
  0xb5   :  { %v583_v53 = vadd.f32 %v581_v10, %v577_v21  ;;  %v584_v44 = vadd.f32 %v582_v16, %v578_v55  ;;  %vm4870_vm13 = vcmp.eq.s32.totalorder %v2279_v7, 11  ;;  %vm4871_vm7 = vcmp.eq.s32.totalorder %v2266_v17, 12 }
  0xb6   :  { %v600_v33 = vsel %vm4870_vm13, %v598_v50, 0.0  ;;  %v605_v13 = vsel %vm4871_vm7, %v604_v56, 0.0  ;;  %v616_v26 = vstv %s3002_s8  ;;  %v622_v63 = vstv %s3022_s29  ;;  %s3294_s8 = sld [smem:[#allocation2 + $0x683]] }
  0xb7   :  { %v478_v15 = vadd.f32 %v2844_v41, %v472_v54  ;;  %v479_v18 = vadd.f32 %v2850_v37, %v473_v60  ;;  %v589_v51 = vadd.f32 %v587_v34, %v583_v53  ;;  %v590_v39 = vadd.f32 %v588_v48, %v584_v44  ;;  %s3296_s29 = sld [smem:[#allocation2 + $0x703]] }
  0xb8   :  { %vm4872_vm9 = vcmp.eq.s32.totalorder %v2279_v7, 12  ;;  %vm4873_vm10 = vcmp.eq.s32.totalorder %v2266_v17, 13  ;;  %vm4874_vm13 = vcmp.eq.s32.totalorder %v2279_v7, 13  ;;  %v628_v22 = vstv %s3036_s17  ;;  %s3309_s17 = sld [smem:[#allocation2 + $0x783]] }
  0xb9   :  { %v606_v25 = vsel %vm4872_vm9, %v604_v56, 0.0  ;;  %v611_v23 = vsel %vm4873_vm10, %v610_v0, 0.0  ;;  %v612_v49 = vsel %vm4874_vm13, %v610_v0, 0.0  ;;  %v484_v41 = vadd.f32 %v2856_v6, %v478_v15 }
  0xba   :  { %v485_v37 = vadd.f32 %v2862_v29, %v479_v18  ;;  %v595_v5 = vadd.f32 %v593_v20, %v589_v51  ;;  %v596_v36 = vadd.f32 %v594_v14, %v590_v39  ;;  %vm4875_vm7 = vcmp.eq.s32.totalorder %v2266_v17, 14 }
  0xbb   :  { %v617_v31 = vsel %vm4875_vm7, %v616_v26, 0.0  ;;  %vm4876_vm9 = vcmp.eq.s32.totalorder %v2279_v7, 14  ;;  %vm4877_vm10 = vcmp.eq.s32.totalorder %v2266_v17, 15  ;;  %v634_v45 = vstv %s3053_s26  ;;  %s3311_s26 = sld [smem:[#allocation2 + $0x803]] }
  0xbc   :  { %v618_v46 = vsel %vm4876_vm9, %v616_v26, 0.0  ;;  %v623_v32 = vsel %vm4877_vm10, %v622_v63, 0.0  ;;  %v490_v28 = vadd.f32 %v2868_v27, %v484_v41  ;;  %v491_v6 = vadd.f32 %v2874_v43, %v485_v37 }
  0xbd   :  { %v601_v11 = vadd.f32 %v599_v1, %v595_v5  ;;  %v602_v29 = vadd.f32 %v600_v33, %v596_v36  ;;  %vm4878_vm13 = vcmp.eq.s32.totalorder %v2279_v7, 15  ;;  %vm4879_vm7 = vcmp.eq.s32.totalorder %v2266_v17, 16 }
  0xbe   :  { %v624_v9 = vsel %vm4878_vm13, %v622_v63, 0.0  ;;  %v629_v10 = vsel %vm4879_vm7, %v628_v22, 0.0  ;;  %v640_v52 = vstv %s3057_s12  ;;  %v646_v50 = vstv %s3066_s9  ;;  %s3322_s12 = sld [smem:[#allocation2 + $0x883]] }
  0xbf   :  { %v496_v42 = vadd.f32 %v2880_v19, %v490_v28  ;;  %v497_v27 = vadd.f32 %v2886_v58, %v491_v6  ;;  %v607_v43 = vadd.f32 %v605_v13, %v601_v11  ;;  %v608_v35 = vadd.f32 %v606_v25, %v602_v29  ;;  %s3324_s9 = sld [smem:[#allocation2 + $0x903]] }
  0xc0   :  { %vm4880_vm9 = vcmp.eq.s32.totalorder %v2279_v7, 16  ;;  %vm4881_vm10 = vcmp.eq.s32.totalorder %v2266_v17, 17  ;;  %vm4882_vm13 = vcmp.eq.s32.totalorder %v2279_v7, 17  ;;  %v652_v34 = vstv %s3076_s10  ;;  %s3334_s10 = sld [smem:[#allocation2 + $0x983]] }
  0xc1   :  { %v630_v38 = vsel %vm4880_vm9, %v628_v22, 0.0  ;;  %v635_v62 = vsel %vm4881_vm10, %v634_v45, 0.0  ;;  %v636_v16 = vsel %vm4882_vm13, %v634_v45, 0.0  ;;  %v502_v19 = vadd.f32 %v2892_v8, %v496_v42 }
  0xc2   :  { %v503_v58 = vadd.f32 %v2898_v2, %v497_v27  ;;  %v613_v48 = vadd.f32 %v611_v23, %v607_v43  ;;  %v614_v56 = vadd.f32 %v612_v49, %v608_v35  ;;  %vm4883_vm7 = vcmp.eq.s32.totalorder %v2266_v17, 18 }
  0xc3   :  { %v641_v59 = vsel %vm4883_vm7, %v640_v52, 0.0  ;;  %vm4884_vm9 = vcmp.eq.s32.totalorder %v2279_v7, 18  ;;  %vm4885_vm10 = vcmp.eq.s32.totalorder %v2266_v17, 19  ;;  %v658_v55 = vstv %s3087_s30  ;;  %s3336_s30 = sld [smem:[#allocation2 + $0xa03]] }
  0xc4   :  { %v642_v47 = vsel %vm4884_vm9, %v640_v52, 0.0  ;;  %v647_v21 = vsel %vm4885_vm10, %v646_v50, 0.0  ;;  %v508_v20 = vadd.f32 %v2904_v24, %v502_v19  ;;  %v509_v8 = vadd.f32 %v2910_v4, %v503_v58 }
  0xc5   :  { %v619_v2 = vadd.f32 %v617_v31, %v613_v48  ;;  %v620_v14 = vadd.f32 %v618_v46, %v614_v56  ;;  %vm4886_vm13 = vcmp.eq.s32.totalorder %v2279_v7, 19  ;;  %vm4887_vm7 = vcmp.eq.s32.totalorder %v2266_v17, 20 }
  0xc6   :  { %v648_v1 = vsel %vm4886_vm13, %v646_v50, 0.0  ;;  %v653_v0 = vsel %vm4887_vm7, %v652_v34, 0.0  ;;  %vm4888_vm9 = vcmp.eq.s32.totalorder %v2279_v7, 20  ;;  %v664_v60 = vstv %s3098_s1  ;;  %s3344_s1 = sld [smem:[#allocation2 + $0xa83]] }
  0xc7   :  { %v654_v54 = vsel %vm4888_vm9, %v652_v34, 0.0  ;;  %v514_v24 = vadd.f32 %v2938_v61, %v508_v20  ;;  %v515_v4 = vadd.f32 %v2958_v57, %v509_v8  ;;  %v625_v53 = vadd.f32 %v623_v32, %v619_v2 }
  0xc8   :  { %v626_v44 = vadd.f32 %v624_v9, %v620_v14  ;;  %vm4889_vm10 = vcmp.eq.s32.totalorder %v2266_v17, 21  ;;  %vm4890_vm13 = vcmp.eq.s32.totalorder %v2279_v7, 21  ;;  %v670_v26 = vstv %s3108_s25  ;;  %s3346_s25 = sld [smem:[#allocation2 + $0xb03]] }
  0xc9   :  { %v659_v33 = vsel %vm4889_vm10, %v658_v55, 0.0  ;;  %v660_v13 = vsel %vm4890_vm13, %v658_v55, 0.0  ;;  %v676_v63 = vstv %s3110_s3  ;;  %v520_v15 = vadd.f32 %v2964_v30, %v514_v24  ;;  %s3354_s3 = sld [smem:[#allocation2 + $0xb83]] }
  0xca   :  { %v521_v61 = vadd.f32 %v2982_v40, %v515_v4  ;;  %v631_v18 = vadd.f32 %v629_v10, %v625_v53  ;;  %v632_v57 = vadd.f32 %v630_v38, %v626_v44  ;;  %vm4891_vm7 = vcmp.eq.s32.totalorder %v2266_v17, 22 }
  0xcb   :  { %v665_v51 = vsel %vm4891_vm7, %v664_v60, 0.0  ;;  %vm4892_vm9 = vcmp.eq.s32.totalorder %v2279_v7, 22  ;;  %v682_v25 = vstv %s3114_s5  ;;  %v688_v23 = vstv %s3123_s6  ;;  %s3356_s5 = sld [smem:[#allocation2 + $0xc03]] }
  0xcc   :  { %v666_v39 = vsel %vm4892_vm9, %v664_v60, 0.0  ;;  %v526_v30 = vadd.f32 %v2988_v3, %v520_v15  ;;  %v527_v40 = vadd.f32 %v3008_v12, %v521_v61  ;;  %v637_v49 = vadd.f32 %v635_v62, %v631_v18  ;;  %s3370_s6 = sld [smem:[#allocation2 + $0xc83]] }
  0xcd   :  { %v638_v22 = vadd.f32 %v636_v16, %v632_v57  ;;  %vm4893_vm10 = vcmp.eq.s32.totalorder %v2266_v17, 23  ;;  %vm4894_vm13 = vcmp.eq.s32.totalorder %v2279_v7, 23  ;;  %vm4895_vm7 = vcmp.eq.s32.totalorder %v2266_v17, 24 }
  0xce   :  { %v671_v41 = vsel %vm4893_vm10, %v670_v26, 0.0  ;;  %v672_v37 = vsel %vm4894_vm13, %v670_v26, 0.0  ;;  %v677_v5 = vsel %vm4895_vm7, %v676_v63, 0.0  ;;  %v694_v36 = vstv %s3134_s4  ;;  %529 = vst.msk [vmem:[#allocation5 + $0x10] sm:$0xff] %vm4648_vm3, %v526_v30  ;;  %530 = vst.msk [vmem:[#allocation5 + $0x18] sm:$0xff] %vm4648_vm3, %v527_v40  ;;  %s3372_s4 = sld [smem:[#allocation2 + $0xd03]] }
  0xcf   :  { %v643_v3 = vadd.f32 %v641_v59, %v637_v49  ;;  %v644_v31 = vadd.f32 %v642_v47, %v638_v22  ;;  %vm4896_vm9 = vcmp.eq.s32.totalorder %v2279_v7, 24  ;;  %v700_v46 = vstv %s3138_s22  ;;  %s3382_s22 = sld [smem:[#allocation2 + $0xd83]] }
  0xd0   :  { %v678_v12 = vsel %vm4896_vm9, %v676_v63, 0.0  ;;  %v683_v32 = vsel %vm277_vm5, %v682_v25, 0.0  ;;  %v684_v45 = vsel %vm278_vm0, %v682_v25, 0.0  ;;  %v3197_v28 = vsel %vm285_vm15, %v688_v23, 0.0 }
  0xd1   :  { %v706_v6 = vstv %s3147_s27  ;;  %v649_v11 = vadd.f32 %v647_v21, %v643_v3  ;;  %v650_v29 = vadd.f32 %v648_v1, %v644_v31  ;;  %v3202_v9 = vsel %vm286_vm1, %v688_v23, 0.0  ;;  %s3386_s27 = sld [smem:[#allocation2 + $0xe03]] }
  0xd2   :  { %v3206_v10 = vsel %vm293_vm6, %v694_v36, 0.0  ;;  %v3212_v52 = vsel %vm294_vm2, %v694_v36, 0.0  ;;  %v3216_v50 = vsel %vm301_vm4, %v700_v46, 0.0  ;;  %vm4897_vm10 = vcmp.eq.s32.totalorder %v2279_v7, 28 }
  0xd3   :  { %v3220_v42 = vsel %vm4897_vm10, %v700_v46, 0.0  ;;  %v727_v27 = vstv %s3157_s0  ;;  %v655_v43 = vadd.f32 %v653_v0, %v649_v11  ;;  %v656_v35 = vadd.f32 %v654_v54, %v650_v29  ;;  %s3396_s0 = sld [smem:[#allocation2 + $0xe83]] }
  0xd4   :  { %vm4898_vm13 = vcmp.eq.s32.totalorder %v2266_v17, 29  ;;  %v712_v62 = vstv %s3161_s13  ;;  %v728_v16 = vsel %vm77_vm8, %v727_v27, 0.0  ;;  %v729_v34 = vsel %vm78_vm12, %v727_v27, 0.0  ;;  %s3408_s13 = sld [smem:[#allocation2 + $0x4]] }
  0xd5   :  { %v3227_v38 = vsel %vm4898_vm13, %v706_v6, 0.0  ;;  %v733_v19 = vstv %s3169_s11  ;;  %v739_v58 = vstv %s3171_s14  ;;  %v661_v48 = vadd.f32 %v659_v33, %v655_v43  ;;  %s3412_s11 = sld [smem:[#allocation2 + $0xf03]]  ;;  %s3414_s14 = sld [smem:[#allocation2 + $0x84]] }
  0xd6   :  { %v662_v56 = vadd.f32 %v660_v13, %v656_v35  ;;  %vm4899_vm7 = vcmp.eq.s32.totalorder %v2266_v17, 1  ;;  %vm4900_vm9 = vcmp.eq.s32.totalorder %v2279_v7, 1  ;;  %vm4901_vm10 = vcmp.eq.s32.totalorder %v2266_v17, 2 }
  0xd7   :  { %v734_v59 = vsel %vm4899_vm7, %v733_v19, 0.0  ;;  %v735_v47 = vsel %vm4900_vm9, %v733_v19, 0.0  ;;  %v740_v20 = vsel %vm4901_vm10, %v739_v58, 0.0  ;;  %v741_v8 = vsel %vm4647_vm14, %v739_v58, 0.0 }
  0xd8   :  { %v736_v21 = vadd.f32 %v734_v59, %v728_v16  ;;  %v737_v55 = vadd.f32 %v735_v47, %v729_v34  ;;  %v667_v2 = vadd.f32 %v665_v51, %v661_v48  ;;  %v668_v14 = vadd.f32 %v666_v39, %v662_v56 }
  0xd9   :  { %v745_v1 = vstv %s3187_s15  ;;  %v751_v0 = vstv %s3189_s16  ;;  %vm4902_vm13 = vcmp.eq.s32.totalorder %v2266_v17, 3  ;;  %vm4903_vm7 = vcmp.eq.s32.totalorder %v2279_v7, 3  ;;  %s3424_s15 = sld [smem:[#allocation2 + $0x104]] }
  0xda   :  { %v742_v54 = vadd.f32 %v740_v20, %v736_v21  ;;  %v743_v60 = vadd.f32 %v741_v8, %v737_v55  ;;  %v746_v24 = vsel %vm4902_vm13, %v745_v1, 0.0  ;;  %v747_v4 = vsel %vm4903_vm7, %v745_v1, 0.0  ;;  %s3442_s16 = sld [smem:[#allocation2 + $0x184]] }
  0xdb   :  { %v673_v53 = vadd.f32 %v671_v41, %v667_v2  ;;  %v674_v44 = vadd.f32 %v672_v37, %v668_v14  ;;  %vm4904_vm9 = vcmp.eq.s32.totalorder %v2266_v17, 4  ;;  %vm4905_vm10 = vcmp.eq.s32.totalorder %v2279_v7, 4 }
  0xdc   :  { %v752_v33 = vsel %vm4904_vm9, %v751_v0, 0.0  ;;  %v753_v13 = vsel %vm4905_vm10, %v751_v0, 0.0  ;;  %v748_v26 = vadd.f32 %v746_v24, %v742_v54  ;;  %v749_v63 = vadd.f32 %v747_v4, %v743_v60 }
  0xdd   :  { %v757_v15 = vstv %s3208_s18  ;;  %v763_v61 = vstv %s3223_s20  ;;  %v679_v18 = vadd.f32 %v677_v5, %v673_v53  ;;  %v680_v57 = vadd.f32 %v678_v12, %v674_v44  ;;  %s3444_s18 = sld [smem:[#allocation2 + $0x204]] }
  0xde   :  { %vm4906_vm13 = vcmp.eq.s32.totalorder %v2266_v17, 5  ;;  %vm4907_vm7 = vcmp.eq.s32.totalorder %v2279_v7, 5  ;;  %vm4908_vm9 = vcmp.eq.s32.totalorder %v2279_v7, 29  ;;  %v754_v23 = vadd.f32 %v752_v33, %v748_v26  ;;  %s3467_s20 = sld [smem:[#allocation2 + $0x284]] }
  0xdf   :  { %v758_v51 = vsel %vm4906_vm13, %v757_v15, 0.0  ;;  %v759_v39 = vsel %vm4907_vm7, %v757_v15, 0.0  ;;  %v708_v25 = vsel %vm4908_vm9, %v706_v6, 0.0  ;;  %v755_v30 = vadd.f32 %v753_v13, %v749_v63 }
  0xe0   :  { %vm4909_vm10 = vcmp.eq.s32.totalorder %v2266_v17, 6  ;;  %v685_v49 = vadd.f32 %v683_v32, %v679_v18  ;;  %v686_v22 = vadd.f32 %v684_v45, %v680_v57  ;;  %vm4910_vm14 = vcmp.eq.s32.totalorder %v2279_v7, 6 }
  0xe1   :  { %v764_v40 = vsel %vm4909_vm10, %v763_v61, 0.0  ;;  %v765_v41 = vsel %vm4910_vm14, %v763_v61, 0.0  ;;  %v769_v37 = vstv %s3240_s19  ;;  %v713_v5 = vsel %vm317_vm11, %v712_v62, 0.0  ;;  %s3482_s19 = sld [smem:[#allocation2 + $0x304]] }
  0xe2   :  { %v760_v36 = vadd.f32 %v758_v51, %v754_v23  ;;  %v761_v3 = vadd.f32 %v759_v39, %v755_v30  ;;  %v775_v31 = vstv %s3246_s21  ;;  %v691_v12 = vadd.f32 %v3197_v28, %v685_v49  ;;  %s3499_s21 = sld [smem:[#allocation2 + $0x384]] }
  0xe3   :  { %v692_v46 = vadd.f32 %v3202_v9, %v686_v22  ;;  %vm4911_vm13 = vcmp.eq.s32.totalorder %v2266_v17, 7  ;;  %vm4912_vm14 = vcmp.eq.s32.totalorder %v2279_v7, 7  ;;  %v718_v6 = vstv %s3250_s24  ;;  %s3501_s24 = sld [smem:[#allocation2 + $0x404]] }
  0xe4   :  { %v770_v32 = vsel %vm4911_vm13, %v769_v37, 0.0  ;;  %v771_v45 = vsel %vm4912_vm14, %v769_v37, 0.0  ;;  %v766_v11 = vadd.f32 %v764_v40, %v760_v36  ;;  %v767_v29 = vadd.f32 %v765_v41, %v761_v3 }
  0xe5   :  { %v781_v27 = vstv %s3256_s28  ;;  %v697_v43 = vadd.f32 %v3206_v10, %v691_v12  ;;  %v698_v28 = vadd.f32 %v3212_v52, %v692_v46  ;;  %vm4913_vm7 = vcmp.eq.s32.totalorder %v2266_v17, 8  ;;  %s3513_s28 = sld [smem:[#allocation2 + $0x484]] }
  0xe6   :  { %v776_v9 = vsel %vm4913_vm7, %v775_v31, 0.0  ;;  %vm4914_vm9 = vcmp.eq.s32.totalorder %v2279_v7, 8  ;;  %vm4915_vm10 = vcmp.eq.s32.totalorder %v2279_v7, 30  ;;  %v772_v34 = vadd.f32 %v770_v32, %v766_v11 }
  0xe7   :  { %v777_v35 = vsel %vm4914_vm9, %v775_v31, 0.0  ;;  %v714_v16 = vsel %vm4915_vm10, %v712_v62, 0.0  ;;  %v773_v19 = vadd.f32 %v771_v45, %v767_v29  ;;  %v787_v58 = vstv %s3264_s2  ;;  %s3519_s2 = sld [smem:[#allocation2 + $0x504]] }
  0xe8   :  { %v703_v10 = vadd.f32 %v3216_v50, %v697_v43  ;;  %v704_v52 = vadd.f32 %v3220_v42, %v698_v28  ;;  %vm4916_vm13 = vcmp.eq.s32.totalorder %v2266_v17, 9  ;;  %vm4917_vm14 = vcmp.eq.s32.totalorder %v2279_v7, 9 }
  0xe9   :  { %v782_v48 = vsel %vm4916_vm13, %v781_v27, 0.0  ;;  %v783_v56 = vsel %vm4917_vm14, %v781_v27, 0.0  ;;  %vm4918_vm7 = vcmp.eq.s32.totalorder %v2266_v17, 31  ;;  %v778_v59 = vadd.f32 %v776_v9, %v772_v34 }
  0xea   :  { %v719_v62 = vsel %vm4918_vm7, %v718_v6, 0.0  ;;  %v779_v47 = vadd.f32 %v777_v35, %v773_v19  ;;  %v793_v21 = vstv %s3274_s7  ;;  %v709_v50 = vadd.f32 %v3227_v38, %v703_v10  ;;  %s3521_s7 = sld [smem:[#allocation2 + $0xf83]] }
  0xeb   :  { %v710_v42 = vadd.f32 %v708_v25, %v704_v52  ;;  %vm4919_vm9 = vcmp.eq.s32.totalorder %v2266_v17, 10  ;;  %vm4920_vm10 = vcmp.eq.s32.totalorder %v2279_v7, 10  ;;  %vm4921_vm13 = vcmp.eq.s32.totalorder %v2279_v7, 31 }
  0xec   :  { %v788_v55 = vsel %vm4919_vm9, %v787_v58, 0.0  ;;  %v789_v20 = vsel %vm4920_vm10, %v787_v58, 0.0  ;;  %v720_v8 = vsel %vm4921_vm13, %v718_v6, 0.0  ;;  %v784_v2 = vadd.f32 %v782_v48, %v778_v59 }
  0xed   :  { %v785_v14 = vadd.f32 %v783_v56, %v779_v47  ;;  %v799_v1 = vstv %s3284_s23  ;;  %v715_v38 = vadd.f32 %v713_v5, %v709_v50  ;;  %v716_v0 = vadd.f32 %v714_v16, %v710_v42  ;;  %s3533_s23 = sld [smem:[#allocation2 + $0x584]] }
  0xee   :  { %vm4922_vm14 = vcmp.eq.s32.totalorder %v2266_v17, 11  ;;  %vm4923_vm7 = vcmp.eq.s32.totalorder %v2279_v7, 11  ;;  %v790_v24 = vadd.f32 %v788_v55, %v784_v2  ;;  %v805_v53 = vstv %s3294_s8  ;;  %s3539_s8 = sld [smem:[#allocation2 + $0x604]] }
  0xef   :  { %v794_v54 = vsel %vm4922_vm14, %v793_v21, 0.0  ;;  %v795_v60 = vsel %vm4923_vm7, %v793_v21, 0.0  ;;  %v791_v4 = vadd.f32 %v789_v20, %v785_v14  ;;  %v811_v44 = vstv %s3296_s29  ;;  %s3556_s29 = sld [smem:[#allocation2 + $0x684]] }
  0xf0   :  { %v721_v33 = vadd.f32 %v719_v62, %v715_v38  ;;  %v722_v13 = vadd.f32 %v720_v8, %v716_v0  ;;  %vm4924_vm9 = vcmp.eq.s32.totalorder %v2266_v17, 12  ;;  %vm4925_vm10 = vcmp.eq.s32.totalorder %v2279_v7, 12 }
  0xf1   :  { %v800_v26 = vsel %vm4924_vm9, %v799_v1, 0.0  ;;  %v801_v63 = vsel %vm4925_vm10, %v799_v1, 0.0  ;;  %v796_v15 = vadd.f32 %v794_v54, %v790_v24  ;;  %v797_v61 = vadd.f32 %v795_v60, %v791_v4 }
  0xf2   :  { %v817_v18 = vstv %s3309_s17  ;;  %v823_v57 = vstv %s3311_s26  ;;  %724 = vst.msk [vmem:[#allocation5 + $0x20] sm:$0xff] %vm4648_vm3, %v721_v33  ;;  %725 = vst.msk [vmem:[#allocation5 + $0x28] sm:$0xff] %vm4648_vm3, %v722_v13  ;;  %vm4926_vm13 = vcmp.eq.s32.totalorder %v2266_v17, 13  ;;  %vm4927_vm14 = vcmp.eq.s32.totalorder %v2279_v7, 13  ;;  %s3563_s17 = sld [smem:[#allocation2 + $0x704]] }
  0xf3   :  { %v806_v51 = vsel %vm4926_vm13, %v805_v53, 0.0  ;;  %v807_v39 = vsel %vm4927_vm14, %v805_v53, 0.0  ;;  %vm4928_vm7 = vcmp.eq.s32.totalorder %v2266_v17, 14  ;;  %vm4929_vm9 = vcmp.eq.s32.totalorder %v2279_v7, 14  ;;  %s3570_s26 = sld [smem:[#allocation2 + $0x784]] }
  0xf4   :  { %v812_v25 = vsel %vm4928_vm7, %v811_v44, 0.0  ;;  %v813_v23 = vsel %vm4929_vm9, %v811_v44, 0.0  ;;  %v802_v30 = vadd.f32 %v800_v26, %v796_v15  ;;  %v803_v40 = vadd.f32 %v801_v63, %v797_v61 }
  0xf5   :  { %v829_v49 = vstv %s3322_s12  ;;  %v835_v22 = vstv %s3324_s9  ;;  %vm4930_vm10 = vcmp.eq.s32.totalorder %v2266_v17, 15  ;;  %vm4931_vm13 = vcmp.eq.s32.totalorder %v2279_v7, 15  ;;  %s3572_s12 = sld [smem:[#allocation2 + $0x804]] }
  0xf6   :  { %v818_v41 = vsel %vm4930_vm10, %v817_v18, 0.0  ;;  %v819_v37 = vsel %vm4931_vm13, %v817_v18, 0.0  ;;  %vm4932_vm14 = vcmp.eq.s32.totalorder %v2266_v17, 16  ;;  %vm4933_vm7 = vcmp.eq.s32.totalorder %v2279_v7, 16  ;;  %s3583_s9 = sld [smem:[#allocation2 + $0x884]] }
  0xf7   :  { %v824_v5 = vsel %vm4932_vm14, %v823_v57, 0.0  ;;  %v825_v36 = vsel %vm4933_vm7, %v823_v57, 0.0  ;;  %v808_v3 = vadd.f32 %v806_v51, %v802_v30  ;;  %v809_v31 = vadd.f32 %v807_v39, %v803_v40 }
  0xf8   :  { %v841_v12 = vstv %s3334_s10  ;;  %v847_v46 = vstv %s3336_s30  ;;  %vm4934_vm9 = vcmp.eq.s32.totalorder %v2266_v17, 17  ;;  %vm4935_vm10 = vcmp.eq.s32.totalorder %v2279_v7, 17  ;;  %s3594_s10 = sld [smem:[#allocation2 + $0x904]] }
  0xf9   :  { %v830_v32 = vsel %vm4934_vm9, %v829_v49, 0.0  ;;  %v831_v45 = vsel %vm4935_vm10, %v829_v49, 0.0  ;;  %vm4936_vm13 = vcmp.eq.s32.totalorder %v2266_v17, 18  ;;  %vm4937_vm14 = vcmp.eq.s32.totalorder %v2279_v7, 18  ;;  %s3596_s30 = sld [smem:[#allocation2 + $0x984]] }
  0xfa   :  { %v836_v6 = vsel %vm4936_vm13, %v835_v22, 0.0  ;;  %v837_v11 = vsel %vm4937_vm14, %v835_v22, 0.0  ;;  %v814_v29 = vadd.f32 %v812_v25, %v808_v3  ;;  %v815_v27 = vadd.f32 %v813_v23, %v809_v31 }
  0xfb   :  { %v853_v43 = vstv %s3344_s1  ;;  %v859_v28 = vstv %s3346_s25  ;;  %vm4938_vm7 = vcmp.eq.s32.totalorder %v2266_v17, 19  ;;  %vm4939_vm9 = vcmp.eq.s32.totalorder %v2279_v7, 19  ;;  %s3603_s1 = sld [smem:[#allocation2 + $0xa04]] }
  0xfc   :  { %v842_v9 = vsel %vm4938_vm7, %v841_v12, 0.0  ;;  %v843_v35 = vsel %vm4939_vm9, %v841_v12, 0.0  ;;  %vm4940_vm10 = vcmp.eq.s32.totalorder %v2266_v17, 20  ;;  %vm4941_vm13 = vcmp.eq.s32.totalorder %v2279_v7, 20  ;;  %s3608_s25 = sld [smem:[#allocation2 + $0xa84]] }
  0xfd   :  { %v848_v16 = vsel %vm4940_vm10, %v847_v46, 0.0  ;;  %v849_v34 = vsel %vm4941_vm13, %v847_v46, 0.0  ;;  %v820_v19 = vadd.f32 %v818_v41, %v814_v29  ;;  %v821_v58 = vadd.f32 %v819_v37, %v815_v27 }
  0xfe   :  { %v865_v10 = vstv %s3354_s3  ;;  %v871_v52 = vstv %s3356_s5  ;;  %vm4942_vm14 = vcmp.eq.s32.totalorder %v2266_v17, 21  ;;  %vm4943_vm7 = vcmp.eq.s32.totalorder %v2279_v7, 21  ;;  %s3610_s3 = sld [smem:[#allocation2 + $0xb04]] }
  0xff   :  { %v854_v48 = vsel %vm4942_vm14, %v853_v43, 0.0  ;;  %v855_v56 = vsel %vm4943_vm7, %v853_v43, 0.0  ;;  %vm4944_vm9 = vcmp.eq.s32.totalorder %v2266_v17, 22  ;;  %vm4945_vm10 = vcmp.eq.s32.totalorder %v2279_v7, 22  ;;  %s3617_s5 = sld [smem:[#allocation2 + $0xb84]] }
 0x100   :  { %v860_v62 = vsel %vm4944_vm9, %v859_v28, 0.0  ;;  %v861_v59 = vsel %vm4945_vm10, %v859_v28, 0.0  ;;  %v826_v47 = vadd.f32 %v824_v5, %v820_v19  ;;  %v827_v21 = vadd.f32 %v825_v36, %v821_v58 }
 0x101   :  { %v877_v50 = vstv %s3370_s6  ;;  %v883_v42 = vstv %s3372_s4  ;;  %vm4946_vm13 = vcmp.eq.s32.totalorder %v2266_v17, 23  ;;  %vm4947_vm14 = vcmp.eq.s32.totalorder %v2279_v7, 23  ;;  %s3626_s6 = sld [smem:[#allocation2 + $0xc04]] }
 0x102   :  { %v866_v55 = vsel %vm4946_vm13, %v865_v10, 0.0  ;;  %v867_v20 = vsel %vm4947_vm14, %v865_v10, 0.0  ;;  %vm4948_vm7 = vcmp.eq.s32.totalorder %v2266_v17, 24  ;;  %v889_v2 = vstv %s3382_s22  ;;  %s3628_s4 = sld [smem:[#allocation2 + $0xc84]] }
 0x103   :  { %v3434_v8 = vsel %vm4948_vm7, %v871_v52, 0.0  ;;  %v832_v14 = vadd.f32 %v830_v32, %v826_v47  ;;  %v833_v1 = vadd.f32 %v831_v45, %v827_v21  ;;  %vm4949_vm9 = vcmp.eq.s32.totalorder %v2279_v7, 24  ;;  %s3640_s22 = sld [smem:[#allocation2 + $0xd04]] }
 0x104   :  { %v3439_v38 = vsel %vm4949_vm9, %v871_v52, 0.0  ;;  %v895_v0 = vstv %s3386_s27  ;;  %v3448_v54 = vsel %vm277_vm5, %v877_v50, 0.0  ;;  %v3452_v60 = vsel %vm278_vm0, %v877_v50, 0.0  ;;  %s3644_s27 = sld [smem:[#allocation2 + $0xd84]] }
 0x105   :  { %v3456_v24 = vsel %vm285_vm15, %v883_v42, 0.0  ;;  %v901_v4 = vstv %s3396_s0  ;;  %v838_v53 = vadd.f32 %v836_v6, %v832_v14  ;;  %v839_v44 = vadd.f32 %v837_v11, %v833_v1  ;;  %s3646_s0 = sld [smem:[#allocation2 + $0xe04]] }
 0x106   :  { %v3461_v33 = vsel %vm286_vm1, %v883_v42, 0.0  ;;  %v3465_v13 = vsel %vm293_vm6, %v889_v2, 0.0  ;;  %v3471_v26 = vsel %vm294_vm2, %v889_v2, 0.0  ;;  %v3475_v63 = vsel %vm301_vm4, %v895_v0, 0.0 }
 0x107   :  { %vm4950_vm10 = vcmp.eq.s32.totalorder %v2279_v7, 28  ;;  %v922_v61 = vstv %s3408_s13  ;;  %v844_v18 = vadd.f32 %v842_v9, %v838_v53  ;;  %v845_v57 = vadd.f32 %v843_v35, %v839_v44  ;;  %s3657_s13 = sld [smem:[#allocation2 + $0xe84]] }
 0x108   :  { %v3479_v15 = vsel %vm4950_vm10, %v895_v0, 0.0  ;;  %vm4951_vm13 = vcmp.eq.s32.totalorder %v2266_v17, 29  ;;  %v907_v39 = vstv %s3412_s11  ;;  %v923_v25 = vsel %vm77_vm8, %v922_v61, 0.0  ;;  %s3670_s11 = sld [smem:[#allocation2 + $0x5]] }
 0x109   :  { %v3486_v51 = vsel %vm4951_vm13, %v901_v4, 0.0  ;;  %v924_v23 = vsel %vm78_vm12, %v922_v61, 0.0  ;;  %v928_v30 = vstv %s3414_s14  ;;  %v934_v40 = vstv %s3424_s15  ;;  %s3680_s14 = sld [smem:[#allocation2 + $0xf04]]  ;;  %s3684_s15 = sld [smem:[#allocation2 + $0x85]] }
 0x10a   :  { %v850_v49 = vadd.f32 %v848_v16, %v844_v18  ;;  %v851_v22 = vadd.f32 %v849_v34, %v845_v57  ;;  %vm4952_vm14 = vcmp.eq.s32.totalorder %v2266_v17, 1  ;;  %vm4953_vm7 = vcmp.eq.s32.totalorder %v2279_v7, 1 }
 0x10b   :  { %v929_v41 = vsel %vm4952_vm14, %v928_v30, 0.0  ;;  %v930_v37 = vsel %vm4953_vm7, %v928_v30, 0.0  ;;  %vm4954_vm9 = vcmp.eq.s32.totalorder %v2266_v17, 2  ;;  %vm4955_vm10 = vcmp.eq.s32.totalorder %v2279_v7, 2 }
 0x10c   :  { %v931_v5 = vadd.f32 %v929_v41, %v923_v25  ;;  %v932_v36 = vadd.f32 %v930_v37, %v924_v23  ;;  %v935_v3 = vsel %vm4954_vm9, %v934_v40, 0.0  ;;  %v936_v31 = vsel %vm4955_vm10, %v934_v40, 0.0 }
 0x10d   :  { %v856_v12 = vadd.f32 %v854_v48, %v850_v49  ;;  %v857_v46 = vadd.f32 %v855_v56, %v851_v22  ;;  %v940_v32 = vstv %s3442_s16  ;;  %v946_v45 = vstv %s3444_s18  ;;  %s3686_s16 = sld [smem:[#allocation2 + $0x105]] }
 0x10e   :  { %v937_v6 = vadd.f32 %v935_v3, %v931_v5  ;;  %v938_v11 = vadd.f32 %v936_v31, %v932_v36  ;;  %vm4956_vm13 = vcmp.eq.s32.totalorder %v2266_v17, 3  ;;  %vm4957_vm14 = vcmp.eq.s32.totalorder %v2279_v7, 3  ;;  %s3695_s18 = sld [smem:[#allocation2 + $0x185]] }
 0x10f   :  { %v941_v29 = vsel %vm4956_vm13, %v940_v32, 0.0  ;;  %v942_v27 = vsel %vm4957_vm14, %v940_v32, 0.0  ;;  %v862_v43 = vadd.f32 %v860_v62, %v856_v12  ;;  %v863_v28 = vadd.f32 %v861_v59, %v857_v46 }
 0x110   :  { %vm4958_vm7 = vcmp.eq.s32.totalorder %v2266_v17, 4  ;;  %vm4959_vm9 = vcmp.eq.s32.totalorder %v2279_v7, 4  ;;  %v943_v16 = vadd.f32 %v941_v29, %v937_v6  ;;  %v944_v34 = vadd.f32 %v942_v27, %v938_v11 }
 0x111   :  { %v947_v9 = vsel %vm4958_vm7, %v946_v45, 0.0  ;;  %v948_v35 = vsel %vm4959_vm9, %v946_v45, 0.0  ;;  %v952_v19 = vstv %s3467_s20  ;;  %v958_v58 = vstv %s3482_s19  ;;  %s3699_s20 = sld [smem:[#allocation2 + $0x205]] }
 0x112   :  { %v868_v10 = vadd.f32 %v866_v55, %v862_v43  ;;  %v869_v52 = vadd.f32 %v867_v20, %v863_v28  ;;  %vm4960_vm10 = vcmp.eq.s32.totalorder %v2266_v17, 5  ;;  %vm4961_vm13 = vcmp.eq.s32.totalorder %v2279_v7, 5  ;;  %s3701_s19 = sld [smem:[#allocation2 + $0x285]] }
 0x113   :  { %v953_v48 = vsel %vm4960_vm10, %v952_v19, 0.0  ;;  %v954_v56 = vsel %vm4961_vm13, %v952_v19, 0.0  ;;  %v949_v62 = vadd.f32 %v947_v9, %v943_v16  ;;  %v950_v59 = vadd.f32 %v948_v35, %v944_v34 }
 0x114   :  { %vm4962_vm14 = vcmp.eq.s32.totalorder %v2266_v17, 6  ;;  %vm4963_vm7 = vcmp.eq.s32.totalorder %v2279_v7, 6  ;;  %v874_v50 = vadd.f32 %v3434_v8, %v868_v10  ;;  %v875_v42 = vadd.f32 %v3439_v38, %v869_v52 }
 0x115   :  { %v959_v47 = vsel %vm4962_vm14, %v958_v58, 0.0  ;;  %v960_v21 = vsel %vm4963_vm7, %v958_v58, 0.0  ;;  %v964_v55 = vstv %s3499_s21  ;;  %v970_v20 = vstv %s3501_s24  ;;  %s3715_s21 = sld [smem:[#allocation2 + $0x305]] }
 0x116   :  { %vm4964_vm9 = vcmp.eq.s32.totalorder %v2279_v7, 29  ;;  %v908_v14 = vsel %vm317_vm11, %v907_v39, 0.0  ;;  %v955_v1 = vadd.f32 %v953_v48, %v949_v62  ;;  %v956_v0 = vadd.f32 %v954_v56, %v950_v59  ;;  %s3754_s24 = sld [smem:[#allocation2 + $0x385]] }
 0x117   :  { %v903_v2 = vsel %vm4964_vm9, %v901_v4, 0.0  ;;  %v880_v8 = vadd.f32 %v3448_v54, %v874_v50  ;;  %v881_v38 = vadd.f32 %v3452_v60, %v875_v42  ;;  %vm4965_vm10 = vcmp.eq.s32.totalorder %v2266_v17, 7 }
 0x118   :  { %v965_v53 = vsel %vm4965_vm10, %v964_v55, 0.0  ;;  %vm4966_vm13 = vcmp.eq.s32.totalorder %v2279_v7, 7  ;;  %v961_v4 = vadd.f32 %v959_v47, %v955_v1  ;;  %v962_v61 = vadd.f32 %v960_v21, %v956_v0 }
 0x119   :  { %v966_v44 = vsel %vm4966_vm13, %v964_v55, 0.0  ;;  %vm4967_vm14 = vcmp.eq.s32.totalorder %v2266_v17, 8  ;;  %v976_v57 = vstv %s3513_s28  ;;  %v886_v25 = vadd.f32 %v3456_v24, %v880_v8  ;;  %s3764_s28 = sld [smem:[#allocation2 + $0x405]] }
 0x11a   :  { %v971_v18 = vsel %vm4967_vm14, %v970_v20, 0.0  ;;  %v887_v54 = vadd.f32 %v3461_v33, %v881_v38  ;;  %vm4968_vm7 = vcmp.eq.s32.totalorder %v2279_v7, 8  ;;  %v982_v23 = vstv %s3519_s2  ;;  %s3766_s2 = sld [smem:[#allocation2 + $0xf84]] }
 0x11b   :  { %v972_v60 = vsel %vm4968_vm7, %v970_v20, 0.0  ;;  %vm4969_vm9 = vcmp.eq.s32.totalorder %v2279_v7, 30  ;;  %v913_v40 = vstv %s3521_s7  ;;  %v967_v49 = vadd.f32 %v965_v53, %v961_v4  ;;  %s3772_s7 = sld [smem:[#allocation2 + $0x485]] }
 0x11c   :  { %v909_v30 = vsel %vm4969_vm9, %v907_v39, 0.0  ;;  %v968_v22 = vadd.f32 %v966_v44, %v962_v61  ;;  %v892_v24 = vadd.f32 %v3465_v13, %v886_v25  ;;  %v893_v33 = vadd.f32 %v3471_v26, %v887_v54 }
 0x11d   :  { %vm4970_vm10 = vcmp.eq.s32.totalorder %v2266_v17, 9  ;;  %vm4971_vm13 = vcmp.eq.s32.totalorder %v2279_v7, 9  ;;  %v973_v5 = vadd.f32 %v971_v18, %v967_v49  ;;  %vm4972_vm14 = vcmp.eq.s32.totalorder %v2266_v17, 10 }
 0x11e   :  { %v977_v41 = vsel %vm4970_vm10, %v976_v57, 0.0  ;;  %v978_v37 = vsel %vm4971_vm13, %v976_v57, 0.0  ;;  %v974_v39 = vadd.f32 %v972_v60, %v968_v22  ;;  %v983_v36 = vsel %vm4972_vm14, %v982_v23, 0.0 }
 0x11f   :  { %v988_v3 = vstv %s3533_s23  ;;  %v898_v31 = vadd.f32 %v3475_v63, %v892_v24  ;;  %v899_v13 = vadd.f32 %v3479_v15, %v893_v33  ;;  %vm4973_vm7 = vcmp.eq.s32.totalorder %v2279_v7, 10  ;;  %s3782_s23 = sld [smem:[#allocation2 + $0x505]] }
 0x120   :  { %v984_v26 = vsel %vm4973_vm7, %v982_v23, 0.0  ;;  %v994_v12 = vstv %s3539_s8  ;;  %vm4974_vm9 = vcmp.eq.s32.totalorder %v2266_v17, 31  ;;  %vm4975_vm10 = vcmp.eq.s32.totalorder %v2279_v7, 31  ;;  %s3794_s8 = sld [smem:[#allocation2 + $0x585]] }
 0x121   :  { %v914_v46 = vsel %vm4974_vm9, %v913_v40, 0.0  ;;  %v915_v32 = vsel %vm4975_vm10, %v913_v40, 0.0  ;;  %v979_v45 = vadd.f32 %v977_v41, %v973_v5  ;;  %v980_v6 = vadd.f32 %v978_v37, %v974_v39 }
 0x122   :  { %v904_v63 = vadd.f32 %v3486_v51, %v898_v31  ;;  %v905_v15 = vadd.f32 %v903_v2, %v899_v13  ;;  %vm4976_vm13 = vcmp.eq.s32.totalorder %v2266_v17, 11  ;;  %vm4977_vm14 = vcmp.eq.s32.totalorder %v2279_v7, 11 }
 0x123   :  { %v989_v11 = vsel %vm4976_vm13, %v988_v3, 0.0  ;;  %v990_v29 = vsel %vm4977_vm14, %v988_v3, 0.0  ;;  %v985_v27 = vadd.f32 %v983_v36, %v979_v45  ;;  %v986_v43 = vadd.f32 %v984_v26, %v980_v6 }
 0x124   :  { %vm4978_vm7 = vcmp.eq.s32.totalorder %v2266_v17, 12  ;;  %v1000_v9 = vstv %s3556_s29  ;;  %v910_v51 = vadd.f32 %v908_v14, %v904_v63  ;;  %v911_v35 = vadd.f32 %v909_v30, %v905_v15  ;;  %s3802_s29 = sld [smem:[#allocation2 + $0x605]] }
 0x125   :  { %v995_v28 = vsel %vm4978_vm7, %v994_v12, 0.0  ;;  %vm4979_vm9 = vcmp.eq.s32.totalorder %v2279_v7, 12  ;;  %v1006_v34 = vstv %s3563_s17  ;;  %v991_v19 = vadd.f32 %v989_v11, %v985_v27  ;;  %s3812_s17 = sld [smem:[#allocation2 + $0x685]] }
 0x126   :  { %v996_v16 = vsel %vm4979_vm9, %v994_v12, 0.0  ;;  %v992_v58 = vadd.f32 %v990_v29, %v986_v43  ;;  %v1012_v10 = vstv %s3570_s26  ;;  %v1018_v52 = vstv %s3572_s12  ;;  %s3814_s26 = sld [smem:[#allocation2 + $0x705]] }
 0x127   :  { %v916_v48 = vadd.f32 %v914_v46, %v910_v51  ;;  %v917_v56 = vadd.f32 %v915_v32, %v911_v35  ;;  %vm4980_vm10 = vcmp.eq.s32.totalorder %v2266_v17, 13  ;;  %vm4981_vm13 = vcmp.eq.s32.totalorder %v2279_v7, 13  ;;  %s3818_s12 = sld [smem:[#allocation2 + $0x785]] }
 0x128   :  { %v1001_v62 = vsel %vm4980_vm10, %v1000_v9, 0.0  ;;  %v1002_v59 = vsel %vm4981_vm13, %v1000_v9, 0.0  ;;  %v997_v47 = vadd.f32 %v995_v28, %v991_v19  ;;  %v998_v21 = vadd.f32 %v996_v16, %v992_v58 }
 0x129   :  { %vm4982_vm14 = vcmp.eq.s32.totalorder %v2266_v17, 14  ;;  %v1024_v42 = vstv %s3583_s9  ;;  %919 = vst.msk [vmem:[#allocation5 + $0x30] sm:$0xff] %vm4648_vm3, %v916_v48  ;;  %920 = vst.msk [vmem:[#allocation5 + $0x38] sm:$0xff] %vm4648_vm3, %v917_v56  ;;  %vm4983_vm7 = vcmp.eq.s32.totalorder %v2279_v7, 14  ;;  %vm4984_vm9 = vcmp.eq.s32.totalorder %v2266_v17, 15  ;;  %s3829_s9 = sld [smem:[#allocation2 + $0x805]] }
 0x12a   :  { %v1007_v50 = vsel %vm4982_vm14, %v1006_v34, 0.0  ;;  %v1008_v55 = vsel %vm4983_vm7, %v1006_v34, 0.0  ;;  %v1013_v20 = vsel %vm4984_vm9, %v1012_v10, 0.0  ;;  %vm4985_vm10 = vcmp.eq.s32.totalorder %v2279_v7, 15 }
 0x12b   :  { %v1014_v2 = vsel %vm4985_vm10, %v1012_v10, 0.0  ;;  %vm4986_vm13 = vcmp.eq.s32.totalorder %v2266_v17, 16  ;;  %v1003_v1 = vadd.f32 %v1001_v62, %v997_v47  ;;  %v1004_v0 = vadd.f32 %v1002_v59, %v998_v21 }
 0x12c   :  { %v1019_v14 = vsel %vm4986_vm13, %v1018_v52, 0.0  ;;  %v1030_v8 = vstv %s3594_s10  ;;  %v1036_v38 = vstv %s3596_s30  ;;  %vm4987_vm14 = vcmp.eq.s32.totalorder %v2279_v7, 16  ;;  %s3842_s10 = sld [smem:[#allocation2 + $0x885]] }
 0x12d   :  { %v1020_v53 = vsel %vm4987_vm14, %v1018_v52, 0.0  ;;  %vm4988_vm7 = vcmp.eq.s32.totalorder %v2266_v17, 17  ;;  %vm4989_vm9 = vcmp.eq.s32.totalorder %v2279_v7, 17  ;;  %v1042_v61 = vstv %s3603_s1  ;;  %s3844_s30 = sld [smem:[#allocation2 + $0x905]] }
 0x12e   :  { %v1025_v44 = vsel %vm4988_vm7, %v1024_v42, 0.0  ;;  %v1026_v4 = vsel %vm4989_vm9, %v1024_v42, 0.0  ;;  %v1009_v18 = vadd.f32 %v1007_v50, %v1003_v1  ;;  %v1010_v57 = vadd.f32 %v1008_v55, %v1004_v0  ;;  %s3854_s1 = sld [smem:[#allocation2 + $0x985]] }
 0x12f   :  { %v1048_v25 = vstv %s3608_s25  ;;  %v1054_v54 = vstv %s3610_s3  ;;  %vm4990_vm10 = vcmp.eq.s32.totalorder %v2266_v17, 18  ;;  %vm4991_vm13 = vcmp.eq.s32.totalorder %v2279_v7, 18  ;;  %s3856_s25 = sld [smem:[#allocation2 + $0xa05]] }
 0x130   :  { %v1031_v60 = vsel %vm4990_vm10, %v1030_v8, 0.0  ;;  %v1032_v23 = vsel %vm4991_vm13, %v1030_v8, 0.0  ;;  %vm4992_vm14 = vcmp.eq.s32.totalorder %v2266_v17, 19  ;;  %vm4993_vm7 = vcmp.eq.s32.totalorder %v2279_v7, 19  ;;  %s3864_s3 = sld [smem:[#allocation2 + $0xa85]] }
 0x131   :  { %v1037_v30 = vsel %vm4992_vm14, %v1036_v38, 0.0  ;;  %v1038_v40 = vsel %vm4993_vm7, %v1036_v38, 0.0  ;;  %v1015_v49 = vadd.f32 %v1013_v20, %v1009_v18  ;;  %v1016_v22 = vadd.f32 %v1014_v2, %v1010_v57 }
 0x132   :  { %vm4994_vm9 = vcmp.eq.s32.totalorder %v2266_v17, 20  ;;  %v1060_v33 = vstv %s3617_s5  ;;  %vm4995_vm10 = vcmp.eq.s32.totalorder %v2279_v7, 20  ;;  %vm4996_vm13 = vcmp.eq.s32.totalorder %v2266_v17, 21  ;;  %s3866_s5 = sld [smem:[#allocation2 + $0xb05]] }
 0x133   :  { %v1043_v24 = vsel %vm4994_vm9, %v1042_v61, 0.0  ;;  %v1044_v41 = vsel %vm4995_vm10, %v1042_v61, 0.0  ;;  %v1049_v37 = vsel %vm4996_vm13, %v1048_v25, 0.0  ;;  %vm4997_vm14 = vcmp.eq.s32.totalorder %v2279_v7, 21 }
 0x134   :  { %v1050_v5 = vsel %vm4997_vm14, %v1048_v25, 0.0  ;;  %vm4998_vm7 = vcmp.eq.s32.totalorder %v2266_v17, 22  ;;  %v1021_v36 = vadd.f32 %v1019_v14, %v1015_v49  ;;  %v1022_v3 = vadd.f32 %v1020_v53, %v1016_v22 }
 0x135   :  { %v1055_v39 = vsel %vm4998_vm7, %v1054_v54, 0.0  ;;  %v1066_v31 = vstv %s3626_s6  ;;  %v1072_v13 = vstv %s3628_s4  ;;  %vm4999_vm9 = vcmp.eq.s32.totalorder %v2279_v7, 22  ;;  %s3874_s6 = sld [smem:[#allocation2 + $0xb85]] }
 0x136   :  { %v1056_v26 = vsel %vm4999_vm9, %v1054_v54, 0.0  ;;  %vm5000_vm10 = vcmp.eq.s32.totalorder %v2266_v17, 23  ;;  %vm5001_vm13 = vcmp.eq.s32.totalorder %v2279_v7, 23  ;;  %v1078_v32 = vstv %s3640_s22  ;;  %s3882_s4 = sld [smem:[#allocation2 + $0xc05]] }
 0x137   :  { %v1061_v12 = vsel %vm5000_vm10, %v1060_v33, 0.0  ;;  %v1062_v46 = vsel %vm5001_vm13, %v1060_v33, 0.0  ;;  %v1027_v45 = vadd.f32 %v1025_v44, %v1021_v36  ;;  %v1028_v6 = vadd.f32 %v1026_v4, %v1022_v3  ;;  %s3888_s22 = sld [smem:[#allocation2 + $0xc85]] }
 0x138   :  { %v1084_v63 = vstv %s3644_s27  ;;  %v1090_v15 = vstv %s3646_s0  ;;  %vm5002_vm14 = vcmp.eq.s32.totalorder %v2266_v17, 24  ;;  %vm5003_vm7 = vcmp.eq.s32.totalorder %v2279_v7, 24  ;;  %s3890_s27 = sld [smem:[#allocation2 + $0xd05]] }
 0x139   :  { %v1067_v11 = vsel %vm5002_vm14, %v1066_v31, 0.0  ;;  %v1068_v29 = vsel %vm5003_vm7, %v1066_v31, 0.0  ;;  %v3709_v27 = vsel %vm277_vm5, %v1072_v13, 0.0  ;;  %v3713_v43 = vsel %vm278_vm0, %v1072_v13, 0.0  ;;  %s3900_s0 = sld [smem:[#allocation2 + $0xd85]] }
 0x13a   :  { %v1033_v28 = vadd.f32 %v1031_v60, %v1027_v45  ;;  %v1034_v9 = vadd.f32 %v1032_v23, %v1028_v6  ;;  %v3719_v51 = vsel %vm285_vm15, %v1078_v32, 0.0  ;;  %v1096_v35 = vstv %s3657_s13  ;;  %s3904_s13 = sld [smem:[#allocation2 + $0xe05]] }
 0x13b   :  { %v3724_v16 = vsel %vm286_vm1, %v1078_v32, 0.0  ;;  %v3728_v34 = vsel %vm293_vm6, %v1084_v63, 0.0  ;;  %v3732_v19 = vsel %vm294_vm2, %v1084_v63, 0.0  ;;  %v3736_v58 = vsel %vm301_vm4, %v1090_v15, 0.0 }
 0x13c   :  { %v1039_v10 = vadd.f32 %v1037_v30, %v1033_v28  ;;  %v1040_v52 = vadd.f32 %v1038_v40, %v1034_v9  ;;  %vm5004_vm9 = vcmp.eq.s32.totalorder %v2279_v7, 28  ;;  %v1117_v56 = vstv %s3670_s11  ;;  %s3916_s11 = sld [smem:[#allocation2 + $0x6]] }
 0x13d   :  { %v3740_v48 = vsel %vm5004_vm9, %v1090_v15, 0.0  ;;  %vm5005_vm10 = vcmp.eq.s32.totalorder %v2266_v17, 29  ;;  %v1102_v59 = vstv %s3680_s14  ;;  %v1118_v47 = vsel %vm77_vm8, %v1117_v56, 0.0  ;;  %s3926_s14 = sld [smem:[#allocation2 + $0x86]] }
 0x13e   :  { %v3745_v62 = vsel %vm5005_vm10, %v1096_v35, 0.0  ;;  %v1119_v21 = vsel %vm78_vm12, %v1117_v56, 0.0  ;;  %v1045_v50 = vadd.f32 %v1043_v24, %v1039_v10  ;;  %v1046_v42 = vadd.f32 %v1044_v41, %v1040_v52 }
 0x13f   :  { %v1123_v55 = vstv %s3684_s15  ;;  %v1129_v20 = vstv %s3686_s16  ;;  %vm5006_vm13 = vcmp.eq.s32.totalorder %v2266_v17, 1  ;;  %vm5007_vm14 = vcmp.eq.s32.totalorder %v2279_v7, 1  ;;  %s3931_s15 = sld [smem:[#allocation2 + $0xe85]] }
 0x140   :  { %v1124_v2 = vsel %vm5006_vm13, %v1123_v55, 0.0  ;;  %v1125_v14 = vsel %vm5007_vm14, %v1123_v55, 0.0  ;;  %vm5008_vm7 = vcmp.eq.s32.totalorder %v2266_v17, 2  ;;  %vm5009_vm9 = vcmp.eq.s32.totalorder %v2279_v7, 2  ;;  %s3933_s16 = sld [smem:[#allocation2 + $0xf05]] }
 0x141   :  { %v1130_v1 = vsel %vm5008_vm7, %v1129_v20, 0.0  ;;  %v1131_v0 = vsel %vm5009_vm9, %v1129_v20, 0.0  ;;  %v1051_v8 = vadd.f32 %v1049_v37, %v1045_v50  ;;  %v1052_v38 = vadd.f32 %v1050_v5, %v1046_v42 }
 0x142   :  { %v1126_v53 = vadd.f32 %v1124_v2, %v1118_v47  ;;  %v1127_v44 = vadd.f32 %v1125_v14, %v1119_v21  ;;  %v1135_v4 = vstv %s3695_s18  ;;  %v1141_v61 = vstv %s3699_s20  ;;  %s3942_s18 = sld [smem:[#allocation2 + $0x106]] }
 0x143   :  { %v1147_v18 = vstv %s3701_s19  ;;  %v1153_v57 = vstv %s3715_s21  ;;  %v1057_v25 = vadd.f32 %v1055_v39, %v1051_v8  ;;  %v1058_v54 = vadd.f32 %v1056_v26, %v1052_v38  ;;  %s3958_s20 = sld [smem:[#allocation2 + $0x186]] }
 0x144   :  { %v1132_v60 = vadd.f32 %v1130_v1, %v1126_v53  ;;  %v1133_v23 = vadd.f32 %v1131_v0, %v1127_v44  ;;  %vm5010_vm10 = vcmp.eq.s32.totalorder %v2266_v17, 3  ;;  %vm5011_vm13 = vcmp.eq.s32.totalorder %v2279_v7, 3  ;;  %s3960_s19 = sld [smem:[#allocation2 + $0x206]] }
 0x145   :  { %v1136_v30 = vsel %vm5010_vm10, %v1135_v4, 0.0  ;;  %v1137_v40 = vsel %vm5011_vm13, %v1135_v4, 0.0  ;;  %vm5012_vm14 = vcmp.eq.s32.totalorder %v2266_v17, 4  ;;  %vm5013_vm7 = vcmp.eq.s32.totalorder %v2279_v7, 4  ;;  %s3984_s21 = sld [smem:[#allocation2 + $0x286]] }
 0x146   :  { %v1142_v49 = vsel %vm5012_vm14, %v1141_v61, 0.0  ;;  %v1143_v22 = vsel %vm5013_vm7, %v1141_v61, 0.0  ;;  %v1063_v24 = vadd.f32 %v1061_v12, %v1057_v25  ;;  %v1064_v33 = vadd.f32 %v1062_v46, %v1058_v54 }
 0x147   :  { %v1138_v41 = vadd.f32 %v1136_v30, %v1132_v60  ;;  %v1139_v37 = vadd.f32 %v1137_v40, %v1133_v23  ;;  %vm5014_vm9 = vcmp.eq.s32.totalorder %v2279_v7, 29  ;;  %v1103_v39 = vsel %vm317_vm11, %v1102_v59, 0.0 }
 0x148   :  { %v1098_v5 = vsel %vm5014_vm9, %v1096_v35, 0.0  ;;  %vm5015_vm10 = vcmp.eq.s32.totalorder %v2266_v17, 5  ;;  %vm5016_vm13 = vcmp.eq.s32.totalorder %v2279_v7, 5  ;;  %v1069_v31 = vadd.f32 %v1067_v11, %v1063_v24 }
 0x149   :  { %v1148_v36 = vsel %vm5015_vm10, %v1147_v18, 0.0  ;;  %v1149_v3 = vsel %vm5016_vm13, %v1147_v18, 0.0  ;;  %v1070_v13 = vadd.f32 %v1068_v29, %v1064_v33  ;;  %v1144_v26 = vadd.f32 %v1142_v49, %v1138_v41 }
 0x14a   :  { %v1145_v12 = vadd.f32 %v1143_v22, %v1139_v37  ;;  %vm5017_vm14 = vcmp.eq.s32.totalorder %v2266_v17, 6  ;;  %vm5018_vm7 = vcmp.eq.s32.totalorder %v2279_v7, 6  ;;  %v1159_v45 = vstv %s3754_s24  ;;  %s3999_s24 = sld [smem:[#allocation2 + $0x306]] }
 0x14b   :  { %v1154_v46 = vsel %vm5017_vm14, %v1153_v57, 0.0  ;;  %v1155_v32 = vsel %vm5018_vm7, %v1153_v57, 0.0  ;;  %v1165_v6 = vstv %s3764_s28  ;;  %v1075_v63 = vadd.f32 %v3709_v27, %v1069_v31  ;;  %s4013_s28 = sld [smem:[#allocation2 + $0x386]] }
 0x14c   :  { %v1076_v15 = vadd.f32 %v3713_v43, %v1070_v13  ;;  %v1150_v11 = vadd.f32 %v1148_v36, %v1144_v26  ;;  %v1151_v29 = vadd.f32 %v1149_v3, %v1145_v12  ;;  %v1108_v28 = vstv %s3766_s2  ;;  %s4019_s2 = sld [smem:[#allocation2 + $0x406]] }
 0x14d   :  { %vm5019_vm9 = vcmp.eq.s32.totalorder %v2266_v17, 7  ;;  %vm5020_vm10 = vcmp.eq.s32.totalorder %v2279_v7, 7  ;;  %v1171_v10 = vstv %s3772_s7  ;;  %v1081_v52 = vadd.f32 %v3719_v51, %v1075_v63  ;;  %s4027_s7 = sld [smem:[#allocation2 + $0x486]] }
 0x14e   :  { %v1160_v9 = vsel %vm5019_vm9, %v1159_v45, 0.0  ;;  %v1161_v35 = vsel %vm5020_vm10, %v1159_v45, 0.0  ;;  %v1082_v27 = vadd.f32 %v3724_v16, %v1076_v15  ;;  %v1156_v43 = vadd.f32 %v1154_v46, %v1150_v11 }
 0x14f   :  { %v1157_v56 = vadd.f32 %v1155_v32, %v1151_v29  ;;  %vm5021_vm13 = vcmp.eq.s32.totalorder %v2279_v7, 30  ;;  %vm5022_vm14 = vcmp.eq.s32.totalorder %v2266_v17, 8  ;;  %vm5023_vm7 = vcmp.eq.s32.totalorder %v2279_v7, 8 }
 0x150   :  { %v1104_v47 = vsel %vm5021_vm13, %v1102_v59, 0.0  ;;  %v1166_v21 = vsel %vm5022_vm14, %v1165_v6, 0.0  ;;  %v1167_v50 = vsel %vm5023_vm7, %v1165_v6, 0.0  ;;  %v1177_v42 = vstv %s3782_s23  ;;  %s4033_s23 = sld [smem:[#allocation2 + $0xf85]] }
 0x151   :  { %v1087_v51 = vadd.f32 %v3728_v34, %v1081_v52  ;;  %v1088_v16 = vadd.f32 %v3732_v19, %v1082_v27  ;;  %v1162_v55 = vadd.f32 %v1160_v9, %v1156_v43  ;;  %v1163_v20 = vadd.f32 %v1161_v35, %v1157_v56 }
 0x152   :  { %vm5024_vm9 = vcmp.eq.s32.totalorder %v2266_v17, 31  ;;  %vm5025_vm10 = vcmp.eq.s32.totalorder %v2266_v17, 9  ;;  %vm5026_vm13 = vcmp.eq.s32.totalorder %v2279_v7, 9  ;;  %v1183_v1 = vstv %s3794_s8  ;;  %s4037_s8 = sld [smem:[#allocation2 + $0x506]] }
 0x153   :  { %v1109_v2 = vsel %vm5024_vm9, %v1108_v28, 0.0  ;;  %v1172_v59 = vsel %vm5025_vm10, %v1171_v10, 0.0  ;;  %v1173_v14 = vsel %vm5026_vm13, %v1171_v10, 0.0  ;;  %v1093_v0 = vadd.f32 %v3736_v58, %v1087_v51 }
 0x154   :  { %v1094_v8 = vadd.f32 %v3740_v48, %v1088_v16  ;;  %v1168_v34 = vadd.f32 %v1166_v21, %v1162_v55  ;;  %v1169_v19 = vadd.f32 %v1167_v50, %v1163_v20  ;;  %vm5027_vm14 = vcmp.eq.s32.totalorder %v2279_v7, 31 }
 0x155   :  { %v1110_v38 = vsel %vm5027_vm14, %v1108_v28, 0.0  ;;  %vm5028_vm7 = vcmp.eq.s32.totalorder %v2266_v17, 10  ;;  %vm5029_vm9 = vcmp.eq.s32.totalorder %v2279_v7, 10  ;;  %v1189_v58 = vstv %s3802_s29  ;;  %s4047_s29 = sld [smem:[#allocation2 + $0x586]] }
 0x156   :  { %v1178_v53 = vsel %vm5028_vm7, %v1177_v42, 0.0  ;;  %v1179_v44 = vsel %vm5029_vm9, %v1177_v42, 0.0  ;;  %v1099_v48 = vadd.f32 %v3745_v62, %v1093_v0  ;;  %v1100_v4 = vadd.f32 %v1098_v5, %v1094_v8 }
 0x157   :  { %v1174_v61 = vadd.f32 %v1172_v59, %v1168_v34  ;;  %v1175_v18 = vadd.f32 %v1173_v14, %v1169_v19  ;;  %vm5030_vm10 = vcmp.eq.s32.totalorder %v2266_v17, 11  ;;  %vm5031_vm13 = vcmp.eq.s32.totalorder %v2279_v7, 11 }
 0x158   :  { %v1184_v57 = vsel %vm5030_vm10, %v1183_v1, 0.0  ;;  %v1185_v25 = vsel %vm5031_vm13, %v1183_v1, 0.0  ;;  %v1195_v54 = vstv %s3812_s17  ;;  %v1201_v60 = vstv %s3814_s26  ;;  %s4056_s17 = sld [smem:[#allocation2 + $0x606]] }
 0x159   :  { %v1105_v23 = vadd.f32 %v1103_v39, %v1099_v48  ;;  %v1106_v30 = vadd.f32 %v1104_v47, %v1100_v4  ;;  %v1180_v62 = vadd.f32 %v1178_v53, %v1174_v61  ;;  %v1181_v40 = vadd.f32 %v1179_v44, %v1175_v18  ;;  %s4069_s26 = sld [smem:[#allocation2 + $0x686]] }
 0x15a   :  { %vm5032_vm14 = vcmp.eq.s32.totalorder %v2266_v17, 12  ;;  %vm5033_vm7 = vcmp.eq.s32.totalorder %v2279_v7, 12  ;;  %v1207_v24 = vstv %s3818_s12  ;;  %v1213_v33 = vstv %s3829_s9  ;;  %s4079_s12 = sld [smem:[#allocation2 + $0x706]] }
 0x15b   :  { %v1190_v49 = vsel %vm5032_vm14, %v1189_v58, 0.0  ;;  %v1191_v22 = vsel %vm5033_vm7, %v1189_v58, 0.0  ;;  %v1111_v41 = vadd.f32 %v1109_v2, %v1105_v23  ;;  %v1112_v37 = vadd.f32 %v1110_v38, %v1106_v30  ;;  %s4081_s9 = sld [smem:[#allocation2 + $0x786]] }
 0x15c   :  { %v1186_v5 = vadd.f32 %v1184_v57, %v1180_v62  ;;  %v1187_v39 = vadd.f32 %v1185_v25, %v1181_v40  ;;  %vm5034_vm9 = vcmp.eq.s32.totalorder %v2266_v17, 13  ;;  %vm5035_vm10 = vcmp.eq.s32.totalorder %v2279_v7, 13 }
 0x15d   :  { %v1196_v36 = vsel %vm5034_vm9, %v1195_v54, 0.0  ;;  %v1197_v3 = vsel %vm5035_vm10, %v1195_v54, 0.0  ;;  %vm5036_vm13 = vcmp.eq.s32.totalorder %v2266_v17, 14  ;;  %1114 = vst.msk [vmem:[#allocation5 + $0x40] sm:$0xff] %vm4648_vm3, %v1111_v41  ;;  %1115 = vst.msk [vmem:[#allocation5 + $0x48] sm:$0xff] %vm4648_vm3, %v1112_v37  ;;  %v1219_v12 = vstv %s3842_s10  ;;  %s4094_s10 = sld [smem:[#allocation2 + $0x806]] }
 0x15e   :  { %v1202_v31 = vsel %vm5036_vm13, %v1201_v60, 0.0  ;;  %v1192_v13 = vadd.f32 %v1190_v49, %v1186_v5  ;;  %v1193_v26 = vadd.f32 %v1191_v22, %v1187_v39  ;;  %v1225_v46 = vstv %s3844_s30  ;;  %s4096_s30 = sld [smem:[#allocation2 + $0x886]] }
 0x15f   :  { %vm5037_vm14 = vcmp.eq.s32.totalorder %v2279_v7, 14  ;;  %vm5038_vm7 = vcmp.eq.s32.totalorder %v2266_v17, 15  ;;  %vm5039_vm9 = vcmp.eq.s32.totalorder %v2279_v7, 15  ;;  %vm5040_vm10 = vcmp.eq.s32.totalorder %v2266_v17, 16 }
 0x160   :  { %v1203_v32 = vsel %vm5037_vm14, %v1201_v60, 0.0  ;;  %v1208_v45 = vsel %vm5038_vm7, %v1207_v24, 0.0  ;;  %v1209_v6 = vsel %vm5039_vm9, %v1207_v24, 0.0  ;;  %v1214_v63 = vsel %vm5040_vm10, %v1213_v33, 0.0 }
 0x161   :  { %v1198_v15 = vadd.f32 %v1196_v36, %v1192_v13  ;;  %v1199_v11 = vadd.f32 %v1197_v3, %v1193_v26  ;;  %v1231_v29 = vstv %s3854_s1  ;;  %v1237_v28 = vstv %s3856_s25  ;;  %s4107_s1 = sld [smem:[#allocation2 + $0x906]] }
 0x162   :  { %vm5041_vm13 = vcmp.eq.s32.totalorder %v2279_v7, 16  ;;  %vm5042_vm14 = vcmp.eq.s32.totalorder %v2266_v17, 17  ;;  %vm5043_vm7 = vcmp.eq.s32.totalorder %v2279_v7, 17  ;;  %vm5044_vm9 = vcmp.eq.s32.totalorder %v2266_v17, 18  ;;  %s4109_s25 = sld [smem:[#allocation2 + $0x986]] }
 0x163   :  { %v1215_v9 = vsel %vm5041_vm13, %v1213_v33, 0.0  ;;  %v1220_v35 = vsel %vm5042_vm14, %v1219_v12, 0.0  ;;  %v1221_v10 = vsel %vm5043_vm7, %v1219_v12, 0.0  ;;  %v1226_v52 = vsel %vm5044_vm9, %v1225_v46, 0.0 }
 0x164   :  { %v1204_v27 = vadd.f32 %v1202_v31, %v1198_v15  ;;  %v1205_v43 = vadd.f32 %v1203_v32, %v1199_v11  ;;  %v1243_v56 = vstv %s3864_s3  ;;  %v1249_v47 = vstv %s3866_s5  ;;  %s4118_s3 = sld [smem:[#allocation2 + $0xa06]] }
 0x165   :  { %vm5045_vm10 = vcmp.eq.s32.totalorder %v2279_v7, 18  ;;  %vm5046_vm13 = vcmp.eq.s32.totalorder %v2266_v17, 19  ;;  %vm5047_vm14 = vcmp.eq.s32.totalorder %v2279_v7, 19  ;;  %vm5048_vm7 = vcmp.eq.s32.totalorder %v2266_v17, 20  ;;  %s4120_s5 = sld [smem:[#allocation2 + $0xa86]] }
 0x166   :  { %v1227_v21 = vsel %vm5045_vm10, %v1225_v46, 0.0  ;;  %v1232_v50 = vsel %vm5046_vm13, %v1231_v29, 0.0  ;;  %v1233_v42 = vsel %vm5047_vm14, %v1231_v29, 0.0  ;;  %v1238_v51 = vsel %vm5048_vm7, %v1237_v28, 0.0 }
 0x167   :  { %v1210_v16 = vadd.f32 %v1208_v45, %v1204_v27  ;;  %v1211_v55 = vadd.f32 %v1209_v6, %v1205_v43  ;;  %vm5049_vm9 = vcmp.eq.s32.totalorder %v2279_v7, 20  ;;  %v1255_v2 = vstv %s3874_s6  ;;  %s4128_s6 = sld [smem:[#allocation2 + $0xb06]] }
 0x168   :  { %v1239_v20 = vsel %vm5049_vm9, %v1237_v28, 0.0  ;;  %vm5050_vm10 = vcmp.eq.s32.totalorder %v2266_v17, 21  ;;  %vm5051_vm13 = vcmp.eq.s32.totalorder %v2279_v7, 21  ;;  %vm5052_vm14 = vcmp.eq.s32.totalorder %v2266_v17, 22 }
 0x169   :  { %v1244_v59 = vsel %vm5050_vm10, %v1243_v56, 0.0  ;;  %v1245_v14 = vsel %vm5051_vm13, %v1243_v56, 0.0  ;;  %v1250_v1 = vsel %vm5052_vm14, %v1249_v47, 0.0  ;;  %v1261_v0 = vstv %s3882_s4  ;;  %s4130_s4 = sld [smem:[#allocation2 + $0xb86]] }
 0x16a   :  { %v1216_v8 = vadd.f32 %v1214_v63, %v1210_v16  ;;  %v1217_v34 = vadd.f32 %v1215_v9, %v1211_v55  ;;  %v1267_v19 = vstv %s3888_s22  ;;  %v1273_v38 = vstv %s3890_s27  ;;  %s4138_s22 = sld [smem:[#allocation2 + $0xc06]] }
 0x16b   :  { %vm5053_vm7 = vcmp.eq.s32.totalorder %v2279_v7, 22  ;;  %vm5054_vm9 = vcmp.eq.s32.totalorder %v2266_v17, 23  ;;  %vm5055_vm10 = vcmp.eq.s32.totalorder %v2279_v7, 23  ;;  %v1279_v48 = vstv %s3900_s0  ;;  %s4140_s27 = sld [smem:[#allocation2 + $0xc86]] }
 0x16c   :  { %v1251_v53 = vsel %vm5053_vm7, %v1249_v47, 0.0  ;;  %v1256_v44 = vsel %vm5054_vm9, %v1255_v2, 0.0  ;;  %v1257_v58 = vsel %vm5055_vm10, %v1255_v2, 0.0  ;;  %v1222_v4 = vadd.f32 %v1220_v35, %v1216_v8  ;;  %s4152_s0 = sld [smem:[#allocation2 + $0xd06]] }
 0x16d   :  { %v1223_v61 = vadd.f32 %v1221_v10, %v1217_v34  ;;  %vm5056_vm13 = vcmp.eq.s32.totalorder %v2266_v17, 24  ;;  %v1285_v57 = vstv %s3904_s13  ;;  %vm5057_vm14 = vcmp.eq.s32.totalorder %v2279_v7, 24  ;;  %s4156_s13 = sld [smem:[#allocation2 + $0xd86]] }
 0x16e   :  { %v3955_v18 = vsel %vm5056_vm13, %v1261_v0, 0.0  ;;  %v1263_v25 = vsel %vm5057_vm14, %v1261_v0, 0.0  ;;  %v3966_v54 = vsel %vm277_vm5, %v1267_v19, 0.0  ;;  %v3970_v60 = vsel %vm278_vm0, %v1267_v19, 0.0 }
 0x16f   :  { %v3974_v23 = vsel %vm285_vm15, %v1273_v38, 0.0  ;;  %v1228_v30 = vadd.f32 %v1226_v52, %v1222_v4  ;;  %v1229_v62 = vadd.f32 %v1227_v21, %v1223_v61  ;;  %v3978_v40 = vsel %vm286_vm1, %v1273_v38, 0.0 }
 0x170   :  { %v3982_v49 = vsel %vm293_vm6, %v1279_v48, 0.0  ;;  %v3988_v22 = vsel %vm294_vm2, %v1279_v48, 0.0  ;;  %v3992_v24 = vsel %vm301_vm4, %v1285_v57, 0.0  ;;  %vm5058_vm7 = vcmp.eq.s32.totalorder %v2279_v7, 28 }
 0x171   :  { %v3996_v33 = vsel %vm5058_vm7, %v1285_v57, 0.0  ;;  %v1312_v41 = vstv %s3916_s11  ;;  %v1234_v37 = vadd.f32 %v1232_v50, %v1228_v30  ;;  %v1235_v5 = vadd.f32 %v1233_v42, %v1229_v62  ;;  %s4158_s11 = sld [smem:[#allocation2 + $0xe06]] }
 0x172   :  { %v1291_v39 = vstv %s3931_s15  ;;  %v1297_v36 = vstv %s3933_s16  ;;  %v1313_v3 = vsel %vm77_vm8, %v1312_v41, 0.0  ;;  %v1314_v31 = vsel %vm78_vm12, %v1312_v41, 0.0  ;;  %s4182_s15 = sld [smem:[#allocation2 + $0x7]]  ;;  %s4192_s16 = sld [smem:[#allocation2 + $0xf06]] }
 0x173   :  { %v1318_v13 = vstv %s3926_s14  ;;  %v1324_v26 = vstv %s3942_s18  ;;  %v1240_v12 = vadd.f32 %v1238_v51, %v1234_v37  ;;  %v1241_v46 = vadd.f32 %v1239_v20, %v1235_v5  ;;  %s4180_s14 = sld [smem:[#allocation2 + $0xe86]]  ;;  %s4196_s18 = sld [smem:[#allocation2 + $0x87]] }
 0x174   :  { %vm5059_vm9 = vcmp.eq.s32.totalorder %v2266_v17, 1  ;;  %vm5060_vm10 = vcmp.eq.s32.totalorder %v2279_v7, 1  ;;  %vm5061_vm13 = vcmp.eq.s32.totalorder %v2266_v17, 2  ;;  %vm5062_vm14 = vcmp.eq.s32.totalorder %v2279_v7, 2 }
 0x175   :  { %v1319_v32 = vsel %vm5059_vm9, %v1318_v13, 0.0  ;;  %v1320_v45 = vsel %vm5060_vm10, %v1318_v13, 0.0  ;;  %v1325_v15 = vsel %vm5061_vm13, %v1324_v26, 0.0  ;;  %v1326_v11 = vsel %vm5062_vm14, %v1324_v26, 0.0 }
 0x176   :  { %v1321_v6 = vadd.f32 %v1319_v32, %v1313_v3  ;;  %v1322_v63 = vadd.f32 %v1320_v45, %v1314_v31  ;;  %v1246_v29 = vadd.f32 %v1244_v59, %v1240_v12  ;;  %v1247_v28 = vadd.f32 %v1245_v14, %v1241_v46 }
 0x177   :  { %v1330_v9 = vstv %s3958_s20  ;;  %v1336_v35 = vstv %s3960_s19  ;;  %vm5063_vm7 = vcmp.eq.s32.totalorder %v2266_v17, 3  ;;  %vm5064_vm9 = vcmp.eq.s32.totalorder %v2279_v7, 3  ;;  %s4198_s20 = sld [smem:[#allocation2 + $0x107]] }
 0x178   :  { %v1327_v10 = vadd.f32 %v1325_v15, %v1321_v6  ;;  %v1328_v52 = vadd.f32 %v1326_v11, %v1322_v63  ;;  %v1331_v27 = vsel %vm5063_vm7, %v1330_v9, 0.0  ;;  %v1332_v43 = vsel %vm5064_vm9, %v1330_v9, 0.0  ;;  %s4207_s19 = sld [smem:[#allocation2 + $0x187]] }
 0x179   :  { %v1252_v56 = vadd.f32 %v1250_v1, %v1246_v29  ;;  %v1253_v47 = vadd.f32 %v1251_v53, %v1247_v28  ;;  %vm5065_vm10 = vcmp.eq.s32.totalorder %v2266_v17, 4  ;;  %vm5066_vm13 = vcmp.eq.s32.totalorder %v2279_v7, 4 }
 0x17a   :  { %v1337_v21 = vsel %vm5065_vm10, %v1336_v35, 0.0  ;;  %v1338_v50 = vsel %vm5066_vm13, %v1336_v35, 0.0  ;;  %v1333_v42 = vadd.f32 %v1331_v27, %v1327_v10  ;;  %v1334_v51 = vadd.f32 %v1332_v43, %v1328_v52 }
 0x17b   :  { %v1342_v16 = vstv %s3984_s21  ;;  %v1348_v55 = vstv %s3999_s24  ;;  %v1258_v20 = vadd.f32 %v1256_v44, %v1252_v56  ;;  %v1259_v2 = vadd.f32 %v1257_v58, %v1253_v47  ;;  %s4211_s21 = sld [smem:[#allocation2 + $0x207]] }
 0x17c   :  { %vm5067_vm14 = vcmp.eq.s32.totalorder %v2266_v17, 5  ;;  %vm5068_vm7 = vcmp.eq.s32.totalorder %v2279_v7, 5  ;;  %vm5069_vm9 = vcmp.eq.s32.totalorder %v2266_v17, 29  ;;  %v1339_v0 = vadd.f32 %v1337_v21, %v1333_v42  ;;  %s4213_s24 = sld [smem:[#allocation2 + $0x287]] }
 0x17d   :  { %v1343_v59 = vsel %vm5067_vm14, %v1342_v16, 0.0  ;;  %v1344_v14 = vsel %vm5068_vm7, %v1342_v16, 0.0  ;;  %v1292_v1 = vsel %vm5069_vm9, %v1291_v39, 0.0  ;;  %v1340_v8 = vadd.f32 %v1338_v50, %v1334_v51 }
 0x17e   :  { %vm5070_vm10 = vcmp.eq.s32.totalorder %v2266_v17, 6  ;;  %v1264_v19 = vadd.f32 %v3955_v18, %v1258_v20  ;;  %v1265_v38 = vadd.f32 %v1263_v25, %v1259_v2  ;;  %vm5071_vm13 = vcmp.eq.s32.totalorder %v2279_v7, 6 }
 0x17f   :  { %v1349_v34 = vsel %vm5070_vm10, %v1348_v55, 0.0  ;;  %v1350_v53 = vsel %vm5071_vm13, %v1348_v55, 0.0  ;;  %v1354_v44 = vstv %s4013_s28  ;;  %vm5072_vm14 = vcmp.eq.s32.totalorder %v2279_v7, 29  ;;  %s4225_s28 = sld [smem:[#allocation2 + $0x307]] }
 0x180   :  { %v1293_v58 = vsel %vm5072_vm14, %v1291_v39, 0.0  ;;  %v1345_v48 = vadd.f32 %v1343_v59, %v1339_v0  ;;  %v1346_v4 = vadd.f32 %v1344_v14, %v1340_v8  ;;  %v1360_v61 = vstv %s4019_s2  ;;  %s4262_s2 = sld [smem:[#allocation2 + $0x387]] }
 0x181   :  { %v1270_v57 = vadd.f32 %v3966_v54, %v1264_v19  ;;  %v1271_v18 = vadd.f32 %v3970_v60, %v1265_v38  ;;  %vm5073_vm7 = vcmp.eq.s32.totalorder %v2266_v17, 7  ;;  %vm5074_vm9 = vcmp.eq.s32.totalorder %v2279_v7, 7 }
 0x182   :  { %v1355_v25 = vsel %vm5073_vm7, %v1354_v44, 0.0  ;;  %v1356_v30 = vsel %vm5074_vm9, %v1354_v44, 0.0  ;;  %v1298_v62 = vsel %vm317_vm11, %v1297_v36, 0.0  ;;  %v1351_v41 = vadd.f32 %v1349_v34, %v1345_v48 }
 0x183   :  { %v1352_v37 = vadd.f32 %v1350_v53, %v1346_v4  ;;  %v1366_v5 = vstv %s4027_s7  ;;  %v1276_v54 = vadd.f32 %v3974_v23, %v1270_v57  ;;  %v1277_v60 = vadd.f32 %v3978_v40, %v1271_v18  ;;  %s4272_s7 = sld [smem:[#allocation2 + $0x407]] }
 0x184   :  { %vm5075_vm10 = vcmp.eq.s32.totalorder %v2266_v17, 8  ;;  %vm5076_vm13 = vcmp.eq.s32.totalorder %v2279_v7, 8  ;;  %v1303_v31 = vstv %s4033_s23  ;;  %v1357_v13 = vadd.f32 %v1355_v25, %v1351_v41  ;;  %s4278_s23 = sld [smem:[#allocation2 + $0x487]] }
 0x185   :  { %v1361_v39 = vsel %vm5075_vm10, %v1360_v61, 0.0  ;;  %v1362_v3 = vsel %vm5076_vm13, %v1360_v61, 0.0  ;;  %v1358_v26 = vadd.f32 %v1356_v30, %v1352_v37  ;;  %v1372_v12 = vstv %s4037_s8  ;;  %s4280_s8 = sld [smem:[#allocation2 + $0x507]] }
 0x186   :  { %v1282_v46 = vadd.f32 %v3982_v49, %v1276_v54  ;;  %v1283_v23 = vadd.f32 %v3988_v22, %v1277_v60  ;;  %vm5077_vm14 = vcmp.eq.s32.totalorder %v2266_v17, 9  ;;  %vm5078_vm7 = vcmp.eq.s32.totalorder %v2279_v7, 9 }
 0x187   :  { %v1367_v40 = vsel %vm5077_vm14, %v1366_v5, 0.0  ;;  %v1368_v32 = vsel %vm5078_vm7, %v1366_v5, 0.0  ;;  %vm5079_vm9 = vcmp.eq.s32.totalorder %v2279_v7, 30  ;;  %v1363_v6 = vadd.f32 %v1361_v39, %v1357_v13 }
 0x188   :  { %v1299_v45 = vsel %vm5079_vm9, %v1297_v36, 0.0  ;;  %v1364_v63 = vadd.f32 %v1362_v3, %v1358_v26  ;;  %v1378_v15 = vstv %s4047_s29  ;;  %v1288_v49 = vadd.f32 %v3992_v24, %v1282_v46  ;;  %s4282_s29 = sld [smem:[#allocation2 + $0xf86]] }
 0x189   :  { %v1289_v22 = vadd.f32 %v3996_v33, %v1283_v23  ;;  %vm5080_vm10 = vcmp.eq.s32.totalorder %v2266_v17, 10  ;;  %vm5081_vm13 = vcmp.eq.s32.totalorder %v2279_v7, 10  ;;  %vm5082_vm14 = vcmp.eq.s32.totalorder %v2266_v17, 31 }
 0x18a   :  { %v1373_v11 = vsel %vm5080_vm10, %v1372_v12, 0.0  ;;  %v1374_v29 = vsel %vm5081_vm13, %v1372_v12, 0.0  ;;  %v1304_v36 = vsel %vm5082_vm14, %v1303_v31, 0.0  ;;  %v1369_v28 = vadd.f32 %v1367_v40, %v1363_v6 }
 0x18b   :  { %v1370_v9 = vadd.f32 %v1368_v32, %v1364_v63  ;;  %v1384_v35 = vstv %s4056_s17  ;;  %v1294_v24 = vadd.f32 %v1292_v1, %v1288_v49  ;;  %v1295_v33 = vadd.f32 %v1293_v58, %v1289_v22  ;;  %s4300_s17 = sld [smem:[#allocation2 + $0x587]] }
 0x18c   :  { %vm5083_vm7 = vcmp.eq.s32.totalorder %v2266_v17, 11  ;;  %vm5084_vm9 = vcmp.eq.s32.totalorder %v2279_v7, 11  ;;  %vm5085_vm10 = vcmp.eq.s32.totalorder %v2279_v7, 31  ;;  %v1375_v43 = vadd.f32 %v1373_v11, %v1369_v28 }
 0x18d   :  { %v1379_v10 = vsel %vm5083_vm7, %v1378_v15, 0.0  ;;  %v1380_v52 = vsel %vm5084_vm9, %v1378_v15, 0.0  ;;  %v1305_v27 = vsel %vm5085_vm10, %v1303_v31, 0.0  ;;  %v1376_v56 = vadd.f32 %v1374_v29, %v1370_v9 }
 0x18e   :  { %v1390_v47 = vstv %s4069_s26  ;;  %v1300_v21 = vadd.f32 %v1298_v62, %v1294_v24  ;;  %v1301_v50 = vadd.f32 %v1299_v45, %v1295_v33  ;;  %vm5086_vm13 = vcmp.eq.s32.totalorder %v2266_v17, 12  ;;  %s4308_s26 = sld [smem:[#allocation2 + $0x607]] }
 0x18f   :  { %v1385_v42 = vsel %vm5086_vm13, %v1384_v35, 0.0  ;;  %vm5087_vm14 = vcmp.eq.s32.totalorder %v2279_v7, 12  ;;  %v1381_v16 = vadd.f32 %v1379_v10, %v1375_v43  ;;  %v1382_v55 = vadd.f32 %v1380_v52, %v1376_v56 }
 0x190   :  { %v1386_v51 = vsel %vm5087_vm14, %v1384_v35, 0.0  ;;  %v1396_v20 = vstv %s4079_s12  ;;  %v1402_v2 = vstv %s4081_s9  ;;  %v1306_v59 = vadd.f32 %v1304_v36, %v1300_v21  ;;  %s4320_s12 = sld [smem:[#allocation2 + $0x687]] }
 0x191   :  { %v1307_v14 = vadd.f32 %v1305_v27, %v1301_v50  ;;  %vm5088_vm7 = vcmp.eq.s32.totalorder %v2266_v17, 13  ;;  %vm5089_vm9 = vcmp.eq.s32.totalorder %v2279_v7, 13  ;;  %v1387_v8 = vadd.f32 %v1385_v42, %v1381_v16  ;;  %s4330_s9 = sld [smem:[#allocation2 + $0x707]] }
 0x192   :  { %v1391_v1 = vsel %vm5088_vm7, %v1390_v47, 0.0  ;;  %v1392_v0 = vsel %vm5089_vm9, %v1390_v47, 0.0  ;;  %v1388_v34 = vadd.f32 %v1386_v51, %v1382_v55  ;;  %v1408_v19 = vstv %s4094_s10  ;;  %1309 = vst.msk [vmem:[#allocation5 + $0x50] sm:$0xff] %vm4648_vm3, %v1306_v59  ;;  %s4345_s10 = sld [smem:[#allocation2 + $0x787]] }
 0x193   :  { %v1414_v38 = vstv %s4096_s30  ;;  %1310 = vst.msk [vmem:[#allocation5 + $0x58] sm:$0xff] %vm4648_vm3, %v1307_v14  ;;  %vm5090_vm10 = vcmp.eq.s32.totalorder %v2266_v17, 14  ;;  %vm5091_vm13 = vcmp.eq.s32.totalorder %v2279_v7, 14  ;;  %vm5092_vm14 = vcmp.eq.s32.totalorder %v2266_v17, 15  ;;  %s4354_s30 = sld [smem:[#allocation2 + $0x807]] }
 0x194   :  { %v1397_v53 = vsel %vm5090_vm10, %v1396_v20, 0.0  ;;  %v1398_v44 = vsel %vm5091_vm13, %v1396_v20, 0.0  ;;  %v1403_v58 = vsel %vm5092_vm14, %v1402_v2, 0.0  ;;  %vm5093_vm7 = vcmp.eq.s32.totalorder %v2279_v7, 15 }
 0x195   :  { %v1404_v48 = vsel %vm5093_vm7, %v1402_v2, 0.0  ;;  %v1393_v4 = vadd.f32 %v1391_v1, %v1387_v8  ;;  %v1394_v61 = vadd.f32 %v1392_v0, %v1388_v34  ;;  %v1420_v57 = vstv %s4107_s1  ;;  %s4363_s1 = sld [smem:[#allocation2 + $0x887]] }
 0x196   :  { %v1426_v18 = vstv %s4109_s25  ;;  %vm5094_vm9 = vcmp.eq.s32.totalorder %v2266_v17, 16  ;;  %vm5095_vm10 = vcmp.eq.s32.totalorder %v2279_v7, 16  ;;  %vm5096_vm13 = vcmp.eq.s32.totalorder %v2266_v17, 17  ;;  %s4370_s25 = sld [smem:[#allocation2 + $0x907]] }
 0x197   :  { %v1409_v25 = vsel %vm5094_vm9, %v1408_v19, 0.0  ;;  %v1410_v30 = vsel %vm5095_vm10, %v1408_v19, 0.0  ;;  %v1415_v62 = vsel %vm5096_vm13, %v1414_v38, 0.0  ;;  %vm5097_vm14 = vcmp.eq.s32.totalorder %v2279_v7, 17 }
 0x198   :  { %v1416_v41 = vsel %vm5097_vm14, %v1414_v38, 0.0  ;;  %v1399_v37 = vadd.f32 %v1397_v53, %v1393_v4  ;;  %v1400_v5 = vadd.f32 %v1398_v44, %v1394_v61  ;;  %v1432_v54 = vstv %s4118_s3  ;;  %s4379_s3 = sld [smem:[#allocation2 + $0x987]] }
 0x199   :  { %v1438_v60 = vstv %s4120_s5  ;;  %vm5098_vm7 = vcmp.eq.s32.totalorder %v2266_v17, 18  ;;  %vm5099_vm3 = vcmp.eq.s32.totalorder %v2279_v7, 18  ;;  %vm5100_vm9 = vcmp.eq.s32.totalorder %v2266_v17, 19  ;;  %s4386_s5 = sld [smem:[#allocation2 + $0xa07]] }
 0x19a   :  { %v1421_v39 = vsel %vm5098_vm7, %v1420_v57, 0.0  ;;  %v1422_v3 = vsel %vm5099_vm3, %v1420_v57, 0.0  ;;  %v1427_v31 = vsel %vm5100_vm9, %v1426_v18, 0.0  ;;  %vm5101_vm10 = vcmp.eq.s32.totalorder %v2279_v7, 19 }
 0x19b   :  { %v1428_v13 = vsel %vm5101_vm10, %v1426_v18, 0.0  ;;  %v1405_v26 = vadd.f32 %v1403_v58, %v1399_v37  ;;  %v1406_v12 = vadd.f32 %v1404_v48, %v1400_v5  ;;  %v1444_v46 = vstv %s4128_s6  ;;  %s4393_s6 = sld [smem:[#allocation2 + $0xa87]] }
 0x19c   :  { %v1450_v23 = vstv %s4130_s4  ;;  %vm5102_vm13 = vcmp.eq.s32.totalorder %v2266_v17, 20  ;;  %vm5103_vm3 = vcmp.eq.s32.totalorder %v2279_v7, 20  ;;  %vm5104_vm14 = vcmp.eq.s32.totalorder %v2266_v17, 21  ;;  %s4400_s4 = sld [smem:[#allocation2 + $0xb07]] }
 0x19d   :  { %v1433_v40 = vsel %vm5102_vm13, %v1432_v54, 0.0  ;;  %v1434_v32 = vsel %vm5103_vm3, %v1432_v54, 0.0  ;;  %v1439_v45 = vsel %vm5104_vm14, %v1438_v60, 0.0  ;;  %vm5105_vm7 = vcmp.eq.s32.totalorder %v2279_v7, 21 }
 0x19e   :  { %v1440_v6 = vsel %vm5105_vm7, %v1438_v60, 0.0  ;;  %v1411_v63 = vadd.f32 %v1409_v25, %v1405_v26  ;;  %v1412_v15 = vadd.f32 %v1410_v30, %v1406_v12  ;;  %v1456_v49 = vstv %s4138_s22  ;;  %s4407_s22 = sld [smem:[#allocation2 + $0xb87]] }
 0x19f   :  { %v1462_v22 = vstv %s4140_s27  ;;  %vm5106_vm9 = vcmp.eq.s32.totalorder %v2266_v17, 22  ;;  %vm5107_vm10 = vcmp.eq.s32.totalorder %v2279_v7, 22  ;;  %vm5108_vm13 = vcmp.eq.s32.totalorder %v2266_v17, 23  ;;  %s4414_s27 = sld [smem:[#allocation2 + $0xc07]] }
 0x1a0   :  { %v1445_v11 = vsel %vm5106_vm9, %v1444_v46, 0.0  ;;  %v1446_v29 = vsel %vm5107_vm10, %v1444_v46, 0.0  ;;  %v1451_v36 = vsel %vm5108_vm13, %v1450_v23, 0.0  ;;  %v1468_v28 = vstv %s4152_s0  ;;  %s4421_s0 = sld [smem:[#allocation2 + $0xc87]] }
 0x1a1   :  { %v1417_v9 = vadd.f32 %v1415_v62, %v1411_v63  ;;  %v1418_v35 = vadd.f32 %v1416_v41, %v1412_v15  ;;  %v1474_v24 = vstv %s4156_s13  ;;  %v1480_v33 = vstv %s4158_s11  ;;  %s4428_s13 = sld [smem:[#allocation2 + $0xd07]] }
 0x1a2   :  { %vm5109_vm3 = vcmp.eq.s32.totalorder %v2279_v7, 23  ;;  %vm5110_vm14 = vcmp.eq.s32.totalorder %v2266_v17, 24  ;;  %vm5111_vm7 = vcmp.eq.s32.totalorder %v2279_v7, 24  ;;  %v4223_v43 = vsel %vm277_vm5, %v1462_v22, 0.0  ;;  %s4435_s11 = sld [smem:[#allocation2 + $0xd87]] }
 0x1a3   :  { %v1452_v10 = vsel %vm5109_vm3, %v1450_v23, 0.0  ;;  %v1457_v52 = vsel %vm5110_vm14, %v1456_v49, 0.0  ;;  %v1458_v27 = vsel %vm5111_vm7, %v1456_v49, 0.0  ;;  %v1423_v56 = vadd.f32 %v1421_v39, %v1417_v9 }
 0x1a4   :  { %v1424_v47 = vadd.f32 %v1422_v3, %v1418_v35  ;;  %v1464_v21 = vsel %vm278_vm0, %v1462_v22, 0.0  ;;  %v4231_v50 = vsel %vm285_vm15, %v1468_v28, 0.0  ;;  %v4235_v42 = vsel %vm286_vm1, %v1468_v28, 0.0 }
 0x1a5   :  { %v4239_v51 = vsel %vm293_vm6, %v1474_v24, 0.0  ;;  %v4243_v16 = vsel %vm294_vm2, %v1474_v24, 0.0  ;;  %v4247_v55 = vsel %vm301_vm4, %v1480_v33, 0.0  ;;  %v1429_v20 = vadd.f32 %v1427_v31, %v1423_v56 }
 0x1a6   :  { %v1430_v2 = vadd.f32 %v1428_v13, %v1424_v47  ;;  %vm5112_vm9 = vcmp.eq.s32.totalorder %v2279_v7, 28  ;;  %v1507_v14 = vstv %s4182_s15  ;;  %v1486_v1 = vstv %s4180_s14  ;;  %s1971_s14 = sld [smem:[#allocation2 + $0xe07]] }
 0x1a7   :  { %v4251_v59 = vsel %vm5112_vm9, %v1480_v33, 0.0  ;;  %v1492_v0 = vstv %s4192_s16  ;;  %v1508_v8 = vsel %vm77_vm8, %v1507_v14, 0.0  ;;  %v1509_v34 = vsel %vm78_vm12, %v1507_v14, 0.0  ;;  %s1972_s15 = sld [smem:[#allocation2 + $0xe87]] }
 0x1a8   :  { %v1435_v19 = vadd.f32 %v1433_v40, %v1429_v20  ;;  %v1436_v38 = vadd.f32 %v1434_v32, %v1430_v2  ;;  %v1513_v53 = vstv %s4196_s18  ;;  %v1519_v44 = vstv %s4198_s20  ;;  %s1973_s16 = sld [smem:[#allocation2 + $0xf07]]  ;;  %s2030_s20 = smov [#allocation5]  }
 0x1a9   :  { %vm5113_vm10 = vcmp.eq.s32.totalorder %v2266_v17, 1  ;;  %vm5114_vm13 = vcmp.eq.s32.totalorder %v2279_v7, 1  ;;  %vm5115_vm8 = vcmp.eq.s32.totalorder %v2266_v17, 2  ;;  %vm5116_vm12 = vcmp.eq.s32.totalorder %v2279_v7, 2  ;;  %s1974_s18 = sld [smem:[#allocation2 + $0xf87]] }
 0x1aa   :  { %v1514_v58 = vsel %vm5113_vm10, %v1513_v53, 0.0  ;;  %v1515_v48 = vsel %vm5114_vm13, %v1513_v53, 0.0  ;;  %v1520_v4 = vsel %vm5115_vm8, %v1519_v44, 0.0  ;;  %v1521_v61 = vsel %vm5116_vm12, %v1519_v44, 0.0 }
 0x1ab   :  { %v1441_v57 = vadd.f32 %v1439_v45, %v1435_v19  ;;  %v1442_v18 = vadd.f32 %v1440_v6, %v1436_v38  ;;  %v1516_v25 = vadd.f32 %v1514_v58, %v1508_v8  ;;  %v1517_v30 = vadd.f32 %v1515_v48, %v1509_v34 }
 0x1ac   :  { %v1525_v62 = vstv %s4207_s19  ;;  %v1531_v41 = vstv %s4211_s21  ;;  %v1537_v37 = vstv %s4213_s24  ;;  %v1543_v5 = vstv %s4225_s28  ;;  %s1706_s19 = sshll.u32 %s2030_s20, 4  ;;  %s1707_s19 = int_to_ptr.vmem [resolvable:$true] %s1706_s19 }
 0x1ad   :  { %v1447_v54 = vadd.f32 %v1445_v11, %v1441_v57  ;;  %v1448_v60 = vadd.f32 %v1446_v29, %v1442_v18  ;;  %v1522_v39 = vadd.f32 %v1520_v4, %v1516_v25  ;;  %v1523_v3 = vadd.f32 %v1521_v61, %v1517_v30  ;;  %s2000_s21 = scalar_lea.vmem %s1707_s19, 2048  ;;  %p2005_p6 = scmp.lt.s32.totalorder %s1707_s19, %s1707_s19 }
 0x1ae   :  { %vm5117_vm3 = vcmp.eq.s32.totalorder %v2266_v17, 3  ;;  %vm5118_vm14 = vcmp.eq.s32.totalorder %v2279_v7, 3  ;;  %vm5119_vm7 = vcmp.eq.s32.totalorder %v2266_v17, 4  ;;  %vm5120_vm9 = vcmp.eq.s32.totalorder %v2279_v7, 4  ;;  %p2001_p5 = scmp.ne.s32.totalorder %s1707_s19, %s2000_s21  ;;  %p2006_p7 = scmp.lt.s32.totalorder %s2000_s21, %s2000_s21 }
 0x1af   :  { %v1526_v31 = vsel %vm5117_vm3, %v1525_v62, 0.0  ;;  %v1527_v13 = vsel %vm5118_vm14, %v1525_v62, 0.0  ;;  %v1532_v26 = vsel %vm5119_vm7, %v1531_v41, 0.0  ;;  %v1533_v12 = vsel %vm5120_vm9, %v1531_v41, 0.0 }
 0x1b0   :  { %v1453_v46 = vadd.f32 %v1451_v36, %v1447_v54  ;;  %v1454_v23 = vadd.f32 %v1452_v10, %v1448_v60  ;;  %v1528_v40 = vadd.f32 %v1526_v31, %v1522_v39  ;;  %v1529_v32 = vadd.f32 %v1527_v13, %v1523_v3  ;;  %p2007_p8 = por %p2006_p7, %p2005_p6 }
 0x1b1   :  { %vm5121_vm10 = vcmp.eq.s32.totalorder %v2266_v17, 29  ;;  %vm5122_vm13 = vcmp.eq.s32.totalorder %v2279_v7, 29  ;;  %vm5123_vm8 = vcmp.eq.s32.totalorder %v2266_v17, 5  ;;  %vm5124_vm12 = vcmp.eq.s32.totalorder %v2279_v7, 5 }
 0x1b2   :  { %v1487_v45 = vsel %vm5121_vm10, %v1486_v1, 0.0  ;;  %v1488_v6 = vsel %vm5122_vm13, %v1486_v1, 0.0  ;;  %v1538_v63 = vsel %vm5123_vm8, %v1537_v37, 0.0  ;;  %v1539_v15 = vsel %vm5124_vm12, %v1537_v37, 0.0  ;;  %p2008_p9 = pnand %p2007_p8, %p2001_p5 }
 0x1b3   :  { %v1459_v49 = vadd.f32 %v1457_v52, %v1453_v46  ;;  %v1460_v22 = vadd.f32 %v1458_v27, %v1454_v23  ;;  %v1534_v11 = vadd.f32 %v1532_v26, %v1528_v40  ;;  %v1535_v29 = vadd.f32 %v1533_v12, %v1529_v32 }
 0x1b4   :  { %vm5125_vm3 = vcmp.eq.s32.totalorder %v2266_v17, 6  ;;  %vm5126_vm14 = vcmp.eq.s32.totalorder %v2279_v7, 6  ;;  %v1549_v9 = vstv %s4262_s2  ;;  %v1555_v35 = vstv %s4272_s7 }
 0x1b5   :  { %v1544_v36 = vsel %vm5125_vm3, %v1543_v5, 0.0  ;;  %v1545_v28 = vsel %vm5126_vm14, %v1543_v5, 0.0  ;;  %v1465_v24 = vadd.f32 %v4223_v43, %v1459_v49  ;;  %v1466_v33 = vadd.f32 %v1464_v21, %v1460_v22 }
 0x1b6   :  { %v1540_v10 = vadd.f32 %v1538_v63, %v1534_v11  ;;  %v1541_v52 = vadd.f32 %v1539_v15, %v1535_v29  ;;  %v1493_v27 = vsel %vm317_vm11, %v1492_v0, 0.0  ;;  %vm5127_vm7 = vcmp.eq.s32.totalorder %v2266_v17, 7 }
 0x1b7   :  { %v1550_v56 = vsel %vm5127_vm7, %v1549_v9, 0.0  ;;  %vm5128_vm9 = vcmp.eq.s32.totalorder %v2279_v7, 7  ;;  %v1561_v20 = vstv %s4278_s23  ;;  %v1471_v43 = vadd.f32 %v4231_v50, %v1465_v24 }
 0x1b8   :  { %v1551_v47 = vsel %vm5128_vm9, %v1549_v9, 0.0  ;;  %v1472_v21 = vadd.f32 %v4235_v42, %v1466_v33  ;;  %v1546_v2 = vadd.f32 %v1544_v36, %v1540_v10  ;;  %v1547_v14 = vadd.f32 %v1545_v28, %v1541_v52 }
 0x1b9   :  { %v1498_v1 = vstv %s4282_s29  ;;  %vm5129_vm10 = vcmp.eq.s32.totalorder %v2266_v17, 8  ;;  %vm5130_vm13 = vcmp.eq.s32.totalorder %v2279_v7, 8  ;;  %v1567_v19 = vstv %s4280_s8 }
 0x1ba   :  { %v1556_v8 = vsel %vm5129_vm10, %v1555_v35, 0.0  ;;  %v1557_v34 = vsel %vm5130_vm13, %v1555_v35, 0.0  ;;  %v1477_v38 = vadd.f32 %v4239_v51, %v1471_v43  ;;  %v1478_v50 = vadd.f32 %v4243_v16, %v1472_v21 }
 0x1bb   :  { %v1552_v53 = vadd.f32 %v1550_v56, %v1546_v2  ;;  %v1553_v44 = vadd.f32 %v1551_v47, %v1547_v14  ;;  %vm5131_vm8 = vcmp.eq.s32.totalorder %v2279_v7, 30  ;;  %vm5132_vm12 = vcmp.eq.s32.totalorder %v2266_v17, 9 }
 0x1bc   :  { %v1494_v42 = vsel %vm5131_vm8, %v1492_v0, 0.0  ;;  %v1562_v58 = vsel %vm5132_vm12, %v1561_v20, 0.0  ;;  %vm5133_vm3 = vcmp.eq.s32.totalorder %v2279_v7, 9  ;;  %v1573_v4 = vstv %s4300_s17 }
 0x1bd   :  { %v1563_v48 = vsel %vm5133_vm3, %v1561_v20, 0.0  ;;  %v1483_v61 = vadd.f32 %v4247_v55, %v1477_v38  ;;  %v1484_v51 = vadd.f32 %v4251_v59, %v1478_v50  ;;  %v1558_v57 = vadd.f32 %v1556_v8, %v1552_v53 }
 0x1be   :  { %v1559_v16 = vadd.f32 %v1557_v34, %v1553_v44  ;;  %vm5134_vm14 = vcmp.eq.s32.totalorder %v2266_v17, 31  ;;  %vm5135_vm7 = vcmp.eq.s32.totalorder %v2266_v17, 10  ;;  %vm5136_vm9 = vcmp.eq.s32.totalorder %v2279_v7, 10 }
 0x1bf   :  { %v1499_v18 = vsel %vm5134_vm14, %v1498_v1, 0.0  ;;  %v1568_v0 = vsel %vm5135_vm7, %v1567_v19, 0.0  ;;  %v1569_v25 = vsel %vm5136_vm9, %v1567_v19, 0.0  ;;  %v1579_v30 = vstv %s4308_s26 }
 0x1c0   :  { %v1489_v62 = vadd.f32 %v1487_v45, %v1483_v61  ;;  %v1490_v55 = vadd.f32 %v1488_v6, %v1484_v51  ;;  %v1564_v41 = vadd.f32 %v1562_v58, %v1558_v57  ;;  %v1565_v59 = vadd.f32 %v1563_v48, %v1559_v16 }
 0x1c1   :  { %vm5137_vm10 = vcmp.eq.s32.totalorder %v2279_v7, 31  ;;  %vm5138_vm13 = vcmp.eq.s32.totalorder %v2266_v17, 11  ;;  %vm5139_vm8 = vcmp.eq.s32.totalorder %v2279_v7, 11  ;;  %v1585_v60 = vstv %s4320_s12 }
 0x1c2   :  { %v1500_v37 = vsel %vm5137_vm10, %v1498_v1, 0.0  ;;  %v1574_v5 = vsel %vm5138_vm13, %v1573_v4, 0.0  ;;  %v1575_v54 = vsel %vm5139_vm8, %v1573_v4, 0.0  ;;  %v1495_v39 = vadd.f32 %v1493_v27, %v1489_v62 }
 0x1c3   :  { %v1496_v3 = vadd.f32 %v1494_v42, %v1490_v55  ;;  %v1570_v31 = vadd.f32 %v1568_v0, %v1564_v41  ;;  %v1571_v13 = vadd.f32 %v1569_v25, %v1565_v59  ;;  %vm5140_vm12 = vcmp.eq.s32.totalorder %v2266_v17, 12 }
 0x1c4   :  { %v1580_v26 = vsel %vm5140_vm12, %v1579_v30, 0.0  ;;  %vm5141_vm3 = vcmp.eq.s32.totalorder %v2279_v7, 12  ;;  %v1591_v46 = vstv %s4330_s9  ;;  %v1501_v23 = vadd.f32 %v1499_v18, %v1495_v39 }
 0x1c5   :  { %v1581_v12 = vsel %vm5141_vm3, %v1579_v30, 0.0  ;;  %v1502_v40 = vadd.f32 %v1500_v37, %v1496_v3  ;;  %v1576_v32 = vadd.f32 %v1574_v5, %v1570_v31  ;;  %v1577_v45 = vadd.f32 %v1575_v54, %v1571_v13 }
 0x1c6   :  { %vm5142_vm14 = vcmp.eq.s32.totalorder %v2266_v17, 13  ;;  %vm5143_vm7 = vcmp.eq.s32.totalorder %v2279_v7, 13  ;;  %vm5144_vm9 = vcmask 130048   ;;  %v1597_v22 = vstv %s4345_s10 }
 0x1c7   :  { %v1586_v6 = vsel %vm5142_vm14, %v1585_v60, 0.0  ;;  %v1587_v63 = vsel %vm5143_vm7, %v1585_v60, 0.0  ;;  %1504 = vst.msk [vmem:[#allocation5 + $0x60] sm:$0xff] %vm5144_vm9, %v1501_v23  ;;  %vm5145_vm10 = vmmov %vm5144_vm9  ;;  %v1582_v15 = vadd.f32 %v1580_v26, %v1576_v32  ;;  %v1583_v49 = vadd.f32 %v1581_v12, %v1577_v45 }
 0x1c8   :  { %1505 = vst.msk [vmem:[#allocation5 + $0x68] sm:$0xff] %vm5145_vm10, %v1502_v40  ;;  %vm5146_vm13 = vcmp.eq.s32.totalorder %v2266_v17, 14  ;;  %vm5147_vm8 = vcmp.eq.s32.totalorder %v2279_v7, 14  ;;  %v1603_v9 = vstv %s4354_s30  ;;  %vm5148_vm12 = vcmp.eq.s32.totalorder %v2266_v17, 15 }
 0x1c9   :  { %v1592_v11 = vsel %vm5146_vm13, %v1591_v46, 0.0  ;;  %v1593_v29 = vsel %vm5147_vm8, %v1591_v46, 0.0  ;;  %v1588_v36 = vadd.f32 %v1586_v6, %v1582_v15  ;;  %v1589_v28 = vadd.f32 %v1587_v63, %v1583_v49 }
 0x1ca   :  { %v1598_v35 = vsel %vm5148_vm12, %v1597_v22, 0.0  ;;  %vm5149_vm3 = vcmp.eq.s32.totalorder %v2279_v7, 15  ;;  %v1609_v52 = vstv %s4363_s1  ;;  %vm5150_vm14 = vcmp.eq.s32.totalorder %v2266_v17, 16 }
 0x1cb   :  { %v1599_v24 = vsel %vm5149_vm3, %v1597_v22, 0.0  ;;  %v1594_v33 = vadd.f32 %v1592_v11, %v1588_v36  ;;  %v1595_v10 = vadd.f32 %v1593_v29, %v1589_v28  ;;  %v1604_v27 = vsel %vm5150_vm14, %v1603_v9, 0.0 }
 0x1cc   :  { %vm5151_vm7 = vcmp.eq.s32.totalorder %v2279_v7, 16  ;;  %v1615_v43 = vstv %s4370_s25  ;;  %vm5152_vm9 = vcmp.eq.s32.totalorder %v2266_v17, 17  ;;  %vm5153_vm10 = vcmp.eq.s32.totalorder %v2279_v7, 17 }
 0x1cd   :  { %v1605_v56 = vsel %vm5151_vm7, %v1603_v9, 0.0  ;;  %v1600_v47 = vadd.f32 %v1598_v35, %v1594_v33  ;;  %v1601_v20 = vadd.f32 %v1599_v24, %v1595_v10  ;;  %v1610_v21 = vsel %vm5152_vm9, %v1609_v52, 0.0 }
 0x1ce   :  { %v1611_v2 = vsel %vm5153_vm10, %v1609_v52, 0.0  ;;  %v1621_v8 = vstv %s4379_s3  ;;  %vm5154_vm13 = vcmp.eq.s32.totalorder %v2266_v17, 18  ;;  %vm5155_vm8 = vcmp.eq.s32.totalorder %v2279_v7, 18 }
 0x1cf   :  { %v1606_v14 = vadd.f32 %v1604_v27, %v1600_v47  ;;  %v1607_v1 = vadd.f32 %v1605_v56, %v1601_v20  ;;  %v1616_v34 = vsel %vm5154_vm13, %v1615_v43, 0.0  ;;  %v1617_v19 = vsel %vm5155_vm8, %v1615_v43, 0.0 }
 0x1d0   :  { %v1627_v53 = vstv %s4386_s5  ;;  %vm5156_vm12 = vcmp.eq.s32.totalorder %v2266_v17, 19  ;;  %vm5157_vm3 = vcmp.eq.s32.totalorder %v2279_v7, 19  ;;  %v1633_v4 = vstv %s4393_s6 }
 0x1d1   :  { %v1612_v38 = vadd.f32 %v1610_v21, %v1606_v14  ;;  %v1613_v50 = vadd.f32 %v1611_v2, %v1607_v1  ;;  %v1622_v44 = vsel %vm5156_vm12, %v1621_v8, 0.0  ;;  %v1623_v42 = vsel %vm5157_vm3, %v1621_v8, 0.0 }
 0x1d2   :  { %vm5158_vm14 = vcmp.eq.s32.totalorder %v2266_v17, 20  ;;  %vm5159_vm7 = vcmp.eq.s32.totalorder %v2279_v7, 20  ;;  %v1639_v18 = vstv %s4400_s4  ;;  %vm5160_vm9 = vcmp.eq.s32.totalorder %v2266_v17, 21 }
 0x1d3   :  { %v1618_v58 = vadd.f32 %v1616_v34, %v1612_v38  ;;  %v1619_v48 = vadd.f32 %v1617_v19, %v1613_v50  ;;  %v1628_v61 = vsel %vm5158_vm14, %v1627_v53, 0.0  ;;  %v1629_v51 = vsel %vm5159_vm7, %v1627_v53, 0.0 }
 0x1d4   :  { %v1634_v0 = vsel %vm5160_vm9, %v1633_v4, 0.0  ;;  %vm5161_vm10 = vcmp.eq.s32.totalorder %v2279_v7, 21  ;;  %v1645_v55 = vstv %s4407_s22  ;;  %vm5162_vm13 = vcmp.eq.s32.totalorder %v2266_v17, 22 }
 0x1d5   :  { %v1624_v57 = vadd.f32 %v1622_v44, %v1618_v58  ;;  %v1625_v16 = vadd.f32 %v1623_v42, %v1619_v48  ;;  %v1635_v25 = vsel %vm5161_vm10, %v1633_v4, 0.0  ;;  %v1640_v41 = vsel %vm5162_vm13, %v1639_v18, 0.0 }
 0x1d6   :  { %vm5163_vm8 = vcmp.eq.s32.totalorder %v2279_v7, 22  ;;  %v1651_v54 = vstv %s4414_s27  ;;  %vm5164_vm12 = vcmp.eq.s32.totalorder %v2266_v17, 23  ;;  %vm5165_vm3 = vcmp.eq.s32.totalorder %v2279_v7, 23 }
 0x1d7   :  { %v1630_v30 = vadd.f32 %v1628_v61, %v1624_v57  ;;  %v1631_v62 = vadd.f32 %v1629_v51, %v1625_v16  ;;  %v1641_v59 = vsel %vm5163_vm8, %v1639_v18, 0.0  ;;  %v1646_v60 = vsel %vm5164_vm12, %v1645_v55, 0.0 }
 0x1d8   :  { %v1647_v39 = vsel %vm5165_vm3, %v1645_v55, 0.0  ;;  %v1657_v13 = vstv %s4421_s0  ;;  %vm5166_vm14 = vcmp.eq.s32.totalorder %v2266_v17, 24  ;;  %vm5167_vm7 = vcmp.eq.s32.totalorder %v2279_v7, 24 }
 0x1d9   :  { %v1636_v37 = vadd.f32 %v1634_v0, %v1630_v30  ;;  %v1637_v5 = vadd.f32 %v1635_v25, %v1631_v62  ;;  %v1652_v26 = vsel %vm5166_vm14, %v1651_v54, 0.0  ;;  %v1653_v12 = vsel %vm5167_vm7, %v1651_v54, 0.0 }
 0x1da   :  { %v1663_v40 = vstv %s4428_s13  ;;  %v1658_v32 = vsel %vm277_vm5, %v1657_v13, 0.0  ;;  %v1659_v45 = vsel %vm278_vm0, %v1657_v13, 0.0  ;;  %v1669_v15 = vstv %s4435_s11 }
 0x1db   :  { %v1642_v3 = vadd.f32 %v1640_v41, %v1636_v37  ;;  %v1643_v31 = vadd.f32 %v1641_v59, %v1637_v5  ;;  %v1664_v49 = vsel %vm285_vm15, %v1663_v40, 0.0  ;;  %v1665_v22 = vsel %vm286_vm1, %v1663_v40, 0.0 }
 0x1dc   :  { %v1675_v36 = vstv %s1971_s14  ;;  %v1670_v28 = vsel %vm293_vm6, %v1669_v15, 0.0  ;;  %v1671_v9 = vsel %vm294_vm2, %v1669_v15, 0.0  ;;  %v1681_v33 = vstv %s1972_s15 }
 0x1dd   :  { %v1648_v46 = vadd.f32 %v1646_v60, %v1642_v3  ;;  %v1649_v23 = vadd.f32 %v1647_v39, %v1643_v31  ;;  %v1676_v10 = vsel %vm301_vm4, %v1675_v36, 0.0  ;;  %vm5168_vm15 = vcmp.eq.s32.totalorder %v2279_v7, 28 }
 0x1de   :  { %v1677_v52 = vsel %vm5168_vm15, %v1675_v36, 0.0  ;;  %v1687_v47 = vstv %s1973_s16  ;;  %vm5169_vm0 = vcmp.eq.s32.totalorder %v2266_v17, 29  ;;  %vm5170_vm1 = vcmp.eq.s32.totalorder %v2279_v7, 29 }
 0x1df   :  { %v1654_v6 = vadd.f32 %v1652_v26, %v1648_v46  ;;  %v1655_v63 = vadd.f32 %v1653_v12, %v1649_v23  ;;  %v1682_v20 = vsel %vm5169_vm0, %v1681_v33, 0.0  ;;  %v1683_v43 = vsel %vm5170_vm1, %v1681_v33, 0.0 }
 0x1e0   :  { %v1693_v14 = vstv %s1974_s18  ;;  %v1688_v1 = vsel %vm317_vm11, %v1687_v47, 0.0  ;;  %vm5171_vm2 = vcmp.eq.s32.totalorder %v2279_v7, 30  ;;  %vm5172_vm4 = vcmp.eq.s32.totalorder %v2266_v17, 31 }
 0x1e1   :  { %v1660_v11 = vadd.f32 %v1658_v32, %v1654_v6  ;;  %v1661_v29 = vadd.f32 %v1659_v45, %v1655_v63  ;;  %v1689_v8 = vsel %vm5171_vm2, %v1687_v47, 0.0  ;;  %v1694_v38 = vsel %vm5172_vm4, %v1693_v14, 0.0 }
 0x1e2   :  { %vm5173_vm5 = vcmp.eq.s32.totalorder %v2279_v7, 31  ;;  %vm5174_vm6 = vcmask 130048  }
 0x1e3   :  { %v1666_v35 = vadd.f32 %v1664_v49, %v1660_v11  ;;  %v1667_v24 = vadd.f32 %v1665_v22, %v1661_v29  ;;  %v1695_v50 = vsel %vm5173_vm5, %v1693_v14, 0.0  ;;  %vm5175_vm11 = vmmov %vm5174_vm6 }
 0x1e5   :  { %v1672_v27 = vadd.f32 %v1670_v28, %v1666_v35  ;;  %v1673_v56 = vadd.f32 %v1671_v9, %v1667_v24 }
 0x1e7   :  { %v1678_v21 = vadd.f32 %v1676_v10, %v1672_v27  ;;  %v1679_v2 = vadd.f32 %v1677_v52, %v1673_v56 }
 0x1e9   :  { %v1684_v34 = vadd.f32 %v1682_v20, %v1678_v21  ;;  %v1685_v19 = vadd.f32 %v1683_v43, %v1679_v2 }
 0x1eb   :  { %v1690_v53 = vadd.f32 %v1688_v1, %v1684_v34  ;;  %v1691_v44 = vadd.f32 %v1689_v8, %v1685_v19 }
 0x1ed   :  { %v1696_v42 = vadd.f32 %v1694_v38, %v1690_v53  ;;  %v1697_v58 = vadd.f32 %v1695_v50, %v1691_v44 }
 0x1ef   :  { %1699 = vst.msk [vmem:[#allocation5 + $0x70] sm:$0xff] %vm5174_vm6, %v1696_v42 }
 0x1f0   :  { %1700 = vst.msk [vmem:[#allocation5 + $0x78] sm:$0xff] %vm5175_vm11, %v1697_v58 }
 0x1f1   :  { %2011 = shalt.err (!%p2008_p9)
}
 0x1f2   :  { %s5176_s2 = sld [smem:[#allocation56_spill]] }
 0x1f8   :  { %s2012_s7 = scalar_lea.hbm %s5176_s2, 2048 }
 0x1f9   :  { %p2013_p10 = scmp.ne.s32.totalorder %s5176_s2, %s2012_s7  ;;  %p2016_p11 = scmp.lt.u32.totalorder %s2012_s7, %s5176_s2 }
 0x1fb   :  { %p2018_p12 = pnand %p2016_p11, %p2013_p10 }
 0x1fd   :  { %2021 = shalt.err (!%p2018_p12)
}
 0x1fe   :  { %s5177_s26 = smov 8   ;;  %s5178_s12 = smov 128  }
 0x1ff   :  { %1712 = dma.vmem_to_hbm [thread:$0]  %s1707_s19, 2048, %s5176_s2, [#allocation3], %s5178_s12, %s5178_s12, %s5177_s26  }
 0x200   :  { %2024 = dma.done.wait [#allocation3], 2048  }
 0x201   :  { %2025 = vsyncadd [#allocation3], 4294965248 }
 0x202   :  { %1716 = vsyncpa [#allocation3], 1 }
 0x203   :  { %1717 = vsyncpa [#allocation4], 1 }

</bundles_post_ra>
